<compile_context>
chip_gen: v5e
topology: v5e:2x2
jax: 0.10.0
libtpu: 0.0.40
codegen_flags: <defaults>
</compile_context>

<pallas_src>
import numpy as np
import jax
import jax.numpy as jnp
from jax.experimental import pallas as pl
from jax.experimental.pallas import tpu as pltpu

BN_EPS = 1e-5
COMPUTE_DTYPE = jnp.bfloat16   # MXU input dtype (f32 accumulation / epilogues)
TILE_B = 8                     # images per grid step (conv1 M = 8*32 = 256)
_IMG = 64

# (H_in, W_in, Cin, Cout, pad, OH, OW, in_width, out_width); stride = 2 everywhere.
# in_width / out_width are the lane widths of the input / output row layout
# A[h, w*C + c]; out_width is padded to a multiple of 128 (conv3: 224->256,
# conv4: 192->256) and in_width always equals the previous layer's out_width.
_CONV_CFG = (
    (64, 64, 1, 8, 1, 32, 32, 64, 256),
    (32, 32, 8, 16, 1, 16, 16, 256, 256),
    (16, 16, 16, 32, 0, 7, 7, 256, 256),
    (7, 7, 32, 64, 0, 3, 3, 256, 256),
)
_OH = tuple(c[5] for c in _CONV_CFG)          # (32, 16, 7, 3)

_PARAM_ORDER = ("S1", "B1", "st1", "S2", "B2", "st2", "S3", "B3", "st3",
                "S4", "B4", "st4", "L1", "lb1", "W6", "lb2")


# ----------------------------------------------------------------------------
# In-kernel building block: one Conv2d (+folded bias/BN) + ReLU for TILE_B images
# ----------------------------------------------------------------------------
def _conv_block(imgs, s_ref, b_ref, st_ref):
    """Batched conv layer.

    imgs   : list of TILE_B arrays (H_in, in_width), compute dtype.
    s_ref  : (3*OH, H_in)          0/1 fused row selection (stride-2 + zero pad).
    b_ref  : (3*in_width, out_w)   conv weights, kw/stride/pad baked in, kh on K.
    st_ref : (2, out_w) f32        [scale; shift] with conv bias + BN folded.
    Returns (TILE_B*OH, out_w) f32.
    """
    cdt = b_ref.dtype
    oh = s_ref.shape[0] // 3
    s = s_ref[...]
    sel_parts = []
    for a in imgs:
        # Row selection is per-image (linear in TILE_B) and exact (0/1 matrix).
        r = jnp.dot(s, a, preferred_element_type=jnp.float32).astype(cdt)  # (3*OH, in_w)
        sel_parts.append(jnp.concatenate([r[0:oh], r[oh:2 * oh], r[2 * oh:3 * oh]],
                                         axis=1))                          # (OH, 3*in_w)
    sel = jnp.concatenate(sel_parts, axis=0)           # (TILE_B*OH, 3*in_w), M stacked
    acc = jnp.dot(sel, b_ref[...], preferred_element_type=jnp.float32)     # single MXU pass
    st = st_ref[...]
    return jnp.maximum(acc * st[0:1, :] + st[1:2, :], 0.0)


def _encoder_kernel(x_ref,
                    s1, b1, t1, s2, b2, t2, s3, b3, t3, s4, b4, t4,
                    l1, lb1, w6, lb2, o_ref):
    cdt = b1.dtype
    # In-kernel f32 -> bf16 cast (no wrapper-side HBM pass).
    imgs = [x_ref[b].astype(cdt) for b in range(TILE_B)]                   # (64, 64) each
    a = _conv_block(imgs, s1, b1, t1).astype(cdt)                          # (8*32, 256)
    a = _conv_block([a[b * _OH[0]:(b + 1) * _OH[0]] for b in range(TILE_B)],
                    s2, b2, t2).astype(cdt)                                # (8*16, 256)
    a = _conv_block([a[b * _OH[1]:(b + 1) * _OH[1]] for b in range(TILE_B)],
                    s3, b3, t3).astype(cdt)                                # (8*7, 256)
    a = _conv_block([a[b * _OH[2]:(b + 1) * _OH[2]] for b in range(TILE_B)],
                    s4, b4, t4).astype(cdt)                                # (8*3, 256)

    # Linear(576, 128) + ReLU: lane-concat each image's 3 rows -> one (TILE_B, 768)
    # matmul (L1 is pre-permuted so (h, w, c) matches PyTorch's (c, h, w) flatten).
    zin = jnp.concatenate(
        [jnp.concatenate([a[3 * b + h:3 * b + h + 1, :] for h in range(3)], axis=1)
         for b in range(TILE_B)], axis=0)                                  # (TILE_B, 768)
    z = jnp.dot(zin, l1[...], preferred_element_type=jnp.float32) + lb1[...]
    z = jnp.maximum(z, 0.0)                                                # (TILE_B, 128) f32

    # Linear(128, D) (no activation)
    out = jnp.dot(z.astype(cdt), w6[...], preferred_element_type=jnp.float32) + lb2[...]
    o_ref[...] = out.astype(o_ref.dtype)                                   # (TILE_B, D)


# ----------------------------------------------------------------------------
# Wrapper: one fused pallas_call, TILE_B images per grid step
# ----------------------------------------------------------------------------
@jax.jit
def encoder_forward(packed, x_nchw):
    if x_nchw.shape[1:] != (1, _IMG, _IMG):
        raise ValueError(f"Encoder expects (N, 1, {_IMG}, {_IMG}); got {x_nchw.shape}")
    n = x_nchw.shape[0]
    d = packed["lb2"].shape[1]
    x3 = x_nchw.reshape(n, _IMG, _IMG)                       # Cin == 1, free reshape
    n_pad = ((n + TILE_B - 1) // TILE_B) * TILE_B
    if n_pad != n:
        x3 = jnp.concatenate(
            [x3, jnp.zeros((n_pad - n, _IMG, _IMG), x3.dtype)], axis=0)

    in_specs = [pl.BlockSpec((TILE_B, _IMG, _IMG), lambda i: (i, 0, 0))]
    args = [x3]
    for name in _PARAM_ORDER:                                # all params are 2-D, resident
        arr = packed[name]
        in_specs.append(pl.BlockSpec(arr.shape, lambda i: (0, 0)))
        args.append(arr)

    out = pl.pallas_call(
        _encoder_kernel,
        out_shape=jax.ShapeDtypeStruct((n_pad, d), jnp.float32),
        grid_spec=pltpu.PrefetchScalarGridSpec(
            num_scalar_prefetch=0,
            grid=(n_pad // TILE_B,),
            in_specs=in_specs,
            out_specs=pl.BlockSpec((TILE_B, d), lambda i: (i, 0)),
        ),
        compiler_params=pltpu.CompilerParams(dimension_semantics=("parallel",)),
    )(*args)
    return out[:n]


# ----------------------------------------------------------------------------
# Host-side construction of the structured matrices (numpy, at init time)
# ----------------------------------------------------------------------------
def _fused_row_select(OH, H_in, pad):
    S = np.zeros((3 * OH, H_in), np.float32)
    for kh in range(3):
        for oh in range(OH):
            h = 2 * oh + kh - pad
            if 0 <= h < H_in:
                S[kh * OH + oh, h] = 1.0
    return S


def _fused_conv_matrix(w_oihw, W_in, OW, pad, in_width, out_width):
    Cout, Cin, _, _ = w_oihw.shape
    B = np.zeros((3 * in_width, out_width), np.float32)
    for kh in range(3):
        for ow in range(OW):
            for kw in range(3):
                wc = 2 * ow + kw - pad
                if 0 <= wc < W_in:
                    r0 = kh * in_width + wc * Cin
                    c0 = ow * Cout
                    B[r0:r0 + Cin, c0:c0 + Cout] = w_oihw[:, :, kh, kw].T
    return B


def _affine_cols(scale_c, shift_c, OW, out_width):
    Cout = scale_c.shape[0]
    st = np.zeros((2, out_width), np.float32)
    st[0, :] = 1.0                                   # padded cols: 0*1 + 0 -> 0
    st[0, :OW * Cout] = np.tile(scale_c, OW)
    st[1, :OW * Cout] = np.tile(shift_c, OW)
    return st


def _linear1_matrix(lw1, row_width, OH=3, OW=3, Cout=64):
    # lw1: (128, Cout*OH*OW) PyTorch layout; flatten index = c*OH*OW + h*OW + w
    out_dim = lw1.shape[0]
    L = np.zeros((OH * row_width, out_dim), np.float32)
    for h in range(OH):
        for w in range(OW):
            for c in range(Cout):
                L[h * row_width + w * Cout + c, :] = lw1[:, c * OH * OW + h * OW + w]
    return L


def pack_params(p):
    f32 = lambda a: np.asarray(a, dtype=np.float32)

    def fold_bn(conv_bias, gamma, beta, mean, var):
        s = gamma / np.sqrt(var + BN_EPS)
        return s, s * (conv_bias - mean) + beta      # conv bias folded into shift

    conv_w = [f32(p["w1"]), f32(p["w2"]), f32(p["w3"]), f32(p["w4"])]
    conv_b = [f32(p["b1"]), f32(p["b2"]), f32(p["b3"]), f32(p["b4"])]
    bn = [None,
          (f32(p["bn2_g"]), f32(p["bn2_b"]), f32(p["bn2_m"]), f32(p["bn2_v"])),
          (f32(p["bn3_g"]), f32(p["bn3_b"]), f32(p["bn3_m"]), f32(p["bn3_v"])),
          (f32(p["bn4_g"]), f32(p["bn4_b"]), f32(p["bn4_m"]), f32(p["bn4_v"]))]

    packed = {}
    for i, (H, W, Cin, Cout, pad, OH, OW, in_w, out_w) in enumerate(_CONV_CFG):
        packed[f"S{i + 1}"] = _fused_row_select(OH, H, pad)
        packed[f"B{i + 1}"] = _fused_conv_matrix(conv_w[i], W, OW, pad, in_w, out_w)
        if bn[i] is None:
            scale, shift = np.ones_like(conv_b[i]), conv_b[i]
        else:
            scale, shift = fold_bn(conv_b[i], *bn[i])
        packed[f"st{i + 1}"] = _affine_cols(scale, shift, OW, out_w)

    packed["L1"] = _linear1_matrix(f32(p["lw1"]), row_width=_CONV_CFG[3][8])
    packed["lb1"] = f32(p["lb1"]).reshape(1, -1)
    packed["W6"] = np.ascontiguousarray(f32(p["lw2"]).T)        # (128, D)
    packed["lb2"] = f32(p["lb2"]).reshape(1, -1)

    dev = {}
    for k, v in packed.items():
        dt = COMPUTE_DTYPE if k[0] in "SBLW" else jnp.float32   # scale/shift & biases f32
        dev[k] = jnp.asarray(v, dtype=dt)
    return dev


# ----------------------------------------------------------------------------
# Deterministic synthetic parameters (PyTorch layouts)
# ----------------------------------------------------------------------------
def init_params(key, encoded_space_dim):
    ks = jax.random.split(key, 16)

    def rnd(k, shape, s=0.05):
        return (s * jax.random.normal(k, shape)).astype(jnp.float32)

    return {
        "w1": rnd(ks[0], (8, 1, 3, 3)),   "b1": rnd(ks[1], (8,)),
        "w2": rnd(ks[2], (16, 8, 3, 3)),  "b2": rnd(ks[3], (16,)),
        "w3": rnd(ks[4], (32, 16, 3, 3)), "b3": rnd(ks[5], (32,)),
        "w4": rnd(ks[6], (64, 32, 3, 3)), "b4": rnd(ks[7], (64,)),
        "bn2_g": jnp.ones((16,), jnp.float32), "bn2_b": rnd(ks[8], (16,)),
        "bn2_m": rnd(ks[9], (16,)),            "bn2_v": jnp.ones((16,), jnp.float32),
        "bn3_g": jnp.ones((32,), jnp.float32), "bn3_b": rnd(ks[10], (32,)),
        "bn3_m": rnd(ks[11], (32,)),           "bn3_v": jnp.ones((32,), jnp.float32),
        "bn4_g": jnp.ones((64,), jnp.float32), "bn4_b": rnd(ks[12], (64,)),
        "bn4_m": rnd(ks[13], (64,)),           "bn4_v": jnp.ones((64,), jnp.float32),
        "lw1": rnd(ks[14], (128, 3 * 3 * 64)), "lb1": jnp.zeros((128,), jnp.float32),
        "lw2": rnd(ks[15], (encoded_space_dim, 128)),
        "lb2": jnp.zeros((encoded_space_dim,), jnp.float32),
    }


# ----------------------------------------------------------------------------
# Pure-JAX reference (for correctness check)
# ----------------------------------------------------------------------------
def encoder_reference(p, x):
    def conv(x, w, b, stride, pad):
        y = jax.lax.conv_general_dilated(
            x, w, window_strides=(stride, stride),
            padding=[(pad, pad), (pad, pad)],
            dimension_numbers=("NCHW", "OIHW", "NCHW"))
        return y + b.reshape(1, -1, 1, 1)

    def bn(x, g, b, m, v):
        s = g / jnp.sqrt(v + BN_EPS)
        return x * s.reshape(1, -1, 1, 1) + (b - m * s).reshape(1, -1, 1, 1)

    x = jax.nn.relu(conv(x, p["w1"], p["b1"], 2, 1))
    x = jax.nn.relu(bn(conv(x, p["w2"], p["b2"], 2, 1),
                       p["bn2_g"], p["bn2_b"], p["bn2_m"], p["bn2_v"]))
    x = jax.nn.relu(bn(conv(x, p["w3"], p["b3"], 2, 0),
                       p["bn3_g"], p["bn3_b"], p["bn3_m"], p["bn3_v"]))
    x = jax.nn.relu(bn(conv(x, p["w4"], p["b4"], 2, 0),
                       p["bn4_g"], p["bn4_b"], p["bn4_m"], p["bn4_v"]))
    x = x.reshape(x.shape[0], -1)
    x = jax.nn.relu(x @ p["lw1"].T + p["lb1"])
    return x @ p["lw2"].T + p["lb2"]


if __name__ == "__main__":
    encoded_space_dim = 16
    key = jax.random.PRNGKey(0)
    k_params, k_x = jax.random.split(key)

    params = init_params(k_params, encoded_space_dim)
    packed = pack_params(params)

    # batch = 16 -> two grid steps of TILE_B=8 (keeps both v7x TensorCores busy).
    # 64x64 input -> conv stack yields (N, 64, 3, 3), as required by Linear(576, 128).
    batch = 16
    x = jax.random.normal(k_x, (batch, 1, _IMG, _IMG), dtype=jnp.float32)

    out = jax.block_until_ready(encoder_forward(packed, x))
    assert out.shape == (batch, encoded_space_dim), out.shape
    assert bool(jnp.all(jnp.isfinite(out)))

    ref = encoder_reference(params, x)
    err = float(jnp.max(jnp.abs(out - ref)))
    assert err < 2e-2, f"max |err| vs reference = {err}"
    print("KERNEL_OK")
</pallas_src>

<mosaic_0001>
module attributes {stable_mosaic.version = 11 : i64} {
  func.func @_encoder_kernel(%arg0: i32, %arg1: memref<8x64x64xf32, #tpu.memory_space<vmem>>, %arg2: memref<96x64xbf16, #tpu.memory_space<vmem>>, %arg3: memref<192x256xbf16, #tpu.memory_space<vmem>>, %arg4: memref<2x256xf32, #tpu.memory_space<vmem>>, %arg5: memref<48x32xbf16, #tpu.memory_space<vmem>>, %arg6: memref<768x256xbf16, #tpu.memory_space<vmem>>, %arg7: memref<2x256xf32, #tpu.memory_space<vmem>>, %arg8: memref<21x16xbf16, #tpu.memory_space<vmem>>, %arg9: memref<768x256xbf16, #tpu.memory_space<vmem>>, %arg10: memref<2x256xf32, #tpu.memory_space<vmem>>, %arg11: memref<9x7xbf16, #tpu.memory_space<vmem>>, %arg12: memref<768x256xbf16, #tpu.memory_space<vmem>>, %arg13: memref<2x256xf32, #tpu.memory_space<vmem>>, %arg14: memref<768x128xbf16, #tpu.memory_space<vmem>>, %arg15: memref<1x128xf32, #tpu.memory_space<vmem>>, %arg16: memref<128x16xbf16, #tpu.memory_space<vmem>>, %arg17: memref<1x16xf32, #tpu.memory_space<vmem>>, %arg18: memref<8x16xf32, #tpu.memory_space<vmem>>) attributes {dimension_semantics = [#tpu.dimension_semantics<parallel>], iteration_bounds = array<i64: 2>, scalar_prefetch = 0 : i64, scratch_operands = 0 : i64, tpu.core_type = #tpu.core_type<tc>, window_params = [{transform_indices = @transform_0, window_bounds = array<i64: 8, 64, 64>}, {pipeline_mode = #tpu.pipeline_mode<synchronous>, transform_indices = @transform_1, window_bounds = array<i64: 96, 64>}, {pipeline_mode = #tpu.pipeline_mode<synchronous>, transform_indices = @transform_2, window_bounds = array<i64: 192, 256>}, {pipeline_mode = #tpu.pipeline_mode<synchronous>, transform_indices = @transform_3, window_bounds = array<i64: 2, 256>}, {pipeline_mode = #tpu.pipeline_mode<synchronous>, transform_indices = @transform_4, window_bounds = array<i64: 48, 32>}, {pipeline_mode = #tpu.pipeline_mode<synchronous>, transform_indices = @transform_5, window_bounds = array<i64: 768, 256>}, {pipeline_mode = #tpu.pipeline_mode<synchronous>, transform_indices = @transform_6, window_bounds = array<i64: 2, 256>}, {pipeline_mode = #tpu.pipeline_mode<synchronous>, transform_indices = @transform_7, window_bounds = array<i64: 21, 16>}, {pipeline_mode = #tpu.pipeline_mode<synchronous>, transform_indices = @transform_8, window_bounds = array<i64: 768, 256>}, {pipeline_mode = #tpu.pipeline_mode<synchronous>, transform_indices = @transform_9, window_bounds = array<i64: 2, 256>}, {pipeline_mode = #tpu.pipeline_mode<synchronous>, transform_indices = @transform_10, window_bounds = array<i64: 9, 7>}, {pipeline_mode = #tpu.pipeline_mode<synchronous>, transform_indices = @transform_11, window_bounds = array<i64: 768, 256>}, {pipeline_mode = #tpu.pipeline_mode<synchronous>, transform_indices = @transform_12, window_bounds = array<i64: 2, 256>}, {pipeline_mode = #tpu.pipeline_mode<synchronous>, transform_indices = @transform_13, window_bounds = array<i64: 768, 128>}, {pipeline_mode = #tpu.pipeline_mode<synchronous>, transform_indices = @transform_14, window_bounds = array<i64: 1, 128>}, {pipeline_mode = #tpu.pipeline_mode<synchronous>, transform_indices = @transform_15, window_bounds = array<i64: 128, 16>}, {pipeline_mode = #tpu.pipeline_mode<synchronous>, transform_indices = @transform_16, window_bounds = array<i64: 1, 16>}, {transform_indices = @transform_17, window_bounds = array<i64: 8, 16>}]} {
    %c0 = arith.constant 0 : index
    %c0_0 = arith.constant 0 : index
    %c0_1 = arith.constant 0 : index
    %0 = vector.load %arg1[%c0, %c0_0, %c0_1] : memref<8x64x64xf32, #tpu.memory_space<vmem>>, vector<1x64x64xf32>
    %1 = vector.shape_cast %0 : vector<1x64x64xf32> to vector<64x64xf32>
    %2 = arith.truncf %1 : vector<64x64xf32> to vector<64x64xbf16>
    %c1 = arith.constant 1 : index
    %c0_2 = arith.constant 0 : index
    %c0_3 = arith.constant 0 : index
    %3 = vector.load %arg1[%c1, %c0_2, %c0_3] : memref<8x64x64xf32, #tpu.memory_space<vmem>>, vector<1x64x64xf32>
    %4 = vector.shape_cast %3 : vector<1x64x64xf32> to vector<64x64xf32>
    %5 = arith.truncf %4 : vector<64x64xf32> to vector<64x64xbf16>
    %c2 = arith.constant 2 : index
    %c0_4 = arith.constant 0 : index
    %c0_5 = arith.constant 0 : index
    %6 = vector.load %arg1[%c2, %c0_4, %c0_5] : memref<8x64x64xf32, #tpu.memory_space<vmem>>, vector<1x64x64xf32>
    %7 = vector.shape_cast %6 : vector<1x64x64xf32> to vector<64x64xf32>
    %8 = arith.truncf %7 : vector<64x64xf32> to vector<64x64xbf16>
    %c3 = arith.constant 3 : index
    %c0_6 = arith.constant 0 : index
    %c0_7 = arith.constant 0 : index
    %9 = vector.load %arg1[%c3, %c0_6, %c0_7] : memref<8x64x64xf32, #tpu.memory_space<vmem>>, vector<1x64x64xf32>
    %10 = vector.shape_cast %9 : vector<1x64x64xf32> to vector<64x64xf32>
    %11 = arith.truncf %10 : vector<64x64xf32> to vector<64x64xbf16>
    %c4 = arith.constant 4 : index
    %c0_8 = arith.constant 0 : index
    %c0_9 = arith.constant 0 : index
    %12 = vector.load %arg1[%c4, %c0_8, %c0_9] : memref<8x64x64xf32, #tpu.memory_space<vmem>>, vector<1x64x64xf32>
    %13 = vector.shape_cast %12 : vector<1x64x64xf32> to vector<64x64xf32>
    %14 = arith.truncf %13 : vector<64x64xf32> to vector<64x64xbf16>
    %c5 = arith.constant 5 : index
    %c0_10 = arith.constant 0 : index
    %c0_11 = arith.constant 0 : index
    %15 = vector.load %arg1[%c5, %c0_10, %c0_11] : memref<8x64x64xf32, #tpu.memory_space<vmem>>, vector<1x64x64xf32>
    %16 = vector.shape_cast %15 : vector<1x64x64xf32> to vector<64x64xf32>
    %17 = arith.truncf %16 : vector<64x64xf32> to vector<64x64xbf16>
    %c6 = arith.constant 6 : index
    %c0_12 = arith.constant 0 : index
    %c0_13 = arith.constant 0 : index
    %18 = vector.load %arg1[%c6, %c0_12, %c0_13] : memref<8x64x64xf32, #tpu.memory_space<vmem>>, vector<1x64x64xf32>
    %19 = vector.shape_cast %18 : vector<1x64x64xf32> to vector<64x64xf32>
    %20 = arith.truncf %19 : vector<64x64xf32> to vector<64x64xbf16>
    %c7 = arith.constant 7 : index
    %c0_14 = arith.constant 0 : index
    %c0_15 = arith.constant 0 : index
    %21 = vector.load %arg1[%c7, %c0_14, %c0_15] : memref<8x64x64xf32, #tpu.memory_space<vmem>>, vector<1x64x64xf32>
    %22 = vector.shape_cast %21 : vector<1x64x64xf32> to vector<64x64xf32>
    %23 = arith.truncf %22 : vector<64x64xf32> to vector<64x64xbf16>
    %c0_16 = arith.constant 0 : index
    %c0_17 = arith.constant 0 : index
    %24 = vector.load %arg2[%c0_16, %c0_17] : memref<96x64xbf16, #tpu.memory_space<vmem>>, vector<96x64xbf16>
    %cst = arith.constant dense<0.000000e+00> : vector<96x64xf32>
    %25 = tpu.matmul %24, %2, %cst {dimension_numbers = #tpu.dot_dimension_numbers<[1], [0], [0], [1], [0, 0, 1, 1], [], []>} : vector<96x64xbf16>, vector<64x64xbf16>, vector<96x64xf32> -> vector<96x64xf32>
    %26 = arith.truncf %25 : vector<96x64xf32> to vector<96x64xbf16>
    %27 = vector.extract_strided_slice %26 {offsets = [0, 0], sizes = [32, 64], strides = [1, 1]} : vector<96x64xbf16> to vector<32x64xbf16>
    %28 = vector.extract_strided_slice %26 {offsets = [32, 0], sizes = [32, 64], strides = [1, 1]} : vector<96x64xbf16> to vector<32x64xbf16>
    %29 = vector.extract_strided_slice %26 {offsets = [64, 0], sizes = [32, 64], strides = [1, 1]} : vector<96x64xbf16> to vector<32x64xbf16>
    %30 = tpu.concatenate %27, %28, %29 in 1 : vector<32x64xbf16>, vector<32x64xbf16>, vector<32x64xbf16> -> vector<32x192xbf16>
    %cst_18 = arith.constant dense<0.000000e+00> : vector<96x64xf32>
    %31 = tpu.matmul %24, %5, %cst_18 {dimension_numbers = #tpu.dot_dimension_numbers<[1], [0], [0], [1], [0, 0, 1, 1], [], []>} : vector<96x64xbf16>, vector<64x64xbf16>, vector<96x64xf32> -> vector<96x64xf32>
    %32 = arith.truncf %31 : vector<96x64xf32> to vector<96x64xbf16>
    %33 = vector.extract_strided_slice %32 {offsets = [0, 0], sizes = [32, 64], strides = [1, 1]} : vector<96x64xbf16> to vector<32x64xbf16>
    %34 = vector.extract_strided_slice %32 {offsets = [32, 0], sizes = [32, 64], strides = [1, 1]} : vector<96x64xbf16> to vector<32x64xbf16>
    %35 = vector.extract_strided_slice %32 {offsets = [64, 0], sizes = [32, 64], strides = [1, 1]} : vector<96x64xbf16> to vector<32x64xbf16>
    %36 = tpu.concatenate %33, %34, %35 in 1 : vector<32x64xbf16>, vector<32x64xbf16>, vector<32x64xbf16> -> vector<32x192xbf16>
    %cst_19 = arith.constant dense<0.000000e+00> : vector<96x64xf32>
    %37 = tpu.matmul %24, %8, %cst_19 {dimension_numbers = #tpu.dot_dimension_numbers<[1], [0], [0], [1], [0, 0, 1, 1], [], []>} : vector<96x64xbf16>, vector<64x64xbf16>, vector<96x64xf32> -> vector<96x64xf32>
    %38 = arith.truncf %37 : vector<96x64xf32> to vector<96x64xbf16>
    %39 = vector.extract_strided_slice %38 {offsets = [0, 0], sizes = [32, 64], strides = [1, 1]} : vector<96x64xbf16> to vector<32x64xbf16>
    %40 = vector.extract_strided_slice %38 {offsets = [32, 0], sizes = [32, 64], strides = [1, 1]} : vector<96x64xbf16> to vector<32x64xbf16>
    %41 = vector.extract_strided_slice %38 {offsets = [64, 0], sizes = [32, 64], strides = [1, 1]} : vector<96x64xbf16> to vector<32x64xbf16>
    %42 = tpu.concatenate %39, %40, %41 in 1 : vector<32x64xbf16>, vector<32x64xbf16>, vector<32x64xbf16> -> vector<32x192xbf16>
    %cst_20 = arith.constant dense<0.000000e+00> : vector<96x64xf32>
    %43 = tpu.matmul %24, %11, %cst_20 {dimension_numbers = #tpu.dot_dimension_numbers<[1], [0], [0], [1], [0, 0, 1, 1], [], []>} : vector<96x64xbf16>, vector<64x64xbf16>, vector<96x64xf32> -> vector<96x64xf32>
    %44 = arith.truncf %43 : vector<96x64xf32> to vector<96x64xbf16>
    %45 = vector.extract_strided_slice %44 {offsets = [0, 0], sizes = [32, 64], strides = [1, 1]} : vector<96x64xbf16> to vector<32x64xbf16>
    %46 = vector.extract_strided_slice %44 {offsets = [32, 0], sizes = [32, 64], strides = [1, 1]} : vector<96x64xbf16> to vector<32x64xbf16>
    %47 = vector.extract_strided_slice %44 {offsets = [64, 0], sizes = [32, 64], strides = [1, 1]} : vector<96x64xbf16> to vector<32x64xbf16>
    %48 = tpu.concatenate %45, %46, %47 in 1 : vector<32x64xbf16>, vector<32x64xbf16>, vector<32x64xbf16> -> vector<32x192xbf16>
    %cst_21 = arith.constant dense<0.000000e+00> : vector<96x64xf32>
    %49 = tpu.matmul %24, %14, %cst_21 {dimension_numbers = #tpu.dot_dimension_numbers<[1], [0], [0], [1], [0, 0, 1, 1], [], []>} : vector<96x64xbf16>, vector<64x64xbf16>, vector<96x64xf32> -> vector<96x64xf32>
    %50 = arith.truncf %49 : vector<96x64xf32> to vector<96x64xbf16>
    %51 = vector.extract_strided_slice %50 {offsets = [0, 0], sizes = [32, 64], strides = [1, 1]} : vector<96x64xbf16> to vector<32x64xbf16>
    %52 = vector.extract_strided_slice %50 {offsets = [32, 0], sizes = [32, 64], strides = [1, 1]} : vector<96x64xbf16> to vector<32x64xbf16>
    %53 = vector.extract_strided_slice %50 {offsets = [64, 0], sizes = [32, 64], strides = [1, 1]} : vector<96x64xbf16> to vector<32x64xbf16>
    %54 = tpu.concatenate %51, %52, %53 in 1 : vector<32x64xbf16>, vector<32x64xbf16>, vector<32x64xbf16> -> vector<32x192xbf16>
    %cst_22 = arith.constant dense<0.000000e+00> : vector<96x64xf32>
    %55 = tpu.matmul %24, %17, %cst_22 {dimension_numbers = #tpu.dot_dimension_numbers<[1], [0], [0], [1], [0, 0, 1, 1], [], []>} : vector<96x64xbf16>, vector<64x64xbf16>, vector<96x64xf32> -> vector<96x64xf32>
    %56 = arith.truncf %55 : vector<96x64xf32> to vector<96x64xbf16>
    %57 = vector.extract_strided_slice %56 {offsets = [0, 0], sizes = [32, 64], strides = [1, 1]} : vector<96x64xbf16> to vector<32x64xbf16>
    %58 = vector.extract_strided_slice %56 {offsets = [32, 0], sizes = [32, 64], strides = [1, 1]} : vector<96x64xbf16> to vector<32x64xbf16>
    %59 = vector.extract_strided_slice %56 {offsets = [64, 0], sizes = [32, 64], strides = [1, 1]} : vector<96x64xbf16> to vector<32x64xbf16>
    %60 = tpu.concatenate %57, %58, %59 in 1 : vector<32x64xbf16>, vector<32x64xbf16>, vector<32x64xbf16> -> vector<32x192xbf16>
    %cst_23 = arith.constant dense<0.000000e+00> : vector<96x64xf32>
    %61 = tpu.matmul %24, %20, %cst_23 {dimension_numbers = #tpu.dot_dimension_numbers<[1], [0], [0], [1], [0, 0, 1, 1], [], []>} : vector<96x64xbf16>, vector<64x64xbf16>, vector<96x64xf32> -> vector<96x64xf32>
    %62 = arith.truncf %61 : vector<96x64xf32> to vector<96x64xbf16>
    %63 = vector.extract_strided_slice %62 {offsets = [0, 0], sizes = [32, 64], strides = [1, 1]} : vector<96x64xbf16> to vector<32x64xbf16>
    %64 = vector.extract_strided_slice %62 {offsets = [32, 0], sizes = [32, 64], strides = [1, 1]} : vector<96x64xbf16> to vector<32x64xbf16>
    %65 = vector.extract_strided_slice %62 {offsets = [64, 0], sizes = [32, 64], strides = [1, 1]} : vector<96x64xbf16> to vector<32x64xbf16>
    %66 = tpu.concatenate %63, %64, %65 in 1 : vector<32x64xbf16>, vector<32x64xbf16>, vector<32x64xbf16> -> vector<32x192xbf16>
    %cst_24 = arith.constant dense<0.000000e+00> : vector<96x64xf32>
    %67 = tpu.matmul %24, %23, %cst_24 {dimension_numbers = #tpu.dot_dimension_numbers<[1], [0], [0], [1], [0, 0, 1, 1], [], []>} : vector<96x64xbf16>, vector<64x64xbf16>, vector<96x64xf32> -> vector<96x64xf32>
    %68 = arith.truncf %67 : vector<96x64xf32> to vector<96x64xbf16>
    %69 = vector.extract_strided_slice %68 {offsets = [0, 0], sizes = [32, 64], strides = [1, 1]} : vector<96x64xbf16> to vector<32x64xbf16>
    %70 = vector.extract_strided_slice %68 {offsets = [32, 0], sizes = [32, 64], strides = [1, 1]} : vector<96x64xbf16> to vector<32x64xbf16>
    %71 = vector.extract_strided_slice %68 {offsets = [64, 0], sizes = [32, 64], strides = [1, 1]} : vector<96x64xbf16> to vector<32x64xbf16>
    %72 = tpu.concatenate %69, %70, %71 in 1 : vector<32x64xbf16>, vector<32x64xbf16>, vector<32x64xbf16> -> vector<32x192xbf16>
    %73 = tpu.concatenate %30, %36, %42, %48, %54, %60, %66, %72 in 0 : vector<32x192xbf16>, vector<32x192xbf16>, vector<32x192xbf16>, vector<32x192xbf16>, vector<32x192xbf16>, vector<32x192xbf16>, vector<32x192xbf16>, vector<32x192xbf16> -> vector<256x192xbf16>
    %c0_25 = arith.constant 0 : index
    %c0_26 = arith.constant 0 : index
    %74 = vector.load %arg3[%c0_25, %c0_26] : memref<192x256xbf16, #tpu.memory_space<vmem>>, vector<192x256xbf16>
    %cst_27 = arith.constant dense<0.000000e+00> : vector<256x256xf32>
    %75 = tpu.matmul %73, %74, %cst_27 {dimension_numbers = #tpu.dot_dimension_numbers<[1], [0], [0], [1], [0, 0, 1, 1], [], []>} : vector<256x192xbf16>, vector<192x256xbf16>, vector<256x256xf32> -> vector<256x256xf32>
    %c0_28 = arith.constant 0 : index
    %c0_29 = arith.constant 0 : index
    %76 = vector.load %arg4[%c0_28, %c0_29] : memref<2x256xf32, #tpu.memory_space<vmem>>, vector<2x256xf32>
    %77 = vector.extract_strided_slice %76 {offsets = [0, 0], sizes = [1, 256], strides = [1, 1]} : vector<2x256xf32> to vector<1x256xf32>
    %78 = vector.broadcast %77 : vector<1x256xf32> to vector<256x256xf32>
    %79 = arith.mulf %75, %78 : vector<256x256xf32>
    %80 = vector.extract_strided_slice %76 {offsets = [1, 0], sizes = [1, 256], strides = [1, 1]} : vector<2x256xf32> to vector<1x256xf32>
    %81 = vector.broadcast %80 : vector<1x256xf32> to vector<256x256xf32>
    %82 = arith.addf %79, %81 : vector<256x256xf32>
    %cst_30 = arith.constant 0.000000e+00 : f32
    %83 = vector.broadcast %cst_30 : f32 to vector<256x256xf32>
    %84 = arith.maximumf %82, %83 : vector<256x256xf32>
    %85 = arith.truncf %84 : vector<256x256xf32> to vector<256x256xbf16>
    %86 = vector.extract_strided_slice %85 {offsets = [0, 0], sizes = [32, 256], strides = [1, 1]} : vector<256x256xbf16> to vector<32x256xbf16>
    %87 = vector.extract_strided_slice %85 {offsets = [32, 0], sizes = [32, 256], strides = [1, 1]} : vector<256x256xbf16> to vector<32x256xbf16>
    %88 = vector.extract_strided_slice %85 {offsets = [64, 0], sizes = [32, 256], strides = [1, 1]} : vector<256x256xbf16> to vector<32x256xbf16>
    %89 = vector.extract_strided_slice %85 {offsets = [96, 0], sizes = [32, 256], strides = [1, 1]} : vector<256x256xbf16> to vector<32x256xbf16>
    %90 = vector.extract_strided_slice %85 {offsets = [128, 0], sizes = [32, 256], strides = [1, 1]} : vector<256x256xbf16> to vector<32x256xbf16>
    %91 = vector.extract_strided_slice %85 {offsets = [160, 0], sizes = [32, 256], strides = [1, 1]} : vector<256x256xbf16> to vector<32x256xbf16>
    %92 = vector.extract_strided_slice %85 {offsets = [192, 0], sizes = [32, 256], strides = [1, 1]} : vector<256x256xbf16> to vector<32x256xbf16>
    %93 = vector.extract_strided_slice %85 {offsets = [224, 0], sizes = [32, 256], strides = [1, 1]} : vector<256x256xbf16> to vector<32x256xbf16>
    %c0_31 = arith.constant 0 : index
    %c0_32 = arith.constant 0 : index
    %94 = vector.load %arg5[%c0_31, %c0_32] : memref<48x32xbf16, #tpu.memory_space<vmem>>, vector<48x32xbf16>
    %cst_33 = arith.constant dense<0.000000e+00> : vector<48x256xf32>
    %95 = tpu.matmul %94, %86, %cst_33 {dimension_numbers = #tpu.dot_dimension_numbers<[1], [0], [0], [1], [0, 0, 1, 1], [], []>} : vector<48x32xbf16>, vector<32x256xbf16>, vector<48x256xf32> -> vector<48x256xf32>
    %96 = arith.truncf %95 : vector<48x256xf32> to vector<48x256xbf16>
    %97 = vector.extract_strided_slice %96 {offsets = [0, 0], sizes = [16, 256], strides = [1, 1]} : vector<48x256xbf16> to vector<16x256xbf16>
    %98 = vector.extract_strided_slice %96 {offsets = [16, 0], sizes = [16, 256], strides = [1, 1]} : vector<48x256xbf16> to vector<16x256xbf16>
    %99 = vector.extract_strided_slice %96 {offsets = [32, 0], sizes = [16, 256], strides = [1, 1]} : vector<48x256xbf16> to vector<16x256xbf16>
    %100 = tpu.concatenate %97, %98, %99 in 1 : vector<16x256xbf16>, vector<16x256xbf16>, vector<16x256xbf16> -> vector<16x768xbf16>
    %cst_34 = arith.constant dense<0.000000e+00> : vector<48x256xf32>
    %101 = tpu.matmul %94, %87, %cst_34 {dimension_numbers = #tpu.dot_dimension_numbers<[1], [0], [0], [1], [0, 0, 1, 1], [], []>} : vector<48x32xbf16>, vector<32x256xbf16>, vector<48x256xf32> -> vector<48x256xf32>
    %102 = arith.truncf %101 : vector<48x256xf32> to vector<48x256xbf16>
    %103 = vector.extract_strided_slice %102 {offsets = [0, 0], sizes = [16, 256], strides = [1, 1]} : vector<48x256xbf16> to vector<16x256xbf16>
    %104 = vector.extract_strided_slice %102 {offsets = [16, 0], sizes = [16, 256], strides = [1, 1]} : vector<48x256xbf16> to vector<16x256xbf16>
    %105 = vector.extract_strided_slice %102 {offsets = [32, 0], sizes = [16, 256], strides = [1, 1]} : vector<48x256xbf16> to vector<16x256xbf16>
    %106 = tpu.concatenate %103, %104, %105 in 1 : vector<16x256xbf16>, vector<16x256xbf16>, vector<16x256xbf16> -> vector<16x768xbf16>
    %cst_35 = arith.constant dense<0.000000e+00> : vector<48x256xf32>
    %107 = tpu.matmul %94, %88, %cst_35 {dimension_numbers = #tpu.dot_dimension_numbers<[1], [0], [0], [1], [0, 0, 1, 1], [], []>} : vector<48x32xbf16>, vector<32x256xbf16>, vector<48x256xf32> -> vector<48x256xf32>
    %108 = arith.truncf %107 : vector<48x256xf32> to vector<48x256xbf16>
    %109 = vector.extract_strided_slice %108 {offsets = [0, 0], sizes = [16, 256], strides = [1, 1]} : vector<48x256xbf16> to vector<16x256xbf16>
    %110 = vector.extract_strided_slice %108 {offsets = [16, 0], sizes = [16, 256], strides = [1, 1]} : vector<48x256xbf16> to vector<16x256xbf16>
    %111 = vector.extract_strided_slice %108 {offsets = [32, 0], sizes = [16, 256], strides = [1, 1]} : vector<48x256xbf16> to vector<16x256xbf16>
    %112 = tpu.concatenate %109, %110, %111 in 1 : vector<16x256xbf16>, vector<16x256xbf16>, vector<16x256xbf16> -> vector<16x768xbf16>
    %cst_36 = arith.constant dense<0.000000e+00> : vector<48x256xf32>
    %113 = tpu.matmul %94, %89, %cst_36 {dimension_numbers = #tpu.dot_dimension_numbers<[1], [0], [0], [1], [0, 0, 1, 1], [], []>} : vector<48x32xbf16>, vector<32x256xbf16>, vector<48x256xf32> -> vector<48x256xf32>
    %114 = arith.truncf %113 : vector<48x256xf32> to vector<48x256xbf16>
    %115 = vector.extract_strided_slice %114 {offsets = [0, 0], sizes = [16, 256], strides = [1, 1]} : vector<48x256xbf16> to vector<16x256xbf16>
    %116 = vector.extract_strided_slice %114 {offsets = [16, 0], sizes = [16, 256], strides = [1, 1]} : vector<48x256xbf16> to vector<16x256xbf16>
    %117 = vector.extract_strided_slice %114 {offsets = [32, 0], sizes = [16, 256], strides = [1, 1]} : vector<48x256xbf16> to vector<16x256xbf16>
    %118 = tpu.concatenate %115, %116, %117 in 1 : vector<16x256xbf16>, vector<16x256xbf16>, vector<16x256xbf16> -> vector<16x768xbf16>
    %cst_37 = arith.constant dense<0.000000e+00> : vector<48x256xf32>
    %119 = tpu.matmul %94, %90, %cst_37 {dimension_numbers = #tpu.dot_dimension_numbers<[1], [0], [0], [1], [0, 0, 1, 1], [], []>} : vector<48x32xbf16>, vector<32x256xbf16>, vector<48x256xf32> -> vector<48x256xf32>
    %120 = arith.truncf %119 : vector<48x256xf32> to vector<48x256xbf16>
    %121 = vector.extract_strided_slice %120 {offsets = [0, 0], sizes = [16, 256], strides = [1, 1]} : vector<48x256xbf16> to vector<16x256xbf16>
    %122 = vector.extract_strided_slice %120 {offsets = [16, 0], sizes = [16, 256], strides = [1, 1]} : vector<48x256xbf16> to vector<16x256xbf16>
    %123 = vector.extract_strided_slice %120 {offsets = [32, 0], sizes = [16, 256], strides = [1, 1]} : vector<48x256xbf16> to vector<16x256xbf16>
    %124 = tpu.concatenate %121, %122, %123 in 1 : vector<16x256xbf16>, vector<16x256xbf16>, vector<16x256xbf16> -> vector<16x768xbf16>
    %cst_38 = arith.constant dense<0.000000e+00> : vector<48x256xf32>
    %125 = tpu.matmul %94, %91, %cst_38 {dimension_numbers = #tpu.dot_dimension_numbers<[1], [0], [0], [1], [0, 0, 1, 1], [], []>} : vector<48x32xbf16>, vector<32x256xbf16>, vector<48x256xf32> -> vector<48x256xf32>
    %126 = arith.truncf %125 : vector<48x256xf32> to vector<48x256xbf16>
    %127 = vector.extract_strided_slice %126 {offsets = [0, 0], sizes = [16, 256], strides = [1, 1]} : vector<48x256xbf16> to vector<16x256xbf16>
    %128 = vector.extract_strided_slice %126 {offsets = [16, 0], sizes = [16, 256], strides = [1, 1]} : vector<48x256xbf16> to vector<16x256xbf16>
    %129 = vector.extract_strided_slice %126 {offsets = [32, 0], sizes = [16, 256], strides = [1, 1]} : vector<48x256xbf16> to vector<16x256xbf16>
    %130 = tpu.concatenate %127, %128, %129 in 1 : vector<16x256xbf16>, vector<16x256xbf16>, vector<16x256xbf16> -> vector<16x768xbf16>
    %cst_39 = arith.constant dense<0.000000e+00> : vector<48x256xf32>
    %131 = tpu.matmul %94, %92, %cst_39 {dimension_numbers = #tpu.dot_dimension_numbers<[1], [0], [0], [1], [0, 0, 1, 1], [], []>} : vector<48x32xbf16>, vector<32x256xbf16>, vector<48x256xf32> -> vector<48x256xf32>
    %132 = arith.truncf %131 : vector<48x256xf32> to vector<48x256xbf16>
    %133 = vector.extract_strided_slice %132 {offsets = [0, 0], sizes = [16, 256], strides = [1, 1]} : vector<48x256xbf16> to vector<16x256xbf16>
    %134 = vector.extract_strided_slice %132 {offsets = [16, 0], sizes = [16, 256], strides = [1, 1]} : vector<48x256xbf16> to vector<16x256xbf16>
    %135 = vector.extract_strided_slice %132 {offsets = [32, 0], sizes = [16, 256], strides = [1, 1]} : vector<48x256xbf16> to vector<16x256xbf16>
    %136 = tpu.concatenate %133, %134, %135 in 1 : vector<16x256xbf16>, vector<16x256xbf16>, vector<16x256xbf16> -> vector<16x768xbf16>
    %cst_40 = arith.constant dense<0.000000e+00> : vector<48x256xf32>
    %137 = tpu.matmul %94, %93, %cst_40 {dimension_numbers = #tpu.dot_dimension_numbers<[1], [0], [0], [1], [0, 0, 1, 1], [], []>} : vector<48x32xbf16>, vector<32x256xbf16>, vector<48x256xf32> -> vector<48x256xf32>
    %138 = arith.truncf %137 : vector<48x256xf32> to vector<48x256xbf16>
    %139 = vector.extract_strided_slice %138 {offsets = [0, 0], sizes = [16, 256], strides = [1, 1]} : vector<48x256xbf16> to vector<16x256xbf16>
    %140 = vector.extract_strided_slice %138 {offsets = [16, 0], sizes = [16, 256], strides = [1, 1]} : vector<48x256xbf16> to vector<16x256xbf16>
    %141 = vector.extract_strided_slice %138 {offsets = [32, 0], sizes = [16, 256], strides = [1, 1]} : vector<48x256xbf16> to vector<16x256xbf16>
    %142 = tpu.concatenate %139, %140, %141 in 1 : vector<16x256xbf16>, vector<16x256xbf16>, vector<16x256xbf16> -> vector<16x768xbf16>
    %143 = tpu.concatenate %100, %106, %112, %118, %124, %130, %136, %142 in 0 : vector<16x768xbf16>, vector<16x768xbf16>, vector<16x768xbf16>, vector<16x768xbf16>, vector<16x768xbf16>, vector<16x768xbf16>, vector<16x768xbf16>, vector<16x768xbf16> -> vector<128x768xbf16>
    %c0_41 = arith.constant 0 : index
    %c0_42 = arith.constant 0 : index
    %144 = vector.load %arg6[%c0_41, %c0_42] : memref<768x256xbf16, #tpu.memory_space<vmem>>, vector<768x256xbf16>
    %cst_43 = arith.constant dense<0.000000e+00> : vector<128x256xf32>
    %145 = tpu.matmul %143, %144, %cst_43 {dimension_numbers = #tpu.dot_dimension_numbers<[1], [0], [0], [1], [0, 0, 1, 1], [], []>} : vector<128x768xbf16>, vector<768x256xbf16>, vector<128x256xf32> -> vector<128x256xf32>
    %c0_44 = arith.constant 0 : index
    %c0_45 = arith.constant 0 : index
    %146 = vector.load %arg7[%c0_44, %c0_45] : memref<2x256xf32, #tpu.memory_space<vmem>>, vector<2x256xf32>
    %147 = vector.extract_strided_slice %146 {offsets = [0, 0], sizes = [1, 256], strides = [1, 1]} : vector<2x256xf32> to vector<1x256xf32>
    %148 = vector.broadcast %147 : vector<1x256xf32> to vector<128x256xf32>
    %149 = arith.mulf %145, %148 : vector<128x256xf32>
    %150 = vector.extract_strided_slice %146 {offsets = [1, 0], sizes = [1, 256], strides = [1, 1]} : vector<2x256xf32> to vector<1x256xf32>
    %151 = vector.broadcast %150 : vector<1x256xf32> to vector<128x256xf32>
    %152 = arith.addf %149, %151 : vector<128x256xf32>
    %cst_46 = arith.constant 0.000000e+00 : f32
    %153 = vector.broadcast %cst_46 : f32 to vector<128x256xf32>
    %154 = arith.maximumf %152, %153 : vector<128x256xf32>
    %155 = arith.truncf %154 : vector<128x256xf32> to vector<128x256xbf16>
    %156 = vector.extract_strided_slice %155 {offsets = [0, 0], sizes = [16, 256], strides = [1, 1]} : vector<128x256xbf16> to vector<16x256xbf16>
    %157 = vector.extract_strided_slice %155 {offsets = [16, 0], sizes = [16, 256], strides = [1, 1]} : vector<128x256xbf16> to vector<16x256xbf16>
    %158 = vector.extract_strided_slice %155 {offsets = [32, 0], sizes = [16, 256], strides = [1, 1]} : vector<128x256xbf16> to vector<16x256xbf16>
    %159 = vector.extract_strided_slice %155 {offsets = [48, 0], sizes = [16, 256], strides = [1, 1]} : vector<128x256xbf16> to vector<16x256xbf16>
    %160 = vector.extract_strided_slice %155 {offsets = [64, 0], sizes = [16, 256], strides = [1, 1]} : vector<128x256xbf16> to vector<16x256xbf16>
    %161 = vector.extract_strided_slice %155 {offsets = [80, 0], sizes = [16, 256], strides = [1, 1]} : vector<128x256xbf16> to vector<16x256xbf16>
    %162 = vector.extract_strided_slice %155 {offsets = [96, 0], sizes = [16, 256], strides = [1, 1]} : vector<128x256xbf16> to vector<16x256xbf16>
    %163 = vector.extract_strided_slice %155 {offsets = [112, 0], sizes = [16, 256], strides = [1, 1]} : vector<128x256xbf16> to vector<16x256xbf16>
    %c0_47 = arith.constant 0 : index
    %c0_48 = arith.constant 0 : index
    %164 = vector.load %arg8[%c0_47, %c0_48] : memref<21x16xbf16, #tpu.memory_space<vmem>>, vector<21x16xbf16>
    %cst_49 = arith.constant dense<0.000000e+00> : vector<21x256xf32>
    %165 = tpu.matmul %164, %156, %cst_49 {dimension_numbers = #tpu.dot_dimension_numbers<[1], [0], [0], [1], [0, 0, 1, 1], [], []>} : vector<21x16xbf16>, vector<16x256xbf16>, vector<21x256xf32> -> vector<21x256xf32>
    %166 = arith.truncf %165 : vector<21x256xf32> to vector<21x256xbf16>
    %167 = vector.extract_strided_slice %166 {offsets = [0, 0], sizes = [7, 256], strides = [1, 1]} : vector<21x256xbf16> to vector<7x256xbf16>
    %168 = vector.extract_strided_slice %166 {offsets = [7, 0], sizes = [7, 256], strides = [1, 1]} : vector<21x256xbf16> to vector<7x256xbf16>
    %169 = vector.extract_strided_slice %166 {offsets = [14, 0], sizes = [7, 256], strides = [1, 1]} : vector<21x256xbf16> to vector<7x256xbf16>
    %170 = tpu.concatenate %167, %168, %169 in 1 : vector<7x256xbf16>, vector<7x256xbf16>, vector<7x256xbf16> -> vector<7x768xbf16>
    %cst_50 = arith.constant dense<0.000000e+00> : vector<21x256xf32>
    %171 = tpu.matmul %164, %157, %cst_50 {dimension_numbers = #tpu.dot_dimension_numbers<[1], [0], [0], [1], [0, 0, 1, 1], [], []>} : vector<21x16xbf16>, vector<16x256xbf16>, vector<21x256xf32> -> vector<21x256xf32>
    %172 = arith.truncf %171 : vector<21x256xf32> to vector<21x256xbf16>
    %173 = vector.extract_strided_slice %172 {offsets = [0, 0], sizes = [7, 256], strides = [1, 1]} : vector<21x256xbf16> to vector<7x256xbf16>
    %174 = vector.extract_strided_slice %172 {offsets = [7, 0], sizes = [7, 256], strides = [1, 1]} : vector<21x256xbf16> to vector<7x256xbf16>
    %175 = vector.extract_strided_slice %172 {offsets = [14, 0], sizes = [7, 256], strides = [1, 1]} : vector<21x256xbf16> to vector<7x256xbf16>
    %176 = tpu.concatenate %173, %174, %175 in 1 : vector<7x256xbf16>, vector<7x256xbf16>, vector<7x256xbf16> -> vector<7x768xbf16>
    %cst_51 = arith.constant dense<0.000000e+00> : vector<21x256xf32>
    %177 = tpu.matmul %164, %158, %cst_51 {dimension_numbers = #tpu.dot_dimension_numbers<[1], [0], [0], [1], [0, 0, 1, 1], [], []>} : vector<21x16xbf16>, vector<16x256xbf16>, vector<21x256xf32> -> vector<21x256xf32>
    %178 = arith.truncf %177 : vector<21x256xf32> to vector<21x256xbf16>
    %179 = vector.extract_strided_slice %178 {offsets = [0, 0], sizes = [7, 256], strides = [1, 1]} : vector<21x256xbf16> to vector<7x256xbf16>
    %180 = vector.extract_strided_slice %178 {offsets = [7, 0], sizes = [7, 256], strides = [1, 1]} : vector<21x256xbf16> to vector<7x256xbf16>
    %181 = vector.extract_strided_slice %178 {offsets = [14, 0], sizes = [7, 256], strides = [1, 1]} : vector<21x256xbf16> to vector<7x256xbf16>
    %182 = tpu.concatenate %179, %180, %181 in 1 : vector<7x256xbf16>, vector<7x256xbf16>, vector<7x256xbf16> -> vector<7x768xbf16>
    %cst_52 = arith.constant dense<0.000000e+00> : vector<21x256xf32>
    %183 = tpu.matmul %164, %159, %cst_52 {dimension_numbers = #tpu.dot_dimension_numbers<[1], [0], [0], [1], [0, 0, 1, 1], [], []>} : vector<21x16xbf16>, vector<16x256xbf16>, vector<21x256xf32> -> vector<21x256xf32>
    %184 = arith.truncf %183 : vector<21x256xf32> to vector<21x256xbf16>
    %185 = vector.extract_strided_slice %184 {offsets = [0, 0], sizes = [7, 256], strides = [1, 1]} : vector<21x256xbf16> to vector<7x256xbf16>
    %186 = vector.extract_strided_slice %184 {offsets = [7, 0], sizes = [7, 256], strides = [1, 1]} : vector<21x256xbf16> to vector<7x256xbf16>
    %187 = vector.extract_strided_slice %184 {offsets = [14, 0], sizes = [7, 256], strides = [1, 1]} : vector<21x256xbf16> to vector<7x256xbf16>
    %188 = tpu.concatenate %185, %186, %187 in 1 : vector<7x256xbf16>, vector<7x256xbf16>, vector<7x256xbf16> -> vector<7x768xbf16>
    %cst_53 = arith.constant dense<0.000000e+00> : vector<21x256xf32>
    %189 = tpu.matmul %164, %160, %cst_53 {dimension_numbers = #tpu.dot_dimension_numbers<[1], [0], [0], [1], [0, 0, 1, 1], [], []>} : vector<21x16xbf16>, vector<16x256xbf16>, vector<21x256xf32> -> vector<21x256xf32>
    %190 = arith.truncf %189 : vector<21x256xf32> to vector<21x256xbf16>
    %191 = vector.extract_strided_slice %190 {offsets = [0, 0], sizes = [7, 256], strides = [1, 1]} : vector<21x256xbf16> to vector<7x256xbf16>
    %192 = vector.extract_strided_slice %190 {offsets = [7, 0], sizes = [7, 256], strides = [1, 1]} : vector<21x256xbf16> to vector<7x256xbf16>
    %193 = vector.extract_strided_slice %190 {offsets = [14, 0], sizes = [7, 256], strides = [1, 1]} : vector<21x256xbf16> to vector<7x256xbf16>
    %194 = tpu.concatenate %191, %192, %193 in 1 : vector<7x256xbf16>, vector<7x256xbf16>, vector<7x256xbf16> -> vector<7x768xbf16>
    %cst_54 = arith.constant dense<0.000000e+00> : vector<21x256xf32>
    %195 = tpu.matmul %164, %161, %cst_54 {dimension_numbers = #tpu.dot_dimension_numbers<[1], [0], [0], [1], [0, 0, 1, 1], [], []>} : vector<21x16xbf16>, vector<16x256xbf16>, vector<21x256xf32> -> vector<21x256xf32>
    %196 = arith.truncf %195 : vector<21x256xf32> to vector<21x256xbf16>
    %197 = vector.extract_strided_slice %196 {offsets = [0, 0], sizes = [7, 256], strides = [1, 1]} : vector<21x256xbf16> to vector<7x256xbf16>
    %198 = vector.extract_strided_slice %196 {offsets = [7, 0], sizes = [7, 256], strides = [1, 1]} : vector<21x256xbf16> to vector<7x256xbf16>
    %199 = vector.extract_strided_slice %196 {offsets = [14, 0], sizes = [7, 256], strides = [1, 1]} : vector<21x256xbf16> to vector<7x256xbf16>
    %200 = tpu.concatenate %197, %198, %199 in 1 : vector<7x256xbf16>, vector<7x256xbf16>, vector<7x256xbf16> -> vector<7x768xbf16>
    %cst_55 = arith.constant dense<0.000000e+00> : vector<21x256xf32>
    %201 = tpu.matmul %164, %162, %cst_55 {dimension_numbers = #tpu.dot_dimension_numbers<[1], [0], [0], [1], [0, 0, 1, 1], [], []>} : vector<21x16xbf16>, vector<16x256xbf16>, vector<21x256xf32> -> vector<21x256xf32>
    %202 = arith.truncf %201 : vector<21x256xf32> to vector<21x256xbf16>
    %203 = vector.extract_strided_slice %202 {offsets = [0, 0], sizes = [7, 256], strides = [1, 1]} : vector<21x256xbf16> to vector<7x256xbf16>
    %204 = vector.extract_strided_slice %202 {offsets = [7, 0], sizes = [7, 256], strides = [1, 1]} : vector<21x256xbf16> to vector<7x256xbf16>
    %205 = vector.extract_strided_slice %202 {offsets = [14, 0], sizes = [7, 256], strides = [1, 1]} : vector<21x256xbf16> to vector<7x256xbf16>
    %206 = tpu.concatenate %203, %204, %205 in 1 : vector<7x256xbf16>, vector<7x256xbf16>, vector<7x256xbf16> -> vector<7x768xbf16>
    %cst_56 = arith.constant dense<0.000000e+00> : vector<21x256xf32>
    %207 = tpu.matmul %164, %163, %cst_56 {dimension_numbers = #tpu.dot_dimension_numbers<[1], [0], [0], [1], [0, 0, 1, 1], [], []>} : vector<21x16xbf16>, vector<16x256xbf16>, vector<21x256xf32> -> vector<21x256xf32>
    %208 = arith.truncf %207 : vector<21x256xf32> to vector<21x256xbf16>
    %209 = vector.extract_strided_slice %208 {offsets = [0, 0], sizes = [7, 256], strides = [1, 1]} : vector<21x256xbf16> to vector<7x256xbf16>
    %210 = vector.extract_strided_slice %208 {offsets = [7, 0], sizes = [7, 256], strides = [1, 1]} : vector<21x256xbf16> to vector<7x256xbf16>
    %211 = vector.extract_strided_slice %208 {offsets = [14, 0], sizes = [7, 256], strides = [1, 1]} : vector<21x256xbf16> to vector<7x256xbf16>
    %212 = tpu.concatenate %209, %210, %211 in 1 : vector<7x256xbf16>, vector<7x256xbf16>, vector<7x256xbf16> -> vector<7x768xbf16>
    %213 = tpu.concatenate %170, %176, %182, %188, %194, %200, %206, %212 in 0 : vector<7x768xbf16>, vector<7x768xbf16>, vector<7x768xbf16>, vector<7x768xbf16>, vector<7x768xbf16>, vector<7x768xbf16>, vector<7x768xbf16>, vector<7x768xbf16> -> vector<56x768xbf16>
    %c0_57 = arith.constant 0 : index
    %c0_58 = arith.constant 0 : index
    %214 = vector.load %arg9[%c0_57, %c0_58] : memref<768x256xbf16, #tpu.memory_space<vmem>>, vector<768x256xbf16>
    %cst_59 = arith.constant dense<0.000000e+00> : vector<56x256xf32>
    %215 = tpu.matmul %213, %214, %cst_59 {dimension_numbers = #tpu.dot_dimension_numbers<[1], [0], [0], [1], [0, 0, 1, 1], [], []>} : vector<56x768xbf16>, vector<768x256xbf16>, vector<56x256xf32> -> vector<56x256xf32>
    %c0_60 = arith.constant 0 : index
    %c0_61 = arith.constant 0 : index
    %216 = vector.load %arg10[%c0_60, %c0_61] : memref<2x256xf32, #tpu.memory_space<vmem>>, vector<2x256xf32>
    %217 = vector.extract_strided_slice %216 {offsets = [0, 0], sizes = [1, 256], strides = [1, 1]} : vector<2x256xf32> to vector<1x256xf32>
    %218 = vector.broadcast %217 : vector<1x256xf32> to vector<56x256xf32>
    %219 = arith.mulf %215, %218 : vector<56x256xf32>
    %220 = vector.extract_strided_slice %216 {offsets = [1, 0], sizes = [1, 256], strides = [1, 1]} : vector<2x256xf32> to vector<1x256xf32>
    %221 = vector.broadcast %220 : vector<1x256xf32> to vector<56x256xf32>
    %222 = arith.addf %219, %221 : vector<56x256xf32>
    %cst_62 = arith.constant 0.000000e+00 : f32
    %223 = vector.broadcast %cst_62 : f32 to vector<56x256xf32>
    %224 = arith.maximumf %222, %223 : vector<56x256xf32>
    %225 = arith.truncf %224 : vector<56x256xf32> to vector<56x256xbf16>
    %226 = vector.extract_strided_slice %225 {offsets = [0, 0], sizes = [7, 256], strides = [1, 1]} : vector<56x256xbf16> to vector<7x256xbf16>
    %227 = vector.extract_strided_slice %225 {offsets = [7, 0], sizes = [7, 256], strides = [1, 1]} : vector<56x256xbf16> to vector<7x256xbf16>
    %228 = vector.extract_strided_slice %225 {offsets = [14, 0], sizes = [7, 256], strides = [1, 1]} : vector<56x256xbf16> to vector<7x256xbf16>
    %229 = vector.extract_strided_slice %225 {offsets = [21, 0], sizes = [7, 256], strides = [1, 1]} : vector<56x256xbf16> to vector<7x256xbf16>
    %230 = vector.extract_strided_slice %225 {offsets = [28, 0], sizes = [7, 256], strides = [1, 1]} : vector<56x256xbf16> to vector<7x256xbf16>
    %231 = vector.extract_strided_slice %225 {offsets = [35, 0], sizes = [7, 256], strides = [1, 1]} : vector<56x256xbf16> to vector<7x256xbf16>
    %232 = vector.extract_strided_slice %225 {offsets = [42, 0], sizes = [7, 256], strides = [1, 1]} : vector<56x256xbf16> to vector<7x256xbf16>
    %233 = vector.extract_strided_slice %225 {offsets = [49, 0], sizes = [7, 256], strides = [1, 1]} : vector<56x256xbf16> to vector<7x256xbf16>
    %c0_63 = arith.constant 0 : index
    %c0_64 = arith.constant 0 : index
    %234 = vector.load %arg11[%c0_63, %c0_64] : memref<9x7xbf16, #tpu.memory_space<vmem>>, vector<9x7xbf16>
    %cst_65 = arith.constant dense<0.000000e+00> : vector<9x256xf32>
    %235 = tpu.matmul %234, %226, %cst_65 {dimension_numbers = #tpu.dot_dimension_numbers<[1], [0], [0], [1], [0, 0, 1, 1], [], []>} : vector<9x7xbf16>, vector<7x256xbf16>, vector<9x256xf32> -> vector<9x256xf32>
    %236 = arith.truncf %235 : vector<9x256xf32> to vector<9x256xbf16>
    %237 = vector.extract_strided_slice %236 {offsets = [0, 0], sizes = [3, 256], strides = [1, 1]} : vector<9x256xbf16> to vector<3x256xbf16>
    %238 = vector.extract_strided_slice %236 {offsets = [3, 0], sizes = [3, 256], strides = [1, 1]} : vector<9x256xbf16> to vector<3x256xbf16>
    %239 = vector.extract_strided_slice %236 {offsets = [6, 0], sizes = [3, 256], strides = [1, 1]} : vector<9x256xbf16> to vector<3x256xbf16>
    %240 = tpu.concatenate %237, %238, %239 in 1 : vector<3x256xbf16>, vector<3x256xbf16>, vector<3x256xbf16> -> vector<3x768xbf16>
    %cst_66 = arith.constant dense<0.000000e+00> : vector<9x256xf32>
    %241 = tpu.matmul %234, %227, %cst_66 {dimension_numbers = #tpu.dot_dimension_numbers<[1], [0], [0], [1], [0, 0, 1, 1], [], []>} : vector<9x7xbf16>, vector<7x256xbf16>, vector<9x256xf32> -> vector<9x256xf32>
    %242 = arith.truncf %241 : vector<9x256xf32> to vector<9x256xbf16>
    %243 = vector.extract_strided_slice %242 {offsets = [0, 0], sizes = [3, 256], strides = [1, 1]} : vector<9x256xbf16> to vector<3x256xbf16>
    %244 = vector.extract_strided_slice %242 {offsets = [3, 0], sizes = [3, 256], strides = [1, 1]} : vector<9x256xbf16> to vector<3x256xbf16>
    %245 = vector.extract_strided_slice %242 {offsets = [6, 0], sizes = [3, 256], strides = [1, 1]} : vector<9x256xbf16> to vector<3x256xbf16>
    %246 = tpu.concatenate %243, %244, %245 in 1 : vector<3x256xbf16>, vector<3x256xbf16>, vector<3x256xbf16> -> vector<3x768xbf16>
    %cst_67 = arith.constant dense<0.000000e+00> : vector<9x256xf32>
    %247 = tpu.matmul %234, %228, %cst_67 {dimension_numbers = #tpu.dot_dimension_numbers<[1], [0], [0], [1], [0, 0, 1, 1], [], []>} : vector<9x7xbf16>, vector<7x256xbf16>, vector<9x256xf32> -> vector<9x256xf32>
    %248 = arith.truncf %247 : vector<9x256xf32> to vector<9x256xbf16>
    %249 = vector.extract_strided_slice %248 {offsets = [0, 0], sizes = [3, 256], strides = [1, 1]} : vector<9x256xbf16> to vector<3x256xbf16>
    %250 = vector.extract_strided_slice %248 {offsets = [3, 0], sizes = [3, 256], strides = [1, 1]} : vector<9x256xbf16> to vector<3x256xbf16>
    %251 = vector.extract_strided_slice %248 {offsets = [6, 0], sizes = [3, 256], strides = [1, 1]} : vector<9x256xbf16> to vector<3x256xbf16>
    %252 = tpu.concatenate %249, %250, %251 in 1 : vector<3x256xbf16>, vector<3x256xbf16>, vector<3x256xbf16> -> vector<3x768xbf16>
    %cst_68 = arith.constant dense<0.000000e+00> : vector<9x256xf32>
    %253 = tpu.matmul %234, %229, %cst_68 {dimension_numbers = #tpu.dot_dimension_numbers<[1], [0], [0], [1], [0, 0, 1, 1], [], []>} : vector<9x7xbf16>, vector<7x256xbf16>, vector<9x256xf32> -> vector<9x256xf32>
    %254 = arith.truncf %253 : vector<9x256xf32> to vector<9x256xbf16>
    %255 = vector.extract_strided_slice %254 {offsets = [0, 0], sizes = [3, 256], strides = [1, 1]} : vector<9x256xbf16> to vector<3x256xbf16>
    %256 = vector.extract_strided_slice %254 {offsets = [3, 0], sizes = [3, 256], strides = [1, 1]} : vector<9x256xbf16> to vector<3x256xbf16>
    %257 = vector.extract_strided_slice %254 {offsets = [6, 0], sizes = [3, 256], strides = [1, 1]} : vector<9x256xbf16> to vector<3x256xbf16>
    %258 = tpu.concatenate %255, %256, %257 in 1 : vector<3x256xbf16>, vector<3x256xbf16>, vector<3x256xbf16> -> vector<3x768xbf16>
    %cst_69 = arith.constant dense<0.000000e+00> : vector<9x256xf32>
    %259 = tpu.matmul %234, %230, %cst_69 {dimension_numbers = #tpu.dot_dimension_numbers<[1], [0], [0], [1], [0, 0, 1, 1], [], []>} : vector<9x7xbf16>, vector<7x256xbf16>, vector<9x256xf32> -> vector<9x256xf32>
    %260 = arith.truncf %259 : vector<9x256xf32> to vector<9x256xbf16>
    %261 = vector.extract_strided_slice %260 {offsets = [0, 0], sizes = [3, 256], strides = [1, 1]} : vector<9x256xbf16> to vector<3x256xbf16>
    %262 = vector.extract_strided_slice %260 {offsets = [3, 0], sizes = [3, 256], strides = [1, 1]} : vector<9x256xbf16> to vector<3x256xbf16>
    %263 = vector.extract_strided_slice %260 {offsets = [6, 0], sizes = [3, 256], strides = [1, 1]} : vector<9x256xbf16> to vector<3x256xbf16>
    %264 = tpu.concatenate %261, %262, %263 in 1 : vector<3x256xbf16>, vector<3x256xbf16>, vector<3x256xbf16> -> vector<3x768xbf16>
    %cst_70 = arith.constant dense<0.000000e+00> : vector<9x256xf32>
    %265 = tpu.matmul %234, %231, %cst_70 {dimension_numbers = #tpu.dot_dimension_numbers<[1], [0], [0], [1], [0, 0, 1, 1], [], []>} : vector<9x7xbf16>, vector<7x256xbf16>, vector<9x256xf32> -> vector<9x256xf32>
    %266 = arith.truncf %265 : vector<9x256xf32> to vector<9x256xbf16>
    %267 = vector.extract_strided_slice %266 {offsets = [0, 0], sizes = [3, 256], strides = [1, 1]} : vector<9x256xbf16> to vector<3x256xbf16>
    %268 = vector.extract_strided_slice %266 {offsets = [3, 0], sizes = [3, 256], strides = [1, 1]} : vector<9x256xbf16> to vector<3x256xbf16>
    %269 = vector.extract_strided_slice %266 {offsets = [6, 0], sizes = [3, 256], strides = [1, 1]} : vector<9x256xbf16> to vector<3x256xbf16>
    %270 = tpu.concatenate %267, %268, %269 in 1 : vector<3x256xbf16>, vector<3x256xbf16>, vector<3x256xbf16> -> vector<3x768xbf16>
    %cst_71 = arith.constant dense<0.000000e+00> : vector<9x256xf32>
    %271 = tpu.matmul %234, %232, %cst_71 {dimension_numbers = #tpu.dot_dimension_numbers<[1], [0], [0], [1], [0, 0, 1, 1], [], []>} : vector<9x7xbf16>, vector<7x256xbf16>, vector<9x256xf32> -> vector<9x256xf32>
    %272 = arith.truncf %271 : vector<9x256xf32> to vector<9x256xbf16>
    %273 = vector.extract_strided_slice %272 {offsets = [0, 0], sizes = [3, 256], strides = [1, 1]} : vector<9x256xbf16> to vector<3x256xbf16>
    %274 = vector.extract_strided_slice %272 {offsets = [3, 0], sizes = [3, 256], strides = [1, 1]} : vector<9x256xbf16> to vector<3x256xbf16>
    %275 = vector.extract_strided_slice %272 {offsets = [6, 0], sizes = [3, 256], strides = [1, 1]} : vector<9x256xbf16> to vector<3x256xbf16>
    %276 = tpu.concatenate %273, %274, %275 in 1 : vector<3x256xbf16>, vector<3x256xbf16>, vector<3x256xbf16> -> vector<3x768xbf16>
    %cst_72 = arith.constant dense<0.000000e+00> : vector<9x256xf32>
    %277 = tpu.matmul %234, %233, %cst_72 {dimension_numbers = #tpu.dot_dimension_numbers<[1], [0], [0], [1], [0, 0, 1, 1], [], []>} : vector<9x7xbf16>, vector<7x256xbf16>, vector<9x256xf32> -> vector<9x256xf32>
    %278 = arith.truncf %277 : vector<9x256xf32> to vector<9x256xbf16>
    %279 = vector.extract_strided_slice %278 {offsets = [0, 0], sizes = [3, 256], strides = [1, 1]} : vector<9x256xbf16> to vector<3x256xbf16>
    %280 = vector.extract_strided_slice %278 {offsets = [3, 0], sizes = [3, 256], strides = [1, 1]} : vector<9x256xbf16> to vector<3x256xbf16>
    %281 = vector.extract_strided_slice %278 {offsets = [6, 0], sizes = [3, 256], strides = [1, 1]} : vector<9x256xbf16> to vector<3x256xbf16>
    %282 = tpu.concatenate %279, %280, %281 in 1 : vector<3x256xbf16>, vector<3x256xbf16>, vector<3x256xbf16> -> vector<3x768xbf16>
    %283 = tpu.concatenate %240, %246, %252, %258, %264, %270, %276, %282 in 0 : vector<3x768xbf16>, vector<3x768xbf16>, vector<3x768xbf16>, vector<3x768xbf16>, vector<3x768xbf16>, vector<3x768xbf16>, vector<3x768xbf16>, vector<3x768xbf16> -> vector<24x768xbf16>
    %c0_73 = arith.constant 0 : index
    %c0_74 = arith.constant 0 : index
    %284 = vector.load %arg12[%c0_73, %c0_74] : memref<768x256xbf16, #tpu.memory_space<vmem>>, vector<768x256xbf16>
    %cst_75 = arith.constant dense<0.000000e+00> : vector<24x256xf32>
    %285 = tpu.matmul %283, %284, %cst_75 {dimension_numbers = #tpu.dot_dimension_numbers<[1], [0], [0], [1], [0, 0, 1, 1], [], []>} : vector<24x768xbf16>, vector<768x256xbf16>, vector<24x256xf32> -> vector<24x256xf32>
    %c0_76 = arith.constant 0 : index
    %c0_77 = arith.constant 0 : index
    %286 = vector.load %arg13[%c0_76, %c0_77] : memref<2x256xf32, #tpu.memory_space<vmem>>, vector<2x256xf32>
    %287 = vector.extract_strided_slice %286 {offsets = [0, 0], sizes = [1, 256], strides = [1, 1]} : vector<2x256xf32> to vector<1x256xf32>
    %288 = vector.broadcast %287 : vector<1x256xf32> to vector<24x256xf32>
    %289 = arith.mulf %285, %288 : vector<24x256xf32>
    %290 = vector.extract_strided_slice %286 {offsets = [1, 0], sizes = [1, 256], strides = [1, 1]} : vector<2x256xf32> to vector<1x256xf32>
    %291 = vector.broadcast %290 : vector<1x256xf32> to vector<24x256xf32>
    %292 = arith.addf %289, %291 : vector<24x256xf32>
    %cst_78 = arith.constant 0.000000e+00 : f32
    %293 = vector.broadcast %cst_78 : f32 to vector<24x256xf32>
    %294 = arith.maximumf %292, %293 : vector<24x256xf32>
    %295 = arith.truncf %294 : vector<24x256xf32> to vector<24x256xbf16>
    %296 = vector.extract_strided_slice %295 {offsets = [0, 0], sizes = [1, 256], strides = [1, 1]} : vector<24x256xbf16> to vector<1x256xbf16>
    %297 = vector.extract_strided_slice %295 {offsets = [1, 0], sizes = [1, 256], strides = [1, 1]} : vector<24x256xbf16> to vector<1x256xbf16>
    %298 = vector.extract_strided_slice %295 {offsets = [2, 0], sizes = [1, 256], strides = [1, 1]} : vector<24x256xbf16> to vector<1x256xbf16>
    %299 = tpu.concatenate %296, %297, %298 in 1 : vector<1x256xbf16>, vector<1x256xbf16>, vector<1x256xbf16> -> vector<1x768xbf16>
    %300 = vector.extract_strided_slice %295 {offsets = [3, 0], sizes = [1, 256], strides = [1, 1]} : vector<24x256xbf16> to vector<1x256xbf16>
    %301 = vector.extract_strided_slice %295 {offsets = [4, 0], sizes = [1, 256], strides = [1, 1]} : vector<24x256xbf16> to vector<1x256xbf16>
    %302 = vector.extract_strided_slice %295 {offsets = [5, 0], sizes = [1, 256], strides = [1, 1]} : vector<24x256xbf16> to vector<1x256xbf16>
    %303 = tpu.concatenate %300, %301, %302 in 1 : vector<1x256xbf16>, vector<1x256xbf16>, vector<1x256xbf16> -> vector<1x768xbf16>
    %304 = vector.extract_strided_slice %295 {offsets = [6, 0], sizes = [1, 256], strides = [1, 1]} : vector<24x256xbf16> to vector<1x256xbf16>
    %305 = vector.extract_strided_slice %295 {offsets = [7, 0], sizes = [1, 256], strides = [1, 1]} : vector<24x256xbf16> to vector<1x256xbf16>
    %306 = vector.extract_strided_slice %295 {offsets = [8, 0], sizes = [1, 256], strides = [1, 1]} : vector<24x256xbf16> to vector<1x256xbf16>
    %307 = tpu.concatenate %304, %305, %306 in 1 : vector<1x256xbf16>, vector<1x256xbf16>, vector<1x256xbf16> -> vector<1x768xbf16>
    %308 = vector.extract_strided_slice %295 {offsets = [9, 0], sizes = [1, 256], strides = [1, 1]} : vector<24x256xbf16> to vector<1x256xbf16>
    %309 = vector.extract_strided_slice %295 {offsets = [10, 0], sizes = [1, 256], strides = [1, 1]} : vector<24x256xbf16> to vector<1x256xbf16>
    %310 = vector.extract_strided_slice %295 {offsets = [11, 0], sizes = [1, 256], strides = [1, 1]} : vector<24x256xbf16> to vector<1x256xbf16>
    %311 = tpu.concatenate %308, %309, %310 in 1 : vector<1x256xbf16>, vector<1x256xbf16>, vector<1x256xbf16> -> vector<1x768xbf16>
    %312 = vector.extract_strided_slice %295 {offsets = [12, 0], sizes = [1, 256], strides = [1, 1]} : vector<24x256xbf16> to vector<1x256xbf16>
    %313 = vector.extract_strided_slice %295 {offsets = [13, 0], sizes = [1, 256], strides = [1, 1]} : vector<24x256xbf16> to vector<1x256xbf16>
    %314 = vector.extract_strided_slice %295 {offsets = [14, 0], sizes = [1, 256], strides = [1, 1]} : vector<24x256xbf16> to vector<1x256xbf16>
    %315 = tpu.concatenate %312, %313, %314 in 1 : vector<1x256xbf16>, vector<1x256xbf16>, vector<1x256xbf16> -> vector<1x768xbf16>
    %316 = vector.extract_strided_slice %295 {offsets = [15, 0], sizes = [1, 256], strides = [1, 1]} : vector<24x256xbf16> to vector<1x256xbf16>
    %317 = vector.extract_strided_slice %295 {offsets = [16, 0], sizes = [1, 256], strides = [1, 1]} : vector<24x256xbf16> to vector<1x256xbf16>
    %318 = vector.extract_strided_slice %295 {offsets = [17, 0], sizes = [1, 256], strides = [1, 1]} : vector<24x256xbf16> to vector<1x256xbf16>
    %319 = tpu.concatenate %316, %317, %318 in 1 : vector<1x256xbf16>, vector<1x256xbf16>, vector<1x256xbf16> -> vector<1x768xbf16>
    %320 = vector.extract_strided_slice %295 {offsets = [18, 0], sizes = [1, 256], strides = [1, 1]} : vector<24x256xbf16> to vector<1x256xbf16>
    %321 = vector.extract_strided_slice %295 {offsets = [19, 0], sizes = [1, 256], strides = [1, 1]} : vector<24x256xbf16> to vector<1x256xbf16>
    %322 = vector.extract_strided_slice %295 {offsets = [20, 0], sizes = [1, 256], strides = [1, 1]} : vector<24x256xbf16> to vector<1x256xbf16>
    %323 = tpu.concatenate %320, %321, %322 in 1 : vector<1x256xbf16>, vector<1x256xbf16>, vector<1x256xbf16> -> vector<1x768xbf16>
    %324 = vector.extract_strided_slice %295 {offsets = [21, 0], sizes = [1, 256], strides = [1, 1]} : vector<24x256xbf16> to vector<1x256xbf16>
    %325 = vector.extract_strided_slice %295 {offsets = [22, 0], sizes = [1, 256], strides = [1, 1]} : vector<24x256xbf16> to vector<1x256xbf16>
    %326 = vector.extract_strided_slice %295 {offsets = [23, 0], sizes = [1, 256], strides = [1, 1]} : vector<24x256xbf16> to vector<1x256xbf16>
    %327 = tpu.concatenate %324, %325, %326 in 1 : vector<1x256xbf16>, vector<1x256xbf16>, vector<1x256xbf16> -> vector<1x768xbf16>
    %328 = tpu.concatenate %299, %303, %307, %311, %315, %319, %323, %327 in 0 : vector<1x768xbf16>, vector<1x768xbf16>, vector<1x768xbf16>, vector<1x768xbf16>, vector<1x768xbf16>, vector<1x768xbf16>, vector<1x768xbf16>, vector<1x768xbf16> -> vector<8x768xbf16>
    %c0_79 = arith.constant 0 : index
    %c0_80 = arith.constant 0 : index
    %329 = vector.load %arg14[%c0_79, %c0_80] : memref<768x128xbf16, #tpu.memory_space<vmem>>, vector<768x128xbf16>
    %cst_81 = arith.constant dense<0.000000e+00> : vector<8x128xf32>
    %330 = tpu.matmul %328, %329, %cst_81 {dimension_numbers = #tpu.dot_dimension_numbers<[1], [0], [0], [1], [0, 0, 1, 1], [], []>} : vector<8x768xbf16>, vector<768x128xbf16>, vector<8x128xf32> -> vector<8x128xf32>
    %c0_82 = arith.constant 0 : index
    %c0_83 = arith.constant 0 : index
    %331 = vector.load %arg15[%c0_82, %c0_83] : memref<1x128xf32, #tpu.memory_space<vmem>>, vector<1x128xf32>
    %332 = vector.broadcast %331 : vector<1x128xf32> to vector<8x128xf32>
    %333 = arith.addf %330, %332 : vector<8x128xf32>
    %cst_84 = arith.constant 0.000000e+00 : f32
    %334 = vector.broadcast %cst_84 : f32 to vector<8x128xf32>
    %335 = arith.maximumf %333, %334 : vector<8x128xf32>
    %336 = arith.truncf %335 : vector<8x128xf32> to vector<8x128xbf16>
    %c0_85 = arith.constant 0 : index
    %c0_86 = arith.constant 0 : index
    %337 = vector.load %arg16[%c0_85, %c0_86] : memref<128x16xbf16, #tpu.memory_space<vmem>>, vector<128x16xbf16>
    %cst_87 = arith.constant dense<0.000000e+00> : vector<8x16xf32>
    %338 = tpu.matmul %336, %337, %cst_87 {dimension_numbers = #tpu.dot_dimension_numbers<[1], [0], [0], [1], [0, 0, 1, 1], [], []>} : vector<8x128xbf16>, vector<128x16xbf16>, vector<8x16xf32> -> vector<8x16xf32>
    %c0_88 = arith.constant 0 : index
    %c0_89 = arith.constant 0 : index
    %339 = vector.load %arg17[%c0_88, %c0_89] : memref<1x16xf32, #tpu.memory_space<vmem>>, vector<1x16xf32>
    %340 = vector.broadcast %339 : vector<1x16xf32> to vector<8x16xf32>
    %341 = arith.addf %338, %340 : vector<8x16xf32>
    %c0_90 = arith.constant 0 : index
    %c0_91 = arith.constant 0 : index
    %342 = vector.load %arg18[%c0_90, %c0_91] : memref<8x16xf32, #tpu.memory_space<vmem>>, vector<8x16xf32>
    tpu.vector_store %arg18[%c0_90, %c0_91], %341 {strides = array<i32>} : memref<8x16xf32, #tpu.memory_space<vmem>>, vector<8x16xf32>,
    return
  }
  func.func @transform_0(%arg0: i32) -> (i32, i32, i32) {
    %c0_i32 = arith.constant 0 : i32
    %c0_i32_0 = arith.constant 0 : i32
    %c0_i32_1 = arith.constant 0 : i32
    return %arg0, %c0_i32, %c0_i32_0 : i32, i32, i32
  }
  func.func @transform_1(%arg0: i32) -> (i32, i32) {
    %c0_i32 = arith.constant 0 : i32
    %c0_i32_0 = arith.constant 0 : i32
    %c0_i32_1 = arith.constant 0 : i32
    return %c0_i32, %c0_i32_0 : i32, i32
  }
  func.func @transform_2(%arg0: i32) -> (i32, i32) {
    %c0_i32 = arith.constant 0 : i32
    %c0_i32_0 = arith.constant 0 : i32
    %c0_i32_1 = arith.constant 0 : i32
    return %c0_i32, %c0_i32_0 : i32, i32
  }
  func.func @transform_3(%arg0: i32) -> (i32, i32) {
    %c0_i32 = arith.constant 0 : i32
    %c0_i32_0 = arith.constant 0 : i32
    %c0_i32_1 = arith.constant 0 : i32
    return %c0_i32, %c0_i32_0 : i32, i32
  }
  func.func @transform_4(%arg0: i32) -> (i32, i32) {
    %c0_i32 = arith.constant 0 : i32
    %c0_i32_0 = arith.constant 0 : i32
    %c0_i32_1 = arith.constant 0 : i32
    return %c0_i32, %c0_i32_0 : i32, i32
  }
  func.func @transform_5(%arg0: i32) -> (i32, i32) {
    %c0_i32 = arith.constant 0 : i32
    %c0_i32_0 = arith.constant 0 : i32
    %c0_i32_1 = arith.constant 0 : i32
    return %c0_i32, %c0_i32_0 : i32, i32
  }
  func.func @transform_6(%arg0: i32) -> (i32, i32) {
    %c0_i32 = arith.constant 0 : i32
    %c0_i32_0 = arith.constant 0 : i32
    %c0_i32_1 = arith.constant 0 : i32
    return %c0_i32, %c0_i32_0 : i32, i32
  }
  func.func @transform_7(%arg0: i32) -> (i32, i32) {
    %c0_i32 = arith.constant 0 : i32
    %c0_i32_0 = arith.constant 0 : i32
    %c0_i32_1 = arith.constant 0 : i32
    return %c0_i32, %c0_i32_0 : i32, i32
  }
  func.func @transform_8(%arg0: i32) -> (i32, i32) {
    %c0_i32 = arith.constant 0 : i32
    %c0_i32_0 = arith.constant 0 : i32
    %c0_i32_1 = arith.constant 0 : i32
    return %c0_i32, %c0_i32_0 : i32, i32
  }
  func.func @transform_9(%arg0: i32) -> (i32, i32) {
    %c0_i32 = arith.constant 0 : i32
    %c0_i32_0 = arith.constant 0 : i32
    %c0_i32_1 = arith.constant 0 : i32
    return %c0_i32, %c0_i32_0 : i32, i32
  }
  func.func @transform_10(%arg0: i32) -> (i32, i32) {
    %c0_i32 = arith.constant 0 : i32
    %c0_i32_0 = arith.constant 0 : i32
    %c0_i32_1 = arith.constant 0 : i32
    return %c0_i32, %c0_i32_0 : i32, i32
  }
  func.func @transform_11(%arg0: i32) -> (i32, i32) {
    %c0_i32 = arith.constant 0 : i32
    %c0_i32_0 = arith.constant 0 : i32
    %c0_i32_1 = arith.constant 0 : i32
    return %c0_i32, %c0_i32_0 : i32, i32
  }
  func.func @transform_12(%arg0: i32) -> (i32, i32) {
    %c0_i32 = arith.constant 0 : i32
    %c0_i32_0 = arith.constant 0 : i32
    %c0_i32_1 = arith.constant 0 : i32
    return %c0_i32, %c0_i32_0 : i32, i32
  }
  func.func @transform_13(%arg0: i32) -> (i32, i32) {
    %c0_i32 = arith.constant 0 : i32
    %c0_i32_0 = arith.constant 0 : i32
    %c0_i32_1 = arith.constant 0 : i32
    return %c0_i32, %c0_i32_0 : i32, i32
  }
  func.func @transform_14(%arg0: i32) -> (i32, i32) {
    %c0_i32 = arith.constant 0 : i32
    %c0_i32_0 = arith.constant 0 : i32
    %c0_i32_1 = arith.constant 0 : i32
    return %c0_i32, %c0_i32_0 : i32, i32
  }
  func.func @transform_15(%arg0: i32) -> (i32, i32) {
    %c0_i32 = arith.constant 0 : i32
    %c0_i32_0 = arith.constant 0 : i32
    %c0_i32_1 = arith.constant 0 : i32
    return %c0_i32, %c0_i32_0 : i32, i32
  }
  func.func @transform_16(%arg0: i32) -> (i32, i32) {
    %c0_i32 = arith.constant 0 : i32
    %c0_i32_0 = arith.constant 0 : i32
    %c0_i32_1 = arith.constant 0 : i32
    return %c0_i32, %c0_i32_0 : i32, i32
  }
  func.func @transform_17(%arg0: i32) -> (i32, i32) {
    %c0_i32 = arith.constant 0 : i32
    %c0_i32_0 = arith.constant 0 : i32
    return %arg0, %c0_i32 : i32, i32
  }
}

</mosaic_0001>

<bundles_post_ra>
// kernel: encoder_forward.1
= control target key start
LH: loop header
LB: loop body
LE: loop exit
PB: predicated region body
PF: predicated region fallthrough
CT: control target
= control target key end

     0   :  { %s14863_s0 = inlined_call_operand.hbm [shape: f32[16,64,64], index: 0, kind: input, shape index: {}]   ;;  %s14864_s1 = inlined_call_operand.vmem [shape: bf16[96,64], index: 1, kind: input, shape index: {}]   ;;  %s14865_s2 = inlined_call_operand.hbm [shape: bf16[192,256], index: 2, kind: input, shape index: {}]   ;;  %s14866_s3 = inlined_call_operand.vmem [shape: f32[2,256], index: 3, kind: input, shape index: {}]   ;;  %s14867_s4 = inlined_call_operand.vmem [shape: bf16[48,32], index: 4, kind: input, shape index: {}]   ;;  %s14868_s5 = inlined_call_operand.hbm [shape: bf16[768,256], index: 5, kind: input, shape index: {}]   ;;  %s14869_s6 = inlined_call_operand.vmem [shape: f32[2,256], index: 6, kind: input, shape index: {}]   ;;  %s14870_s7 = inlined_call_operand.vmem [shape: bf16[21,16], index: 7, kind: input, shape index: {}]   ;;  %s14871_s8 = inlined_call_operand.hbm [shape: bf16[768,256], index: 8, kind: input, shape index: {}]   ;;  %s14872_s9 = inlined_call_operand.vmem [shape: f32[2,256], index: 9, kind: input, shape index: {}]   ;;  %s14873_s10 = inlined_call_operand.vmem [shape: bf16[9,7], index: 10, kind: input, shape index: {}]   ;;  %s14874_s11 = inlined_call_operand.hbm [shape: bf16[768,256], index: 11, kind: input, shape index: {}]   ;;  %s14875_s12 = inlined_call_operand.vmem [shape: f32[2,256], index: 12, kind: input, shape index: {}]   ;;  %s14876_s13 = inlined_call_operand.hbm [shape: bf16[768,128], index: 13, kind: input, shape index: {}]   ;;  %s14877_s14 = inlined_call_operand.vmem [shape: f32[1,128], index: 14, kind: input, shape index: {}]   ;;  %s14878_s15 = inlined_call_operand.vmem [shape: bf16[128,16], index: 15, kind: input, shape index: {}]   ;;  %s14879_s16 = inlined_call_operand.vmem [shape: f32[1,16], index: 16, kind: input, shape index: {}]   ;;  %s14880_s17 = inlined_call_operand.hbm [shape: f32[16,16], index: 17, kind: output, shape index: {}]  }
   0x1   :  { %14926 = sst [smem:[#allocation42_spill]] %s14863_s0 }
   0x2   :  { %14927 = sst [smem:[#allocation43_spill]] %s14864_s1 }
   0x3   :  { %14928 = sst [smem:[#allocation44_spill]] %s14865_s2 }
   0x4   :  { %14929 = sst [smem:[#allocation45_spill]] %s14866_s3 }
   0x5   :  { %14930 = sst [smem:[#allocation46_spill]] %s14868_s5 }
   0x6   :  { %14931 = sst [smem:[#allocation47_spill]] %s14871_s8 }
   0x7   :  { %14932 = sst [smem:[#allocation48_spill]] %s14874_s11 }
   0x8   :  { %14933 = sst [smem:[#allocation49_spill]] %s14876_s13 }
   0x9   :  { %14934 = sst [smem:[#allocation50_spill]] %s14877_s14 }
   0xa   :  { %14935 = sst [smem:[#allocation51_spill]] %s14879_s16 }
   0xb   :  { %14936 = sst [smem:[#allocation52_spill]] %s14880_s17 }
   0xc   :  { %22 = vsyncpa [#allocation3], 0 }
   0xd   :  { %24 = vsyncpa [#allocation3 + $0x1], 0 }
   0xe   :  { %25 = vsyncpa [#allocation6], 0 }
   0xf   :  { %26 = vsyncpa [#allocation9], 0 }
  0x10   :  { %27 = vsyncpa [#allocation12], 0 }
  0x11   :  { %28 = vsyncpa [#allocation4], 0 }
  0x12   :  { %30 = vsyncpa [#allocation4 + $0x1], 0  ;;  %s11814_s24 = smov 0   ;;  %s11816_s25 = smov 0  }
  0x13   :  { %s11818_s26 = smov 0   ;;  %s11820_s27 = smov 0  }
  0x14 LB: > { %14937 = sst [smem:[#allocation19_spill]] %s11707_s26  ;;  %s11838_s30 = sadd.s32 4294967295, %s11711_s27   ;;  %s11711_s27 = sphi %s11820_s27, %s15086_s27   ;;  %s11707_s26 = sphi %s11818_s26, %s15083_s26   ;;  %s11703_s25 = sphi %s11816_s25, %s15085_s25   ;;  %s11699_s24 = sphi %s11814_s24, %s15084_s24  }
  0x15   : > { %s14938_s2 = sld [smem:[#allocation44_spill]]  ;;  %p9173_p0 = scmp.ge.s32.totalorder %s11711_s27, 1 }
  0x16   : > { %p57_p1 = scmp.eq.s32.totalorder %s11838_s30, 0  ;;  %p429_p2 = scmp.lt.s32.totalorder %s11711_s27, 3 }
  0x17   : > { %s11713_s19 = smov [#allocation5]   ;;  %s14940_s8 = sld [smem:[#allocation47_spill]] }
  0x18   : > { %p11843_p3 = pnand %p9173_p0, %p429_p2  ;;  %s445_s1 = sshll.u32 %s11713_s19, 4  ;;  %s446_s1 = int_to_ptr.vmem [resolvable:$true] %s445_s1 }
  0x19   : > { %s14942_s5 = sld [smem:[#allocation46_spill]]  ;;  %s14884_s17 = smov 128  }
  0x1a   : > { %p11369_p4 = pneg %p11843_p3  ;;  %s14885_s14 = smov 8  }
  0x1b   : > { %s443_s0 = sshll.u32 %s14938_s2, 4  ;;  %s11714_s2 = smov [#allocation8]   ;;  %s444_s0 = int_to_ptr.hbm [resolvable:$true] %s443_s0 }
  0x1c   : > { %p11855_p6 = pnand %p11369_p4, %p57_p1  ;;  %s485_s16 = sshll.u32 %s11714_s2, 4  ;;  %s486_s16 = int_to_ptr.vmem [resolvable:$true] %s485_s16 }
  0x1d   : > { %s483_s22 = sshll.u32 %s14940_s8, 4  ;;  %s14943_s11 = sld [smem:[#allocation48_spill]]  ;;  %s484_s22 = int_to_ptr.hbm [resolvable:$true] %s483_s22 }
  0x1e   : > { %11372 = dma.hbm_to_vmem [thread:$0]  (!%p11855_p6), %s444_s0, 3072, %s446_s1, [#allocation6], %s14884_s17, %s14884_s17, %s14885_s14  }
  0x1f   : > { %s463_s19 = sshll.u32 %s14942_s5, 4  ;;  %s11717_s2 = smov [#allocation7]   ;;  %s464_s19 = int_to_ptr.hbm [resolvable:$true] %s463_s19 }
  0x20   : > { %11378 = dma.hbm_to_vmem [thread:$0]  (!%p11855_p6), %s484_s22, 12288, %s486_s16, [#allocation9], %s14884_s17, %s14884_s17, %s14885_s14  }
  0x21   : > { %s465_s29 = sshll.u32 %s11717_s2, 4  ;;  %s11718_s0 = smov [#allocation10]   ;;  %s466_s29 = int_to_ptr.vmem [resolvable:$true] %s465_s29 }
  0x22   : > { %11375 = dma.hbm_to_vmem [thread:$0]  (!%p11855_p6), %s464_s19, 12288, %s466_s29, [#allocation6], %s14884_s17, %s14884_s17, %s14885_s14  }
  0x23   : > { %s503_s28 = sshll.u32 %s14943_s11, 4  ;;  %s505_s16 = sshll.u32 %s11718_s0, 4  ;;  %s504_s28 = int_to_ptr.hbm [resolvable:$true] %s503_s28  ;;  %s506_s16 = int_to_ptr.vmem [resolvable:$true] %s505_s16 }
  0x24   : > { %s14944_s13 = sld [smem:[#allocation49_spill]]  ;;  %s11719_s19 = smov [#allocation11]  }
  0x25   : > { %11381 = dma.hbm_to_vmem [thread:$0]  (!%p11855_p6), %s504_s28, 12288, %s506_s16, [#allocation9], %s14884_s17, %s14884_s17, %s14885_s14  }
  0x26   : > { %s522_s21 = sshll.u32 %s11719_s19, 4  ;;  %s11720_s2 = smov 64   ;;  %s523_s21 = int_to_ptr.vmem [resolvable:$true] %s522_s21 }
  0x27   : > { %s11721_s29 = smov 4   ;;  %s9172_s0 = sadd.s32 4294967294, %s11711_s27  }
  0x28   : > { %s11892_s1 = sadd.s32 1, %s11711_s27   ;;  %s43_s22 = sadd.s32 1, %s11707_s26 }
  0x29   : > { %s40_s5 = ssub.s32 %s11711_s27, %s11892_s1  ;;  %p50_p7 = scmp.ne.s32.totalorder %s11707_s26, %s11703_s25 }
  0x2a   : > { %s520_s20 = sshll.u32 %s14944_s13, 4  ;;  %p41_p8 = scmp.eq.s32.totalorder %s40_s5, 0  ;;  %s521_s20 = int_to_ptr.hbm [resolvable:$true] %s520_s20 }
  0x2b   : > { %11384 = dma.hbm_to_vmem [thread:$0]  (!%p11855_p6), %s521_s20, 6144, %s523_s21, [#allocation12], %s11720_s2, %s11720_s2, %s11721_s29  }
  0x2c   : > { %p51_p9 = scmp.eq.s32.totalorder %s11711_s27, 0  ;;  %p56_p10 = scmp.ne.s32.totalorder %s11703_s25, %s11699_s24 }
  0x2d   : > { %p416_p11 = scmp.eq.s32.totalorder %s11838_s30, 1  ;;  %p422_p0 = scmp.eq.s32.totalorder %s9172_s0, 1 }
  0x2e   : > { %s11904_s28 = scalar_select %p41_p8, %s11707_s26, %s43_s22  }
  0x2f   : > { %p11908_p12 = por %p57_p1, %p56_p10  ;;  %p11912_p13 = por %p416_p11, %p50_p7 }
  0x30   : > { %14945 = sst [smem:[#allocation20_spill]] %s11904_s28  ;;  %p52_p2 = por %p51_p9, %p50_p7 }
  0x31   : > { %s545_s20 = sand.u32 1, %s11707_s26   ;;  %p11917_p4 = por %p422_p0, %p56_p10 }
  0x32   : > { %p11398_p6 = scmp.lt.s32.totalorder %s11711_s27, 2  ;;  %s9180_s5 = sshll.u32 %s545_s20, 9 }
  0x33   : > { %s10963_s21 = sshll.u32 %s11711_s27, 9  ;;  %s14949_s22 = sld [smem:[#allocation42_spill]] }
  0x34   : > { %s549_s8 = scalar_lea.vmem [#allocation2], %s9180_s5  ;;  %p11926_p8 = pnand %p11398_p6, %p52_p2 }
  0x35   : > { %s558_s11 = sshll.u32 %s549_s8, 4  ;;  %s546_s13 = scalar_lea.sflag [#allocation3], %s545_s20  ;;  %s559_s11 = int_to_ptr.vmem [resolvable:$true] %s558_s11 }
  0x36   : > { %p11607_p9 = pneg %p11926_p8 }
  0x39   : > { %s555_s17 = scalar_lea.hbm %s14949_s22, %s10963_s21  ;;  %s11610_s8 = scalar_lea.hbm %s14949_s22, 1024 }
  0x3a   : > { %s556_s14 = sshll.u32 %s555_s17, 4  ;;  %s557_s14 = int_to_ptr.hbm [resolvable:$true] %s556_s14 }
  0x3b   : > { %s11603_s28 = sshra.s32 %s557_s14, 4  ;;  %s11604_s28 = int_to_ptr.hbm [resolvable:$true] %s11603_s28 }
  0x3c   : > { %s11605_s26 = scalar_lea.hbm %s11604_s28, 512  ;;  %p11611_p0 = scmp.lt.s32.totalorder %s11604_s28, %s14949_s22 }
  0x3d   : > { %p11606_p7 = scmp.ne.s32.totalorder %s11604_s28, %s11605_s26  ;;  %p11612_p2 = scmp.lt.s32.totalorder %s11610_s8, %s11605_s26 }
  0x3f   : > { %p11608_p10 = pnand %p11607_p9, %p11606_p7  ;;  %p11613_p6 = por %p11612_p2, %p11611_p0 }
  0x41   : > { %p11609_p11 = pneg %p11608_p10 }
  0x43   : > { %p11614_p5 = pnand %p11613_p6, %p11609_p11 }
  0x45   : > { %11617 = shalt.err (!%p11614_p5)
}
  0x46   : > { %s14951_s20 = smov 8   ;;  %s14952_s29 = smov 128  }
  0x47   : > { %11388 = dma.hbm_to_vmem [thread:$0]  (!%p11926_p8), %s557_s14, 8192, %s559_s11, %s546_s13, %s14952_s29, %s14952_s29, %s14951_s20  }
  0x48   : > { %570 = sbr.rel (%p11843_p3) target bundleno = 2505 (0x9c9), region = 88 }
  0x4d   : > { %s11946_s21 = sand.u32 1, %s11703_s25  }
  0x4e   : > { %s9185_s28 = sshll.u32 %s11946_s21, 9  ;;  %s573_s26 = scalar_lea.sflag [#allocation3], %s11946_s21 }
  0x4f   : > { %s11950_s17 = scalar_lea.vmem [#allocation2], %s9185_s28 }
  0x50   : > { %11678 = dma.done.wait (%p11908_p12), %s573_s26, 8192  }
  0x51   : > { %11680 = vsyncadd (%p11908_p12), %s573_s26, 4294959104 }
  0x52   : > { %11682 = dma.done.wait (%p57_p1), [#allocation6], 15360  }
  0x53   : > { %11684 = vsyncadd (%p57_p1), [#allocation6], 4294951936 }
  0x54   : > { %11686 = dma.done.wait (%p57_p1), [#allocation9], 24576  }
  0x55   : > { %11688 = vsyncadd (%p57_p1), [#allocation9], 4294942720 }
  0x56   : > { %11690 = dma.done.wait (%p57_p1), [#allocation12], 6144  }
  0x57   : > { %11692 = vsyncadd (%p57_p1), [#allocation12], 4294961152  ;;  %v661_v0 = vld [vmem:[%s11950_s17 + $0x30] sm:$0xff]  ;;  %v662_v1 = vld [vmem:[%s11950_s17 + $0x38] sm:$0xff]  ;;  %s14953_s14 = sld [smem:[#allocation43_spill]]  ;;  %vm800_vm0 = vcmask 523264  }
  0x58   : > { %v9198_v2 = vld [vmem:[%s11950_s17 + $0x70] sm:$0xff]  ;;  %v666_v3 = vpack.c.bf16 %v662_v1, %v661_v0  ;;  %v9199_v4 = vld [vmem:[%s11950_s17 + $0x78] sm:$0xff]  ;;  %v659_v11 = vld [vmem:[%s11950_s17 + $0x20] sm:$0xff]  ;;  %s14956_s3 = sld [smem:[#allocation45_spill]]  ;;  %vm2390_vm1 = vcmask 261120   ;;  %vm4523_vm2 = vcmask 130048  }
  0x59   : > { %v9206_v5 = vld [vmem:[%s11950_s17 + $0xb0] sm:$0xff]  ;;  %v9207_v6 = vld [vmem:[%s11950_s17 + $0xb8] sm:$0xff]  ;;  %v679_v7 = vpack.c.bf16 %v9199_v4, %v9198_v2  ;;  %v660_v13 = vld [vmem:[%s11950_s17 + $0x28] sm:$0xff]  ;;  %vm5428_vm3 = vcmask 1043456   ;;  %vm5429_vm4 = vsmask.f32 3328 }
  0x5a   : > { %v692_v8 = vpack.c.bf16 %v9207_v6, %v9206_v5  ;;  %v9214_v9 = vld [vmem:[%s11950_s17 + $0xf0] sm:$0xff]  ;;  %v9215_v10 = vld [vmem:[%s11950_s17 + $0xf8] sm:$0xff]  ;;  %823 = vmatpush.bf16.msra.mxu0 %v666_v3  ;;  %v9196_v14 = vld [vmem:[%s11950_s17 + $0x60] sm:$0xff]  ;;  %v665_v16 = vpack.c.bf16 %v660_v13, %v659_v11  ;;  %vm5437_vm5 = vcmask 1046528   ;;  %vm5462_vm7 = vcmask 1042432   ;;  %s15078_s2 = sld [smem:[#allocation50_spill]] }
  0x5b   : > { %v705_v12 = vpack.c.bf16 %v9215_v10, %v9214_v9  ;;  %v9197_v15 = vld [vmem:[%s11950_s17 + $0x68] sm:$0xff]  ;;  %916 = vmatpush.bf16.msra.mxu1 %v679_v7  ;;  %v9204_v18 = vld [vmem:[%s11950_s17 + $0xa0] sm:$0xff]  ;;  %v657_v23 = vld [vmem:[%s11950_s17 + $0x10] sm:$0xff]  ;;  %vm5463_vm8 = vsmask.f32 2304  ;;  %vm5471_vm10 = vcmask 1045504  }
  0x5c   : > { %1009 = vmatpush.bf16.msra.mxu2 %v692_v8  ;;  %v678_v17 = vpack.c.bf16 %v9197_v15, %v9196_v14  ;;  %v9205_v19 = vld [vmem:[%s11950_s17 + $0xa8] sm:$0xff]  ;;  %v9212_v20 = vld [vmem:[%s11950_s17 + $0xe0] sm:$0xff]  ;;  %v658_v24 = vld [vmem:[%s11950_s17 + $0x18] sm:$0xff]  ;;  %vm5496_vm11 = vcmask 1041408   ;;  %vm5497_vm12 = vsmask.f32 1280 }
  0x5d   : > { %1102 = vmatpush.bf16.msra.mxu3 %v705_v12  ;;  %v691_v21 = vpack.c.bf16 %v9205_v19, %v9204_v18  ;;  %v9213_v22 = vld [vmem:[%s11950_s17 + $0xe8] sm:$0xff]  ;;  %v9194_v26 = vld [vmem:[%s11950_s17 + $0x50] sm:$0xff]  ;;  %v9195_v27 = vld [vmem:[%s11950_s17 + $0x58] sm:$0xff]  ;;  %v664_v29 = vpack.c.bf16 %v658_v24, %v657_v23  ;;  %vm5505_vm14 = vcmask 1044480   ;;  %vm5530_vm15 = vcmask 1040384   ;;  %s10959_s20 = sshll.u32 %s11838_s30, 3 }
  0x5e   : > { %v704_v25 = vpack.c.bf16 %v9213_v22, %v9212_v20  ;;  %v9202_v28 = vld [vmem:[%s11950_s17 + $0x90] sm:$0xff]  ;;  %824 = vmatpush.bf16.msra.mxu0 %v665_v16  ;;  %v9203_v30 = vld [vmem:[%s11950_s17 + $0x98] sm:$0xff]  ;;  %v677_v33 = vpack.c.bf16 %v9195_v27, %v9194_v26  ;;  %v655_v35 = vld [vmem:[%s11950_s17] sm:$0xff]  ;;  %s9191_s29 = sshll.u32 %s11946_s21, 3  ;;  %s15080_s23 = sld [smem:[#allocation51_spill]] }
  0x5f   : > { %v9210_v31 = vld [vmem:[%s11950_s17 + $0xd0] sm:$0xff]  ;;  %v9211_v32 = vld [vmem:[%s11950_s17 + $0xd8] sm:$0xff]  ;;  %917 = vmatpush.bf16.msra.mxu1 %v678_v17  ;;  %v690_v34 = vpack.c.bf16 %v9203_v30, %v9202_v28  ;;  %v656_v36 = vld [vmem:[%s11950_s17 + $0x8] sm:$0xff]  ;;  %s652_s0 = scalar_lea.vmem [#allocation13], %s9191_s29  ;;  %s9039_s30 = scalar_lea.sflag [#allocation4], %s11946_s21 }
  0x60   : > { %1010 = vmatpush.bf16.msra.mxu2 %v691_v21  ;;  %v9192_v37 = vld [vmem:[%s11950_s17 + $0x40] sm:$0xff]  ;;  %v703_v38 = vpack.c.bf16 %v9211_v32, %v9210_v31  ;;  %v9193_v39 = vld [vmem:[%s11950_s17 + $0x48] sm:$0xff]  ;;  %v663_v44 = vpack.c.bf16 %v656_v36, %v655_v35  ;;  %v12029_v50 = vld [vmem:[%s14953_s14 + $0x10] sm:$0xff]  ;;  %s9051_s8 = sshll.u32 %s652_s0, 4  ;;  %s9052_s8 = int_to_ptr.vmem [resolvable:$true] %s9051_s8 }
  0x61   : > { %1103 = vmatpush.bf16.msra.mxu3 %v704_v25  ;;  %v9200_v40 = vld [vmem:[%s11950_s17 + $0x80] sm:$0xff]  ;;  %v9201_v41 = vld [vmem:[%s11950_s17 + $0x88] sm:$0xff]  ;;  %v676_v45 = vpack.c.bf16 %v9193_v39, %v9192_v37  ;;  %v12042_v51 = vld [vmem:[%s14953_s14 + $0x18] sm:$0xff] }
  0x62   : > { %v9208_v42 = vld [vmem:[%s11950_s17 + $0xc0] sm:$0xff]  ;;  %v9209_v43 = vld [vmem:[%s11950_s17 + $0xc8] sm:$0xff]  ;;  %825 = vmatpush.bf16.msra.mxu0 %v664_v29  ;;  %v689_v46 = vpack.c.bf16 %v9201_v41, %v9200_v40  ;;  %v9222_v52 = vld [vmem:[%s11950_s17 + $0x130] sm:$0xff] }
  0x63   : > { %918 = vmatpush.bf16.msra.mxu1 %v677_v33  ;;  %v702_v47 = vpack.c.bf16 %v9209_v43, %v9208_v42  ;;  %v12003_v48 = vld [vmem:[%s14953_s14] sm:$0xff]  ;;  %v12016_v49 = vld [vmem:[%s14953_s14 + $0x8] sm:$0xff]  ;;  %v9223_v53 = vld [vmem:[%s11950_s17 + $0x138] sm:$0xff] }
  0x64   : > { %1011 = vmatpush.bf16.msra.mxu2 %v690_v34  ;;  %v9230_v54 = vld [vmem:[%s11950_s17 + $0x170] sm:$0xff]  ;;  %v718_v55 = vpack.c.bf16 %v9223_v53, %v9222_v52  ;;  %v9231_v56 = vld [vmem:[%s11950_s17 + $0x178] sm:$0xff]  ;;  %v9220_v61 = vld [vmem:[%s11950_s17 + $0x120] sm:$0xff] }
  0x65   : > { %1104 = vmatpush.bf16.msra.mxu3 %v703_v38  ;;  %v9238_v57 = vld [vmem:[%s11950_s17 + $0x1b0] sm:$0xff]  ;;  %v9239_v58 = vld [vmem:[%s11950_s17 + $0x1b8] sm:$0xff]  ;;  %v731_v59 = vpack.c.bf16 %v9231_v56, %v9230_v54  ;;  %v9221_v62 = vld [vmem:[%s11950_s17 + $0x128] sm:$0xff] }
  0x66   : > { %826 = vmatpush.bf16.msra.mxu0 %v663_v44  ;;  %v744_v60 = vpack.c.bf16 %v9239_v58, %v9238_v57  ;;  %v9228_v63 = vld [vmem:[%s11950_s17 + $0x160] sm:$0xff]  ;;  %v717_v0 = vpack.c.bf16 %v9221_v62, %v9220_v61  ;;  %v9229_v1 = vld [vmem:[%s11950_s17 + $0x168] sm:$0xff]  ;;  %v9218_v6 = vld [vmem:[%s11950_s17 + $0x110] sm:$0xff] }
  0x67   : > { %919 = vmatpush.bf16.msra.mxu1 %v676_v45  ;;  %v9236_v2 = vld [vmem:[%s11950_s17 + $0x1a0] sm:$0xff]  ;;  %v9237_v3 = vld [vmem:[%s11950_s17 + $0x1a8] sm:$0xff]  ;;  %v730_v4 = vpack.c.bf16 %v9229_v1, %v9228_v63  ;;  %v9219_v7 = vld [vmem:[%s11950_s17 + $0x118] sm:$0xff] }
  0x68   : > { %1012 = vmatpush.bf16.msra.mxu2 %v689_v46  ;;  %v743_v5 = vpack.c.bf16 %v9237_v3, %v9236_v2  ;;  %v9226_v8 = vld [vmem:[%s11950_s17 + $0x150] sm:$0xff]  ;;  %v9227_v9 = vld [vmem:[%s11950_s17 + $0x158] sm:$0xff]  ;;  %v716_v14 = vpack.c.bf16 %v9219_v7, %v9218_v6  ;;  %v9216_v16 = vld [vmem:[%s11950_s17 + $0x100] sm:$0xff] }
  0x69   : > { %1105 = vmatpush.bf16.msra.mxu3 %v702_v47  ;;  %9272 = vmatmul.msk.bf16.vlgmr.msra.gmra.mxu0 %vm800_vm0, %v12003_v48  ;;  %v9234_v10 = vld [vmem:[%s11950_s17 + $0x190] sm:$0xff]  ;;  %v9235_v11 = vld [vmem:[%s11950_s17 + $0x198] sm:$0xff]  ;;  %v9217_v17 = vld [vmem:[%s11950_s17 + $0x108] sm:$0xff]  ;;  %v729_v18 = vpack.c.bf16 %v9227_v9, %v9226_v8 }
  0x6a   : > { %9278 = vmatmul.msk.bf16.vlgmr.msra.gmra.mxu1 %vm800_vm0, %v12003_v48  ;;  %1195 = vmatpush.bf16.msrb.mxu0 %v718_v55  ;;  %v9246_v12 = vld [vmem:[%s11950_s17 + $0x1f0] sm:$0xff]  ;;  %v9247_v13 = vld [vmem:[%s11950_s17 + $0x1f8] sm:$0xff]  ;;  %v742_v19 = vpack.c.bf16 %v9235_v11, %v9234_v10  ;;  %v9224_v20 = vld [vmem:[%s11950_s17 + $0x140] sm:$0xff]  ;;  %v715_v27 = vpack.c.bf16 %v9217_v17, %v9216_v16 }
  0x6b   : > { %9284 = vmatmul.msk.bf16.vlgmr.msra.gmra.mxu2 %vm800_vm0, %v12003_v48  ;;  %1288 = vmatpush.bf16.msrb.mxu1 %v731_v59  ;;  %v757_v15 = vpack.c.bf16 %v9247_v13, %v9246_v12  ;;  %v9225_v21 = vld [vmem:[%s11950_s17 + $0x148] sm:$0xff]  ;;  %v9244_v22 = vld [vmem:[%s11950_s17 + $0x1e0] sm:$0xff]  ;;  %v9242_v31 = vld [vmem:[%s11950_s17 + $0x1d0] sm:$0xff] }
  0x6c   : > { %9290 = vmatmul.msk.bf16.vlgmr.msra.gmra.mxu3 %vm800_vm0, %v12003_v48  ;;  %1381 = vmatpush.bf16.msrb.mxu2 %v744_v60  ;;  %v9232_v23 = vld [vmem:[%s11950_s17 + $0x180] sm:$0xff]  ;;  %v9233_v24 = vld [vmem:[%s11950_s17 + $0x188] sm:$0xff]  ;;  %v728_v28 = vpack.c.bf16 %v9225_v21, %v9224_v20  ;;  %v9243_v32 = vld [vmem:[%s11950_s17 + $0x1d8] sm:$0xff] }
  0x6d   : > { %1474 = vmatpush.bf16.msrb.mxu3 %v757_v15  ;;  %v9245_v25 = vld [vmem:[%s11950_s17 + $0x1e8] sm:$0xff]  ;;  %v741_v29 = vpack.c.bf16 %v9233_v24, %v9232_v23  ;;  %v12083_v30 = vld [vmem:[%s14953_s14 + $0x20] sm:$0xff]  ;;  %v755_v34 = vpack.c.bf16 %v9243_v32, %v9242_v31  ;;  %v9410_v59 = vld [vmem:[#allocation5 + $0xb0] sm:$0xf] }
  0x6e   : > { %1196 = vmatpush.bf16.msrb.mxu0 %v717_v0  ;;  %v756_v26 = vpack.c.bf16 %v9245_v25, %v9244_v22  ;;  %v9240_v33 = vld [vmem:[%s11950_s17 + $0x1c0] sm:$0xff]  ;;  %v9241_v35 = vld [vmem:[%s11950_s17 + $0x1c8] sm:$0xff]  ;;  %v10993_v60 = vld [vmem:[#allocation5 + $0xb4] sm:$0xf0]  ;;  %s11722_s17 = smov 64  }
  0x6f   : > { %1289 = vmatpush.bf16.msrb.mxu1 %v730_v4  ;;  %v754_v36 = vpack.c.bf16 %v9241_v35, %v9240_v33  ;;  %v12100_v37 = vld [vmem:[%s14953_s14 + $0x28] sm:$0xff]  ;;  %v10992_v61 = vld [vmem:[#allocation5 + $0xb4] sm:$0xf]  ;;  %v9411_v63 = vor.u32 %v10993_v60, %v9410_v59  ;;  %v9412_v0 = vld [vmem:[#allocation5 + $0xb8] sm:$0xf0] }
  0x70   : > { %1382 = vmatpush.bf16.msrb.mxu2 %v743_v5  ;;  %v9415_v3 = vor.u32 %v10992_v61, %v9412_v0  ;;  %v9402_v6 = vld [vmem:[#allocation5 + $0xa0] sm:$0xf]  ;;  %v10991_v7 = vld [vmem:[#allocation5 + $0xa4] sm:$0xf0]  ;;  %v10990_v8 = vld [vmem:[#allocation5 + $0xa4] sm:$0xf] }
  0x71   : > { %1475 = vmatpush.bf16.msrb.mxu3 %v756_v26  ;;  %v9403_v10 = vor.u32 %v10991_v7, %v9402_v6  ;;  %v9404_v11 = vld [vmem:[#allocation5 + $0xa8] sm:$0xf0]  ;;  %v9394_v15 = vld [vmem:[#allocation5 + $0x90] sm:$0xf]  ;;  %v10989_v16 = vld [vmem:[#allocation5 + $0x94] sm:$0xf0] }
  0x72   : > { %1197 = vmatpush.bf16.msrb.mxu0 %v716_v14  ;;  %v9407_v12 = vor.u32 %v10990_v8, %v9404_v11  ;;  %v10988_v17 = vld [vmem:[#allocation5 + $0x94] sm:$0xf]  ;;  %v9395_v20 = vor.u32 %v10989_v16, %v9394_v15  ;;  %v9396_v21 = vld [vmem:[#allocation5 + $0x98] sm:$0xf0]  ;;  %v10986_v31 = vld [vmem:[#allocation5 + $0x84] sm:$0xf] }
  0x73   : > { %1290 = vmatpush.bf16.msrb.mxu1 %v729_v18  ;;  %v9399_v24 = vor.u32 %v10988_v17, %v9396_v21  ;;  %v9388_v35 = vld [vmem:[#allocation5 + $0x88] sm:$0xf0]  ;;  %vm13575_vm6 = vmand %vm5428_vm3, %vm5429_vm4  ;;  %vm7371_vm4 = vsmask.f32 4352 }
  0x74   : > { %1383 = vmatpush.bf16.msrb.mxu2 %v742_v19  ;;  %vm13644_vm9 = vmand %vm5462_vm7, %vm5463_vm8  ;;  %vm7403_vm8 = vcmask 1047552  }
  0x75   : > { %1476 = vmatpush.bf16.msrb.mxu3 %v755_v34  ;;  %vm13712_vm13 = vmand %vm5496_vm11, %vm5497_vm12  ;;  %vm7404_vm12 = vsmask.f32 7424 }
  0x76   : > { %1198 = vmatpush.bf16.msrb.mxu0 %v715_v27 }
  0x77   : > { %1291 = vmatpush.bf16.msrb.mxu1 %v728_v28 }
  0x78   : > { %1384 = vmatpush.bf16.msrb.mxu2 %v741_v29  ;;  %v9386_v29 = vld [vmem:[#allocation5 + $0x80] sm:$0xf] }
  0x79   : > { %9273 = vmatmul.msk.bf16.gmra.mxu0 %vm800_vm0, %v12016_v49  ;;  %1477 = vmatpush.bf16.msrb.mxu3 %v754_v36 }
  0x7a   : > { %9279 = vmatmul.msk.bf16.gmra.mxu1 %vm800_vm0, %v12016_v49 }
  0x7b   : > { %9285 = vmatmul.msk.bf16.gmra.mxu2 %vm800_vm0, %v12016_v49  ;;  %1848 = vmatpush.bf16.msra.mxu1 %v9411_v63 }
  0x7c   : > { %9291 = vmatmul.msk.bf16.gmra.mxu3 %vm800_vm0, %v12016_v49 }
  0x7d   : > { %2026 = vmatpush.bf16.msra.mxu3 %v9415_v3 }
  0x7f   : > { %1849 = vmatpush.bf16.msra.mxu1 %v9403_v10 }
  0x81   : > { %2027 = vmatpush.bf16.msra.mxu3 %v9407_v12 }
  0x83   : > { %1850 = vmatpush.bf16.msra.mxu1 %v9395_v20 }
  0x85   : > { %2028 = vmatpush.bf16.msra.mxu3 %v9399_v24 }
  0x89   : > { %9274 = vmatmul.msk.bf16.gmra.mxu0 %vm800_vm0, %v12029_v50 }
  0x8a   : > { %9280 = vmatmul.msk.bf16.gmra.mxu1 %vm800_vm0, %v12029_v50 }
  0x8b   : > { %9286 = vmatmul.msk.bf16.gmra.mxu2 %vm800_vm0, %v12029_v50 }
  0x8c   : > { %9292 = vmatmul.msk.bf16.gmra.mxu3 %vm800_vm0, %v12029_v50 }
  0x99   : > { %9275 = vmatmul.msk.bf16.gmra.mxu0 %vm800_vm0, %v12042_v51 }
  0x9a   : > { %9281 = vmatmul.msk.bf16.gmra.mxu1 %vm800_vm0, %v12042_v51 }
  0x9b   : > { %9287 = vmatmul.msk.bf16.gmra.mxu2 %vm800_vm0, %v12042_v51 }
  0x9c   : > { %9293 = vmatmul.msk.bf16.gmra.mxu3 %vm800_vm0, %v12042_v51 }
  0xa9   : > { %9276 = vmatmul.msk.bf16.gmra.mxu0 %vm800_vm0, %v12083_v30 }
  0xaa   : > { %9282 = vmatmul.msk.bf16.gmra.mxu1 %vm800_vm0, %v12083_v30 }
  0xab   : > { %9288 = vmatmul.msk.bf16.gmra.mxu2 %vm800_vm0, %v12083_v30 }
  0xac   : > { %9294 = vmatmul.msk.bf16.gmra.mxu3 %vm800_vm0, %v12083_v30 }
  0xb9   : > { %9277 = vmatmul.msk.bf16.gmra.mxu0 %vm800_vm0, %v12100_v37 }
  0xba   : > { %9283 = vmatmul.msk.bf16.gmra.mxu1 %vm800_vm0, %v12100_v37 }
  0xbb   : > { %9289 = vmatmul.msk.bf16.gmra.mxu2 %vm800_vm0, %v12100_v37 }
  0xbc   : > { %9295 = vmatmul.msk.bf16.gmra.mxu3 %vm800_vm0, %v12100_v37 }
  0xc9   : > { %9296 = vmatmul.msk.bf16.vlgmr.msrb.gmra.mxu0 %vm800_vm0, %v12003_v48 }
  0xca   : > { %9302 = vmatmul.msk.bf16.vlgmr.msrb.gmra.mxu1 %vm800_vm0, %v12003_v48 }
  0xcb   : > { %9308 = vmatmul.msk.bf16.vlgmr.msrb.gmra.mxu2 %vm800_vm0, %v12003_v48 }
  0xcc   : > { %9314 = vmatmul.msk.bf16.vlgmr.msrb.gmra.mxu3 %vm800_vm0, %v12003_v48 }
  0xd9   : > { %9297 = vmatmul.msk.bf16.gmra.mxu0 %vm800_vm0, %v12016_v49 }
  0xda   : > { %9303 = vmatmul.msk.bf16.gmra.mxu1 %vm800_vm0, %v12016_v49 }
  0xdb   : > { %9309 = vmatmul.msk.bf16.gmra.mxu2 %vm800_vm0, %v12016_v49 }
  0xdc   : > { %9315 = vmatmul.msk.bf16.gmra.mxu3 %vm800_vm0, %v12016_v49 }
  0xe6   : > { %v12126_v38 = vpop.f32.mrf.mxu0 }
  0xe7   : > { %v12128_v39 = vpop.f32.mrf.mxu1 }
  0xe9   : > { %9298 = vmatmul.msk.bf16.gmra.mxu0 %vm800_vm0, %v12029_v50 }
  0xea   : > { %9304 = vmatmul.msk.bf16.gmra.mxu1 %vm800_vm0, %v12029_v50 }
  0xeb   : > { %9310 = vmatmul.msk.bf16.gmra.mxu2 %vm800_vm0, %v12029_v50 }
  0xec   : > { %9316 = vmatmul.msk.bf16.gmra.mxu3 %vm800_vm0, %v12029_v50 }
  0xee   : > { %v12138_v40 = vpop.f32.mrf.mxu2  ;;  %v12140_v41 = vpop.f32.mrf.mxu0 }
  0xef   : > { %v1107_v42 = vpop.f32.mrf.mxu3  ;;  %v12142_v43 = vpop.f32.mrf.mxu1 }
  0xf0   : > { %v1137_v44 = vpack.c.bf16 %v1107_v42, %v1107_v42 }
  0xf2   : > { %v12148_v48 = vunpack.c.l.b16 %v1137_v44  ;;  %v9391_v44 = vor.u32 %v10986_v31, %v9388_v35 }
  0xf4   : > { %2029 = vmatpush.bf16.msra.mxu3 %v9391_v44 }
  0xf6   : > { %v12144_v45 = vpop.f32.mrf.mxu2  ;;  %v12146_v46 = vpop.f32.mrf.mxu0 }
  0xf7   : > { %v1109_v47 = vpop.f32.mrf.mxu3  ;;  %v12150_v49 = vpop.f32.mrf.mxu1 }
  0xf8   : > { %v1138_v52 = vpack.c.bf16 %v1109_v47, %v1109_v47 }
  0xf9   : > { %9299 = vmatmul.msk.bf16.gmra.mxu0 %vm800_vm0, %v12042_v51 }
  0xfa   : > { %v12152_v53 = vunpack.c.l.b16 %v1138_v52  ;;  %9305 = vmatmul.msk.bf16.gmra.mxu1 %vm800_vm0, %v12042_v51 }
  0xfb   : > { %9311 = vmatmul.msk.bf16.gmra.mxu2 %vm800_vm0, %v12042_v51 }
  0xfc   : > { %9317 = vmatmul.msk.bf16.gmra.mxu3 %vm800_vm0, %v12042_v51 }
  0xfe   : > { %v12164_v54 = vpop.f32.mrf.mxu2  ;;  %v12166_v55 = vpop.f32.mrf.mxu0 }
  0xff   : > { %v1112_v56 = vpop.f32.mrf.mxu3  ;;  %v12168_v57 = vpop.f32.mrf.mxu1 }
 0x100   : > { %v1139_v58 = vpack.c.bf16 %v1112_v56, %v1112_v56 }
 0x102   : > { %v12172_v4 = vunpack.c.l.b16 %v1139_v58 }
 0x106   : > { %v12170_v62 = vpop.f32.mrf.mxu2  ;;  %v838_v1 = vpop.f32.mrf.mxu0 }
 0x107   : > { %v1114_v2 = vpop.f32.mrf.mxu3  ;;  %v931_v51 = vpop.f32.mrf.mxu1  ;;  %v862_v18 = vpack.c.bf16 %v838_v1, %v838_v1 }
 0x108   : > { %v1140_v5 = vpack.c.bf16 %v1114_v2, %v1114_v2  ;;  %v955_v14 = vpack.c.bf16 %v931_v51, %v931_v51 }
 0x109   : > { %9300 = vmatmul.msk.bf16.gmra.mxu0 %vm800_vm0, %v12083_v30  ;;  %v884_v32 = vunpack.c.l.b16 %v862_v18 }
 0x10a   : > { %v12174_v9 = vunpack.c.l.b16 %v1140_v5  ;;  %9306 = vmatmul.msk.bf16.gmra.mxu1 %vm800_vm0, %v12083_v30  ;;  %v977_v27 = vunpack.c.l.b16 %v955_v14 }
 0x10b   : > { %9312 = vmatmul.msk.bf16.gmra.mxu2 %vm800_vm0, %v12083_v30 }
 0x10c   : > { %9318 = vmatmul.msk.bf16.gmra.mxu3 %vm800_vm0, %v12083_v30  ;;  %v10987_v30 = vld [vmem:[#allocation5 + $0x84] sm:$0xf0] }
 0x10d   : > { %v9387_v34 = vor.u32 %v10987_v30, %v9386_v29 }
 0x10e   : > { %v1024_v19 = vpop.f32.mrf.mxu2  ;;  %v840_v22 = vpop.f32.mrf.mxu0 }
 0x10f   : > { %v1117_v23 = vpop.f32.mrf.mxu3  ;;  %v863_v25 = vpack.c.bf16 %v840_v22, %v840_v22  ;;  %v933_v26 = vpop.f32.mrf.mxu1  ;;  %v1048_v36 = vpack.c.bf16 %v1024_v19, %v1024_v19  ;;  %1851 = vmatpush.bf16.msra.mxu1 %v9387_v34 }
 0x110   : > { %v956_v28 = vpack.c.bf16 %v933_v26, %v933_v26  ;;  %v1141_v12 = vpack.c.bf16 %v1117_v23, %v1117_v23 }
 0x111   : > { %v885_v33 = vunpack.c.l.b16 %v863_v25  ;;  %v1070_v58 = vunpack.c.l.b16 %v1048_v36 }
 0x112   : > { %v978_v42 = vunpack.c.l.b16 %v956_v28  ;;  %v1163_v21 = vunpack.c.l.b16 %v1141_v12 }
 0x113   : > { %v888_v47 = vpack.c.b16 %v885_v33, %v884_v32 }
 0x114   : > { %v981_v52 = vpack.c.b16 %v978_v42, %v977_v27 }
 0x115   : > { %890 = vrot.lane.b32.xlu0 %v888_v47, %s11722_s17 }
 0x116   : > { %v1026_v56 = vpop.f32.mrf.mxu2  ;;  %983 = vrot.lane.b32.xlu1 %v981_v52, %s11722_s17  ;;  %v843_v60 = vpop.f32.mrf.mxu0 }
 0x117   : > { %v1049_v59 = vpack.c.bf16 %v1026_v56, %v1026_v56  ;;  %v1119_v61 = vpop.f32.mrf.mxu3  ;;  %v936_v63 = vpop.f32.mrf.mxu1  ;;  %v864_v3 = vpack.c.bf16 %v843_v60, %v843_v60 }
 0x118   : > { %v957_v2 = vpack.c.bf16 %v936_v63, %v936_v63  ;;  %v1142_v15 = vpack.c.bf16 %v1119_v61, %v1119_v61 }
 0x119   : > { %v1071_v0 = vunpack.c.l.b16 %v1049_v59  ;;  %9301 = vmatmul.msk.bf16.gmra.mxu0 %vm800_vm0, %v12100_v37  ;;  %v886_v14 = vunpack.c.l.b16 %v864_v3 }
 0x11a   : > { %9307 = vmatmul.msk.bf16.gmra.mxu1 %vm800_vm0, %v12100_v37  ;;  %v979_v10 = vunpack.c.l.b16 %v957_v2  ;;  %v1164_v22 = vunpack.c.l.b16 %v1142_v15 }
 0x11b   : > { %v1074_v1 = vpack.c.b16 %v1071_v0, %v1070_v58  ;;  %9313 = vmatmul.msk.bf16.gmra.mxu2 %vm800_vm0, %v12100_v37 }
 0x11c   : > { %9319 = vmatmul.msk.bf16.gmra.mxu3 %vm800_vm0, %v12100_v37  ;;  %v1167_v33 = vpack.c.b16 %v1164_v22, %v1163_v21 }
 0x11d   : > { %1076 = vrot.lane.b32.xlu2 %v1074_v1, %s11722_s17 }
 0x11e   : > { %v1029_v51 = vpop.f32.mrf.mxu2  ;;  %v845_v5 = vpop.f32.mrf.mxu0 }
 0x11f   : > { %v1122_v6 = vpop.f32.mrf.mxu3  ;;  %v865_v7 = vpack.c.bf16 %v845_v5, %v845_v5  ;;  %v938_v8 = vpop.f32.mrf.mxu1  ;;  %v1050_v17 = vpack.c.bf16 %v1029_v51, %v1029_v51 }
 0x120   : > { %v958_v11 = vpack.c.bf16 %v938_v8, %v938_v8  ;;  %v1143_v19 = vpack.c.bf16 %v1122_v6, %v1122_v6 }
 0x121   : > { %v887_v16 = vunpack.c.l.b16 %v865_v7  ;;  %v1072_v25 = vunpack.c.l.b16 %v1050_v17 }
 0x122   : > { %v980_v18 = vunpack.c.l.b16 %v958_v11  ;;  %v1165_v23 = vunpack.c.l.b16 %v1143_v19 }
 0x123   : > { %v889_v20 = vpack.c.b16 %v887_v16, %v886_v14 }
 0x124   : > { %v982_v37 = vpack.c.b16 %v980_v18, %v979_v10 }
 0x125   : > { %892 = vrot.lane.b32.xlu0 %v889_v20, %s11722_s17 }
 0x126   : > { %v1031_v24 = vpop.f32.mrf.mxu2  ;;  %985 = vrot.lane.b32.xlu1 %v982_v37, %s11722_s17  ;;  %v848_v27 = vpop.f32.mrf.mxu0 }
 0x127   : > { %v1051_v26 = vpack.c.bf16 %v1031_v24, %v1031_v24  ;;  %v1124_v28 = vpop.f32.mrf.mxu3  ;;  %v12199_v29 = vpop.f32.mrf.mxu1  ;;  %v866_v35 = vpack.c.bf16 %v848_v27, %v848_v27  ;;  %v10984_v27 = vld [vmem:[#allocation5 + $0x74] sm:$0xf] }
 0x128   : > { %v1144_v30 = vpack.c.bf16 %v1124_v28, %v1124_v28  ;;  %v959_v28 = vpack.c.bf16 %v12199_v29, %v12199_v29 }
 0x129   : > { %v1073_v31 = vunpack.c.l.b16 %v1051_v26  ;;  %v898_v52 = vunpack.c.l.b16 %v866_v35  ;;  %v10985_v26 = vld [vmem:[#allocation5 + $0x74] sm:$0xf0]  ;;  %v9370_v35 = vld [vmem:[#allocation5 + $0x60] sm:$0xf] }
 0x12a   : > { %v1166_v32 = vunpack.c.l.b16 %v1144_v30 }
 0x12b   : > { %v1075_v34 = vpack.c.b16 %v1073_v31, %v1072_v25  ;;  %v9378_v25 = vld [vmem:[#allocation5 + $0x70] sm:$0xf] }
 0x12c   : > { %v1168_v36 = vpack.c.b16 %v1166_v32, %v1165_v23  ;;  %v9379_v31 = vor.u32 %v10985_v26, %v9378_v25  ;;  %v9380_v32 = vld [vmem:[#allocation5 + $0x78] sm:$0xf0] }
 0x12d   : > { %1078 = vrot.lane.b32.xlu2 %v1075_v34, %s11722_s17  ;;  %1169 = vrot.lane.b32.xlu0 %v1167_v33, %s11722_s17  ;;  %v9383_v33 = vor.u32 %v10984_v27, %v9380_v32  ;;  %v10976_v32 = vld [vmem:[#allocation5 + $0x34] sm:$0xf] }
 0x12e   : > { %v12202_v42 = vpop.f32.mrf.mxu2  ;;  %1171 = vrot.lane.b32.xlu1 %v1168_v36, %s11722_s17  ;;  %v850_v44 = vpop.f32.mrf.mxu0  ;;  %1755 = vmatpush.bf16.msra.mxu0 %v9379_v31  ;;  %v10983_v36 = vld [vmem:[#allocation5 + $0x64] sm:$0xf0]  ;;  %v10977_v31 = vld [vmem:[#allocation5 + $0x34] sm:$0xf0] }
 0x12f   : > { %v1127_v47 = vpop.f32.mrf.mxu3  ;;  %v867_v56 = vpack.c.bf16 %v850_v44, %v850_v44  ;;  %v943_v58 = vpop.f32.mrf.mxu1  ;;  %1933 = vmatpush.bf16.msra.mxu2 %v9383_v33  ;;  %v10982_v44 = vld [vmem:[#allocation5 + $0x64] sm:$0xf] }
 0x130   : > { %v1145_v61 = vpack.c.bf16 %v1127_v47, %v1127_v47  ;;  %v960_v23 = vpack.c.bf16 %v943_v58, %v943_v58  ;;  %v991_v47 = vunpack.c.l.b16 %v959_v28 }
 0x131   : > { %v899_v59 = vunpack.c.l.b16 %v867_v56 }
 0x132   : > { %v1177_v3 = vunpack.c.l.b16 %v1145_v61 }
 0x133   : > { %v902_v60 = vpack.c.b16 %v899_v59, %v898_v52  ;;  %v992_v52 = vunpack.c.l.b16 %v960_v23  ;;  %v9371_v59 = vor.u32 %v10983_v36, %v9370_v35 }
 0x135   : > { %9416 = vmatmul.msk.bf16.vlgmr.msra.gmra.mxu1 %vm800_vm0, %v902_v60  ;;  %9432 = vmatmul.msk.bf16.vlgmr.msra.gmra.mxu3 %vm800_vm0, %v902_v60  ;;  %v9372_v60 = vld [vmem:[#allocation5 + $0x68] sm:$0xf0] }
 0x136   : > { %v12206_v63 = vpop.f32.mrf.mxu2  ;;  %v853_v0 = vpop.f32.mrf.mxu0  ;;  %v9375_v58 = vor.u32 %v10982_v44, %v9372_v60  ;;  %1756 = vmatpush.bf16.msra.mxu0 %v9371_v59  ;;  %v9338_v60 = vld [vmem:[#allocation5 + $0x20] sm:$0xf] }
 0x137   : > { %v1129_v1 = vpop.f32.mrf.mxu3  ;;  %v12210_v2 = vpop.f32.mrf.mxu1  ;;  %v868_v6 = vpack.c.bf16 %v853_v0, %v853_v0 }
 0x138   : > { %v1146_v51 = vpack.c.bf16 %v1129_v1, %v1129_v1  ;;  %1934 = vmatpush.bf16.msra.mxu2 %v9375_v58  ;;  %v9362_v1 = vld [vmem:[#allocation5 + $0x50] sm:$0xf]  ;;  %v961_v33 = vpack.c.bf16 %v12210_v2, %v12210_v2  ;;  %v10974_v58 = vld [vmem:[#allocation5 + $0x24] sm:$0xf] }
 0x139   : > { %v900_v12 = vunpack.c.l.b16 %v868_v6 }
 0x13a   : > { %v1178_v5 = vunpack.c.l.b16 %v1146_v51  ;;  %v10980_v51 = vld [vmem:[#allocation5 + $0x54] sm:$0xf] }
 0x13c   : > { %v12212_v7 = vpack.c.b16 %v1178_v5, %v1177_v3  ;;  %v10981_v3 = vld [vmem:[#allocation5 + $0x54] sm:$0xf0]  ;;  %v995_v5 = vpack.c.b16 %v992_v52, %v991_v47  ;;  %v9348_v47 = vld [vmem:[#allocation5 + $0x38] sm:$0xf0] }
 0x13d   : > { %v9363_v6 = vor.u32 %v10981_v3, %v9362_v1  ;;  %v9351_v52 = vor.u32 %v10976_v32, %v9348_v47  ;;  %v993_v1 = vunpack.c.l.b16 %v961_v33 }
 0x13e   : > { %v12214_v8 = vpop.f32.mrf.mxu2  ;;  %v855_v10 = vpop.f32.mrf.mxu0 }
 0x13f   : > { %v1132_v11 = vpop.f32.mrf.mxu3  ;;  %v869_v14 = vpack.c.bf16 %v855_v10, %v855_v10  ;;  %v12216_v15 = vpop.f32.mrf.mxu1  ;;  %v9364_v10 = vld [vmem:[#allocation5 + $0x58] sm:$0xf0]  ;;  %1757 = vmatpush.bf16.msra.mxu0 %v9363_v6 }
 0x140   : > { %v1147_v18 = vpack.c.bf16 %v1132_v11, %v1132_v11  ;;  %v9367_v11 = vor.u32 %v10980_v51, %v9364_v10  ;;  %v962_v35 = vpack.c.bf16 %v12216_v15, %v12216_v15 }
 0x141   : > { %v901_v16 = vunpack.c.l.b16 %v869_v14  ;;  %v9354_v14 = vld [vmem:[#allocation5 + $0x40] sm:$0xf] }
 0x142   : > { %v1179_v21 = vunpack.c.l.b16 %v1147_v18  ;;  %1935 = vmatpush.bf16.msra.mxu2 %v9367_v11  ;;  %v994_v3 = vunpack.c.l.b16 %v962_v35  ;;  %v9324_v35 = vld [vmem:[#allocation5 + $0x8] sm:$0xf0] }
 0x143   : > { %v903_v17 = vpack.c.b16 %v901_v16, %v900_v12  ;;  %v10979_v16 = vld [vmem:[#allocation5 + $0x44] sm:$0xf0] }
 0x145   : > { %9417 = vmatmul.msk.bf16.gmra.mxu1 %vm800_vm0, %v903_v17  ;;  %9433 = vmatmul.msk.bf16.gmra.mxu3 %vm800_vm0, %v903_v17  ;;  %v10978_v17 = vld [vmem:[#allocation5 + $0x44] sm:$0xf] }
 0x146   : > { %v12218_v19 = vpop.f32.mrf.mxu2  ;;  %v12222_v20 = vpop.f32.mrf.mxu0 }
 0x147   : > { %v1134_v37 = vpop.f32.mrf.mxu3  ;;  %v12224_v22 = vpop.f32.mrf.mxu1 }
 0x148   : > { %v1148_v24 = vpack.c.bf16 %v1134_v37, %v1134_v37  ;;  %v9355_v37 = vor.u32 %v10979_v16, %v9354_v14  ;;  %v10973_v14 = vld [vmem:[#allocation5 + $0x14] sm:$0xf0]  ;;  %v10972_v16 = vld [vmem:[#allocation5 + $0x14] sm:$0xf] }
 0x14a   : > { %v1180_v30 = vunpack.c.l.b16 %v1148_v24  ;;  %1758 = vmatpush.bf16.msra.mxu0 %v9355_v37 }
 0x14c   : > { %v12228_v34 = vpack.c.b16 %v1180_v30, %v1179_v21  ;;  %v9356_v21 = vld [vmem:[#allocation5 + $0x48] sm:$0xf0]  ;;  %v9346_v30 = vld [vmem:[#allocation5 + $0x30] sm:$0xf] }
 0x14d   : > { %v9359_v26 = vor.u32 %v10978_v17, %v9356_v21  ;;  %v9347_v44 = vor.u32 %v10977_v31, %v9346_v30  ;;  %v996_v17 = vpack.c.b16 %v994_v3, %v993_v1  ;;  %v9332_v21 = vld [vmem:[#allocation5 + $0x18] sm:$0xf0]  ;;  %v10971_v30 = vld [vmem:[#allocation5 + $0x4] sm:$0xf0]  ;;  %v10970_v31 = vld [vmem:[#allocation5 + $0x4] sm:$0xf]  ;;  %v1052_v1 = vpack.c.bf16 %v12202_v42, %v12202_v42 }
 0x14e   : > { %v12230_v56 = vpop.f32.mrf.mxu2  ;;  %v12232_v61 = vpop.f32.mrf.mxu0  ;;  %v1053_v3 = vpack.c.bf16 %v12206_v63, %v12206_v63 }
 0x14f   : > { %v1479_v29 = vpop.f32.mrf.mxu3  ;;  %v12234_v0 = vpop.f32.mrf.mxu1  ;;  %1936 = vmatpush.bf16.msra.mxu2 %v9359_v26  ;;  %1759 = vmatpush.bf16.msra.mxu0 %v9347_v44 }
 0x150   : > { %v1509_v12 = vpack.c.bf16 %v1479_v29, %v1479_v29  ;;  %v10975_v29 = vld [vmem:[#allocation5 + $0x24] sm:$0xf0] }
 0x151   : > { %v9339_v2 = vor.u32 %v10975_v29, %v9338_v60 }
 0x152   : > { %v12244_v28 = vunpack.c.l.b16 %v1509_v12  ;;  %v9330_v12 = vld [vmem:[#allocation5 + $0x10] sm:$0xf] }
 0x153   : > { %1937 = vmatpush.bf16.msra.mxu2 %v9351_v52  ;;  %1760 = vmatpush.bf16.msra.mxu0 %v9339_v2  ;;  %v9331_v37 = vor.u32 %v10973_v14, %v9330_v12  ;;  %v9327_v52 = vor.u32 %v10970_v31, %v9324_v35  ;;  %v1084_v12 = vunpack.c.l.b16 %v1052_v1  ;;  %v1085_v14 = vunpack.c.l.b16 %v1053_v3 }
 0x154   : > { %v1055_v1 = vpack.c.bf16 %v12218_v19, %v12218_v19 }
 0x155   : > { %9418 = vmatmul.msk.bf16.gmra.mxu1 %vm800_vm0, %v995_v5  ;;  %9434 = vmatmul.msk.bf16.gmra.mxu3 %vm800_vm0, %v995_v5  ;;  %v9340_v5 = vld [vmem:[#allocation5 + $0x28] sm:$0xf0] }
 0x156   : > { %v12236_v18 = vpop.f32.mrf.mxu2  ;;  %v12240_v24 = vpop.f32.mrf.mxu0  ;;  %v9343_v10 = vor.u32 %v10974_v58, %v9340_v5 }
 0x157   : > { %v1481_v25 = vpop.f32.mrf.mxu3  ;;  %v12242_v27 = vpop.f32.mrf.mxu1  ;;  %1761 = vmatpush.bf16.msra.mxu0 %v9331_v37 }
 0x158   : > { %v1510_v23 = vpack.c.bf16 %v1481_v25, %v1481_v25  ;;  %1938 = vmatpush.bf16.msra.mxu2 %v9343_v10  ;;  %v9335_v25 = vor.u32 %v10972_v16, %v9332_v21 }
 0x15a   : > { %v12250_v36 = vunpack.c.l.b16 %v1510_v23  ;;  %v9322_v23 = vld [vmem:[#allocation5] sm:$0xf] }
 0x15b   : > { %v9323_v33 = vor.u32 %v10971_v30, %v9322_v23  ;;  %v1088_v30 = vpack.c.b16 %v1085_v14, %v1084_v12  ;;  %v1087_v14 = vunpack.c.l.b16 %v1055_v1 }
 0x15c   : > { %1939 = vmatpush.bf16.msra.mxu2 %v9335_v25 }
 0x15d   : > { %1762 = vmatpush.bf16.msra.mxu0 %v9323_v33 }
 0x15e   : > { %v12254_v51 = vpop.f32.mrf.mxu2  ;;  %v12256_v15 = vpop.f32.mrf.mxu0 }
 0x15f   : > { %v1484_v6 = vpop.f32.mrf.mxu3  ;;  %v12258_v11 = vpop.f32.mrf.mxu1 }
 0x160   : > { %v1511_v26 = vpack.c.bf16 %v1484_v6, %v1484_v6  ;;  %1940 = vmatpush.bf16.msra.mxu2 %v9327_v52 }
 0x162   : > { %v12264_v29 = vunpack.c.l.b16 %v1511_v26 }
 0x165   : > { %9419 = vmatmul.msk.bf16.gmra.mxu1 %vm800_vm0, %v996_v17  ;;  %9435 = vmatmul.msk.bf16.gmra.mxu3 %vm800_vm0, %v996_v17 }
 0x166   : > { %v12260_v32 = vpop.f32.mrf.mxu2  ;;  %v1210_v44 = vpop.f32.mrf.mxu0 }
 0x167   : > { %v1486_v47 = vpop.f32.mrf.mxu3  ;;  %v1303_v60 = vpop.f32.mrf.mxu1  ;;  %v1234_v5 = vpack.c.bf16 %v1210_v44, %v1210_v44 }
 0x168   : > { %v1512_v58 = vpack.c.bf16 %v1486_v47, %v1486_v47  ;;  %v1327_v10 = vpack.c.bf16 %v1303_v60, %v1303_v60 }
 0x169   : > { %v1256_v21 = vunpack.c.l.b16 %v1234_v5  ;;  %v859_v5 = vpack.c.bf16 %v12140_v41, %v12140_v41 }
 0x16a   : > { %v12270_v2 = vunpack.c.l.b16 %v1512_v58  ;;  %v1349_v23 = vunpack.c.l.b16 %v1327_v10  ;;  %v1054_v58 = vpack.c.bf16 %v12214_v8, %v12214_v8 }
 0x16b   : > { %v875_v8 = vunpack.c.l.b16 %v859_v5 }
 0x16c   : > { %v1086_v12 = vunpack.c.l.b16 %v1054_v58 }
 0x16e   : > { %v1396_v16 = vpop.f32.mrf.mxu2  ;;  %v1212_v17 = vpop.f32.mrf.mxu0  ;;  %v1089_v19 = vpack.c.b16 %v1087_v14, %v1086_v12 }
 0x16f   : > { %v1489_v37 = vpop.f32.mrf.mxu3  ;;  %v1235_v25 = vpack.c.bf16 %v1212_v17, %v1212_v17  ;;  %v1305_v26 = vpop.f32.mrf.mxu1 }
 0x170   : > { %v1328_v42 = vpack.c.bf16 %v1305_v26, %v1305_v26  ;;  %v1513_v41 = vpack.c.bf16 %v1489_v37, %v1489_v37 }
 0x171   : > { %v1257_v31 = vunpack.c.l.b16 %v1235_v25  ;;  %v858_v25 = vpack.c.bf16 %v12126_v38, %v12126_v38 }
 0x172   : > { %v1350_v63 = vunpack.c.l.b16 %v1328_v42  ;;  %v1535_v5 = vunpack.c.l.b16 %v1513_v41 }
 0x173   : > { %v1260_v33 = vpack.c.b16 %v1257_v31, %v1256_v21  ;;  %v874_v6 = vunpack.c.l.b16 %v858_v25 }
 0x174   : > { %v1353_v35 = vpack.c.b16 %v1350_v63, %v1349_v23 }
 0x175   : > { %1262 = vrot.lane.b32.xlu2 %v1260_v33, %s11722_s17  ;;  %9420 = vmatmul.msk.bf16.gmra.mxu1 %vm800_vm0, %v1088_v30  ;;  %v1420_v33 = vpack.c.bf16 %v1396_v16, %v1396_v16  ;;  %v878_v50 = vpack.c.b16 %v875_v8, %v874_v6  ;;  %v861_v8 = vpack.c.bf16 %v12166_v55, %v12166_v55 }
 0x176   : > { %v1398_v44 = vpop.f32.mrf.mxu2  ;;  %1355 = vrot.lane.b32.xlu1 %v1353_v35, %s11722_s17  ;;  %9436 = vmatmul.msk.bf16.gmra.mxu3 %vm800_vm0, %v1088_v30  ;;  %v1215_v47 = vpop.f32.mrf.mxu0 }
 0x177   : > { %v1308_v52 = vpop.f32.mrf.mxu1  ;;  %v1491_v60 = vpop.f32.mrf.mxu3  ;;  %v1236_v3 = vpack.c.bf16 %v1215_v47, %v1215_v47  ;;  %v1421_v35 = vpack.c.bf16 %v1398_v44, %v1398_v44  ;;  %v1442_v38 = vunpack.c.l.b16 %v1420_v33 }
 0x178   : > { %v1329_v10 = vpack.c.bf16 %v1308_v52, %v1308_v52  ;;  %v1514_v1 = vpack.c.bf16 %v1491_v60, %v1491_v60 }
 0x179   : > { %v1258_v26 = vunpack.c.l.b16 %v1236_v3  ;;  %v1443_v3 = vunpack.c.l.b16 %v1421_v35 }
 0x17a   : > { %v1351_v31 = vunpack.c.l.b16 %v1329_v10  ;;  %v1536_v16 = vunpack.c.l.b16 %v1514_v1 }
 0x17e   : > { %v1401_v17 = vpop.f32.mrf.mxu2  ;;  %v1217_v21 = vpop.f32.mrf.mxu0 }
 0x17f   : > { %v1237_v23 = vpack.c.bf16 %v1217_v21, %v1217_v21  ;;  %v1310_v42 = vpop.f32.mrf.mxu1  ;;  %v1494_v30 = vpop.f32.mrf.mxu3  ;;  %v1422_v52 = vpack.c.bf16 %v1401_v17, %v1401_v17  ;;  %v1446_v17 = vpack.c.b16 %v1443_v3, %v1442_v38 }
 0x180   : > { %v1330_v63 = vpack.c.bf16 %v1310_v42, %v1310_v42  ;;  %v1515_v14 = vpack.c.bf16 %v1494_v30, %v1494_v30 }
 0x181   : > { %v1259_v47 = vunpack.c.l.b16 %v1237_v23  ;;  %v1444_v10 = vunpack.c.l.b16 %v1422_v52  ;;  %v951_v52 = vpack.c.bf16 %v12128_v39, %v12128_v39 }
 0x182   : > { %v1352_v58 = vunpack.c.l.b16 %v1330_v63  ;;  %v1537_v42 = vunpack.c.l.b16 %v1515_v14  ;;  %v877_v63 = vunpack.c.l.b16 %v861_v8  ;;  %v954_v14 = vpack.c.bf16 %v12168_v57, %v12168_v57 }
 0x183   : > { %v1261_v59 = vpack.c.b16 %v1259_v47, %v1258_v26  ;;  %v1539_v26 = vpack.c.b16 %v1536_v16, %v1535_v5  ;;  %v967_v38 = vunpack.c.l.b16 %v951_v52 }
 0x184   : > { %v1354_v13 = vpack.c.b16 %v1352_v58, %v1351_v31  ;;  %v952_v58 = vpack.c.bf16 %v12142_v43, %v12142_v43 }
 0x185   : > { %1264 = vrot.lane.b32.xlu0 %v1261_v59, %s11722_s17  ;;  %9421 = vmatmul.msk.bf16.gmra.mxu1 %vm800_vm0, %v1089_v19 }
 0x186   : > { %v1403_v21 = vpop.f32.mrf.mxu2  ;;  %1357 = vrot.lane.b32.xlu2 %v1354_v13, %s11722_s17  ;;  %9437 = vmatmul.msk.bf16.gmra.mxu3 %vm800_vm0, %v1089_v19  ;;  %v968_v3 = vunpack.c.l.b16 %v952_v58 }
 0x187   : > { %v1423_v44 = vpack.c.bf16 %v1403_v21, %v1403_v21  ;;  %v891_v37 = vpop.permute.xlu0 %890  ;;  %v1496_v60 = vpop.f32.mrf.mxu3 }
 0x188   : > { %v906_v6 = vsel %vm800_vm0, %v878_v50, %v891_v37  ;;  %v1516_v59 = vpack.c.bf16 %v1496_v60, %v1496_v60  ;;  %v12291_v23 = vpop.f32.mrf.mxu1  ;;  %v860_v50 = vpack.c.bf16 %v12146_v46, %v12146_v46  ;;  %v1220_v46 = vpop.f32.mrf.mxu0 }
 0x189   : > { %v1445_v12 = vunpack.c.l.b16 %v1423_v44  ;;  %1763 = vmatmul.bf16.vlgmr.msra.gmra.mxu0 %v906_v6  ;;  %1941 = vmatmul.bf16.vlgmr.msra.gmra.mxu2 %v906_v6  ;;  %v984_v5 = vpop.permute.xlu1 %983  ;;  %v1238_v43 = vpack.c.bf16 %v1220_v46, %v1220_v46  ;;  %v953_v6 = vpack.c.bf16 %v12150_v49, %v12150_v49 }
 0x18a   : > { %v1538_v13 = vunpack.c.l.b16 %v1516_v59  ;;  %v876_v19 = vunpack.c.l.b16 %v860_v50 }
 0x18b   : > { %v1447_v25 = vpack.c.b16 %v1445_v12, %v1444_v10  ;;  %v971_v10 = vpack.c.b16 %v968_v3, %v967_v38  ;;  %v1270_v60 = vunpack.c.l.b16 %v1238_v43  ;;  %v969_v59 = vunpack.c.l.b16 %v953_v6 }
 0x18c   : > { %v1540_v31 = vpack.c.b16 %v1538_v13, %v1537_v42  ;;  %v879_v35 = vpack.c.b16 %v877_v63, %v876_v19 }
 0x18d   : > { %1450 = vrot.lane.b32.xlu1 %v1447_v25, %s11722_s17  ;;  %1448 = vrot.lane.b32.xlu0 %v1446_v17, %s11722_s17  ;;  %v999_v39 = vsel %vm800_vm0, %v971_v10, %v984_v5  ;;  %v970_v25 = vunpack.c.l.b16 %v954_v14 }
 0x18e   : > { %1541 = vrot.lane.b32.xlu2 %v1539_v26, %s11722_s17 }
 0x18f   : > { %v12300_v30 = vpop.f32.mrf.mxu3  ;;  %v972_v13 = vpack.c.b16 %v970_v25, %v969_v59 }
 0x190   : > { %v12302_v33 = vpop.f32.mrf.mxu1  ;;  %v1222_v21 = vpop.f32.mrf.mxu0 }
 0x191   : > { %v1239_v44 = vpack.c.bf16 %v1222_v21, %v1222_v21  ;;  %v1077_v21 = vpop.permute.xlu2 %1076 }
 0x193   : > { %v1271_v12 = vunpack.c.l.b16 %v1239_v44 }
 0x195   : > { %1543 = vrot.lane.b32.xlu0 %v1540_v31, %s11722_s17  ;;  %9422 = vmatmul.msk.bf16.gmra.mxu1 %vm800_vm0, %v12212_v7  ;;  %s15079_s17 = sld [smem:[#allocation52_spill]] }
 0x196   : > { %9438 = vmatmul.msk.bf16.gmra.mxu3 %vm800_vm0, %v12212_v7 }
 0x197   : > { %v893_v55 = vpop.permute.xlu0 %892  ;;  %v12310_v41 = vpop.f32.mrf.mxu3 }
 0x198   : > { %v910_v47 = vsel %vm800_vm0, %v879_v35, %v893_v55  ;;  %v12316_v1 = vpop.f32.mrf.mxu1  ;;  %v1225_v37 = vpop.f32.mrf.mxu0  ;;  %v1044_v55 = vpack.c.bf16 %v12138_v40, %v12138_v40 }
 0x199   : > { %1768 = vmatmul.bf16.gmra.mxu0 %v910_v47  ;;  %1946 = vmatmul.bf16.gmra.mxu2 %v910_v47  ;;  %v986_v42 = vpop.permute.xlu1 %985  ;;  %v1240_v31 = vpack.c.bf16 %v1225_v37, %v1225_v37  ;;  %v1045_v47 = vpack.c.bf16 %v12144_v45, %v12144_v45  ;;  %v1331_v45 = vpack.c.bf16 %v12291_v23, %v12291_v23 }
 0x19a   : > { %v1003_v49 = vsel %vm800_vm0, %v972_v13, %v986_v42  ;;  %v1060_v58 = vunpack.c.l.b16 %v1044_v55  ;;  %v1406_v13 = vpop.f32.mrf.mxu2 }
 0x19b   : > { %v1272_v19 = vunpack.c.l.b16 %v1240_v31  ;;  %v1061_v38 = vunpack.c.l.b16 %v1045_v47  ;;  %v1363_v44 = vunpack.c.l.b16 %v1331_v45  ;;  %s9049_s11 = scalar_lea.hbm %s15079_s17, %s10959_s20  ;;  %s11653_s29 = scalar_lea.hbm %s15079_s17, 16 }
 0x19c   : > { %s9053_s5 = sshll.u32 %s9049_s11, 4  ;;  %s9054_s5 = int_to_ptr.hbm [resolvable:$true] %s9053_s5 }
 0x19d   : > { %v1064_v5 = vpack.c.b16 %v1061_v38, %v1060_v58  ;;  %v1424_v58 = vpack.c.bf16 %v1406_v13, %v1406_v13 }
 0x19f   : > { %v12318_v7 = vpop.f32.mrf.mxu3  ;;  %v1092_v40 = vsel %vm800_vm0, %v1064_v5, %v1077_v21  ;;  %v1456_v45 = vunpack.c.l.b16 %v1424_v58  ;;  %v1518_v58 = vpack.c.bf16 %v12310_v41, %v12310_v41 }
 0x1a0   : > { %v12325_v16 = vpop.f32.mrf.mxu1  ;;  %v1227_v8 = vpop.f32.mrf.mxu0 }
 0x1a1   : > { %v1241_v57 = vpack.c.bf16 %v1227_v8, %v1227_v8  ;;  %v1334_v8 = vpack.c.bf16 %v12325_v16, %v12325_v16 }
 0x1a2   : > { %v1408_v47 = vpop.f32.mrf.mxu2 }
 0x1a3   : > { %v1273_v35 = vunpack.c.l.b16 %v1241_v57  ;;  %v1366_v57 = vunpack.c.l.b16 %v1334_v8  ;;  %v1425_v21 = vpack.c.bf16 %v1408_v47, %v1408_v47  ;;  %v1231_v8 = vpack.c.bf16 %v12232_v61, %v12232_v61 }
 0x1a4   : > { %v1517_v61 = vpack.c.bf16 %v12300_v30, %v12300_v30 }
 0x1a5   : > { %9423 = vmatmul.msk.bf16.gmra.mxu1 %vm800_vm0, %v12228_v34  ;;  %v1275_v52 = vpack.c.b16 %v1273_v35, %v1272_v19 }
 0x1a6   : > { %9439 = vmatmul.msk.bf16.gmra.mxu3 %vm800_vm0, %v12228_v34  ;;  %v1274_v34 = vpack.c.b16 %v1271_v12, %v1270_v60  ;;  %v1046_v60 = vpack.c.bf16 %v12164_v54, %v12164_v54  ;;  %v1047_v12 = vpack.c.bf16 %v12170_v62, %v12170_v62  ;;  %v1333_v62 = vpack.c.bf16 %v12316_v1, %v12316_v1 }
 0x1a7   : > { %v12331_v17 = vpop.f32.mrf.mxu3  ;;  %v14954_v1 = vpack.c.b16 %v12152_v53, %v12148_v48  ;;  %v14955_v53 = vpack.c.b16 %v12174_v9, %v12172_v4 }
 0x1a8   : > { %v1063_v23 = vunpack.c.l.b16 %v1047_v12  ;;  %v1365_v31 = vunpack.c.l.b16 %v1333_v62  ;;  %v1172_v12 = vpop.permute.xlu1 %1171  ;;  %v1230_v62 = vpack.c.bf16 %v12222_v20, %v12222_v20 }
 0x1a9   : > { %1773 = vmatmul.bf16.gmra.mxu0 %v999_v39  ;;  %1951 = vmatmul.bf16.gmra.mxu2 %v999_v39  ;;  %v1332_v39 = vpack.c.bf16 %v12302_v33, %v12302_v33  ;;  %v1079_v33 = vpop.permute.xlu2 %1078 }
 0x1aa   : > { %v1368_v35 = vpack.c.b16 %v1366_v57, %v1365_v31  ;;  %v1246_v9 = vunpack.c.l.b16 %v1230_v62  ;;  %v1247_v57 = vunpack.c.l.b16 %v1231_v8 }
 0x1ab   : > { %v1364_v37 = vunpack.c.l.b16 %v1332_v39  ;;  %v1457_v39 = vunpack.c.l.b16 %v1425_v21 }
 0x1ad   : > { %v1367_v14 = vpack.c.b16 %v1364_v37, %v1363_v44  ;;  %v1460_v44 = vpack.c.b16 %v1457_v39, %v1456_v45  ;;  %v1232_v45 = vpack.c.bf16 %v12240_v24, %v12240_v24  ;;  %v1233_v39 = vpack.c.bf16 %v12256_v15, %v12256_v15  ;;  %v2111_v15 = vld [vmem:[%s14956_s3] sm:$0xf] }
 0x1ae   : > { %v2114_v62 = vperm.slane %v2111_v15, 2 }
 0x1b2   : > { %v12333_v26 = vpop.f32.mrf.mxu1 }
 0x1b5   : > { %9424 = vmatmul.msk.bf16.gmra.mxu1 %vm800_vm0, %v1274_v34 }
 0x1b6   : > { %9440 = vmatmul.msk.bf16.gmra.mxu3 %vm800_vm0, %v1274_v34  ;;  %v1062_v34 = vunpack.c.l.b16 %v1046_v60 }
 0x1b8   : > { %v12337_v50 = vpop.f32.mrf.mxu3  ;;  %v1065_v25 = vpack.c.b16 %v1063_v23, %v1062_v34 }
 0x1b9   : > { %1778 = vmatmul.bf16.gmra.mxu0 %v1003_v49  ;;  %1956 = vmatmul.bf16.gmra.mxu2 %v1003_v49 }
 0x1ba   : > { %v12340_v63 = vpop.f32.mrf.mxu1  ;;  %v1096_v54 = vsel %vm800_vm0, %v1065_v25, %v1079_v33 }
 0x1c0   : > { %v12346_v46 = vpop.f32.mrf.mxu3 }
 0x1c2   : > { %v12348_v3 = vpop.f32.mrf.mxu1 }
 0x1c5   : > { %9425 = vmatmul.msk.bf16.gmra.mxu1 %vm800_vm0, %v1275_v52 }
 0x1c6   : > { %9441 = vmatmul.msk.bf16.gmra.mxu3 %vm800_vm0, %v1275_v52  ;;  %v1170_v52 = vpop.permute.xlu0 %1169 }
 0x1c7   : > { %v1185_v16 = vsel %vm800_vm0, %v14954_v1, %v1170_v52  ;;  %v1250_v52 = vpack.c.b16 %v1247_v57, %v1246_v9  ;;  %v1520_v9 = vpack.c.bf16 %v12331_v17, %v12331_v17  ;;  %v2113_v57 = vperm.slane %v2111_v15, 0 }
 0x1c8   : > { %v12352_v10 = vpop.f32.mrf.mxu3 }
 0x1c9   : > { %1783 = vmatmul.bf16.gmra.mxu0 %v1092_v40  ;;  %1961 = vmatmul.bf16.gmra.mxu2 %v1092_v40  ;;  %v1411_v40 = vpop.f32.mrf.mxu2 }
 0x1ca   : > { %v12359_v43 = vpop.f32.mrf.mxu1  ;;  %v1426_v34 = vpack.c.bf16 %v1411_v40, %v1411_v40 }
 0x1cf   : > { %v1263_v47 = vpop.permute.xlu2 %1262 }
 0x1d0   : > { %v12365_v6 = vpop.f32.mrf.mxu3 }
 0x1d1   : > { %v1413_v48 = vpop.f32.mrf.mxu2 }
 0x1d2   : > { %v12367_v59 = vpop.f32.mrf.mxu1  ;;  %v1427_v33 = vpack.c.bf16 %v1413_v48, %v1413_v48  ;;  %v1550_v48 = vunpack.c.l.b16 %v1518_v58 }
 0x1d4   : > { %v1459_v13 = vunpack.c.l.b16 %v1427_v33 }
 0x1d5   : > { %9426 = vmatmul.msk.bf16.gmra.mxu1 %vm800_vm0, %v1367_v14 }
 0x1d6   : > { %9442 = vmatmul.msk.bf16.gmra.mxu3 %vm800_vm0, %v1367_v14  ;;  %v1189_v14 = vsel %vm800_vm0, %v14955_v53, %v1172_v12  ;;  %v1549_v12 = vunpack.c.l.b16 %v1517_v61  ;;  %v1248_v53 = vunpack.c.l.b16 %v1232_v45  ;;  %v12451_v61 = vperm.slane %v2114_v62, 0 }
 0x1d7   : > { %v2184_v45 = vperm.slane %v2111_v15, 3 }
 0x1d8   : > { %v12371_v42 = vpop.f32.mrf.mxu3  ;;  %v1553_v30 = vpack.c.b16 %v1550_v48, %v1549_v12  ;;  %v1552_v48 = vunpack.c.l.b16 %v1520_v9 }
 0x1d9   : > { %1788 = vmatmul.bf16.gmra.mxu0 %v1096_v54  ;;  %1966 = vmatmul.bf16.gmra.mxu2 %v1096_v54  ;;  %v1458_v54 = vunpack.c.l.b16 %v1426_v34 }
 0x1da   : > { %v12378_v49 = vpop.f32.mrf.mxu1 }
 0x1db   : > { %v1461_v31 = vpack.c.b16 %v1459_v13, %v1458_v54 }
 0x1e0   : > { %v12380_v19 = vpop.f32.mrf.mxu3 }
 0x1e2   : > { %v12382_v55 = vpop.f32.mrf.mxu1 }
 0x1e5   : > { %9427 = vmatmul.msk.bf16.gmra.mxu1 %vm800_vm0, %v1368_v35 }
 0x1e6   : > { %9443 = vmatmul.msk.bf16.gmra.mxu3 %vm800_vm0, %v1368_v35 }
 0x1e8   : > { %v12390_v38 = vpop.f32.mrf.mxu3  ;;  %v1356_v9 = vpop.permute.xlu1 %1355 }
 0x1e9   : > { %1793 = vmatmul.bf16.gmra.mxu0 %v1185_v16  ;;  %1971 = vmatmul.bf16.gmra.mxu2 %v1185_v16  ;;  %v1278_v16 = vsel %vm800_vm0, %v1250_v52, %v1263_v47  ;;  %v1323_v52 = vpack.c.bf16 %v12224_v22, %v12224_v22 }
 0x1ea   : > { %v12392_v5 = vpop.f32.mrf.mxu1 }
 0x1eb   : > { %v1339_v62 = vunpack.c.l.b16 %v1323_v52 }
 0x1f0   : > { %v12394_v37 = vpop.f32.mrf.mxu3 }
 0x1f2   : > { %v12396_v60 = vpop.f32.mrf.mxu1 }
 0x1f5   : > { %9428 = vmatmul.msk.bf16.gmra.mxu1 %vm800_vm0, %v1460_v44 }
 0x1f6   : > { %9444 = vmatmul.msk.bf16.gmra.mxu3 %vm800_vm0, %v1460_v44 }
 0x1f7   : > { %v1265_v54 = vpop.permute.xlu0 %1264 }
 0x1f9   : > { %v12404_v23 = vpop.f32.mrf.mxu3  ;;  %1798 = vmatmul.bf16.gmra.mxu0 %v1189_v14  ;;  %1976 = vmatmul.bf16.gmra.mxu2 %v1189_v14  ;;  %v1249_v14 = vunpack.c.l.b16 %v1233_v39 }
 0x1fa   : > { %v12406_v25 = vpop.f32.mrf.mxu1 }
 0x1fb   : > { %v1251_v13 = vpack.c.b16 %v1249_v14, %v1248_v53  ;;  %v12456_v53 = vperm.slane %v2113_v57, 0 }
 0x1fd   : > { %v1282_v8 = vsel %vm800_vm0, %v1251_v13, %v1265_v54 }
 0x201   : > { %v12412_v4 = vpop.f32.mrf.mxu3 }
 0x202   : > { %v12414_v35 = vpop.f32.mrf.mxu1 }
 0x205   : > { %9429 = vmatmul.msk.bf16.gmra.mxu1 %vm800_vm0, %v1461_v31 }
 0x206   : > { %9445 = vmatmul.msk.bf16.gmra.mxu3 %vm800_vm0, %v1461_v31  ;;  %v1764_v1 = vpop.f32.mrf.mxu0  ;;  %v1519_v31 = vpack.c.bf16 %v12318_v7, %v12318_v7 }
 0x208   : > { %v1551_v17 = vunpack.c.l.b16 %v1519_v31 }
 0x209   : > { %1803 = vmatmul.bf16.gmra.mxu0 %v1278_v16  ;;  %1981 = vmatmul.bf16.gmra.mxu2 %v1278_v16  ;;  %v12425_v21 = vpop.f32.mrf.mxu3  ;;  %v1324_v16 = vpack.c.bf16 %v12234_v0, %v12234_v0 }
 0x20a   : > { %v12419_v20 = vpop.f32.mrf.mxu1 }
 0x20c   : > { %v1942_v40 = vpop.f32.mrf.mxu2 }
 0x20d   : > { %v2032_v14 = vadd.f32 %v12337_v50, %v1942_v40  ;;  %v1340_v50 = vunpack.c.l.b16 %v1324_v16  ;;  %v1554_v40 = vpack.c.b16 %v1552_v48, %v1551_v17 }
 0x20e   : > { %v1766_v44 = vpop.f32.mrf.mxu0 }
 0x20f   : > { %v1856_v0 = vadd.f32 %v12340_v63, %v1766_v44 }
 0x211   : > { %v12433_v41 = vpop.f32.mrf.mxu3 }
 0x212   : > { %v12431_v34 = vpop.f32.mrf.mxu1 }
 0x214   : > { %v1944_v33 = vpop.f32.mrf.mxu2 }
 0x215   : > { %9430 = vmatmul.msk.bf16.gmra.mxu1 %vm800_vm0, %v1553_v30  ;;  %v2034_v39 = vadd.f32 %v12346_v46, %v1944_v33  ;;  %v12465_v33 = vperm.slane %v2184_v45, 1 }
 0x216   : > { %9446 = vmatmul.msk.bf16.gmra.mxu3 %vm800_vm0, %v1553_v30  ;;  %v1769_v24 = vpop.f32.mrf.mxu0  ;;  %v2183_v30 = vperm.slane %v2111_v15, 1  ;;  %v2120_v15 = vmul.f32 %v12451_v61, %v2032_v14 }
 0x217   : > { %v1859_v7 = vadd.f32 %v12348_v3, %v1769_v24  ;;  %v1854_v3 = vadd.f32 %v12333_v26, %v1764_v1 }
 0x218   : > { %v12472_v44 = vperm.slane %v2183_v30, 1  ;;  %v2190_v45 = vadd.f32 %v12465_v33, %v2120_v15 }
 0x219   : > { %1808 = vmatmul.bf16.gmra.mxu0 %v1282_v8  ;;  %1986 = vmatmul.bf16.gmra.mxu2 %v1282_v8  ;;  %v12460_v54 = vpop.f32.mrf.mxu3  ;;  %v2123_v24 = vmul.f32 %v12456_v53, %v1859_v7  ;;  %v2121_v8 = vmul.f32 %v12456_v53, %v1856_v0  ;;  %v2119_v1 = vmul.f32 %v12456_v53, %v1854_v3 }
 0x21a   : > { %v12445_v47 = vpop.f32.mrf.mxu1 }
 0x21b   : > { %v2193_v52 = vadd.f32 %v12472_v44, %v2123_v24  ;;  %v2191_v7 = vadd.f32 %v12472_v44, %v2121_v8  ;;  %v2189_v14 = vadd.f32 %v12472_v44, %v2119_v1  ;;  %v1326_v1 = vpack.c.bf16 %v12258_v11, %v12258_v11 }
 0x21c   : > { %v1947_v58 = vpop.f32.mrf.mxu2 }
 0x21d   : > { %v2037_v12 = vadd.f32 %v12352_v10, %v1947_v58  ;;  %v2122_v10 = vmul.f32 %v12451_v61, %v2034_v39  ;;  %v1343_v58 = vpack.c.b16 %v1340_v50, %v1339_v62  ;;  %v2257_v30 = vmax.f32 %v2193_v52, 0.0 }
 0x21e   : > { %v1771_v22 = vpop.f32.mrf.mxu0 }
 0x21f   : > { %v2124_v13 = vmul.f32 %v12451_v61, %v2037_v12  ;;  %v1861_v46 = vadd.f32 %v12359_v43, %v1771_v22  ;;  %v2192_v57 = vadd.f32 %v12465_v33, %v2122_v10  ;;  %v2255_v10 = vmax.f32 %v2191_v7, 0.0 }
 0x221   : > { %v2194_v43 = vadd.f32 %v12465_v33, %v2124_v13  ;;  %v2125_v26 = vmul.f32 %v12456_v53, %v1861_v46  ;;  %v2256_v22 = vmax.f32 %v2192_v57, 0.0  ;;  %v12491_v0 = vpop.f32.mrf.mxu3  ;;  %v2254_v46 = vmax.f32 %v2190_v45, 0.0 }
 0x222   : > { %v12470_v63 = vpop.f32.mrf.mxu1 }
 0x223   : > { %v2258_v12 = vmax.f32 %v2194_v43, 0.0  ;;  %v2195_v17 = vadd.f32 %v12472_v44, %v2125_v26  ;;  %v2318_v43 = vpack.c.bf16 %v2256_v22, %v2255_v10  ;;  %v1325_v26 = vpack.c.bf16 %v12242_v27, %v12242_v27 }
 0x224   : > { %v1949_v31 = vpop.f32.mrf.mxu2 }
 0x225   : > { %v2039_v16 = vadd.f32 %v12365_v6, %v1949_v31  ;;  %9431 = vmatmul.msk.bf16.gmra.mxu1 %vm800_vm0, %v1554_v40  ;;  %v1371_v6 = vsel %vm800_vm0, %v1343_v58, %v1356_v9  ;;  %v2319_v24 = vpack.c.bf16 %v2258_v12, %v2257_v30  ;;  %v2259_v62 = vmax.f32 %v2195_v17, 0.0 }
 0x226   : > { %9447 = vmatmul.msk.bf16.gmra.mxu3 %vm800_vm0, %v1554_v40  ;;  %v12484_v39 = vpop.f32.mrf.mxu0  ;;  %v2253_v40 = vmax.f32 %v2189_v14, 0.0  ;;  %v2376_v12 = vunpack.c.l.b16 %v2318_v43  ;;  %v2377_v17 = vunpack.c.h.b16 %v2318_v43  ;;  %v1342_v14 = vunpack.c.l.b16 %v1326_v1 }
 0x227   : > { %v2126_v48 = vmul.f32 %v12451_v61, %v2039_v16  ;;  %v2378_v57 = vunpack.c.l.b16 %v2319_v24  ;;  %v2379_v52 = vunpack.c.h.b16 %v2319_v24 }
 0x228   : > { %v2317_v31 = vpack.c.bf16 %v2254_v46, %v2253_v40 }
 0x229   : > { %v2196_v13 = vadd.f32 %v12465_v33, %v2126_v48  ;;  %1813 = vmatmul.bf16.gmra.mxu0 %v1371_v6  ;;  %1991 = vmatmul.bf16.gmra.mxu2 %v1371_v6  ;;  %v1341_v48 = vunpack.c.l.b16 %v1325_v26  ;;  %v12502_v22 = vpop.f32.mrf.mxu3 }
 0x22a   : > { %v12494_v3 = vpop.f32.mrf.mxu1  ;;  %v2374_v27 = vunpack.c.l.b16 %v2317_v31  ;;  %v2375_v11 = vunpack.c.h.b16 %v2317_v31 }
 0x22b   : > { %v2260_v50 = vmax.f32 %v2196_v13, 0.0  ;;  %v1358_v13 = vpop.permute.xlu2 %1357  ;;  %v1344_v24 = vpack.c.b16 %v1342_v14, %v1341_v48 }
 0x22c   : > { %v1952_v15 = vpop.f32.mrf.mxu2  ;;  %v2382_v46 = vpack.c.b16 %v2376_v12, %v2374_v27  ;;  %v2383_v10 = vpack.c.b16 %v2377_v17, %v2375_v11 }
 0x22d   : > { %v2320_v8 = vpack.c.bf16 %v2260_v50, %v2259_v62  ;;  %v1375_v50 = vsel %vm800_vm0, %v1344_v24, %v1358_v13 }
 0x22e   : > { %v1776_v9 = vpop.f32.mrf.mxu0 }
 0x22f   : > { %v2380_v16 = vunpack.c.l.b16 %v2320_v8  ;;  %v2381_v58 = vunpack.c.h.b16 %v2320_v8 }
 0x231   : > { %v2384_v45 = vpack.c.b16 %v2380_v16, %v2378_v57  ;;  %v2385_v7 = vpack.c.b16 %v2381_v58, %v2379_v52  ;;  %v12507_v43 = vpop.f32.mrf.mxu3  ;;  %v1416_v57 = vpack.c.bf16 %v12230_v56, %v12230_v56  ;;  %v1417_v52 = vpack.c.bf16 %v12236_v18, %v12236_v18 }
 0x232   : > { %v12500_v6 = vpop.f32.mrf.mxu1  ;;  %v2042_v16 = vadd.f32 %v12371_v42, %v1952_v15 }
 0x233   : > { %2406 = vmatpush.bf16.msrb.mxu0 %v2384_v45  ;;  %2430 = vmatpush.bf16.msrb.mxu1 %v2385_v7  ;;  %v1866_v45 = vadd.f32 %v12378_v49, %v1776_v9  ;;  %v1432_v56 = vunpack.c.l.b16 %v1416_v57  ;;  %v1433_v17 = vunpack.c.l.b16 %v1417_v52  ;;  %v12548_v57 = vld [vmem:[%s14867_s4] sm:$0xff] }
 0x234   : > { %v1954_v30 = vpop.f32.mrf.mxu2  ;;  %v2128_v18 = vmul.f32 %v12451_v61, %v2042_v16 }
 0x235   : > { %v2044_v26 = vadd.f32 %v12380_v19, %v1954_v30  ;;  %v1864_v19 = vadd.f32 %v12367_v59, %v12484_v39  ;;  %v2129_v42 = vmul.f32 %v12456_v53, %v1866_v45  ;;  %v1449_v59 = vpop.permute.xlu0 %1448  ;;  %v1436_v11 = vpack.c.b16 %v1433_v17, %v1432_v56 }
 0x236   : > { %v1779_v62 = vpop.f32.mrf.mxu0  ;;  %v2198_v30 = vadd.f32 %v12465_v33, %v2128_v18  ;;  %v1418_v17 = vpack.c.bf16 %v12254_v51, %v12254_v51  ;;  %v1419_v18 = vpack.c.bf16 %v12260_v32, %v12260_v32 }
 0x237   : > { %2407 = vmatpush.bf16.msrb.mxu0 %v2382_v46  ;;  %2431 = vmatpush.bf16.msrb.mxu1 %v2383_v10  ;;  %v1869_v1 = vadd.f32 %v12382_v55, %v1779_v62  ;;  %v2130_v55 = vmul.f32 %v12451_v61, %v2044_v26  ;;  %v2199_v46 = vadd.f32 %v12472_v44, %v2129_v42 }
 0x238   : > { %v1464_v26 = vsel %vm800_vm0, %v1436_v11, %v1449_v59  ;;  %v2262_v52 = vmax.f32 %v2198_v30, 0.0 }
 0x239   : > { %1818 = vmatmul.bf16.gmra.mxu0 %v1375_v50  ;;  %1996 = vmatmul.bf16.gmra.mxu2 %v1375_v50  ;;  %v2200_v39 = vadd.f32 %v12465_v33, %v2130_v55  ;;  %v12538_v10 = vpop.f32.mrf.mxu3 }
 0x23a   : > { %v12505_v40 = vpop.f32.mrf.mxu1  ;;  %9463 = vmatmul.msk.bf16.vlgmr.msrb.gmra.mxu1 %vm2390_vm1, %v12548_v57 }
 0x23c   : > { %v1957_v8 = vpop.f32.mrf.mxu2 }
 0x23d   : > { %v2047_v31 = vadd.f32 %v12390_v38, %v1957_v8  ;;  %v2131_v38 = vmul.f32 %v12456_v53, %v1869_v1  ;;  %v2264_v1 = vmax.f32 %v2200_v39, 0.0 }
 0x23e   : > { %v1781_v58 = vpop.f32.mrf.mxu0 }
 0x23f   : > { %v2132_v7 = vmul.f32 %v12451_v61, %v2047_v31  ;;  %v1871_v12 = vadd.f32 %v12392_v5, %v1781_v58  ;;  %v2127_v5 = vmul.f32 %v12456_v53, %v1864_v19  ;;  %v2201_v14 = vadd.f32 %v12472_v44, %v2131_v38 }
 0x240   : > { %v2263_v58 = vmax.f32 %v2199_v46, 0.0  ;;  %v1434_v46 = vunpack.c.l.b16 %v1418_v17 }
 0x241   : > { %v2202_v49 = vadd.f32 %v12465_v33, %v2132_v7  ;;  %v2133_v15 = vmul.f32 %v12456_v53, %v1871_v12  ;;  %v2197_v8 = vadd.f32 %v12472_v44, %v2127_v5  ;;  %v12558_v39 = vpop.f32.mrf.mxu3 }
 0x242   : > { %v12525_v48 = vpop.f32.mrf.mxu1  ;;  %v2322_v56 = vpack.c.bf16 %v2264_v1, %v2263_v58  ;;  %v12566_v58 = vld [vmem:[%s14867_s4 + $0x8] sm:$0xff] }
 0x243   : > { %v2266_v24 = vmax.f32 %v2202_v49, 0.0  ;;  %v2203_v62 = vadd.f32 %v12472_v44, %v2133_v15  ;;  %v2261_v19 = vmax.f32 %v2197_v8, 0.0  ;;  %v1451_v8 = vpop.permute.xlu1 %1450 }
 0x244   : > { %v1959_v9 = vpop.f32.mrf.mxu2  ;;  %v2490_v11 = vunpack.c.l.b16 %v2322_v56  ;;  %v2491_v30 = vunpack.c.h.b16 %v2322_v56 }
 0x245   : > { %v2049_v27 = vadd.f32 %v12394_v37, %v1959_v9  ;;  %v2265_v37 = vmax.f32 %v2201_v14, 0.0  ;;  %v2267_v7 = vmax.f32 %v2203_v62, 0.0  ;;  %v2321_v42 = vpack.c.bf16 %v2262_v52, %v2261_v19 }
 0x246   : > { %v12535_v13 = vpop.f32.mrf.mxu0 }
 0x247   : > { %v2134_v50 = vmul.f32 %v12451_v61, %v2049_v27  ;;  %v2323_v45 = vpack.c.bf16 %v2266_v24, %v2265_v37  ;;  %v1435_v24 = vunpack.c.l.b16 %v1419_v18  ;;  %v2488_v51 = vunpack.c.l.b16 %v2321_v42 }
 0x248   : > { %v2489_v32 = vunpack.c.h.b16 %v2321_v42 }
 0x249   : > { %v2204_v31 = vadd.f32 %v12465_v33, %v2134_v50  ;;  %1823 = vmatmul.bf16.gmra.mxu0 %v1464_v26  ;;  %2001 = vmatmul.bf16.gmra.mxu2 %v1464_v26  ;;  %v2492_v15 = vunpack.c.l.b16 %v2323_v45  ;;  %v2493_v5 = vunpack.c.h.b16 %v2323_v45  ;;  %v2496_v26 = vpack.c.b16 %v2490_v11, %v2488_v51  ;;  %v12570_v45 = vpop.f32.mrf.mxu3 }
 0x24a   : > { %v12550_v16 = vpop.f32.mrf.mxu1  ;;  %v2497_v1 = vpack.c.b16 %v2491_v30, %v2489_v32  ;;  %v1437_v37 = vpack.c.b16 %v1435_v24, %v1434_v46  ;;  %9464 = vmatmul.msk.bf16.gmra.mxu1 %vm2390_vm1, %v12566_v58 }
 0x24b   : > { %v2268_v12 = vmax.f32 %v2204_v31, 0.0 }
 0x24c   : > { %v1962_v55 = vpop.f32.mrf.mxu2  ;;  %v1468_v52 = vsel %vm800_vm0, %v1437_v37, %v1451_v8 }
 0x24d   : > { %v2324_v38 = vpack.c.bf16 %v2268_v12, %v2267_v7  ;;  %v2052_v17 = vadd.f32 %v12404_v23, %v1962_v55 }
 0x24e   : > { %v1786_v49 = vpop.f32.mrf.mxu0 }
 0x24f   : > { %v2494_v9 = vunpack.c.l.b16 %v2324_v38  ;;  %v2495_v59 = vunpack.c.h.b16 %v2324_v38  ;;  %v1876_v42 = vadd.f32 %v12406_v25, %v1786_v49 }
 0x251   : > { %v2498_v14 = vpack.c.b16 %v2494_v9, %v2492_v15  ;;  %v2499_v27 = vpack.c.b16 %v2495_v59, %v2493_v5  ;;  %v1874_v9 = vadd.f32 %v12396_v60, %v12535_v13 }
 0x252   : > { %v12560_v62 = vpop.f32.mrf.mxu1 }
 0x253   : > { %2510 = vmatpush.bf16.msrb.mxu2 %v2498_v14  ;;  %2534 = vmatpush.bf16.msrb.mxu3 %v2499_v27  ;;  %v2135_v25 = vmul.f32 %v12456_v53, %v1874_v9  ;;  %v1542_v14 = vpop.permute.xlu2 %1541 }
 0x254   : > { %v1964_v50 = vpop.f32.mrf.mxu2 }
 0x255   : > { %v2054_v19 = vadd.f32 %v12412_v4, %v1964_v50  ;;  %v2205_v8 = vadd.f32 %v12472_v44, %v2135_v25 }
 0x256   : > { %v1789_v31 = vpop.f32.mrf.mxu0 }
 0x257   : > { %2511 = vmatpush.bf16.msrb.mxu2 %v2496_v26  ;;  %2535 = vmatpush.bf16.msrb.mxu3 %v2497_v1  ;;  %v1879_v38 = vadd.f32 %v12414_v35, %v1789_v31  ;;  %v2138_v59 = vmul.f32 %v12451_v61, %v2054_v19  ;;  %v2136_v35 = vmul.f32 %v12451_v61, %v2052_v17 }
 0x258   : > { %v14957_v26 = vpack.c.b16 %v12250_v36, %v12244_v28 }
 0x259   : > { %1828 = vmatmul.bf16.gmra.mxu0 %v1468_v52  ;;  %2006 = vmatmul.bf16.gmra.mxu2 %v1468_v52  ;;  %v2139_v4 = vmul.f32 %v12456_v53, %v1879_v38  ;;  %v2208_v60 = vadd.f32 %v12465_v33, %v2138_v59  ;;  %v2206_v11 = vadd.f32 %v12465_v33, %v2136_v35  ;;  %v12614_v52 = vld [vmem:[%s14867_s4 + $0x10] sm:$0xff] }
 0x25a   : > { %9469 = vmatmul.msk.bf16.vlgmr.msrb.gmra.mxu3 %vm2390_vm1, %v12548_v57  ;;  %v12574_v7 = vpop.f32.mrf.mxu1  ;;  %9465 = vmatmul.msk.bf16.gmra.mxu1 %vm2390_vm1, %v12614_v52 }
 0x25b   : > { %v2209_v13 = vadd.f32 %v12472_v44, %v2139_v4  ;;  %v2272_v1 = vmax.f32 %v2208_v60, 0.0 }
 0x25c   : > { %v1967_v12 = vpop.f32.mrf.mxu2 }
 0x25d   : > { %v2057_v56 = vadd.f32 %v12425_v21, %v1967_v12  ;;  %v2137_v21 = vmul.f32 %v12456_v53, %v1876_v42  ;;  %v2273_v37 = vmax.f32 %v2209_v13, 0.0  ;;  %v2270_v12 = vmax.f32 %v2206_v11, 0.0  ;;  %v1544_v11 = vpop.permute.xlu0 %1543 }
 0x25e   : > { %v1791_v18 = vpop.f32.mrf.mxu0 }
 0x25f   : > { %v2140_v15 = vmul.f32 %v12451_v61, %v2057_v56  ;;  %v1881_v5 = vadd.f32 %v12419_v20, %v1791_v18  ;;  %v12592_v20 = vpop.f32.mrf.mxu3  ;;  %v2207_v24 = vadd.f32 %v12472_v44, %v2137_v21  ;;  %v2269_v56 = vmax.f32 %v2205_v8, 0.0 }
 0x261   : > { %v2210_v23 = vadd.f32 %v12465_v33, %v2140_v15  ;;  %v2141_v55 = vmul.f32 %v12456_v53, %v1881_v5  ;;  %v2271_v19 = vmax.f32 %v2207_v24, 0.0  ;;  %v2325_v15 = vpack.c.bf16 %v2270_v12, %v2269_v56 }
 0x262   : > { %v12598_v30 = vpop.f32.mrf.mxu1 }
 0x263   : > { %v2274_v51 = vmax.f32 %v2210_v23, 0.0  ;;  %v2211_v32 = vadd.f32 %v12472_v44, %v2141_v55  ;;  %v2326_v42 = vpack.c.bf16 %v2272_v1, %v2271_v19  ;;  %v2592_v60 = vunpack.c.l.b16 %v2325_v15 }
 0x264   : > { %v1969_v49 = vpop.f32.mrf.mxu2  ;;  %v2593_v13 = vunpack.c.h.b16 %v2325_v15 }
 0x265   : > { %v2059_v27 = vadd.f32 %v12433_v41, %v1969_v49  ;;  %v1557_v41 = vsel %vm800_vm0, %v14957_v26, %v1542_v14  ;;  %v2327_v38 = vpack.c.bf16 %v2274_v51, %v2273_v37  ;;  %v2275_v28 = vmax.f32 %v2211_v32, 0.0 }
 0x266   : > { %v12600_v46 = vpop.f32.mrf.mxu0  ;;  %v2594_v49 = vunpack.c.l.b16 %v2326_v42  ;;  %v2595_v14 = vunpack.c.h.b16 %v2326_v42 }
 0x267   : > { %v2142_v50 = vmul.f32 %v12451_v61, %v2059_v27  ;;  %v12620_v9 = vpop.f32.mrf.mxu3  ;;  %v2596_v59 = vunpack.c.l.b16 %v2327_v38  ;;  %v2597_v4 = vunpack.c.h.b16 %v2327_v38 }
 0x268   : > { %v2600_v24 = vpack.c.b16 %v2594_v49, %v2592_v60  ;;  %v2601_v51 = vpack.c.b16 %v2595_v14, %v2593_v13 }
 0x269   : > { %v2212_v31 = vadd.f32 %v12465_v33, %v2142_v50  ;;  %1833 = vmatmul.bf16.gmra.mxu0 %v1557_v41  ;;  %2011 = vmatmul.bf16.gmra.mxu2 %v1557_v41  ;;  %v14958_v50 = vpack.c.b16 %v12270_v2, %v12264_v29 }
 0x26a   : > { %9470 = vmatmul.msk.bf16.gmra.mxu3 %vm2390_vm1, %v12566_v58  ;;  %v12622_v23 = vpop.f32.mrf.mxu1 }
 0x26b   : > { %v2276_v36 = vmax.f32 %v2212_v31, 0.0  ;;  %v1561_v8 = vsel %vm800_vm0, %v14958_v50, %v1544_v11  ;;  %vm5531_vm0 = vsmask.f32 256 }
 0x26c   : > { %v1972_v17 = vpop.f32.mrf.mxu2 }
 0x26d   : > { %v2328_v18 = vpack.c.bf16 %v2276_v36, %v2275_v28  ;;  %v2062_v2 = vadd.f32 %v12460_v54, %v1972_v17  ;;  %v1884_v36 = vadd.f32 %v12431_v34, %v12600_v46 }
 0x26e   : > { %v1796_v5 = vpop.f32.mrf.mxu0 }
 0x26f   : > { %v2598_v35 = vunpack.c.l.b16 %v2328_v18  ;;  %v2599_v21 = vunpack.c.h.b16 %v2328_v18  ;;  %v12628_v26 = vpop.f32.mrf.mxu3  ;;  %v1886_v19 = vadd.f32 %v12445_v47, %v1796_v5  ;;  %v2143_v17 = vmul.f32 %v12456_v53, %v1884_v36 }
 0x271   : > { %v2602_v55 = vpack.c.b16 %v2598_v35, %v2596_v59  ;;  %v2603_v25 = vpack.c.b16 %v2599_v21, %v2597_v4  ;;  %v2145_v54 = vmul.f32 %v12456_v53, %v1886_v19 }
 0x272   : > { %v12630_v41 = vpop.f32.mrf.mxu1 }
 0x273   : > { %2614 = vmatpush.bf16.msra.mxu0 %v2602_v55  ;;  %2638 = vmatpush.bf16.msra.mxu1 %v2603_v25  ;;  %v2215_v4 = vadd.f32 %v12472_v44, %v2145_v54  ;;  %v2213_v25 = vadd.f32 %v12472_v44, %v2143_v17 }
 0x274   : > { %v1974_v27 = vpop.f32.mrf.mxu2 }
 0x275   : > { %v2064_v37 = vadd.f32 %v12491_v0, %v1974_v27  ;;  %v2279_v13 = vmax.f32 %v2215_v4, 0.0 }
 0x276   : > { %v1799_v32 = vpop.f32.mrf.mxu0 }
 0x277   : > { %2615 = vmatpush.bf16.msra.mxu0 %v2600_v24  ;;  %2639 = vmatpush.bf16.msra.mxu1 %v2601_v51  ;;  %v1889_v31 = vadd.f32 %v12470_v63, %v1799_v32  ;;  %v2146_v56 = vmul.f32 %v12451_v61, %v2064_v37  ;;  %v2144_v63 = vmul.f32 %v12451_v61, %v2062_v2  ;;  %v12648_v18 = vpop.f32.mrf.mxu3  ;;  %v2277_v51 = vmax.f32 %v2213_v25, 0.0 }
 0x279   : > { %1838 = vmatmul.bf16.gmra.mxu0 %v1561_v8  ;;  %2016 = vmatmul.bf16.gmra.mxu2 %v1561_v8  ;;  %v2147_v0 = vmul.f32 %v12456_v53, %v1889_v31  ;;  %v2216_v34 = vadd.f32 %v12465_v33, %v2146_v56  ;;  %v2214_v5 = vadd.f32 %v12465_v33, %v2144_v63 }
 0x27a   : > { %9471 = vmatmul.msk.bf16.gmra.mxu3 %vm2390_vm1, %v12614_v52  ;;  %9475 = vmatmul.msk.bf16.vlgmr.msra.gmra.mxu1 %vm2390_vm1, %v12548_v57 }
 0x27b   : > { %v2217_v46 = vadd.f32 %v12472_v44, %v2147_v0  ;;  %v2280_v49 = vmax.f32 %v2216_v34, 0.0 }
 0x27c   : > { %v1977_v1 = vpop.f32.mrf.mxu2 }
 0x27d   : > { %v2067_v29 = vadd.f32 %v12502_v22, %v1977_v1  ;;  %v2281_v14 = vmax.f32 %v2217_v46, 0.0  ;;  %v2330_v1 = vpack.c.bf16 %v2280_v49, %v2279_v13 }
 0x27e   : > { %v1801_v12 = vpop.f32.mrf.mxu0 }
 0x27f   : > { %v2148_v38 = vmul.f32 %v12451_v61, %v2067_v29  ;;  %v1891_v28 = vadd.f32 %v12494_v3, %v1801_v12  ;;  %v12654_v3 = vpop.f32.mrf.mxu1  ;;  %v12671_v50 = vpop.f32.mrf.mxu3  ;;  %v2698_v56 = vunpack.c.l.b16 %v2330_v1  ;;  %v2699_v0 = vunpack.c.h.b16 %v2330_v1 }
 0x281   : > { %v2218_v22 = vadd.f32 %v12465_v33, %v2148_v38  ;;  %v2149_v47 = vmul.f32 %v12456_v53, %v1891_v28 }
 0x283   : > { %v2282_v35 = vmax.f32 %v2218_v22, 0.0  ;;  %v2219_v21 = vadd.f32 %v12472_v44, %v2149_v47 }
 0x284   : > { %v1979_v42 = vpop.f32.mrf.mxu2 }
 0x285   : > { %v2069_v15 = vadd.f32 %v12507_v43, %v1979_v42  ;;  %v2278_v43 = vmax.f32 %v2214_v5, 0.0  ;;  %v2331_v27 = vpack.c.bf16 %v2282_v35, %v2281_v14  ;;  %v2283_v11 = vmax.f32 %v2219_v21, 0.0 }
 0x286   : > { %v1804_v59 = vpop.f32.mrf.mxu0 }
 0x287   : > { %v2150_v55 = vmul.f32 %v12451_v61, %v2069_v15  ;;  %v2329_v37 = vpack.c.bf16 %v2278_v43, %v2277_v51  ;;  %v12673_v31 = vpop.f32.mrf.mxu1  ;;  %v2700_v2 = vunpack.c.l.b16 %v2331_v27  ;;  %v2701_v12 = vunpack.c.h.b16 %v2331_v27  ;;  %v12675_v34 = vpop.f32.mrf.mxu3 }
 0x289   : > { %v2220_v60 = vadd.f32 %v12465_v33, %v2150_v55  ;;  %9460 = vmatmul.msk.bf16.vlgmr.msrb.gmra.mxu0 %vm2390_vm1, %v12548_v57  ;;  %9466 = vmatmul.msk.bf16.vlgmr.msrb.gmra.mxu2 %vm2390_vm1, %v12548_v57  ;;  %v2696_v63 = vunpack.c.l.b16 %v2329_v37  ;;  %v2697_v54 = vunpack.c.h.b16 %v2329_v37 }
 0x28a   : > { %9476 = vmatmul.msk.bf16.gmra.mxu1 %vm2390_vm1, %v12566_v58 }
 0x28b   : > { %v2284_v24 = vmax.f32 %v2220_v60, 0.0  ;;  %v2704_v47 = vpack.c.b16 %v2698_v56, %v2696_v63  ;;  %v2705_v17 = vpack.c.b16 %v2699_v0, %v2697_v54  ;;  %v1894_v60 = vadd.f32 %v12500_v6, %v1804_v59 }
 0x28c   : > { %v1982_v32 = vpop.f32.mrf.mxu2 }
 0x28d   : > { %v2332_v8 = vpack.c.bf16 %v2284_v24, %v2283_v11  ;;  %v2072_v21 = vadd.f32 %v12538_v10, %v1982_v32 }
 0x28e   : > { %v1806_v29 = vpop.f32.mrf.mxu0 }
 0x28f   : > { %v2702_v19 = vunpack.c.l.b16 %v2332_v8  ;;  %v2703_v38 = vunpack.c.h.b16 %v2332_v8  ;;  %v12677_v46 = vpop.f32.mrf.mxu1  ;;  %v1896_v25 = vadd.f32 %v12505_v40, %v1806_v29  ;;  %v12695_v43 = vpop.f32.mrf.mxu3 }
 0x291   : > { %v2706_v28 = vpack.c.b16 %v2702_v19, %v2700_v2  ;;  %v2707_v36 = vpack.c.b16 %v2703_v38, %v2701_v12  ;;  %v2153_v10 = vmul.f32 %v12456_v53, %v1896_v25 }
 0x293   : > { %2718 = vmatpush.bf16.msra.mxu2 %v2706_v28  ;;  %2742 = vmatpush.bf16.msra.mxu3 %v2707_v36  ;;  %v2223_v8 = vadd.f32 %v12472_v44, %v2153_v10 }
 0x294   : > { %v1984_v22 = vpop.f32.mrf.mxu2 }
 0x295   : > { %v2074_v5 = vadd.f32 %v12558_v39, %v1984_v22  ;;  %v2287_v36 = vmax.f32 %v2223_v8, 0.0 }
 0x296   : > { %v1809_v42 = vpop.f32.mrf.mxu0 }
 0x297   : > { %2719 = vmatpush.bf16.msra.mxu2 %v2704_v47  ;;  %2743 = vmatpush.bf16.msra.mxu3 %v2705_v17  ;;  %v1899_v4 = vadd.f32 %v12525_v48, %v1809_v42  ;;  %v2154_v13 = vmul.f32 %v12451_v61, %v2074_v5  ;;  %v2152_v48 = vmul.f32 %v12451_v61, %v2072_v21  ;;  %v12721_v28 = vpop.f32.mrf.mxu3 }
 0x299   : > { %9461 = vmatmul.msk.bf16.gmra.mxu0 %vm2390_vm1, %v12566_v58  ;;  %9467 = vmatmul.msk.bf16.gmra.mxu2 %vm2390_vm1, %v12566_v58  ;;  %v2155_v39 = vmul.f32 %v12456_v53, %v1899_v4  ;;  %v2224_v6 = vadd.f32 %v12465_v33, %v2154_v13  ;;  %v2222_v51 = vadd.f32 %v12465_v33, %v2152_v48 }
 0x29a   : > { %9481 = vmatmul.msk.bf16.vlgmr.msra.gmra.mxu3 %vm2390_vm1, %v12548_v57  ;;  %9477 = vmatmul.msk.bf16.gmra.mxu1 %vm2390_vm1, %v12614_v52 }
 0x29b   : > { %v2225_v59 = vadd.f32 %v12472_v44, %v2155_v39  ;;  %v2288_v12 = vmax.f32 %v2224_v6, 0.0 }
 0x29c   : > { %v1987_v15 = vpop.f32.mrf.mxu2 }
 0x29d   : > { %v2077_v35 = vadd.f32 %v12570_v45, %v1987_v15  ;;  %v12700_v45 = vpop.f32.mrf.mxu1  ;;  %v2289_v19 = vmax.f32 %v2225_v59, 0.0  ;;  %v2334_v42 = vpack.c.bf16 %v2288_v12, %v2287_v36 }
 0x29e   : > { %v1811_v55 = vpop.f32.mrf.mxu0 }
 0x29f   : > { %v2156_v49 = vmul.f32 %v12451_v61, %v2077_v35  ;;  %v1901_v14 = vadd.f32 %v12550_v16, %v1811_v55  ;;  %v2151_v16 = vmul.f32 %v12456_v53, %v1894_v60  ;;  %v2803_v60 = vunpack.c.h.b16 %v2334_v42  ;;  %v12725_v10 = vpop.f32.mrf.mxu3 }
 0x2a1   : > { %v2226_v40 = vadd.f32 %v12465_v33, %v2156_v49  ;;  %v2157_v27 = vmul.f32 %v12456_v53, %v1901_v14  ;;  %v2221_v2 = vadd.f32 %v12472_v44, %v2151_v16  ;;  %v2802_v14 = vunpack.c.l.b16 %v2334_v42 }
 0x2a3   : > { %v2290_v1 = vmax.f32 %v2226_v40, 0.0  ;;  %v2227_v37 = vadd.f32 %v12472_v44, %v2157_v27  ;;  %v2285_v54 = vmax.f32 %v2221_v2, 0.0 }
 0x2a4   : > { %v1989_v11 = vpop.f32.mrf.mxu2 }
 0x2a5   : > { %v2079_v24 = vadd.f32 %v12592_v20, %v1989_v11  ;;  %v2286_v20 = vmax.f32 %v2222_v51, 0.0  ;;  %v2335_v56 = vpack.c.bf16 %v2290_v1, %v2289_v19  ;;  %v2291_v0 = vmax.f32 %v2227_v37, 0.0  ;;  %v12723_v22 = vpop.f32.mrf.mxu1 }
 0x2a6   : > { %v1814_v32 = vpop.f32.mrf.mxu0 }
 0x2a7   : > { %v2158_v29 = vmul.f32 %v12451_v61, %v2079_v24  ;;  %v2333_v15 = vpack.c.bf16 %v2286_v20, %v2285_v54  ;;  %v2804_v4 = vunpack.c.l.b16 %v2335_v56  ;;  %v2805_v35 = vunpack.c.h.b16 %v2335_v56  ;;  %v12741_v37 = vpop.f32.mrf.mxu3 }
 0x2a8   : > { %v1904_v19 = vadd.f32 %v12560_v62, %v1814_v32 }
 0x2a9   : > { %v2228_v38 = vadd.f32 %v12465_v33, %v2158_v29  ;;  %9462 = vmatmul.msk.bf16.gmra.mxu0 %vm2390_vm1, %v12614_v52  ;;  %9468 = vmatmul.msk.bf16.gmra.mxu2 %vm2390_vm1, %v12614_v52  ;;  %v2800_v13 = vunpack.c.l.b16 %v2333_v15  ;;  %v2801_v39 = vunpack.c.h.b16 %v2333_v15 }
 0x2aa   : > { %9482 = vmatmul.msk.bf16.gmra.mxu3 %vm2390_vm1, %v12566_v58  ;;  %v2159_v36 = vmul.f32 %v12456_v53, %v1904_v19 }
 0x2ab   : > { %v2292_v63 = vmax.f32 %v2228_v38, 0.0  ;;  %v2808_v40 = vpack.c.b16 %v2802_v14, %v2800_v13  ;;  %v2809_v27 = vpack.c.b16 %v2803_v60, %v2801_v39 }
 0x2ac   : > { %v1992_v47 = vpop.f32.mrf.mxu2  ;;  %v2229_v15 = vadd.f32 %v12472_v44, %v2159_v36 }
 0x2ad   : > { %v2336_v17 = vpack.c.bf16 %v2292_v63, %v2291_v0  ;;  %v12727_v16 = vpop.f32.mrf.mxu1  ;;  %v2082_v8 = vadd.f32 %v12620_v9, %v1992_v47 }
 0x2ae   : > { %v1816_v5 = vpop.f32.mrf.mxu0  ;;  %v2293_v13 = vmax.f32 %v2229_v15, 0.0 }
 0x2af   : > { %v2806_v21 = vunpack.c.l.b16 %v2336_v17  ;;  %v2807_v55 = vunpack.c.h.b16 %v2336_v17  ;;  %v1906_v29 = vadd.f32 %v12574_v7, %v1816_v5 }
 0x2b1   : > { %v2810_v25 = vpack.c.b16 %v2806_v21, %v2804_v4  ;;  %v2811_v49 = vpack.c.b16 %v2807_v55, %v2805_v35  ;;  %v2161_v9 = vmul.f32 %v12456_v53, %v1906_v29  ;;  %v12766_v4 = vpop.f32.mrf.mxu3 }
 0x2b3   : > { %2822 = vmatpush.bf16.msrb.mxu0 %v2810_v25  ;;  %2846 = vmatpush.bf16.msrb.mxu1 %v2811_v49  ;;  %v2231_v54 = vadd.f32 %v12472_v44, %v2161_v9 }
 0x2b4   : > { %v1994_v48 = vpop.f32.mrf.mxu2 }
 0x2b5   : > { %v2084_v59 = vadd.f32 %v12628_v26, %v1994_v48  ;;  %v12747_v38 = vpop.f32.mrf.mxu1  ;;  %v2295_v25 = vmax.f32 %v2231_v54, 0.0 }
 0x2b6   : > { %v1819_v11 = vpop.f32.mrf.mxu0 }
 0x2b7   : > { %2823 = vmatpush.bf16.msrb.mxu0 %v2808_v40  ;;  %2847 = vmatpush.bf16.msrb.mxu1 %v2809_v27  ;;  %v1909_v24 = vadd.f32 %v12598_v30, %v1819_v11  ;;  %v2162_v26 = vmul.f32 %v12451_v61, %v2084_v59 }
 0x2b9   : > { %9472 = vmatmul.msk.bf16.vlgmr.msra.gmra.mxu0 %vm2390_vm1, %v12548_v57  ;;  %9478 = vmatmul.msk.bf16.vlgmr.msra.gmra.mxu2 %vm2390_vm1, %v12548_v57  ;;  %v2163_v30 = vmul.f32 %v12456_v53, %v1909_v24  ;;  %v12777_v19 = vpop.f32.mrf.mxu3 }
 0x2ba   : > { %9483 = vmatmul.msk.bf16.gmra.mxu3 %vm2390_vm1, %v12614_v52  ;;  %9487 = vmatmul.msk.bf16.vlgmr.msrb.gmra.mxu1 %vm2390_vm1, %v12548_v57 }
 0x2bb   : > { %v2233_v62 = vadd.f32 %v12472_v44, %v2163_v30 }
 0x2bc   : > { %v1997_v6 = vpop.f32.mrf.mxu2 }
 0x2bd   : > { %v2087_v51 = vadd.f32 %v12648_v18, %v1997_v6  ;;  %v2160_v18 = vmul.f32 %v12451_v61, %v2082_v8  ;;  %v12764_v5 = vpop.f32.mrf.mxu1  ;;  %v2297_v21 = vmax.f32 %v2233_v62, 0.0 }
 0x2be   : > { %v1821_v1 = vpop.f32.mrf.mxu0 }
 0x2bf   : > { %v2164_v2 = vmul.f32 %v12451_v61, %v2087_v51  ;;  %v1911_v12 = vadd.f32 %v12622_v23, %v1821_v1  ;;  %v2232_v23 = vadd.f32 %v12465_v33, %v2162_v26  ;;  %v2230_v0 = vadd.f32 %v12465_v33, %v2160_v18 }
 0x2c1   : > { %v2234_v20 = vadd.f32 %v12465_v33, %v2164_v2  ;;  %v2165_v7 = vmul.f32 %v12456_v53, %v1911_v12  ;;  %v2296_v35 = vmax.f32 %v2232_v23, 0.0  ;;  %v2294_v55 = vmax.f32 %v2230_v0, 0.0  ;;  %v12789_v23 = vpop.f32.mrf.mxu3 }
 0x2c3   : > { %v2298_v47 = vmax.f32 %v2234_v20, 0.0  ;;  %v2235_v17 = vadd.f32 %v12472_v44, %v2165_v7  ;;  %v2338_v40 = vpack.c.bf16 %v2296_v35, %v2295_v25  ;;  %v2337_v27 = vpack.c.bf16 %v2294_v55, %v2293_v13 }
 0x2c4   : > { %v1999_v56 = vpop.f32.mrf.mxu2 }
 0x2c5   : > { %v2089_v32 = vadd.f32 %v12671_v50, %v1999_v56  ;;  %v2339_v49 = vpack.c.bf16 %v2298_v47, %v2297_v21  ;;  %v2299_v14 = vmax.f32 %v2235_v17, 0.0  ;;  %v12775_v8 = vpop.f32.mrf.mxu1  ;;  %v2906_v2 = vunpack.c.l.b16 %v2338_v40 }
 0x2c6   : > { %v1824_v63 = vpop.f32.mrf.mxu0  ;;  %v2907_v12 = vunpack.c.h.b16 %v2338_v40  ;;  %v2904_v26 = vunpack.c.l.b16 %v2337_v27  ;;  %v2905_v30 = vunpack.c.h.b16 %v2337_v27 }
 0x2c7   : > { %v2166_v42 = vmul.f32 %v12451_v61, %v2089_v32  ;;  %v2908_v6 = vunpack.c.l.b16 %v2339_v49  ;;  %v2909_v59 = vunpack.c.h.b16 %v2339_v49  ;;  %v1914_v35 = vadd.f32 %v12630_v41, %v1824_v63 }
 0x2c8   : > { %v2912_v9 = vpack.c.b16 %v2906_v2, %v2904_v26  ;;  %v2913_v20 = vpack.c.b16 %v2907_v12, %v2905_v30 }
 0x2c9   : > { %v2236_v50 = vadd.f32 %v12465_v33, %v2166_v42  ;;  %9473 = vmatmul.msk.bf16.gmra.mxu0 %vm2390_vm1, %v12566_v58  ;;  %9479 = vmatmul.msk.bf16.gmra.mxu2 %vm2390_vm1, %v12566_v58  ;;  %v2167_v55 = vmul.f32 %v12456_v53, %v1914_v35  ;;  %v9630_v35 = vld [vmem:[#allocation7 + $0xf0] sm:$0xf] }
 0x2ca   : > { %9488 = vmatmul.msk.bf16.gmra.mxu1 %vm2390_vm1, %v12566_v58 }
 0x2cb   : > { %v2300_v60 = vmax.f32 %v2236_v50, 0.0  ;;  %v2237_v27 = vadd.f32 %v12472_v44, %v2167_v55 }
 0x2cc   : > { %v2002_v39 = vpop.f32.mrf.mxu2 }
 0x2cd   : > { %v2340_v48 = vpack.c.bf16 %v2300_v60, %v2299_v14  ;;  %v12779_v36 = vpop.f32.mrf.mxu1  ;;  %v2092_v54 = vadd.f32 %v12675_v34, %v2002_v39  ;;  %v2301_v2 = vmax.f32 %v2237_v27, 0.0  ;;  %v11024_v27 = vld [vmem:[#allocation7 + $0xd4] sm:$0xf0] }
 0x2ce   : > { %v1826_v11 = vpop.f32.mrf.mxu0 }
 0x2cf   : > { %v2910_v24 = vunpack.c.l.b16 %v2340_v48  ;;  %v2911_v51 = vunpack.c.h.b16 %v2340_v48  ;;  %v1916_v17 = vadd.f32 %v12654_v3, %v1826_v11 }
 0x2d1   : > { %v2914_v1 = vpack.c.b16 %v2910_v24, %v2908_v6  ;;  %v2915_v29 = vpack.c.b16 %v2911_v51, %v2909_v59 }
 0x2d3   : > { %2926 = vmatpush.bf16.msrb.mxu2 %v2914_v1  ;;  %2950 = vmatpush.bf16.msrb.mxu3 %v2915_v29 }
 0x2d4   : > { %v2004_v18 = vpop.f32.mrf.mxu2 }
 0x2d5   : > { %v2094_v62 = vadd.f32 %v12695_v43, %v2004_v18  ;;  %v2168_v43 = vmul.f32 %v12451_v61, %v2092_v54 }
 0x2d6   : > { %v1829_v7 = vpop.f32.mrf.mxu0 }
 0x2d7   : > { %2927 = vmatpush.bf16.msrb.mxu2 %v2912_v9  ;;  %2951 = vmatpush.bf16.msrb.mxu3 %v2913_v20  ;;  %v1919_v32 = vadd.f32 %v12673_v31, %v1829_v7  ;;  %v2170_v21 = vmul.f32 %v12451_v61, %v2094_v62  ;;  %v12802_v31 = vpop.f32.mrf.mxu1  ;;  %v2238_v14 = vadd.f32 %v12465_v33, %v2168_v43 }
 0x2d9   : > { %9474 = vmatmul.msk.bf16.gmra.mxu0 %vm2390_vm1, %v12614_v52  ;;  %9480 = vmatmul.msk.bf16.gmra.mxu2 %vm2390_vm1, %v12614_v52  ;;  %v2171_v50 = vmul.f32 %v12456_v53, %v1919_v32 }
 0x2da   : > { %9493 = vmatmul.msk.bf16.vlgmr.msrb.gmra.mxu3 %vm2390_vm1, %v12548_v57  ;;  %9489 = vmatmul.msk.bf16.gmra.mxu1 %vm2390_vm1, %v12614_v52 }
 0x2db   : > { %v2241_v41 = vadd.f32 %v12472_v44, %v2171_v50 }
 0x2dc   : > { %v2007_v56 = vpop.f32.mrf.mxu2 }
 0x2dd   : > { %v2097_v0 = vadd.f32 %v12721_v28, %v2007_v56  ;;  %v2169_v28 = vmul.f32 %v12456_v53, %v1916_v17  ;;  %v12811_v49 = vpop.f32.mrf.mxu3  ;;  %v2305_v6 = vmax.f32 %v2241_v41, 0.0  ;;  %v11026_v41 = vld [vmem:[#allocation7 + $0xe4] sm:$0xf0] }
 0x2de   : > { %v1831_v47 = vpop.f32.mrf.mxu0 }
 0x2df   : > { %v2172_v42 = vmul.f32 %v12451_v61, %v2097_v0  ;;  %v1921_v15 = vadd.f32 %v12677_v46, %v1831_v47  ;;  %v2240_v46 = vadd.f32 %v12465_v33, %v2170_v21  ;;  %v2239_v13 = vadd.f32 %v12472_v44, %v2169_v28  ;;  %v12827_v26 = vpop.f32.mrf.mxu1  ;;  %v11028_v21 = vld [vmem:[#allocation7 + $0xf4] sm:$0xf0] }
 0x2e0   : > { %v9631_v55 = vor.u32 %v11028_v21, %v9630_v35  ;;  %v9542_v35 = vld [vmem:[#allocation7 + $0x40] sm:$0xf]  ;;  %v11006_v21 = vld [vmem:[#allocation7 + $0x44] sm:$0xf0] }
 0x2e1   : > { %v2242_v34 = vadd.f32 %v12465_v33, %v2172_v42  ;;  %v2173_v3 = vmul.f32 %v12456_v53, %v1921_v15  ;;  %v2304_v11 = vmax.f32 %v2240_v46, 0.0  ;;  %v2303_v24 = vmax.f32 %v2239_v13, 0.0  ;;  %v9622_v46 = vld [vmem:[#allocation7 + $0xe0] sm:$0xf] }
 0x2e3   : > { %v2306_v39 = vmax.f32 %v2242_v34, 0.0  ;;  %v2243_v48 = vadd.f32 %v12472_v44, %v2173_v3  ;;  %v2342_v18 = vpack.c.bf16 %v2304_v11, %v2303_v24 }
 0x2e4   : > { %v2009_v25 = vpop.f32.mrf.mxu2 }
 0x2e5   : > { %v2099_v63 = vadd.f32 %v12725_v10, %v2009_v25  ;;  %v2302_v10 = vmax.f32 %v2238_v14, 0.0  ;;  %v2343_v51 = vpack.c.bf16 %v2306_v39, %v2305_v6  ;;  %v2307_v1 = vmax.f32 %v2243_v48, 0.0  ;;  %v12829_v0 = vpop.f32.mrf.mxu3  ;;  %v11012_v14 = vld [vmem:[#allocation7 + $0x74] sm:$0xf0]  ;;  %v9558_v6 = vld [vmem:[#allocation7 + $0x60] sm:$0xf] }
 0x2e6   : > { %v12814_v60 = vpop.f32.mrf.mxu0  ;;  %v3010_v17 = vunpack.c.l.b16 %v2342_v18  ;;  %v3011_v42 = vunpack.c.h.b16 %v2342_v18  ;;  %v9623_v48 = vor.u32 %v11026_v41, %v9622_v46 }
 0x2e7   : > { %v2174_v40 = vmul.f32 %v12451_v61, %v2099_v63  ;;  %v2341_v9 = vpack.c.bf16 %v2302_v10, %v2301_v2  ;;  %v3012_v7 = vunpack.c.l.b16 %v2343_v51  ;;  %v3013_v56 = vunpack.c.h.b16 %v2343_v51  ;;  %v12831_v25 = vpop.f32.mrf.mxu1  ;;  %v9566_v63 = vld [vmem:[#allocation7 + $0x70] sm:$0xf] }
 0x2e8   : > { %v9567_v39 = vor.u32 %v11012_v14, %v9566_v63 }
 0x2e9   : > { %v2244_v59 = vadd.f32 %v12465_v33, %v2174_v40  ;;  %9484 = vmatmul.msk.bf16.vlgmr.msrb.gmra.mxu0 %vm2390_vm1, %v12548_v57  ;;  %9490 = vmatmul.msk.bf16.vlgmr.msrb.gmra.mxu2 %vm2390_vm1, %v12548_v57  ;;  %v3008_v15 = vunpack.c.l.b16 %v2341_v9  ;;  %v3009_v43 = vunpack.c.h.b16 %v2341_v9  ;;  %v9614_v40 = vld [vmem:[#allocation7 + $0xd0] sm:$0xf] }
 0x2ea   : > { %9494 = vmatmul.msk.bf16.gmra.mxu3 %vm2390_vm1, %v12566_v58 }
 0x2eb   : > { %v2308_v29 = vmax.f32 %v2244_v59, 0.0  ;;  %v3016_v28 = vpack.c.b16 %v3010_v17, %v3008_v15  ;;  %v3017_v3 = vpack.c.b16 %v3011_v42, %v3009_v43  ;;  %v11010_v59 = vld [vmem:[#allocation7 + $0x64] sm:$0xf0]  ;;  %v11020_v17 = vld [vmem:[#allocation7 + $0xb4] sm:$0xf0] }
 0x2ec   : > { %v2012_v12 = vpop.f32.mrf.mxu2 }
 0x2ed   : > { %v2344_v30 = vpack.c.bf16 %v2308_v29, %v2307_v1  ;;  %v12837_v13 = vpop.f32.mrf.mxu3  ;;  %v9559_v1 = vor.u32 %v11010_v59, %v9558_v6  ;;  %v2102_v29 = vadd.f32 %v12741_v37, %v2012_v12 }
 0x2ee   : > { %v1836_v20 = vpop.f32.mrf.mxu0 }
 0x2ef   : > { %v3014_v62 = vunpack.c.l.b16 %v2344_v30  ;;  %v3015_v32 = vunpack.c.h.b16 %v2344_v30  ;;  %v1926_v2 = vadd.f32 %v12723_v22, %v1836_v20  ;;  %v2176_v12 = vmul.f32 %v12451_v61, %v2102_v29 }
 0x2f1   : > { %v3018_v54 = vpack.c.b16 %v3014_v62, %v3012_v7  ;;  %v3019_v47 = vpack.c.b16 %v3015_v32, %v3013_v56  ;;  %v9606_v7 = vld [vmem:[#allocation7 + $0xc0] sm:$0xf]  ;;  %v11022_v56 = vld [vmem:[#allocation7 + $0xc4] sm:$0xf0]  ;;  %v2177_v20 = vmul.f32 %v12456_v53, %v1926_v2 }
 0x2f3   : > { %3030 = vmatpush.bf16.msra.mxu0 %v3018_v54  ;;  %11343 = vmatpush.bf16.msra.mxu3 %v3018_v54 }
 0x2f4   : > { %3054 = vmatpush.bf16.msra.mxu1 %v3019_v47  ;;  %v2014_v50 = vpop.f32.mrf.mxu2 }
 0x2f5   : > { %v2104_v10 = vadd.f32 %v12766_v4, %v2014_v50  ;;  %v9550_v4 = vld [vmem:[#allocation7 + $0x50] sm:$0xf] }
 0x2f6   : > { %v1839_v34 = vpop.f32.mrf.mxu0 }
 0x2f7   : > { %3031 = vmatpush.bf16.msra.mxu0 %v3016_v28  ;;  %11344 = vmatpush.bf16.msra.mxu3 %v3016_v28  ;;  %v1929_v24 = vadd.f32 %v12727_v16, %v1839_v34  ;;  %v1924_v16 = vadd.f32 %v12700_v45, %v12814_v60  ;;  %v12852_v62 = vpop.f32.mrf.mxu1  ;;  %v2178_v37 = vmul.f32 %v12451_v61, %v2104_v10  ;;  %v12860_v45 = vpop.f32.mrf.mxu3  ;;  %v9598_v60 = vld [vmem:[#allocation7 + $0xb0] sm:$0xf] }
 0x2f8   : > { %3055 = vmatpush.bf16.msra.mxu1 %v3017_v3  ;;  %v9543_v34 = vor.u32 %v11006_v21, %v9542_v35  ;;  %v2246_v3 = vadd.f32 %v12465_v33, %v2176_v12  ;;  %v9599_v41 = vor.u32 %v11020_v17, %v9598_v60  ;;  %v9518_v60 = vld [vmem:[#allocation7 + $0x10] sm:$0xf]  ;;  %v11000_v17 = vld [vmem:[#allocation7 + $0x14] sm:$0xf0] }
 0x2f9   : > { %9485 = vmatmul.msk.bf16.gmra.mxu0 %vm2390_vm1, %v12566_v58  ;;  %9491 = vmatmul.msk.bf16.gmra.mxu2 %vm2390_vm1, %v12566_v58  ;;  %v2179_v22 = vmul.f32 %v12456_v53, %v1929_v24  ;;  %v2175_v42 = vmul.f32 %v12456_v53, %v1924_v16  ;;  %v2248_v50 = vadd.f32 %v12465_v33, %v2178_v37  ;;  %v9694_v35 = vld [vmem:[#allocation7 + $0x170] sm:$0xf]  ;;  %v11044_v21 = vld [vmem:[#allocation7 + $0x174] sm:$0xf0] }
 0x2fa   : > { %9495 = vmatmul.msk.bf16.gmra.mxu3 %vm2390_vm1, %v12614_v52  ;;  %v2310_v24 = vmax.f32 %v2246_v3, 0.0  ;;  %v11060_v3 = vld [vmem:[#allocation7 + $0x1f4] sm:$0xf0] }
 0x2fb   : > { %9499 = vmatmul.msk.bf16.vlgmr.msra.gmra.mxu1 %vm2390_vm1, %v12548_v57  ;;  %3788 = vmatpush.bf16.msrb.mxu0 %v9567_v39  ;;  %v9615_v57 = vor.u32 %v11024_v27, %v9614_v40  ;;  %v2249_v43 = vadd.f32 %v12472_v44, %v2179_v22  ;;  %v9590_v39 = vld [vmem:[#allocation7 + $0xa0] sm:$0xf]  ;;  %v2245_v40 = vadd.f32 %v12472_v44, %v2175_v42  ;;  %v11004_v27 = vld [vmem:[#allocation7 + $0x34] sm:$0xf0] }
 0x2fc   : > { %3837 = vmatpush.bf16.msrb.mxu1 %v9631_v55  ;;  %v2017_v11 = vpop.f32.mrf.mxu2  ;;  %v2247_v55 = vadd.f32 %v12472_v44, %v2177_v20 }
 0x2fd   : > { %v2107_v51 = vadd.f32 %v12777_v19, %v2017_v11  ;;  %v11008_v19 = vld [vmem:[#allocation7 + $0x54] sm:$0xf0]  ;;  %v2312_v11 = vmax.f32 %v2248_v50, 0.0  ;;  %v2313_v6 = vmax.f32 %v2249_v43, 0.0  ;;  %v9519_v50 = vor.u32 %v11000_v17, %v9518_v60  ;;  %v9662_v17 = vld [vmem:[#allocation7 + $0x130] sm:$0xf] }
 0x2fe   : > { %v1841_v30 = vpop.f32.mrf.mxu0  ;;  %v9551_v32 = vor.u32 %v11008_v19, %v9550_v4 }
 0x2ff   : > { %v2180_v18 = vmul.f32 %v12451_v61, %v2107_v51  ;;  %v1931_v9 = vadd.f32 %v12747_v38, %v1841_v30  ;;  %3789 = vmatpush.bf16.msrb.mxu0 %v9559_v1  ;;  %v9607_v38 = vor.u32 %v11022_v56, %v9606_v7  ;;  %v11016_v30 = vld [vmem:[#allocation7 + $0x94] sm:$0xf0]  ;;  %v2309_v7 = vmax.f32 %v2245_v40, 0.0  ;;  %v12886_v4 = vpop.f32.mrf.mxu3  ;;  %v10998_v40 = vld [vmem:[#allocation7 + $0x4] sm:$0xf0] }
 0x300   : > { %3838 = vmatpush.bf16.msrb.mxu1 %v9623_v48  ;;  %v11018_v48 = vld [vmem:[#allocation7 + $0xa4] sm:$0xf0] }
 0x301   : > { %v2250_v54 = vadd.f32 %v12465_v33, %v2180_v18  ;;  %v2181_v47 = vmul.f32 %v12456_v53, %v1931_v9  ;;  %v9591_v51 = vor.u32 %v11018_v48, %v9590_v39  ;;  %v9526_v18 = vld [vmem:[#allocation7 + $0x20] sm:$0xf]  ;;  %v11002_v9 = vld [vmem:[#allocation7 + $0x24] sm:$0xf0]  ;;  %v2345_v12 = vpack.c.bf16 %v2310_v24, %v2309_v7  ;;  %v11056_v7 = vld [vmem:[#allocation7 + $0x1d4] sm:$0xf0] }
 0x302   : > { %v9527_v19 = vor.u32 %v11002_v9, %v9526_v18  ;;  %v9510_v48 = vld [vmem:[#allocation7] sm:$0xf]  ;;  %v11040_v18 = vld [vmem:[#allocation7 + $0x154] sm:$0xf0]  ;;  %v9742_v9 = vld [vmem:[#allocation7 + $0x1d0] sm:$0xf] }
 0x303   : > { %3790 = vmatpush.bf16.msrb.mxu0 %v9551_v32  ;;  %v2314_v53 = vmax.f32 %v2250_v54, 0.0  ;;  %v2251_v63 = vadd.f32 %v12472_v44, %v2181_v47  ;;  %v12880_v44 = vpop.f32.mrf.mxu1  ;;  %v9574_v32 = vld [vmem:[#allocation7 + $0x80] sm:$0xf] }
 0x304   : > { %3839 = vmatpush.bf16.msrb.mxu1 %v9615_v57  ;;  %v2019_v15 = vpop.f32.mrf.mxu2  ;;  %v9750_v24 = vld [vmem:[#allocation7 + $0x1e0] sm:$0xf] }
 0x305   : > { %v2109_v28 = vadd.f32 %v12789_v23, %v2019_v15  ;;  %v9534_v23 = vld [vmem:[#allocation7 + $0x30] sm:$0xf]  ;;  %v2347_v1 = vpack.c.bf16 %v2314_v53, %v2313_v6  ;;  %v2315_v29 = vmax.f32 %v2251_v63, 0.0  ;;  %v3113_v63 = vunpack.c.h.b16 %v2345_v12  ;;  %v11042_v6 = vld [vmem:[#allocation7 + $0x164] sm:$0xf0] }
 0x306   : > { %v12868_v46 = vpop.f32.mrf.mxu0  ;;  %v9535_v10 = vor.u32 %v11004_v27, %v9534_v23 }
 0x307   : > { %v2182_v14 = vmul.f32 %v12451_v61, %v2109_v28  ;;  %3791 = vmatpush.bf16.msrb.mxu0 %v9543_v34  ;;  %v2311_v61 = vmax.f32 %v2247_v55, 0.0  ;;  %v3116_v20 = vunpack.c.l.b16 %v2347_v1  ;;  %v3117_v54 = vunpack.c.h.b16 %v2347_v1  ;;  %v9758_v34 = vld [vmem:[#allocation7 + $0x1f0] sm:$0xf]  ;;  %v12896_v1 = vpop.f32.mrf.mxu3 }
 0x308   : > { %3840 = vmatpush.bf16.msrb.mxu1 %v9607_v38  ;;  %v11014_v38 = vld [vmem:[#allocation7 + $0x84] sm:$0xf0]  ;;  %v9759_v27 = vor.u32 %v11060_v3, %v9758_v34 }
 0x309   : > { %v2252_v59 = vadd.f32 %v12465_v33, %v2182_v14  ;;  %9486 = vmatmul.msk.bf16.gmra.mxu0 %vm2390_vm1, %v12614_v52  ;;  %9492 = vmatmul.msk.bf16.gmra.mxu2 %vm2390_vm1, %v12614_v52  ;;  %v9582_v33 = vld [vmem:[#allocation7 + $0x90] sm:$0xf]  ;;  %v2346_v16 = vpack.c.bf16 %v2312_v11, %v2311_v61  ;;  %v9575_v55 = vor.u32 %v11014_v38, %v9574_v32  ;;  %v9686_v11 = vld [vmem:[#allocation7 + $0x160] sm:$0xf]  ;;  %v11058_v61 = vld [vmem:[#allocation7 + $0x1e4] sm:$0xf0] }
 0x30a   : > { %9498 = vmatmul.msk.bf16.vlgmr.msra.gmra.mxu3 %vm2390_vm1, %v12614_v52  ;;  %v9583_v22 = vor.u32 %v11016_v30, %v9582_v33  ;;  %v9695_v14 = vor.u32 %v11044_v21, %v9694_v35  ;;  %v9751_v33 = vor.u32 %v11058_v61, %v9750_v24  ;;  %v9678_v30 = vld [vmem:[#allocation7 + $0x150] sm:$0xf]  ;;  %v11054_v32 = vld [vmem:[#allocation7 + $0x1c4] sm:$0xf0]  ;;  %v11052_v35 = vld [vmem:[#allocation7 + $0x1b4] sm:$0xf0]  ;;  %v12920_v21 = vpack.c.bf16 %v12764_v5, %v12868_v46 }
 0x30b   : > { %v2316_v2 = vmax.f32 %v2252_v59, 0.0  ;;  %9500 = vmatmul.msk.bf16.gmra.mxu1 %vm2390_vm1, %v12566_v58  ;;  %3792 = vmatpush.bf16.msrb.mxu0 %v9535_v10  ;;  %v3114_v15 = vunpack.c.l.b16 %v2346_v16  ;;  %v3115_v28 = vunpack.c.h.b16 %v2346_v16  ;;  %v12892_v39 = vpop.f32.mrf.mxu1  ;;  %v9679_v16 = vor.u32 %v11040_v18, %v9678_v30  ;;  %v11034_v34 = vld [vmem:[#allocation7 + $0x124] sm:$0xf0]  ;;  %v9702_v30 = vld [vmem:[#allocation7 + $0x180] sm:$0xf] }
 0x30c   : > { %3841 = vmatpush.bf16.msrb.mxu1 %v9599_v41  ;;  %v12884_v57 = vpop.f32.mrf.mxu2  ;;  %v3112_v41 = vunpack.c.l.b16 %v2345_v12  ;;  %v11038_v12 = vld [vmem:[#allocation7 + $0x144] sm:$0xf0] }
 0x30d   : > { %v2348_v56 = vpack.c.bf16 %v2316_v2, %v2315_v29  ;;  %v3121_v10 = vpack.c.b16 %v3115_v28, %v3113_v63  ;;  %v9687_v29 = vor.u32 %v11042_v6, %v9686_v11  ;;  %v11450_v2 = vld [vmem:[%s14867_s4] sm:$0xff]  ;;  %v2457_v63 = vunpack.c.h.b16 %v12920_v21  ;;  %v11032_v11 = vld [vmem:[#allocation7 + $0x114] sm:$0xf0]  ;;  %v9710_v6 = vld [vmem:[#allocation7 + $0x190] sm:$0xf] }
 0x30e   : > { %v12888_v37 = vpop.f32.mrf.mxu0  ;;  %v3120_v23 = vpack.c.b16 %v3114_v15, %v3112_v41  ;;  %v9726_v15 = vld [vmem:[#allocation7 + $0x1b0] sm:$0xf]  ;;  %v11050_v41 = vld [vmem:[#allocation7 + $0x1a4] sm:$0xf0] }
 0x30f   : > { %v3118_v58 = vunpack.c.l.b16 %v2348_v56  ;;  %v3119_v47 = vunpack.c.h.b16 %v2348_v56  ;;  %3793 = vmatpush.bf16.msrb.mxu0 %v9527_v19  ;;  %v9743_v19 = vor.u32 %v11056_v7, %v9742_v9  ;;  %v11046_v18 = vld [vmem:[#allocation7 + $0x184] sm:$0xf0] }
 0x310   : > { %3842 = vmatpush.bf16.msrb.mxu1 %v9591_v51  ;;  %v9511_v51 = vor.u32 %v10998_v40, %v9510_v48  ;;  %v11451_v40 = vld [vmem:[%s14867_s4 + $0x8] sm:$0xff] }
 0x311   : > { %v3122_v42 = vpack.c.b16 %v3118_v58, %v3116_v20  ;;  %v3123_v43 = vpack.c.b16 %v3119_v47, %v3117_v54  ;;  %v9734_v58 = vld [vmem:[#allocation7 + $0x1c0] sm:$0xf]  ;;  %v12914_v47 = vpack.c.bf16 %v12775_v8, %v12888_v37  ;;  %v9727_v8 = vor.u32 %v11052_v35, %v9726_v15 }
 0x312   : > { %v9735_v60 = vor.u32 %v11054_v32, %v9734_v58  ;;  %v9654_v37 = vld [vmem:[#allocation7 + $0x120] sm:$0xf] }
 0x313   : > { %3134 = vmatpush.bf16.msra.mxu2 %v3122_v42  ;;  %3158 = vmatpush.bf16.msrb.mxu3 %v3123_v43  ;;  %v12910_v38 = vpop.f32.mrf.mxu1  ;;  %v11036_v42 = vld [vmem:[#allocation7 + $0x134] sm:$0xf0]  ;;  %v2459_v28 = vunpack.c.h.b16 %v12914_v47  ;;  %v9655_v5 = vor.u32 %v11034_v34, %v9654_v37 }
 0x314   : > { %3843 = vmatpush.bf16.msrb.mxu1 %v9583_v22  ;;  %v12890_v53 = vpop.f32.mrf.mxu2  ;;  %3794 = vmatpush.bf16.msrb.mxu0 %v9519_v50  ;;  %v9670_v22 = vld [vmem:[#allocation7 + $0x140] sm:$0xf]  ;;  %v9663_v43 = vor.u32 %v11036_v42, %v9662_v17 }
 0x315   : > { %v9671_v54 = vor.u32 %v11038_v12, %v9670_v22  ;;  %v12929_v48 = vpack.c.b16 %v2459_v28, %v2457_v63  ;;  %v9703_v22 = vor.u32 %v11046_v18, %v9702_v30 }
 0x316   : > { %v12894_v59 = vpop.f32.mrf.mxu0 }
 0x317   : > { %3135 = vmatpush.bf16.msra.mxu2 %v3120_v23  ;;  %3159 = vmatpush.bf16.msrb.mxu3 %v3121_v10 }
 0x318   : > { %3844 = vmatpush.bf16.msrb.mxu1 %v9575_v55  ;;  %3795 = vmatpush.bf16.msrb.mxu0 %v9511_v51  ;;  %v9718_v55 = vld [vmem:[#allocation7 + $0x1a0] sm:$0xf] }
 0x319   : > { %9496 = vmatmul.msk.bf16.vlgmr.msra.gmra.mxu0 %vm2390_vm1, %v11450_v2  ;;  %v9719_v23 = vor.u32 %v11050_v41, %v9718_v55  ;;  %v9638_v51 = vld [vmem:[#allocation7 + $0x100] sm:$0xf] }
 0x31a   : > { %9502 = vmatmul.msk.bf16.vlgmr.msra.gmra.mxu2 %vm2390_vm1, %v11450_v2  ;;  %9505 = vmatmul.msk.bf16.vlgmr.msrb.gmra.mxu3 %vm2390_vm1, %v11450_v2 }
 0x31b   : > { %3886 = vmatpush.bf16.msrb.mxu2 %v9695_v14  ;;  %3935 = vmatpush.bf16.msra.mxu3 %v9759_v27  ;;  %v12927_v46 = vpop.f32.mrf.mxu1  ;;  %v9646_v27 = vld [vmem:[#allocation7 + $0x110] sm:$0xf] }
 0x31c   : > { %9501 = vmatmul.msk.bf16.gmra.mxu1 %vm2390_vm1, %v12614_v52  ;;  %v12906_v56 = vpop.f32.mrf.mxu2  ;;  %v9647_v61 = vor.u32 %v11032_v11, %v9646_v27  ;;  %v2450_v27 = vpack.c.bf16 %v12779_v36, %v12894_v59 }
 0x31d   : > { %v12916_v52 = vpop.f32.mrf.mxu3 }
 0x31e   : > { %v12908_v20 = vpop.f32.mrf.mxu0  ;;  %v2467_v18 = vunpack.c.h.b16 %v2450_v27 }
 0x31f   : > { %3887 = vmatpush.bf16.msrb.mxu2 %v9687_v29  ;;  %3936 = vmatpush.bf16.msra.mxu3 %v9751_v33  ;;  %v11030_v33 = vld [vmem:[#allocation7 + $0x104] sm:$0xf0] }
 0x323   : > { %3888 = vmatpush.bf16.msrb.mxu2 %v9679_v16  ;;  %3937 = vmatpush.bf16.msra.mxu3 %v9743_v19  ;;  %v2553_v16 = vpack.c.bf16 %v12829_v0, %v12890_v53  ;;  %v9639_v19 = vor.u32 %v11030_v33, %v9638_v51  ;;  %v12947_v17 = vpop.f32.mrf.mxu1  ;;  %v2456_v0 = vunpack.c.l.b16 %v12920_v21 }
 0x324   : > { %v12922_v50 = vpop.f32.mrf.mxu2 }
 0x325   : > { %v12937_v10 = vpop.f32.mrf.mxu3  ;;  %v2563_v15 = vunpack.c.h.b16 %v2553_v16  ;;  %v2562_v11 = vunpack.c.l.b16 %v2553_v16  ;;  %v2555_v16 = vpack.c.bf16 %v12860_v45, %v12922_v50 }
 0x326   : > { %v2419_v3 = vpop.f32.mrf.mxu0 }
 0x327   : > { %3889 = vmatpush.bf16.msrb.mxu2 %v9671_v54  ;;  %3938 = vmatpush.bf16.msra.mxu3 %v9735_v60  ;;  %v2452_v14 = vpack.c.bf16 %v12827_v26, %v2419_v3  ;;  %v11048_v26 = vld [vmem:[#allocation7 + $0x194] sm:$0xf0]  ;;  %v2458_v60 = vunpack.c.l.b16 %v12914_v47 }
 0x328   : > { %v9711_v2 = vor.u32 %v11048_v26, %v9710_v6 }
 0x329   : > { %9497 = vmatmul.msk.bf16.gmra.mxu0 %vm2390_vm1, %v11451_v40  ;;  %v2476_v12 = vunpack.c.l.b16 %v2452_v14  ;;  %v2477_v58 = vunpack.c.h.b16 %v2452_v14 }
 0x32a   : > { %9503 = vmatmul.msk.bf16.gmra.mxu2 %vm2390_vm1, %v11451_v40  ;;  %9506 = vmatmul.msk.bf16.gmra.mxu3 %vm2390_vm1, %v11451_v40  ;;  %v2451_v40 = vpack.c.bf16 %v12802_v31, %v12908_v20 }
 0x32b   : > { %3890 = vmatpush.bf16.msrb.mxu2 %v9663_v43  ;;  %3939 = vmatpush.bf16.msra.mxu3 %v9727_v8 }
 0x32c   : > { %3845 = vmatmul.bf16.vlgmr.msrb.gmra.mxu1 %v12929_v48  ;;  %v2523_v24 = vpop.f32.mrf.mxu2  ;;  %v2468_v26 = vunpack.c.l.b16 %v2451_v40  ;;  %v2469_v51 = vunpack.c.h.b16 %v2451_v40 }
 0x32d   : > { %v2556_v29 = vpack.c.bf16 %v12886_v4, %v2523_v24  ;;  %v2552_v4 = vpack.c.bf16 %v12811_v49, %v12884_v57  ;;  %v12955_v43 = vpop.f32.mrf.mxu3  ;;  %v12957_v49 = vpack.c.b16 %v2458_v60, %v2456_v0  ;;  %v2573_v0 = vunpack.c.h.b16 %v2555_v16 }
 0x32e   : > { %v2421_v9 = vpop.f32.mrf.mxu0  ;;  %v12988_v20 = vpack.c.b16 %v2469_v51, %v2467_v18 }
 0x32f   : > { %3891 = vmatpush.bf16.msrb.mxu2 %v9655_v5  ;;  %3940 = vmatpush.bf16.msra.mxu3 %v9719_v23  ;;  %v2453_v7 = vpack.c.bf16 %v12831_v25, %v2421_v9  ;;  %v2561_v28 = vunpack.c.h.b16 %v2552_v4  ;;  %v2580_v47 = vunpack.c.l.b16 %v2556_v29  ;;  %v2581_v8 = vunpack.c.h.b16 %v2556_v29 }
 0x331   : > { %v2478_v32 = vunpack.c.l.b16 %v2453_v7  ;;  %v2479_v54 = vunpack.c.h.b16 %v2453_v7  ;;  %v12960_v3 = vpack.c.b16 %v2563_v15, %v2561_v28 }
 0x333   : > { %3892 = vmatpush.bf16.msrb.mxu2 %v9647_v61  ;;  %3941 = vmatpush.bf16.msra.mxu3 %v9711_v2  ;;  %v12949_v42 = vpack.c.b16 %v2478_v32, %v2476_v12  ;;  %v12951_v25 = vpack.c.b16 %v2479_v54, %v2477_v58  ;;  %v2560_v61 = vunpack.c.l.b16 %v2552_v4  ;;  %v2466_v2 = vunpack.c.l.b16 %v2450_v27 }
 0x334   : > { %v2525_v53 = vpop.f32.mrf.mxu2  ;;  %v2554_v12 = vpack.c.bf16 %v12837_v13, %v12906_v56  ;;  %v2572_v4 = vunpack.c.l.b16 %v2555_v16 }
 0x335   : > { %v2557_v35 = vpack.c.bf16 %v12896_v1, %v2525_v53  ;;  %v11452_v1 = vld [vmem:[%s14867_s4 + $0x10] sm:$0xff]  ;;  %v12974_v5 = vpop.f32.mrf.mxu3  ;;  %v12984_v31 = vpack.c.b16 %v2562_v11, %v2560_v61 }
 0x336   : > { %v2617_v57 = vpop.f32.mrf.mxu0 }
 0x337   : > { %3893 = vmatpush.bf16.msrb.mxu2 %v9639_v19  ;;  %3942 = vmatpush.bf16.msra.mxu3 %v9703_v22  ;;  %v2582_v37 = vunpack.c.l.b16 %v2557_v35  ;;  %v2583_v34 = vunpack.c.h.b16 %v2557_v35  ;;  %v12972_v63 = vpop.f32.mrf.mxu1  ;;  %v2656_v6 = vpack.c.bf16 %v12852_v62, %v2617_v57  ;;  %v2570_v35 = vunpack.c.l.b16 %v2554_v12 }
 0x338   : > { %v2571_v57 = vunpack.c.h.b16 %v2554_v12 }
 0x339   : > { %3796 = vmatmul.bf16.vlgmr.msrb.gmra.mxu0 %v12957_v49  ;;  %v12962_v21 = vpack.c.b16 %v2582_v37, %v2580_v47  ;;  %v12964_v55 = vpack.c.b16 %v2583_v34, %v2581_v8  ;;  %v2665_v9 = vunpack.c.h.b16 %v2656_v6  ;;  %v2664_v53 = vunpack.c.l.b16 %v2656_v6 }
 0x33a   : > { %9504 = vmatmul.msk.bf16.gmra.mxu2 %vm2390_vm1, %v11452_v1  ;;  %9507 = vmatmul.msk.bf16.gmra.mxu3 %vm2390_vm1, %v11452_v1  ;;  %v13011_v47 = vpack.c.b16 %v2572_v4, %v2570_v35  ;;  %v13013_v13 = vpack.c.b16 %v2573_v0, %v2571_v57  ;;  %vm13794_vm1 = vmand %vm5530_vm15, %vm5531_vm0 }
 0x33c   : > { %3850 = vmatmul.bf16.gmra.mxu1 %v12960_v3  ;;  %v2721_v41 = vpop.f32.mrf.mxu2 }
 0x33d   : > { %v2755_v36 = vpop.f32.mrf.mxu3  ;;  %v2760_v58 = vpack.c.bf16 %v12916_v52, %v2721_v41 }
 0x33e   : > { %v2619_v14 = vpop.f32.mrf.mxu0 }
 0x33f   : > { %v2657_v23 = vpack.c.bf16 %v12880_v44, %v2619_v14  ;;  %v12982_v30 = vpop.f32.mrf.mxu1  ;;  %v12986_v44 = vpack.c.b16 %v2468_v26, %v2466_v2  ;;  %v2769_v45 = vunpack.c.h.b16 %v2760_v58  ;;  %v2768_v40 = vunpack.c.l.b16 %v2760_v58 }
 0x341   : > { %v2667_v29 = vunpack.c.h.b16 %v2657_v23  ;;  %v2666_v32 = vunpack.c.l.b16 %v2657_v23 }
 0x343   : > { %v12991_v62 = vpack.c.b16 %v2667_v29, %v2665_v9 }
 0x344   : > { %v2723_v24 = vpop.f32.mrf.mxu2 }
 0x345   : > { %v2761_v22 = vpack.c.bf16 %v12937_v10, %v2723_v24  ;;  %v2757_v54 = vpop.f32.mrf.mxu3  ;;  %v13009_v10 = vpack.c.b16 %v2666_v32, %v2664_v53 }
 0x346   : > { %v2622_v33 = vpop.f32.mrf.mxu0 }
 0x347   : > { %v13000_v19 = vpop.f32.mrf.mxu1  ;;  %v2771_v15 = vunpack.c.h.b16 %v2761_v22  ;;  %v2770_v41 = vunpack.c.l.b16 %v2761_v22  ;;  %v2658_v14 = vpack.c.bf16 %v12892_v39, %v2622_v33 }
 0x349   : > { %3801 = vmatmul.bf16.gmra.mxu0 %v12984_v31  ;;  %v13016_v56 = vpack.c.b16 %v2771_v15, %v2769_v45  ;;  %v2674_v61 = vunpack.c.l.b16 %v2658_v14  ;;  %v2675_v51 = vunpack.c.h.b16 %v2658_v14  ;;  %v13029_v2 = vpack.c.b16 %v2770_v41, %v2768_v40 }
 0x34a   : > { %3894 = vmatmul.bf16.vlgmr.msrb.gmra.mxu2 %v12986_v44  ;;  %3943 = vmatmul.bf16.vlgmr.msra.gmra.mxu3 %v12988_v20 }
 0x34c   : > { %3855 = vmatmul.bf16.gmra.mxu1 %v12991_v62  ;;  %v12996_v59 = vpop.f32.mrf.mxu2 }
 0x34d   : > { %v2762_v35 = vpack.c.bf16 %v12955_v43, %v12996_v59 }
 0x34e   : > { %v2624_v7 = vpop.f32.mrf.mxu0 }
 0x34f   : > { %v13019_v52 = vpop.f32.mrf.mxu1  ;;  %v2659_v1 = vpack.c.bf16 %v12910_v38, %v2624_v7  ;;  %v2778_v41 = vunpack.c.l.b16 %v2762_v35  ;;  %v2779_v14 = vunpack.c.h.b16 %v2762_v35 }
 0x351   : > { %v2676_v23 = vunpack.c.l.b16 %v2659_v1  ;;  %v2677_v6 = vunpack.c.h.b16 %v2659_v1 }
 0x353   : > { %v13031_v7 = vpack.c.b16 %v2676_v23, %v2674_v61  ;;  %v13034_v39 = vpack.c.b16 %v2677_v6, %v2675_v51 }
 0x354   : > { %v2728_v60 = vpop.f32.mrf.mxu2 }
 0x355   : > { %14959 = vst [vmem:[#allocation21_spill] sm:$0xff] %v13031_v7  ;;  %v2763_v0 = vpack.c.bf16 %v12974_v5, %v2728_v60 }
 0x356   : > { %v2627_v28 = vpop.f32.mrf.mxu0  ;;  %14960 = vst [vmem:[#allocation22_spill] sm:$0xff] %v13034_v39 }
 0x357   : > { %v13007_v50 = vpack.c.bf16 %v12927_v46, %v2627_v28  ;;  %v13027_v11 = vpop.f32.mrf.mxu1  ;;  %v2780_v45 = vunpack.c.l.b16 %v2763_v0 }
 0x359   : > { %3806 = vmatmul.bf16.gmra.mxu0 %v13009_v10  ;;  %v13058_v60 = vpack.c.b16 %v2780_v45, %v2778_v41 }
 0x35a   : > { %3899 = vmatmul.bf16.gmra.mxu2 %v13011_v47  ;;  %3948 = vmatmul.bf16.gmra.mxu3 %v13013_v13 }
 0x35b   : > { %14961 = vst [vmem:[#allocation23_spill] sm:$0xff] %v13058_v60 }
 0x35c   : > { %3860 = vmatmul.bf16.gmra.mxu1 %v13016_v56  ;;  %v2731_v46 = vpop.f32.mrf.mxu2 }
 0x35d   : > { %v2764_v8 = vpack.c.bf16 %v2755_v36, %v2731_v46  ;;  %v2953_v37 = vpop.f32.mrf.mxu3 }
 0x35e   : > { %v13023_v34 = vpop.f32.mrf.mxu0 }
 0x35f   : > { %v2788_v18 = vunpack.c.l.b16 %v2764_v8  ;;  %v2789_v9 = vunpack.c.h.b16 %v2764_v8 }
 0x364   : > { %v2733_v27 = vpop.f32.mrf.mxu2 }
 0x365   : > { %v2765_v26 = vpack.c.bf16 %v2757_v54, %v2733_v27  ;;  %v2955_v24 = vpop.f32.mrf.mxu3  ;;  %v13045_v54 = vpop.f32.mrf.mxu1 }
 0x366   : > { %v2825_v29 = vpop.f32.mrf.mxu0 }
 0x367   : > { %v2790_v36 = vunpack.c.l.b16 %v2765_v26  ;;  %v2791_v38 = vunpack.c.h.b16 %v2765_v26  ;;  %v2864_v12 = vpack.c.bf16 %v12972_v63, %v2825_v29  ;;  %v2781_v63 = vunpack.c.h.b16 %v2763_v0  ;;  %v9886_v0 = vld [vmem:[#allocation7 + $0x2f0] sm:$0xf] }
 0x369   : > { %3811 = vmatmul.bf16.gmra.mxu0 %v13029_v2  ;;  %v13036_v33 = vpack.c.b16 %v2790_v36, %v2788_v18  ;;  %v13038_v16 = vpack.c.b16 %v2791_v38, %v2789_v9  ;;  %v2873_v53 = vunpack.c.h.b16 %v2864_v12  ;;  %v2872_v8 = vunpack.c.l.b16 %v2864_v12 }
 0x36a   : > { %3904 = vmatmul.bf16.gmra.mxu2 %v13031_v7  ;;  %3953 = vmatmul.bf16.gmra.mxu3 %v13034_v39  ;;  %v13063_v43 = vpack.c.b16 %v2781_v63, %v2779_v14  ;;  %v11074_v14 = vld [vmem:[#allocation7 + $0x264] sm:$0xf0] }
 0x36c   : > { %v2929_v22 = vpop.f32.mrf.mxu2  ;;  %14962 = vst [vmem:[#allocation24_spill] sm:$0xff] %v13063_v43 }
 0x36d   : > { %v13043_v58 = vpop.f32.mrf.mxu3  ;;  %v2968_v27 = vpack.c.bf16 %v2953_v37, %v2929_v22 }
 0x36e   : > { %v2827_v32 = vpop.f32.mrf.mxu0 }
 0x36f   : > { %v2865_v4 = vpack.c.bf16 %v12982_v30, %v2827_v32  ;;  %v2977_v18 = vunpack.c.h.b16 %v2968_v27  ;;  %v9822_v32 = vld [vmem:[#allocation7 + $0x270] sm:$0xf] }
 0x371   : > { %v2875_v15 = vunpack.c.h.b16 %v2865_v4  ;;  %v2874_v28 = vunpack.c.l.b16 %v2865_v4  ;;  %v11076_v4 = vld [vmem:[#allocation7 + $0x274] sm:$0xf0] }
 0x373   : > { %v13051_v57 = vpack.c.b16 %v2875_v15, %v2873_v53  ;;  %v13056_v5 = vpack.c.b16 %v2874_v28, %v2872_v8  ;;  %v2976_v53 = vunpack.c.l.b16 %v2968_v27  ;;  %v9823_v15 = vor.u32 %v11076_v4, %v9822_v32 }
 0x374   : > { %v2931_v46 = vpop.f32.mrf.mxu2 }
 0x375   : > { %v13053_v1 = vpop.f32.mrf.mxu3  ;;  %3865 = vmatmul.bf16.gmra.mxu1 %v13051_v57  ;;  %v2969_v59 = vpack.c.bf16 %v2955_v24, %v2931_v46  ;;  %3984 = vmatpush.bf16.msra.mxu0 %v9823_v15 }
 0x376   : > { %v2830_v30 = vpop.f32.mrf.mxu0 }
 0x377   : > { %v2979_v61 = vunpack.c.h.b16 %v2969_v59  ;;  %v2866_v9 = vpack.c.bf16 %v13000_v19, %v2830_v30  ;;  %v2978_v36 = vunpack.c.l.b16 %v2969_v59  ;;  %v9814_v30 = vld [vmem:[#allocation7 + $0x260] sm:$0xf] }
 0x378   : > { %v13060_v40 = vpop.f32.mrf.mxu1  ;;  %v9878_v59 = vld [vmem:[#allocation7 + $0x2e0] sm:$0xf] }
 0x379   : > { %3816 = vmatmul.bf16.gmra.mxu0 %v13056_v5  ;;  %v13073_v38 = vpack.c.b16 %v2979_v61, %v2977_v18  ;;  %v2882_v35 = vunpack.c.l.b16 %v2866_v9  ;;  %v2883_v46 = vunpack.c.h.b16 %v2866_v9  ;;  %v13079_v63 = vpack.c.b16 %v2978_v36, %v2976_v53  ;;  %v9806_v18 = vld [vmem:[#allocation7 + $0x250] sm:$0xf]  ;;  %v11072_v9 = vld [vmem:[#allocation7 + $0x254] sm:$0xf0] }
 0x37a   : > { %3909 = vmatmul.bf16.gmra.mxu2 %v13058_v60  ;;  %3958 = vmatmul.bf16.gmra.mxu3 %v13063_v43  ;;  %v9870_v36 = vld [vmem:[#allocation7 + $0x2d0] sm:$0xf]  ;;  %v9807_v4 = vor.u32 %v11072_v9, %v9806_v18  ;;  %v9592_v60 = vld [vmem:[#allocation7 + $0xa8] sm:$0xf0] }
 0x37c   : > { %v13067_v23 = vpop.f32.mrf.mxu2 }
 0x37d   : > { %v2963_v6 = vpop.f32.mrf.mxu3 }
 0x37e   : > { %v2832_v26 = vpop.f32.mrf.mxu0 }
 0x37f   : > { %v2867_v51 = vpack.c.bf16 %v13019_v52, %v2832_v26  ;;  %v11092_v52 = vld [vmem:[#allocation7 + $0x2f4] sm:$0xf0]  ;;  %v11090_v26 = vld [vmem:[#allocation7 + $0x2e4] sm:$0xf0] }
 0x380   : > { %v13070_v29 = vpop.f32.mrf.mxu1  ;;  %v9887_v45 = vor.u32 %v11092_v52, %v9886_v0  ;;  %v9879_v61 = vor.u32 %v11090_v26, %v9878_v59  ;;  %v11088_v0 = vld [vmem:[#allocation7 + $0x2d4] sm:$0xf0] }
 0x381   : > { %v2884_v12 = vunpack.c.l.b16 %v2867_v51  ;;  %v2885_v37 = vunpack.c.h.b16 %v2867_v51 }
 0x382   : > { %4033 = vmatpush.bf16.msra.mxu1 %v9887_v45  ;;  %v9862_v45 = vld [vmem:[#allocation7 + $0x2c0] sm:$0xf] }
 0x383   : > { %v13081_v8 = vpack.c.b16 %v2884_v12, %v2882_v35  ;;  %v13086_v27 = vpack.c.b16 %v2885_v37, %v2883_v46  ;;  %v9871_v37 = vor.u32 %v11088_v0, %v9870_v36  ;;  %v9798_v35 = vld [vmem:[#allocation7 + $0x240] sm:$0xf]  ;;  %v11084_v36 = vld [vmem:[#allocation7 + $0x2b4] sm:$0xf0]  ;;  %v9568_v0 = vld [vmem:[#allocation7 + $0x78] sm:$0xf0] }
 0x384   : > { %v2936_v24 = vpop.f32.mrf.mxu2 }
 0x385   : > { %v2965_v22 = vpop.f32.mrf.mxu3  ;;  %3870 = vmatmul.bf16.gmra.mxu1 %v13073_v38  ;;  %14963 = vst [vmem:[#allocation25_spill] sm:$0xff] %v13081_v8  ;;  %v2971_v15 = vpack.c.bf16 %v13053_v1, %v2936_v24  ;;  %v9854_v1 = vld [vmem:[#allocation7 + $0x2b0] sm:$0xf] }
 0x386   : > { %v2835_v28 = vpop.f32.mrf.mxu0  ;;  %14964 = vst [vmem:[#allocation26_spill] sm:$0xff] %v13086_v27  ;;  %4034 = vmatpush.bf16.msra.mxu1 %v9879_v61  ;;  %v11068_v61 = vld [vmem:[#allocation7 + $0x234] sm:$0xf0] }
 0x387   : > { %v13077_v19 = vpack.c.bf16 %v13027_v11, %v2835_v28  ;;  %v9815_v11 = vor.u32 %v11074_v14, %v9814_v30  ;;  %v11070_v28 = vld [vmem:[#allocation7 + $0x244] sm:$0xf0]  ;;  %v2988_v59 = vunpack.c.l.b16 %v2971_v15  ;;  %v2989_v24 = vunpack.c.h.b16 %v2971_v15 }
 0x388   : > { %v13083_v41 = vpop.f32.mrf.mxu1  ;;  %v9799_v46 = vor.u32 %v11070_v28, %v9798_v35  ;;  %v11086_v30 = vld [vmem:[#allocation7 + $0x2c4] sm:$0xf0] }
 0x389   : > { %3821 = vmatmul.bf16.gmra.mxu0 %v13079_v63  ;;  %v9863_v14 = vor.u32 %v11086_v30, %v9862_v45  ;;  %v11027_v45 = vld [vmem:[#allocation7 + $0xf4] sm:$0xf]  ;;  %v9632_v30 = vld [vmem:[#allocation7 + $0xf8] sm:$0xf0] }
 0x38a   : > { %3914 = vmatmul.bf16.gmra.mxu2 %v13081_v8  ;;  %3963 = vmatmul.bf16.gmra.mxu3 %v13086_v27  ;;  %v9635_v8 = vor.u32 %v11027_v45, %v9632_v30  ;;  %v11064_v45 = vld [vmem:[#allocation7 + $0x214] sm:$0xf0]  ;;  %v9838_v30 = vld [vmem:[#allocation7 + $0x290] sm:$0xf] }
 0x38b   : > { %3985 = vmatpush.bf16.msra.mxu0 %v9815_v11  ;;  %4035 = vmatpush.bf16.msra.mxu1 %v9871_v37  ;;  %v9790_v11 = vld [vmem:[#allocation7 + $0x230] sm:$0xf] }
 0x38c   : > { %v2939_v51 = vpop.f32.mrf.mxu2  ;;  %v9791_v9 = vor.u32 %v11068_v61, %v9790_v11  ;;  %4131 = vmatpush.bf16.msrb.mxu3 %v9635_v8  ;;  %v11066_v61 = vld [vmem:[#allocation7 + $0x224] sm:$0xf0] }
 0x38d   : > { %v2972_v12 = vpack.c.bf16 %v2963_v6, %v2939_v51  ;;  %v3043_v32 = vpop.f32.mrf.mxu3  ;;  %v2970_v6 = vpack.c.bf16 %v13043_v58, %v13067_v23  ;;  %v9855_v58 = vor.u32 %v11084_v36, %v9854_v1  ;;  %v9846_v1 = vld [vmem:[#allocation7 + $0x2a0] sm:$0xf] }
 0x38e   : > { %v13090_v53 = vpop.f32.mrf.mxu0 }
 0x38f   : > { %3986 = vmatpush.bf16.msra.mxu0 %v9807_v4  ;;  %4036 = vmatpush.bf16.msra.mxu1 %v9863_v14  ;;  %v11011_v4 = vld [vmem:[#allocation7 + $0x74] sm:$0xf]  ;;  %v2986_v37 = vunpack.c.l.b16 %v2970_v6  ;;  %v2987_v35 = vunpack.c.h.b16 %v2970_v6  ;;  %v2997_v43 = vunpack.c.h.b16 %v2972_v12  ;;  %v9782_v6 = vld [vmem:[#allocation7 + $0x220] sm:$0xf] }
 0x390   : > { %v13093_v52 = vpop.f32.mrf.mxu1  ;;  %v9571_v23 = vor.u32 %v11011_v4, %v9568_v0  ;;  %v9560_v4 = vld [vmem:[#allocation7 + $0x68] sm:$0xf0] }
 0x391   : > { %v13099_v15 = vpack.c.b16 %v2988_v59, %v2986_v37  ;;  %v11009_v59 = vld [vmem:[#allocation7 + $0x64] sm:$0xf]  ;;  %v9624_v37 = vld [vmem:[#allocation7 + $0xe8] sm:$0xf0] }
 0x392   : > { %4082 = vmatpush.bf16.msra.mxu2 %v9571_v23  ;;  %v9774_v23 = vld [vmem:[#allocation7 + $0x210] sm:$0xf] }
 0x393   : > { %3987 = vmatpush.bf16.msra.mxu0 %v9799_v46  ;;  %v2996_v46 = vunpack.c.l.b16 %v2972_v12  ;;  %14965 = vst [vmem:[#allocation27_spill] sm:$0xff] %v13099_v15  ;;  %4037 = vmatpush.bf16.msra.mxu1 %v9855_v58  ;;  %v11082_v12 = vld [vmem:[#allocation7 + $0x2a4] sm:$0xf0] }
 0x394   : > { %v2941_v26 = vpop.f32.mrf.mxu2 }
 0x395   : > { %v2973_v51 = vpack.c.bf16 %v2965_v22, %v2941_v26  ;;  %v13097_v18 = vpop.f32.mrf.mxu3  ;;  %v13101_v26 = vpack.c.b16 %v2989_v24, %v2987_v35  ;;  %v9847_v24 = vor.u32 %v11082_v12, %v9846_v1  ;;  %v11023_v12 = vld [vmem:[#allocation7 + $0xd4] sm:$0xf] }
 0x396   : > { %v3033_v28 = vpop.f32.mrf.mxu0 }
 0x397   : > { %v2998_v14 = vunpack.c.l.b16 %v2973_v51  ;;  %v2999_v27 = vunpack.c.h.b16 %v2973_v51  ;;  %3988 = vmatpush.bf16.msra.mxu0 %v9791_v9  ;;  %14966 = vst [vmem:[#allocation28_spill] sm:$0xff] %v13101_v26  ;;  %v9783_v51 = vor.u32 %v11066_v61, %v9782_v6  ;;  %v11025_v9 = vld [vmem:[#allocation7 + $0xe4] sm:$0xf]  ;;  %v3072_v35 = vpack.c.bf16 %v13060_v40, %v3033_v28  ;;  %4038 = vmatpush.bf16.msra.mxu1 %v9847_v24  ;;  %v9552_v6 = vld [vmem:[#allocation7 + $0x58] sm:$0xf0] }
 0x398   : > { %v9627_v8 = vor.u32 %v11025_v9, %v9624_v37  ;;  %v9616_v40 = vld [vmem:[#allocation7 + $0xd8] sm:$0xf0]  ;;  %v9766_v37 = vld [vmem:[#allocation7 + $0x200] sm:$0xf] }
 0x399   : > { %v3067_v22 = vpop.f32.mrf.mxu1  ;;  %v13105_v36 = vpack.c.b16 %v2998_v14, %v2996_v46  ;;  %v13108_v0 = vpack.c.b16 %v2999_v27, %v2997_v43  ;;  %v9775_v27 = vor.u32 %v11064_v45, %v9774_v23  ;;  %v11080_v14 = vld [vmem:[#allocation7 + $0x294] sm:$0xf0]  ;;  %v3081_v24 = vunpack.c.h.b16 %v3072_v35  ;;  %v9830_v23 = vld [vmem:[#allocation7 + $0x280] sm:$0xf] }
 0x39a   : > { %v13103_v11 = vpack.c.bf16 %v3067_v22, %v3043_v32  ;;  %3919 = vmatmul.bf16.gmra.mxu2 %v13099_v15  ;;  %3968 = vmatmul.bf16.gmra.mxu3 %v13101_v26  ;;  %v9563_v32 = vor.u32 %v11009_v59, %v9560_v4  ;;  %v11007_v22 = vld [vmem:[#allocation7 + $0x54] sm:$0xf]  ;;  %v9839_v1 = vor.u32 %v11080_v14, %v9838_v30  ;;  %v3080_v4 = vunpack.c.l.b16 %v3072_v35  ;;  %v11005_v14 = vld [vmem:[#allocation7 + $0x44] sm:$0xf] }
 0x39b   : > { %3989 = vmatpush.bf16.msra.mxu0 %v9783_v51  ;;  %4132 = vmatpush.bf16.msrb.mxu3 %v9627_v8  ;;  %v9555_v51 = vor.u32 %v11007_v22, %v9552_v6  ;;  %v9619_v59 = vor.u32 %v11023_v12, %v9616_v40  ;;  %v11062_v8 = vld [vmem:[#allocation7 + $0x204] sm:$0xf0]  ;;  %v9544_v22 = vld [vmem:[#allocation7 + $0x48] sm:$0xf0] }
 0x39c   : > { %4083 = vmatpush.bf16.msra.mxu2 %v9563_v32  ;;  %4039 = vmatpush.bf16.msra.mxu1 %v9839_v1  ;;  %v3100_v45 = vunpack.c.l.b16 %v13103_v11  ;;  %v9767_v30 = vor.u32 %v11062_v8, %v9766_v37  ;;  %v11021_v1 = vld [vmem:[#allocation7 + $0xc4] sm:$0xf]  ;;  %v3101_v12 = vunpack.c.h.b16 %v13103_v11  ;;  %v9600_v37 = vld [vmem:[#allocation7 + $0xb8] sm:$0xf0] }
 0x39d   : > { %v13112_v58 = vpop.f32.mrf.mxu2  ;;  %v3161_v43 = vpop.f32.mrf.mxu3 }
 0x39e   : > { %v3035_v46 = vpop.f32.mrf.mxu0 }
 0x39f   : > { %v3073_v61 = vpack.c.bf16 %v13070_v29, %v3035_v46  ;;  %3990 = vmatpush.bf16.msra.mxu0 %v9775_v27  ;;  %4133 = vmatpush.bf16.msrb.mxu3 %v9619_v59  ;;  %v11078_v46 = vld [vmem:[#allocation7 + $0x284] sm:$0xf0]  ;;  %v9536_v59 = vld [vmem:[#allocation7 + $0x38] sm:$0xf0] }
 0x3a0   : > { %4084 = vmatpush.bf16.msra.mxu2 %v9555_v51  ;;  %v9831_v35 = vor.u32 %v11078_v46, %v9830_v23  ;;  %v9608_v51 = vld [vmem:[#allocation7 + $0xc8] sm:$0xf0]  ;;  %v11001_v46 = vld [vmem:[#allocation7 + $0x24] sm:$0xf] }
 0x3a1   : > { %v3069_v28 = vpop.f32.mrf.mxu1  ;;  %v3082_v32 = vunpack.c.l.b16 %v3073_v61  ;;  %v3083_v9 = vunpack.c.h.b16 %v3073_v61  ;;  %v9547_v61 = vor.u32 %v11005_v14, %v9544_v22  ;;  %v9611_v15 = vor.u32 %v11021_v1, %v9608_v51  ;;  %v9528_v14 = vld [vmem:[#allocation7 + $0x28] sm:$0xf0]  ;;  %v11017_v22 = vld [vmem:[#allocation7 + $0xa4] sm:$0xf] }
 0x3a2   : > { %v3077_v29 = vpack.c.bf16 %v3069_v28, %v13097_v18  ;;  %v11003_v28 = vld [vmem:[#allocation7 + $0x34] sm:$0xf]  ;;  %4040 = vmatpush.bf16.msra.mxu1 %v9831_v35  ;;  %v9531_v51 = vor.u32 %v11001_v46, %v9528_v14  ;;  %v9595_v35 = vor.u32 %v11017_v22, %v9592_v60  ;;  %v9512_v46 = vld [vmem:[#allocation7 + $0x8] sm:$0xf0] }
 0x3a3   : > { %v13117_v27 = vpack.c.b16 %v3082_v32, %v3080_v4  ;;  %v13119_v6 = vpack.c.b16 %v3083_v9, %v3081_v24  ;;  %3991 = vmatpush.bf16.msra.mxu0 %v9767_v30  ;;  %v11019_v4 = vld [vmem:[#allocation7 + $0xb4] sm:$0xf]  ;;  %v9539_v9 = vor.u32 %v11003_v28, %v9536_v59  ;;  %4134 = vmatpush.bf16.msrb.mxu3 %v9611_v15 }
 0x3a4   : > { %v3102_v40 = vunpack.c.l.b16 %v3077_v29  ;;  %v3103_v26 = vunpack.c.h.b16 %v3077_v29  ;;  %4085 = vmatpush.bf16.msra.mxu2 %v9547_v61  ;;  %v9603_v23 = vor.u32 %v11019_v4, %v9600_v37  ;;  %v3176_v30 = vpack.c.bf16 %v3161_v43, %v13112_v58  ;;  %v11015_v15 = vld [vmem:[#allocation7 + $0x94] sm:$0xf] }
 0x3a5   : > { %v3139_v18 = vpop.f32.mrf.mxu2  ;;  %3826 = vmatmul.bf16.gmra.mxu0 %v13117_v27  ;;  %3875 = vmatmul.bf16.gmra.mxu1 %v13119_v6  ;;  %v3163_v32 = vpop.f32.mrf.mxu3 }
 0x3a6   : > { %v3038_v24 = vpop.f32.mrf.mxu0  ;;  %v13124_v8 = vpack.c.b16 %v3102_v40, %v3100_v45  ;;  %v13126_v11 = vpack.c.b16 %v3103_v26, %v3101_v12  ;;  %v3177_v1 = vpack.c.bf16 %v3163_v32, %v3139_v18  ;;  %v3184_v61 = vunpack.c.l.b16 %v3176_v30  ;;  %v10999_v26 = vld [vmem:[#allocation7 + $0x14] sm:$0xf]  ;;  %v9520_v12 = vld [vmem:[#allocation7 + $0x18] sm:$0xf0] }
 0x3a7   : > { %4135 = vmatpush.bf16.msrb.mxu3 %v9603_v23  ;;  %v3074_v45 = vpack.c.bf16 %v13083_v41, %v3038_v24  ;;  %v3185_v28 = vunpack.c.h.b16 %v3176_v30  ;;  %v9523_v37 = vor.u32 %v10999_v26, %v9520_v12  ;;  %v9584_v18 = vld [vmem:[#allocation7 + $0x98] sm:$0xf0]  ;;  %v10997_v23 = vld [vmem:[#allocation7 + $0x4] sm:$0xf]  ;;  %v9576_v30 = vld [vmem:[#allocation7 + $0x88] sm:$0xf0] }
 0x3a8   : > { %4086 = vmatpush.bf16.msra.mxu2 %v9539_v9  ;;  %v3186_v59 = vunpack.c.l.b16 %v3177_v1  ;;  %v3187_v4 = vunpack.c.h.b16 %v3177_v1  ;;  %v9587_v9 = vor.u32 %v11015_v15, %v9584_v18  ;;  %v11013_v41 = vld [vmem:[#allocation7 + $0x84] sm:$0xf] }
 0x3a9   : > { %v3846_v29 = vpop.f32.mrf.mxu1  ;;  %v3090_v24 = vunpack.c.l.b16 %v3074_v45  ;;  %v3091_v14 = vunpack.c.h.b16 %v3074_v45 }
 0x3aa   : > { %v13131_v7 = vpack.c.b16 %v3186_v59, %v3184_v61  ;;  %v13133_v1 = vpack.c.b16 %v3187_v4, %v3185_v28 }
 0x3ab   : > { %4136 = vmatpush.bf16.msrb.mxu3 %v9595_v35  ;;  %v9579_v35 = vor.u32 %v11013_v41, %v9576_v30 }
 0x3ac   : > { %4087 = vmatpush.bf16.msra.mxu2 %v9531_v51 }
 0x3ad   : > { %v3142_v40 = vpop.f32.mrf.mxu2  ;;  %v3166_v43 = vpop.f32.mrf.mxu3 }
 0x3ae   : > { %v3040_v58 = vpop.f32.mrf.mxu0 }
 0x3af   : > { %v3075_v32 = vpack.c.bf16 %v13093_v52, %v3040_v58  ;;  %4137 = vmatpush.bf16.msrb.mxu3 %v9587_v9  ;;  %v9515_v52 = vor.u32 %v10997_v23, %v9512_v46 }
 0x3b0   : > { %4088 = vmatpush.bf16.msra.mxu2 %v9523_v37 }
 0x3b1   : > { %v3848_v60 = vpop.f32.mrf.mxu1  ;;  %v3092_v22 = vunpack.c.l.b16 %v3075_v32  ;;  %v3093_v39 = vunpack.c.h.b16 %v3075_v32 }
 0x3b3   : > { %v13135_v51 = vpack.c.b16 %v3092_v22, %v3090_v24  ;;  %v13137_v26 = vpack.c.b16 %v3093_v39, %v3091_v14  ;;  %4138 = vmatpush.bf16.msrb.mxu3 %v9579_v35  ;;  %v3178_v39 = vpack.c.bf16 %v3166_v43, %v3142_v40 }
 0x3b4   : > { %4089 = vmatpush.bf16.msra.mxu2 %v9515_v52 }
 0x3b5   : > { %v3144_v12 = vpop.f32.mrf.mxu2  ;;  %3831 = vmatmul.bf16.gmra.mxu0 %v13131_v7  ;;  %3880 = vmatmul.bf16.gmra.mxu1 %v13133_v1  ;;  %v3168_v61 = vpop.f32.mrf.mxu3  ;;  %v3194_v32 = vunpack.c.l.b16 %v3178_v39  ;;  %v3195_v9 = vunpack.c.h.b16 %v3178_v39 }
 0x3b6   : > { %3924 = vmatmul.bf16.gmra.mxu2 %v13135_v51  ;;  %3973 = vmatmul.bf16.gmra.mxu3 %v13137_v26  ;;  %v3797_v45 = vpop.f32.mrf.mxu0  ;;  %v3179_v59 = vpack.c.bf16 %v3168_v61, %v3144_v12 }
 0x3b7   : > { %v3847_v15 = vadd.f32 %v3846_v29, %v3797_v45 }
 0x3b8   : > { %v3196_v23 = vunpack.c.l.b16 %v3179_v59  ;;  %v3197_v46 = vunpack.c.h.b16 %v3179_v59 }
 0x3b9   : > { %v3851_v28 = vpop.f32.mrf.mxu1 }
 0x3ba   : > { %v13143_v24 = vpack.c.b16 %v3196_v23, %v3194_v32  ;;  %v13145_v14 = vpack.c.b16 %v3197_v46, %v3195_v9 }
 0x3bc   : > { %14967 = vst [vmem:[#allocation29_spill] sm:$0xff] %v13145_v14 }
 0x3bd   : > { %v3147_v4 = vpop.f32.mrf.mxu2  ;;  %v3171_v58 = vpop.f32.mrf.mxu3 }
 0x3be   : > { %v3799_v37 = vpop.f32.mrf.mxu0  ;;  %v3180_v18 = vpack.c.bf16 %v3171_v58, %v3147_v4 }
 0x3bf   : > { %v3849_v46 = vadd.f32 %v3848_v60, %v3799_v37 }
 0x3c0   : > { %v3204_v43 = vunpack.c.l.b16 %v3180_v18  ;;  %v3205_v30 = vunpack.c.h.b16 %v3180_v18 }
 0x3c1   : > { %v3853_v41 = vpop.f32.mrf.mxu1 }
 0x3c5   : > { %v3149_v22 = vpop.f32.mrf.mxu2  ;;  %3992 = vmatmul.bf16.vlgmr.msra.gmra.mxu0 %v12949_v42  ;;  %4041 = vmatmul.bf16.vlgmr.msra.gmra.mxu1 %v12951_v25  ;;  %v3173_v29 = vpop.f32.mrf.mxu3 }
 0x3c6   : > { %3929 = vmatmul.bf16.gmra.mxu2 %v13143_v24  ;;  %3978 = vmatmul.bf16.gmra.mxu3 %v13145_v14  ;;  %v3802_v40 = vpop.f32.mrf.mxu0  ;;  %v3181_v52 = vpack.c.bf16 %v3173_v29, %v3149_v22 }
 0x3c7   : > { %v3852_v35 = vadd.f32 %v3851_v28, %v3802_v40 }
 0x3c8   : > { %v3206_v12 = vunpack.c.l.b16 %v3181_v52  ;;  %v3207_v61 = vunpack.c.h.b16 %v3181_v52 }
 0x3c9   : > { %v3856_v45 = vpop.f32.mrf.mxu1 }
 0x3ca   : > { %v13151_v39 = vpack.c.b16 %v3206_v12, %v3204_v43  ;;  %v13153_v59 = vpack.c.b16 %v3207_v61, %v3205_v30  ;;  %v2661_v43 = vpack.c.bf16 %v12947_v17, %v13023_v34 }
 0x3cc   : > { %v2686_v12 = vunpack.c.l.b16 %v2661_v43  ;;  %v2687_v61 = vunpack.c.h.b16 %v2661_v43 }
 0x3cd   : > { %v3895_v4 = vpop.f32.mrf.mxu2  ;;  %v3944_v32 = vpop.f32.mrf.mxu3 }
 0x3ce   : > { %v3896_v58 = vadd.f32 %v3895_v4, %v3847_v15  ;;  %v3804_v9 = vpop.f32.mrf.mxu0 }
 0x3d0   : > { %v13155_v23 = vadd.f32 %v3944_v32, %v3896_v58  ;;  %v3854_v32 = vadd.f32 %v3853_v41, %v3804_v9 }
 0x3d1   : > { %v3858_v28 = vpop.f32.mrf.mxu1 }
 0x3d5   : > { %v3897_v14 = vpop.f32.mrf.mxu2  ;;  %3997 = vmatmul.bf16.gmra.mxu0 %v12962_v21  ;;  %4046 = vmatmul.bf16.gmra.mxu1 %v12964_v55  ;;  %v3946_v22 = vpop.f32.mrf.mxu3 }
 0x3d6   : > { %v3898_v18 = vadd.f32 %v3897_v14, %v3849_v46  ;;  %4090 = vmatmul.bf16.vlgmr.msra.gmra.mxu2 %v12957_v49  ;;  %4139 = vmatmul.bf16.vlgmr.msrb.gmra.mxu3 %v12929_v48  ;;  %v3807_v29 = vpop.f32.mrf.mxu0  ;;  %v2684_v49 = vunpack.c.l.b16 %v13007_v50  ;;  %v2685_v48 = vunpack.c.h.b16 %v13007_v50 }
 0x3d7   : > { %v3857_v40 = vadd.f32 %v3856_v45, %v3807_v29 }
 0x3d8   : > { %v13161_v15 = vadd.f32 %v3946_v22, %v3898_v18  ;;  %v13169_v58 = vpack.c.b16 %v2686_v12, %v2684_v49  ;;  %v13171_v45 = vpack.c.b16 %v2687_v61, %v2685_v48  ;;  %v2869_v49 = vpack.c.bf16 %v13045_v54, %v13090_v53 }
 0x3d9   : > { %v3861_v14 = vpop.f32.mrf.mxu1 }
 0x3dd   : > { %v3900_v60 = vpop.f32.mrf.mxu2  ;;  %v3949_v30 = vpop.f32.mrf.mxu3 }
 0x3de   : > { %v3901_v37 = vadd.f32 %v3900_v60, %v3852_v35  ;;  %v3809_v52 = vpop.f32.mrf.mxu0 }
 0x3e0   : > { %v13165_v4 = vadd.f32 %v3949_v30, %v3901_v37  ;;  %v3859_v30 = vadd.f32 %v3858_v28, %v3809_v52 }
 0x3e1   : > { %v3863_v50 = vpop.f32.mrf.mxu1 }
 0x3e5   : > { %v3902_v46 = vpop.f32.mrf.mxu2  ;;  %4002 = vmatmul.bf16.gmra.mxu0 %v13169_v58  ;;  %4051 = vmatmul.bf16.gmra.mxu1 %v13171_v45  ;;  %v3951_v34 = vpop.f32.mrf.mxu3 }
 0x3e6   : > { %v3903_v17 = vadd.f32 %v3902_v46, %v3854_v32  ;;  %4095 = vmatmul.bf16.gmra.mxu2 %v12984_v31  ;;  %4144 = vmatmul.bf16.gmra.mxu3 %v12960_v3  ;;  %v3812_v35 = vpop.f32.mrf.mxu0 }
 0x3e7   : > { %v3862_v18 = vadd.f32 %v3861_v14, %v3812_v35 }
 0x3e8   : > { %v13177_v22 = vadd.f32 %v3951_v34, %v3903_v17  ;;  %v2894_v17 = vunpack.c.l.b16 %v2869_v49  ;;  %v2895_v34 = vunpack.c.h.b16 %v2869_v49 }
 0x3ed   : > { %v3905_v29 = vpop.f32.mrf.mxu2  ;;  %v3954_v60 = vpop.f32.mrf.mxu3 }
 0x3ee   : > { %v3906_v43 = vadd.f32 %v3905_v29, %v3857_v40  ;;  %v3814_v41 = vpop.f32.mrf.mxu0 }
 0x3f0   : > { %v13179_v9 = vadd.f32 %v3954_v60, %v3906_v43  ;;  %v3864_v60 = vadd.f32 %v3863_v50, %v3814_v41 }
 0x3f2   : > { %v3866_v37 = vpop.f32.mrf.mxu1 }
 0x3f5   : > { %4007 = vmatmul.bf16.gmra.mxu0 %v13036_v33  ;;  %4056 = vmatmul.bf16.gmra.mxu1 %v13038_v16  ;;  %v3907_v31 = vpop.f32.mrf.mxu2  ;;  %v3956_v12 = vpop.f32.mrf.mxu3 }
 0x3f6   : > { %4100 = vmatmul.bf16.gmra.mxu2 %v13009_v10  ;;  %4149 = vmatmul.bf16.gmra.mxu3 %v12991_v62  ;;  %v3908_v3 = vadd.f32 %v3907_v31, %v3859_v30  ;;  %v3817_v61 = vpop.f32.mrf.mxu0  ;;  %v2892_v62 = vunpack.c.l.b16 %v13077_v19  ;;  %v2893_v10 = vunpack.c.h.b16 %v13077_v19  ;;  %v11059_v30 = vld [vmem:[#allocation7 + $0x1f4] sm:$0xf] }
 0x3f7   : > { %v3867_v14 = vadd.f32 %v3866_v37, %v3817_v61  ;;  %v9696_v37 = vld [vmem:[#allocation7 + $0x178] sm:$0xf0] }
 0x3f8   : > { %v13185_v40 = vadd.f32 %v3956_v12, %v3908_v3  ;;  %v13193_v29 = vpack.c.b16 %v2894_v17, %v2892_v62  ;;  %v13195_v43 = vpack.c.b16 %v2895_v34, %v2893_v10  ;;  %v9760_v61 = vld [vmem:[#allocation7 + $0x1f8] sm:$0xf0]  ;;  %v9752_v34 = vld [vmem:[#allocation7 + $0x1e8] sm:$0xf0]  ;;  %v11039_v62 = vld [vmem:[#allocation7 + $0x154] sm:$0xf] }
 0x3f9   : > { %v9763_v50 = vor.u32 %v11059_v30, %v9760_v61  ;;  %v11055_v10 = vld [vmem:[#allocation7 + $0x1d4] sm:$0xf] }
 0x3fa   : > { %v3868_v48 = vpop.f32.mrf.mxu1 }
 0x3fb   : > { %4229 = vmatpush.bf16.msrb.mxu1 %v9763_v50  ;;  %v9736_v50 = vld [vmem:[#allocation7 + $0x1c8] sm:$0xf0] }
 0x3fd   : > { %v3910_v28 = vpop.f32.mrf.mxu2  ;;  %v3959_v32 = vpop.f32.mrf.mxu3 }
 0x3fe   : > { %v3911_v52 = vadd.f32 %v3910_v28, %v3862_v18  ;;  %v3819_v46 = vpop.f32.mrf.mxu0  ;;  %v11043_v18 = vld [vmem:[#allocation7 + $0x174] sm:$0xf]  ;;  %v11041_v28 = vld [vmem:[#allocation7 + $0x164] sm:$0xf] }
 0x3ff   : > { %v9699_v12 = vor.u32 %v11043_v18, %v9696_v37 }
 0x400   : > { %v13189_v35 = vadd.f32 %v3959_v32, %v3911_v52  ;;  %v9688_v52 = vld [vmem:[#allocation7 + $0x168] sm:$0xf0]  ;;  %v11057_v32 = vld [vmem:[#allocation7 + $0x1e4] sm:$0xf] }
 0x401   : > { %4180 = vmatpush.bf16.msrb.mxu0 %v9699_v12  ;;  %v9691_v17 = vor.u32 %v11041_v28, %v9688_v52  ;;  %v11053_v12 = vld [vmem:[#allocation7 + $0x1c4] sm:$0xf]  ;;  %v3869_v52 = vadd.f32 %v3868_v48, %v3819_v46 }
 0x402   : > { %v3871_v53 = vpop.f32.mrf.mxu1  ;;  %v9739_v28 = vor.u32 %v11053_v12, %v9736_v50  ;;  %v9720_v50 = vld [vmem:[#allocation7 + $0x1a8] sm:$0xf0] }
 0x405   : > { %4012 = vmatmul.bf16.gmra.mxu0 %v13193_v29  ;;  %4061 = vmatmul.bf16.gmra.mxu1 %v13195_v43  ;;  %v3912_v54 = vpop.f32.mrf.mxu2  ;;  %v3961_v19 = vpop.f32.mrf.mxu3 }
 0x406   : > { %4105 = vmatmul.bf16.gmra.mxu2 %v13029_v2  ;;  %4154 = vmatmul.bf16.gmra.mxu3 %v13016_v56  ;;  %v3913_v31 = vadd.f32 %v3912_v54, %v3864_v60  ;;  %v3822_v3 = vpop.f32.mrf.mxu0  ;;  %v9755_v2 = vor.u32 %v11057_v32, %v9752_v34  ;;  %v9680_v56 = vld [vmem:[#allocation7 + $0x158] sm:$0xf0]  ;;  %v11051_v34 = vld [vmem:[#allocation7 + $0x1b4] sm:$0xf] }
 0x407   : > { %v13201_v49 = vadd.f32 %v3871_v53, %v3822_v3  ;;  %4181 = vmatpush.bf16.msrb.mxu0 %v9691_v17  ;;  %v9683_v60 = vor.u32 %v11039_v62, %v9680_v56  ;;  %v9744_v54 = vld [vmem:[#allocation7 + $0x1d8] sm:$0xf0]  ;;  %v9672_v3 = vld [vmem:[#allocation7 + $0x148] sm:$0xf0]  ;;  %v11035_v17 = vld [vmem:[#allocation7 + $0x134] sm:$0xf] }
 0x408   : > { %v13203_v41 = vadd.f32 %v3961_v19, %v3913_v31  ;;  %4230 = vmatpush.bf16.msrb.mxu1 %v9755_v2  ;;  %v9747_v53 = vor.u32 %v11055_v10, %v9744_v54  ;;  %v11037_v19 = vld [vmem:[#allocation7 + $0x144] sm:$0xf]  ;;  %v9728_v10 = vld [vmem:[#allocation7 + $0x1b8] sm:$0xf0] }
 0x409   : > { %v9675_v61 = vor.u32 %v11037_v19, %v9672_v3  ;;  %v9824_v54 = vld [vmem:[#allocation7 + $0x278] sm:$0xf0]  ;;  %v9731_v48 = vor.u32 %v11051_v34, %v9728_v10  ;;  %v11033_v19 = vld [vmem:[#allocation7 + $0x124] sm:$0xf]  ;;  %v9880_v34 = vld [vmem:[#allocation7 + $0x2e8] sm:$0xf0] }
 0x40a   : > { %v11049_v3 = vld [vmem:[#allocation7 + $0x1a4] sm:$0xf]  ;;  %v3873_v12 = vpop.f32.mrf.mxu1  ;;  %v11047_v10 = vld [vmem:[#allocation7 + $0x194] sm:$0xf] }
 0x40b   : > { %4182 = vmatpush.bf16.msrb.mxu0 %v9683_v60  ;;  %v11075_v60 = vld [vmem:[#allocation7 + $0x274] sm:$0xf] }
 0x40c   : > { %4231 = vmatpush.bf16.msrb.mxu1 %v9747_v53  ;;  %v9827_v46 = vor.u32 %v11075_v60, %v9824_v54  ;;  %v9888_v53 = vld [vmem:[#allocation7 + $0x2f8] sm:$0xf0] }
 0x40d   : > { %v3915_v18 = vpop.f32.mrf.mxu2  ;;  %v3964_v30 = vpop.f32.mrf.mxu3 }
 0x40e   : > { %v3916_v37 = vadd.f32 %v3915_v18, %v3867_v14  ;;  %v9664_v14 = vld [vmem:[#allocation7 + $0x138] sm:$0xf0]  ;;  %v11091_v18 = vld [vmem:[#allocation7 + $0x2f4] sm:$0xf]  ;;  %4278 = vmatpush.bf16.msrb.mxu2 %v9827_v46 }
 0x40f   : > { %4183 = vmatpush.bf16.msrb.mxu0 %v9675_v61  ;;  %v9667_v56 = vor.u32 %v11035_v17, %v9664_v14  ;;  %v11089_v14 = vld [vmem:[#allocation7 + $0x2e4] sm:$0xf]  ;;  %v9712_v46 = vld [vmem:[#allocation7 + $0x198] sm:$0xf0] }
 0x410   : > { %v13205_v31 = vadd.f32 %v3964_v30, %v3916_v37  ;;  %4232 = vmatpush.bf16.msrb.mxu1 %v9739_v28  ;;  %v9891_v30 = vor.u32 %v11091_v18, %v9888_v53  ;;  %v9723_v28 = vor.u32 %v11049_v3, %v9720_v50  ;;  %v11071_v18 = vld [vmem:[#allocation7 + $0x254] sm:$0xf]  ;;  %v9808_v53 = vld [vmem:[#allocation7 + $0x258] sm:$0xf0]  ;;  %v9715_v50 = vor.u32 %v11047_v10, %v9712_v46  ;;  %v11085_v46 = vld [vmem:[#allocation7 + $0x2c4] sm:$0xf] }
 0x411   : > { %v9872_v3 = vld [vmem:[#allocation7 + $0x2d8] sm:$0xf0] }
 0x412   : > { %4327 = vmatpush.bf16.msra.mxu3 %v9891_v30 }
 0x413   : > { %4184 = vmatpush.bf16.msrb.mxu0 %v9667_v56  ;;  %v9648_v56 = vld [vmem:[#allocation7 + $0x118] sm:$0xf0] }
 0x414   : > { %4233 = vmatpush.bf16.msrb.mxu1 %v9731_v48  ;;  %v9811_v48 = vor.u32 %v11071_v18, %v9808_v53  ;;  %v9864_v53 = vld [vmem:[#allocation7 + $0x2c8] sm:$0xf0] }
 0x415   : > { %4017 = vmatmul.bf16.gmra.mxu0 %v13105_v36  ;;  %4066 = vmatmul.bf16.gmra.mxu1 %v13108_v0  ;;  %v3917_v32 = vpop.f32.mrf.mxu2  ;;  %v3966_v62 = vpop.f32.mrf.mxu3 }
 0x416   : > { %4110 = vmatmul.bf16.gmra.mxu2 %v13056_v5  ;;  %4159 = vmatmul.bf16.gmra.mxu3 %v13051_v57  ;;  %v3918_v2 = vadd.f32 %v3917_v32, %v3869_v52  ;;  %v9656_v5 = vld [vmem:[#allocation7 + $0x128] sm:$0xf0]  ;;  %v3824_v57 = vpop.f32.mrf.mxu0  ;;  %v11073_v52 = vld [vmem:[#allocation7 + $0x264] sm:$0xf] }
 0x417   : > { %v9659_v61 = vor.u32 %v11033_v19, %v9656_v5  ;;  %v9816_v32 = vld [vmem:[#allocation7 + $0x268] sm:$0xf0]  ;;  %v11087_v5 = vld [vmem:[#allocation7 + $0x2d4] sm:$0xf] }
 0x418   : > { %v13211_v37 = vadd.f32 %v3966_v62, %v3918_v2  ;;  %v9819_v17 = vor.u32 %v11073_v52, %v9816_v32  ;;  %v9883_v2 = vor.u32 %v11089_v14, %v9880_v34  ;;  %v11031_v62 = vld [vmem:[#allocation7 + $0x114] sm:$0xf]  ;;  %4234 = vmatpush.bf16.msrb.mxu1 %v9723_v28  ;;  %v11029_v32 = vld [vmem:[#allocation7 + $0x104] sm:$0xf] }
 0x419   : > { %4185 = vmatpush.bf16.msrb.mxu0 %v9659_v61  ;;  %v9651_v54 = vor.u32 %v11031_v62, %v9648_v56  ;;  %v9875_v61 = vor.u32 %v11087_v5, %v9872_v3  ;;  %v11045_v14 = vld [vmem:[#allocation7 + $0x184] sm:$0xf]  ;;  %v9792_v5 = vld [vmem:[#allocation7 + $0x238] sm:$0xf0] }
 0x41a   : > { %4279 = vmatpush.bf16.msrb.mxu2 %v9819_v17  ;;  %4328 = vmatpush.bf16.msra.mxu3 %v9883_v2  ;;  %v9640_v17 = vld [vmem:[#allocation7 + $0x108] sm:$0xf0] }
 0x41b   : > { %v9643_v56 = vor.u32 %v11029_v32, %v9640_v17  ;;  %v9800_v2 = vld [vmem:[#allocation7 + $0x248] sm:$0xf0] }
 0x41c   : > { %4235 = vmatpush.bf16.msrb.mxu1 %v9715_v50  ;;  %v11083_v50 = vld [vmem:[#allocation7 + $0x2b4] sm:$0xf] }
 0x41d   : > { %v3920_v60 = vpop.f32.mrf.mxu2  ;;  %v3969_v19 = vpop.f32.mrf.mxu3  ;;  %4186 = vmatpush.bf16.msrb.mxu0 %v9651_v54  ;;  %v9867_v54 = vor.u32 %v11085_v46, %v9864_v53  ;;  %v11063_v46 = vld [vmem:[#allocation7 + $0x214] sm:$0xf]  ;;  %v9776_v53 = vld [vmem:[#allocation7 + $0x218] sm:$0xf0] }
 0x41e   : > { %v3921_v30 = vadd.f32 %v3920_v60, %v13201_v49  ;;  %4280 = vmatpush.bf16.msrb.mxu2 %v9811_v48  ;;  %4329 = vmatpush.bf16.msra.mxu3 %v9875_v61  ;;  %v9704_v49 = vld [vmem:[#allocation7 + $0x188] sm:$0xf0]  ;;  %v11069_v60 = vld [vmem:[#allocation7 + $0x244] sm:$0xf]  ;;  %v11067_v48 = vld [vmem:[#allocation7 + $0x234] sm:$0xf] }
 0x41f   : > { %v9707_v28 = vor.u32 %v11045_v14, %v9704_v49  ;;  %v9803_v10 = vor.u32 %v11069_v60, %v9800_v2  ;;  %v9856_v61 = vld [vmem:[#allocation7 + $0x2b8] sm:$0xf0]  ;;  %v11065_v14 = vld [vmem:[#allocation7 + $0x224] sm:$0xf]  ;;  %v9848_v60 = vld [vmem:[#allocation7 + $0x2a8] sm:$0xf0] }
 0x420   : > { %v13214_v52 = vadd.f32 %v3969_v19, %v3921_v30  ;;  %v3874_v30 = vadd.f32 %v3873_v12, %v3824_v57  ;;  %v9795_v57 = vor.u32 %v11067_v48, %v9792_v5  ;;  %v9859_v17 = vor.u32 %v11083_v50, %v9856_v61  ;;  %v11081_v49 = vld [vmem:[#allocation7 + $0x2a4] sm:$0xf]  ;;  %v9768_v48 = vld [vmem:[#allocation7 + $0x208] sm:$0xf0] }
 0x421   : > { %4187 = vmatpush.bf16.msrb.mxu0 %v9643_v56  ;;  %4236 = vmatpush.bf16.msrb.mxu1 %v9707_v28  ;;  %v9851_v2 = vor.u32 %v11081_v49, %v9848_v60  ;;  %v11079_v28 = vld [vmem:[#allocation7 + $0x294] sm:$0xf]  ;;  %v11077_v5 = vld [vmem:[#allocation7 + $0x284] sm:$0xf]  ;;  %v9832_v61 = vld [vmem:[#allocation7 + $0x288] sm:$0xf0] }
 0x422   : > { %v3827_v34 = vpop.f32.mrf.mxu0  ;;  %v3876_v62 = vpop.f32.mrf.mxu1  ;;  %4281 = vmatpush.bf16.msrb.mxu2 %v9803_v10  ;;  %4330 = vmatpush.bf16.msra.mxu3 %v9867_v54  ;;  %v9840_v10 = vld [vmem:[#allocation7 + $0x298] sm:$0xf0] }
 0x423   : > { %v13216_v18 = vadd.f32 %v3876_v62, %v3827_v34  ;;  %v9784_v34 = vld [vmem:[#allocation7 + $0x228] sm:$0xf0]  ;;  %v9843_v54 = vor.u32 %v11079_v28, %v9840_v10 }
 0x425   : > { %4022 = vmatmul.bf16.gmra.mxu0 %v13124_v8  ;;  %4071 = vmatmul.bf16.gmra.mxu1 %v13126_v11  ;;  %v3922_v19 = vpop.f32.mrf.mxu2  ;;  %v3971_v32 = vpop.f32.mrf.mxu3 }
 0x426   : > { %4115 = vmatmul.bf16.gmra.mxu2 %v13079_v63  ;;  %4164 = vmatmul.bf16.gmra.mxu3 %v13073_v38  ;;  %v3923_v3 = vadd.f32 %v3922_v19, %v3874_v30  ;;  %v9787_v38 = vor.u32 %v11065_v14, %v9784_v34  ;;  %v9779_v30 = vor.u32 %v11063_v46, %v9776_v53  ;;  %v11061_v19 = vld [vmem:[#allocation7 + $0x204] sm:$0xf] }
 0x427   : > { %4282 = vmatpush.bf16.msrb.mxu2 %v9795_v57  ;;  %4331 = vmatpush.bf16.msra.mxu3 %v9859_v17  ;;  %v9771_v57 = vor.u32 %v11061_v19, %v9768_v48  ;;  %v9835_v17 = vor.u32 %v11077_v5, %v9832_v61 }
 0x428   : > { %v13222_v12 = vadd.f32 %v3971_v32, %v3923_v3 }
 0x42a   : > { %v3829_v62 = vpop.f32.mrf.mxu0  ;;  %v3878_v56 = vpop.f32.mrf.mxu1 }
 0x42b   : > { %v3879_v63 = vadd.f32 %v3878_v56, %v3829_v62  ;;  %4283 = vmatpush.bf16.msrb.mxu2 %v9787_v38  ;;  %4332 = vmatpush.bf16.msra.mxu3 %v9851_v2 }
 0x42f   : > { %4284 = vmatpush.bf16.msrb.mxu2 %v9779_v30  ;;  %4333 = vmatpush.bf16.msra.mxu3 %v9843_v54 }
 0x432   : > { %v3832_v3 = vpop.f32.mrf.mxu0  ;;  %v3881_v50 = vpop.f32.mrf.mxu1 }
 0x433   : > { %v3882_v32 = vadd.f32 %v3881_v50, %v3832_v3  ;;  %4285 = vmatpush.bf16.msrb.mxu2 %v9771_v57  ;;  %4334 = vmatpush.bf16.msra.mxu3 %v9835_v17 }
 0x435   : > { %4027 = vmatmul.bf16.gmra.mxu0 %v13151_v39  ;;  %4076 = vmatmul.bf16.gmra.mxu1 %v13153_v59 }
 0x436   : > { %4120 = vmatmul.bf16.gmra.mxu2 %v13117_v27  ;;  %4169 = vmatmul.bf16.gmra.mxu3 %v13119_v6 }
 0x439   : > { %v3925_v14 = vpop.f32.mrf.mxu2  ;;  %v3974_v34 = vpop.f32.mrf.mxu3 }
 0x43a   : > { %v3926_v62 = vadd.f32 %v3925_v14, %v13216_v18  ;;  %v3834_v56 = vpop.f32.mrf.mxu0  ;;  %v3883_v49 = vpop.f32.mrf.mxu1 }
 0x43b   : > { %v3884_v60 = vadd.f32 %v3883_v49, %v3834_v56 }
 0x43c   : > { %v13229_v38 = vadd.f32 %v3974_v34, %v3926_v62 }
 0x441   : > { %v3927_v2 = vpop.f32.mrf.mxu2  ;;  %v3976_v46 = vpop.f32.mrf.mxu3 }
 0x442   : > { %v3928_v53 = vadd.f32 %v3927_v2, %v3879_v63  ;;  %v3993_v28 = vpop.f32.mrf.mxu0  ;;  %v4042_v10 = vpop.f32.mrf.mxu1 }
 0x443   : > { %v3994_v27 = vadd.f32 %v3993_v28, %v13155_v23 }
 0x444   : > { %v13232_v30 = vadd.f32 %v3976_v46, %v3928_v53  ;;  %v14970_v53 = vld [vmem:[#allocation22_spill] sm:$0xff] }
 0x445   : > { %v13234_v6 = vadd.f32 %v4042_v10, %v3994_v27  ;;  %4188 = vmatmul.bf16.vlgmr.msrb.gmra.mxu0 %v12986_v44  ;;  %4237 = vmatmul.bf16.vlgmr.msrb.gmra.mxu1 %v12988_v20 }
 0x446   : > { %4125 = vmatmul.bf16.gmra.mxu2 %v13131_v7  ;;  %4174 = vmatmul.bf16.gmra.mxu3 %v13133_v1 }
 0x449   : > { %v3930_v18 = vpop.f32.mrf.mxu2  ;;  %v3979_v54 = vpop.f32.mrf.mxu3 }
 0x44a   : > { %v3931_v19 = vadd.f32 %v3930_v18, %v3882_v32  ;;  %v3995_v63 = vpop.f32.mrf.mxu0  ;;  %v4044_v48 = vpop.f32.mrf.mxu1 }
 0x44b   : > { %v3996_v5 = vadd.f32 %v3995_v63, %v13161_v15 }
 0x44c   : > { %v13241_v23 = vadd.f32 %v3979_v54, %v3931_v19 }
 0x44d   : > { %v13243_v3 = vadd.f32 %v4044_v48, %v3996_v5 }
 0x451   : > { %v3932_v50 = vpop.f32.mrf.mxu2  ;;  %v3981_v61 = vpop.f32.mrf.mxu3 }
 0x452   : > { %v3933_v44 = vadd.f32 %v3932_v50, %v3884_v60  ;;  %v3998_v57 = vpop.f32.mrf.mxu0  ;;  %v4047_v20 = vpop.f32.mrf.mxu1 }
 0x453   : > { %v3999_v7 = vadd.f32 %v3998_v57, %v13165_v4 }
 0x454   : > { %v13246_v17 = vadd.f32 %v3981_v61, %v3933_v44  ;;  %v14972_v44 = vld [vmem:[#allocation24_spill] sm:$0xff] }
 0x455   : > { %v13248_v1 = vadd.f32 %v4047_v20, %v3999_v7  ;;  %4193 = vmatmul.bf16.gmra.mxu0 %v13011_v47  ;;  %4242 = vmatmul.bf16.gmra.mxu1 %v13013_v13 }
 0x456   : > { %14968 = vst [vmem:[#allocation30_spill] sm:$0xff] %v13246_v17  ;;  %4286 = vmatmul.bf16.vlgmr.msrb.gmra.mxu2 %v12949_v42  ;;  %4335 = vmatmul.bf16.vlgmr.msra.gmra.mxu3 %v12951_v25  ;;  %v14969_v25 = vld [vmem:[#allocation21_spill] sm:$0xff] }
 0x459   : > { %v4091_v15 = vpop.f32.mrf.mxu2  ;;  %v4140_v32 = vpop.f32.mrf.mxu3 }
 0x45a   : > { %v13254_v14 = vadd.f32 %v4140_v32, %v4091_v15  ;;  %v4000_v34 = vpop.f32.mrf.mxu0  ;;  %v4049_v62 = vpop.f32.mrf.mxu1 }
 0x45b   : > { %v4001_v4 = vadd.f32 %v4000_v34, %v13177_v22 }
 0x45d   : > { %v13257_v56 = vadd.f32 %v4049_v62, %v4001_v4 }
 0x461   : > { %v4093_v49 = vpop.f32.mrf.mxu2  ;;  %v4142_v60 = vpop.f32.mrf.mxu3 }
 0x462   : > { %v13259_v2 = vadd.f32 %v4142_v60, %v4093_v49  ;;  %v4003_v47 = vpop.f32.mrf.mxu0  ;;  %v4052_v13 = vpop.f32.mrf.mxu1 }
 0x463   : > { %v4004_v42 = vadd.f32 %v4003_v47, %v13179_v9 }
 0x465   : > { %v13262_v46 = vadd.f32 %v4052_v13, %v4004_v42  ;;  %4198 = vmatmul.bf16.gmra.mxu0 %v14969_v25  ;;  %4247 = vmatmul.bf16.gmra.mxu1 %v14970_v53  ;;  %v14974_v13 = vld [vmem:[#allocation26_spill] sm:$0xff] }
 0x466   : > { %4291 = vmatmul.bf16.gmra.mxu2 %v12962_v21  ;;  %4340 = vmatmul.bf16.gmra.mxu3 %v12964_v55  ;;  %v14971_v55 = vld [vmem:[#allocation23_spill] sm:$0xff] }
 0x469   : > { %v4096_v22 = vpop.f32.mrf.mxu2  ;;  %v4145_v28 = vpop.f32.mrf.mxu3 }
 0x46a   : > { %v13268_v10 = vadd.f32 %v4145_v28, %v4096_v22  ;;  %v4005_v27 = vpop.f32.mrf.mxu0  ;;  %v4054_v18 = vpop.f32.mrf.mxu1 }
 0x46b   : > { %v4006_v54 = vadd.f32 %v4005_v27, %v13185_v40 }
 0x46d   : > { %v13271_v19 = vadd.f32 %v4054_v18, %v4006_v54 }
 0x471   : > { %v4098_v9 = vpop.f32.mrf.mxu2  ;;  %v4147_v63 = vpop.f32.mrf.mxu3 }
 0x472   : > { %v13273_v48 = vadd.f32 %v4147_v63, %v4098_v9  ;;  %v4008_v5 = vpop.f32.mrf.mxu0  ;;  %v4057_v50 = vpop.f32.mrf.mxu1 }
 0x473   : > { %v4009_v21 = vadd.f32 %v4008_v5, %v13189_v35 }
 0x475   : > { %v13276_v61 = vadd.f32 %v4057_v50, %v4009_v21  ;;  %4203 = vmatmul.bf16.gmra.mxu0 %v14971_v55  ;;  %4252 = vmatmul.bf16.gmra.mxu1 %v14972_v44 }
 0x476   : > { %4296 = vmatmul.bf16.gmra.mxu2 %v13169_v58  ;;  %4345 = vmatmul.bf16.gmra.mxu3 %v13171_v45  ;;  %v14973_v45 = vld [vmem:[#allocation25_spill] sm:$0xff] }
 0x479   : > { %v4101_v40 = vpop.f32.mrf.mxu2  ;;  %v4150_v57 = vpop.f32.mrf.mxu3 }
 0x47a   : > { %v13282_v20 = vadd.f32 %v4150_v57, %v4101_v40  ;;  %v4010_v7 = vpop.f32.mrf.mxu0  ;;  %v4059_v15 = vpop.f32.mrf.mxu1 }
 0x47b   : > { %v4011_v32 = vadd.f32 %v4010_v7, %v13203_v41 }
 0x47d   : > { %v13285_v34 = vadd.f32 %v4059_v15, %v4011_v32 }
 0x481   : > { %v4103_v35 = vpop.f32.mrf.mxu2  ;;  %v4152_v62 = vpop.f32.mrf.mxu3 }
 0x482   : > { %v13287_v4 = vadd.f32 %v4152_v62, %v4103_v35  ;;  %v4013_v49 = vpop.f32.mrf.mxu0  ;;  %v4062_v60 = vpop.f32.mrf.mxu1 }
 0x483   : > { %v4014_v58 = vadd.f32 %v4013_v49, %v13205_v31 }
 0x485   : > { %v13290_v47 = vadd.f32 %v4062_v60, %v4014_v58  ;;  %4208 = vmatmul.bf16.gmra.mxu0 %v14973_v45  ;;  %4257 = vmatmul.bf16.gmra.mxu1 %v14974_v13 }
 0x486   : > { %4301 = vmatmul.bf16.gmra.mxu2 %v13036_v33  ;;  %4350 = vmatmul.bf16.gmra.mxu3 %v13038_v16  ;;  %v14975_v33 = vld [vmem:[#allocation27_spill] sm:$0xff]  ;;  %v14976_v16 = vld [vmem:[#allocation28_spill] sm:$0xff] }
 0x489   : > { %v4106_v41 = vpop.f32.mrf.mxu2  ;;  %v4155_v42 = vpop.f32.mrf.mxu3 }
 0x48a   : > { %v13296_v25 = vadd.f32 %v4155_v42, %v4106_v41  ;;  %v13298_v53 = vpop.f32.mrf.mxu0  ;;  %v13300_v22 = vpop.f32.mrf.mxu1 }
 0x491   : > { %v4108_v28 = vpop.f32.mrf.mxu2  ;;  %v4157_v31 = vpop.f32.mrf.mxu3 }
 0x492   : > { %v13302_v27 = vadd.f32 %v4157_v31, %v4108_v28  ;;  %v4018_v18 = vpop.f32.mrf.mxu0  ;;  %v4067_v54 = vpop.f32.mrf.mxu1 }
 0x493   : > { %v4019_v9 = vadd.f32 %v4018_v18, %v13214_v52 }
 0x495   : > { %v13305_v63 = vadd.f32 %v4067_v54, %v4019_v9  ;;  %4213 = vmatmul.bf16.gmra.mxu0 %v14975_v33  ;;  %4262 = vmatmul.bf16.gmra.mxu1 %v14976_v16  ;;  %v4376_v16 = vld [vmem:[%s14869_s6] sm:$0xf] }
 0x496   : > { %4306 = vmatmul.bf16.gmra.mxu2 %v13193_v29  ;;  %4355 = vmatmul.bf16.gmra.mxu3 %v13195_v43 }
 0x499   : > { %v4111_v5 = vpop.f32.mrf.mxu2  ;;  %v4160_v50 = vpop.f32.mrf.mxu3 }
 0x49a   : > { %v13311_v21 = vadd.f32 %v4160_v50, %v4111_v5  ;;  %v13313_v55 = vpop.f32.mrf.mxu0  ;;  %v13315_v44 = vpop.f32.mrf.mxu1 }
 0x4a1   : > { %v13317_v40 = vpop.f32.mrf.mxu2  ;;  %v13319_v52 = vpop.f32.mrf.mxu3 }
 0x4a2   : > { %v4023_v57 = vpop.f32.mrf.mxu0  ;;  %v4072_v7 = vpop.f32.mrf.mxu1 }
 0x4a3   : > { %v4024_v15 = vadd.f32 %v4023_v57, %v13229_v38  ;;  %v4378_v57 = vperm.slane %v4376_v16, 0 }
 0x4a5   : > { %v13322_v32 = vadd.f32 %v4072_v7, %v4024_v15  ;;  %4218 = vmatmul.bf16.gmra.mxu0 %v13135_v51  ;;  %4267 = vmatmul.bf16.gmra.mxu1 %v13137_v26 }
 0x4a6   : > { %4311 = vmatmul.bf16.gmra.mxu2 %v13105_v36  ;;  %4360 = vmatmul.bf16.gmra.mxu3 %v13108_v0  ;;  %v14978_v36 = vld [vmem:[#allocation29_spill] sm:$0xff] }
 0x4a9   : > { %v4116_v29 = vpop.f32.mrf.mxu2  ;;  %v4165_v43 = vpop.f32.mrf.mxu3 }
 0x4aa   : > { %v13328_v35 = vadd.f32 %v4165_v43, %v4116_v29  ;;  %v13330_v62 = vpop.f32.mrf.mxu0  ;;  %v13332_v49 = vpop.f32.mrf.mxu1  ;;  %v4416_v29 = vperm.slane %v4376_v16, 1  ;;  %v4379_v43 = vperm.slane %v4376_v16, 2 }
 0x4b1   : > { %v13334_v60 = vpop.f32.mrf.mxu2  ;;  %v13336_v38 = vpop.f32.mrf.mxu3 }
 0x4b2   : > { %v4028_v58 = vpop.f32.mrf.mxu0  ;;  %v4077_v51 = vpop.f32.mrf.mxu1 }
 0x4b3   : > { %v4029_v26 = vadd.f32 %v4028_v58, %v13241_v23 }
 0x4b5   : > { %v13339_v45 = vadd.f32 %v4077_v51, %v4029_v26  ;;  %4223 = vmatmul.bf16.gmra.mxu0 %v13143_v24  ;;  %4272 = vmatmul.bf16.gmra.mxu1 %v14978_v36  ;;  %v4417_v51 = vperm.slane %v4376_v16, 3 }
 0x4b6   : > { %4316 = vmatmul.bf16.gmra.mxu2 %v13124_v8  ;;  %4365 = vmatmul.bf16.gmra.mxu3 %v13126_v11 }
 0x4b7   : > { %14977 = vst [vmem:[#allocation21_spill] sm:$0xff] %v13339_v45 }
 0x4b9   : > { %v4121_v0 = vpop.f32.mrf.mxu2  ;;  %v4170_v13 = vpop.f32.mrf.mxu3 }
 0x4ba   : > { %v13345_v41 = vadd.f32 %v4170_v13, %v4121_v0  ;;  %v13347_v42 = vpop.f32.mrf.mxu0  ;;  %v13349_v28 = vpop.f32.mrf.mxu1  ;;  %v13371_v13 = vperm.slane %v4416_v29, 1 }
 0x4bb   : > { %14979 = vst [vmem:[#allocation22_spill] sm:$0xff] %v13347_v42 }
 0x4bc   : > { %14980 = vst [vmem:[#allocation23_spill] sm:$0xff] %v13349_v28 }
 0x4c1   : > { %v13351_v31 = vpop.f32.mrf.mxu2  ;;  %v13353_v23 = vpop.f32.mrf.mxu3 }
 0x4c2   : > { %v4189_v18 = vpop.f32.mrf.mxu0  ;;  %v4238_v24 = vpop.f32.mrf.mxu1 }
 0x4c6   : > { %4321 = vmatmul.bf16.gmra.mxu2 %v13151_v39  ;;  %4370 = vmatmul.bf16.gmra.mxu3 %v13153_v59  ;;  %v4190_v39 = vadd.f32 %v4189_v18, %v13254_v14  ;;  %v13367_v59 = vperm.slane %v4378_v57, 0  ;;  %v13376_v57 = vperm.slane %v4417_v51, 1 }
 0x4c8   : > { %v4239_v58 = vadd.f32 %v4238_v24, %v4190_v39  ;;  %v4384_v0 = vmul.f32 %v13367_v59, %v13234_v6 }
 0x4c9   : > { %v4126_v8 = vpop.f32.mrf.mxu2  ;;  %v4175_v11 = vpop.f32.mrf.mxu3 }
 0x4ca   : > { %v13357_v54 = vadd.f32 %v4175_v11, %v4126_v8  ;;  %v4191_v9 = vpop.f32.mrf.mxu0  ;;  %v4240_v33 = vpop.f32.mrf.mxu1  ;;  %v13373_v11 = vperm.slane %v4379_v43, 0  ;;  %v4422_v24 = vadd.f32 %v13371_v13, %v4384_v0  ;;  %v4386_v43 = vmul.f32 %v13367_v59, %v13243_v3 }
 0x4cb   : > { %v4192_v14 = vadd.f32 %v4191_v9, %v13259_v2 }
 0x4cc   : > { %v4454_v42 = vmax.f32 %v4422_v24, 0.0  ;;  %v4424_v0 = vadd.f32 %v13371_v13, %v4386_v43 }
 0x4cd   : > { %v4241_v39 = vadd.f32 %v4240_v33, %v4192_v14 }
 0x4d1   : > { %v13362_v5 = vpop.f32.mrf.mxu2  ;;  %v13364_v50 = vpop.f32.mrf.mxu3 }
 0x4d2   : > { %14981 = vst [vmem:[#allocation24_spill] sm:$0xff] %v13362_v5  ;;  %v4194_v7 = vpop.f32.mrf.mxu0  ;;  %v4243_v15 = vpop.f32.mrf.mxu1 }
 0x4d3   : > { %14982 = vst [vmem:[#allocation25_spill] sm:$0xff] %v13364_v50  ;;  %v4195_v9 = vadd.f32 %v4194_v7, %v13268_v10 }
 0x4d9   : > { %v4287_v26 = vpop.f32.mrf.mxu2  ;;  %v4336_v36 = vpop.f32.mrf.mxu3 }
 0x4da   : > { %v4288_v8 = vadd.f32 %v4287_v26, %v4239_v58  ;;  %v4196_v28 = vpop.f32.mrf.mxu0  ;;  %v4245_v50 = vpop.f32.mrf.mxu1 }
 0x4db   : > { %v4197_v10 = vadd.f32 %v4196_v28, %v13273_v48  ;;  %v13396_v48 = vld [vmem:[%s14870_s7] sm:$0xff]  ;;  %v4390_v28 = vmul.f32 %v13367_v59, %v13257_v56 }
 0x4dc   : > { %v4337_v18 = vadd.f32 %v4336_v36, %v4288_v8  ;;  %v4244_v8 = vadd.f32 %v4243_v15, %v4195_v9 }
 0x4de   : > { %v4385_v16 = vmul.f32 %v13373_v11, %v4337_v18  ;;  %v4388_v18 = vmul.f32 %v13367_v59, %v13248_v1  ;;  %v4246_v1 = vadd.f32 %v4245_v50, %v4197_v10  ;;  %v4428_v10 = vadd.f32 %v13371_v13, %v4390_v28 }
 0x4e0   : > { %v4423_v5 = vadd.f32 %v13376_v57, %v4385_v16 }
 0x4e1   : > { %v4289_v6 = vpop.f32.mrf.mxu2  ;;  %v4338_v29 = vpop.f32.mrf.mxu3 }
 0x4e2   : > { %v4455_v58 = vmax.f32 %v4423_v5, 0.0  ;;  %v4290_v26 = vadd.f32 %v4289_v6, %v4241_v39  ;;  %v4199_v17 = vpop.f32.mrf.mxu0  ;;  %v4248_v2 = vpop.f32.mrf.mxu1  ;;  %v4456_v5 = vmax.f32 %v4424_v0, 0.0 }
 0x4e4   : > { %v4486_v51 = vpack.c.bf16 %v4455_v58, %v4454_v42  ;;  %v4339_v36 = vadd.f32 %v4338_v29, %v4290_v26  ;;  %v4426_v29 = vadd.f32 %v13371_v13, %v4388_v18 }
 0x4e6   : > { %v4387_v33 = vmul.f32 %v13373_v11, %v4339_v36  ;;  %v4515_v43 = vunpack.c.l.b16 %v4486_v51  ;;  %v4516_v15 = vunpack.c.h.b16 %v4486_v51 }
 0x4e8   : > { %v4425_v14 = vadd.f32 %v13376_v57, %v4387_v33 }
 0x4e9   : > { %v4292_v24 = vpop.f32.mrf.mxu2  ;;  %v4341_v3 = vpop.f32.mrf.mxu3 }
 0x4ea   : > { %v4457_v16 = vmax.f32 %v4425_v14, 0.0  ;;  %v4293_v39 = vadd.f32 %v4292_v24, %v4244_v8  ;;  %v4201_v6 = vpop.f32.mrf.mxu0  ;;  %v4250_v45 = vpop.f32.mrf.mxu1  ;;  %v4458_v8 = vmax.f32 %v4426_v29, 0.0  ;;  %v4392_v29 = vmul.f32 %v13367_v59, %v13262_v46 }
 0x4ec   : > { %v4487_v42 = vpack.c.bf16 %v4457_v16, %v4456_v5  ;;  %v4342_v7 = vadd.f32 %v4341_v3, %v4293_v39  ;;  %v4200_v3 = vadd.f32 %v4199_v17, %v13282_v20 }
 0x4ee   : > { %v4389_v58 = vmul.f32 %v13373_v11, %v4342_v7  ;;  %v4517_v26 = vunpack.c.l.b16 %v4487_v42  ;;  %v4518_v9 = vunpack.c.h.b16 %v4487_v42  ;;  %v4249_v42 = vadd.f32 %v4248_v2, %v4200_v3 }
 0x4ef   : > { %v4430_v2 = vadd.f32 %v13371_v13, %v4392_v29 }
 0x4f0   : > { %v4427_v36 = vadd.f32 %v13376_v57, %v4389_v58  ;;  %v4519_v0 = vpack.c.b16 %v4517_v26, %v4515_v43  ;;  %v4520_v33 = vpack.c.b16 %v4518_v9, %v4516_v15  ;;  %v4460_v43 = vmax.f32 %v4428_v10, 0.0  ;;  %v4504_v9 = vld [vmem:[%s14870_s7 + $0x8] sm:$0x7] }
 0x4f1   : > { %v4294_v14 = vpop.f32.mrf.mxu2  ;;  %v4343_v24 = vpop.f32.mrf.mxu3 }
 0x4f2   : > { %v4459_v51 = vmax.f32 %v4427_v36, 0.0  ;;  %v4295_v18 = vadd.f32 %v4294_v14, %v4246_v1  ;;  %4537 = vmatpush.bf16.msra.mxu0 %v4519_v0  ;;  %4555 = vmatpush.bf16.msra.mxu1 %v4520_v33  ;;  %v4204_v50 = vpop.f32.mrf.mxu0  ;;  %v4253_v39 = vpop.f32.mrf.mxu1  ;;  %v4202_v1 = vadd.f32 %v4201_v6, %v13287_v4  ;;  %v4394_v6 = vmul.f32 %v13367_v59, %v13271_v19 }
 0x4f4   : > { %v4488_v5 = vpack.c.bf16 %v4459_v51, %v4458_v8  ;;  %v4344_v16 = vadd.f32 %v4343_v24, %v4295_v18  ;;  %v4510_v8 = vunpack.c.l.b16 %v4504_v9  ;;  %v4251_v18 = vadd.f32 %v4250_v45, %v4202_v1 }
 0x4f5   : > { %9896 = vmatmul.msk.bf16.vlgmr.msra.gmra.mxu0 %vm4523_vm2, %v13396_v48  ;;  %9898 = vmatmul.msk.bf16.vlgmr.msra.gmra.mxu1 %vm4523_vm2, %v13396_v48  ;;  %v4396_v9 = vmul.f32 %v13367_v59, %v13276_v61 }
 0x4f6   : > { %v4391_v56 = vmul.f32 %v13373_v11, %v4344_v16  ;;  %v4610_v33 = vunpack.c.l.b16 %v4488_v5  ;;  %v4611_v14 = vunpack.c.h.b16 %v4488_v5 }
 0x4f8   : > { %v4429_v7 = vadd.f32 %v13376_v57, %v4391_v56  ;;  %v4462_v56 = vmax.f32 %v4430_v2, 0.0 }
 0x4f9   : > { %v4297_v17 = vpop.f32.mrf.mxu2  ;;  %v4346_v20 = vpop.f32.mrf.mxu3 }
 0x4fa   : > { %v4461_v15 = vmax.f32 %v4429_v7, 0.0  ;;  %v4298_v58 = vadd.f32 %v4297_v17, %v4249_v42  ;;  %v4206_v26 = vpop.f32.mrf.mxu0  ;;  %v4255_v24 = vpop.f32.mrf.mxu1  ;;  %v13419_v17 = vpack.c.b16 %v4510_v8, %v4510_v8 }
 0x4fb   : > { %v4207_v8 = vadd.f32 %v4206_v26, %v13302_v27  ;;  %v4398_v27 = vmul.f32 %v13367_v59, %v13285_v34 }
 0x4fc   : > { %v4489_v36 = vpack.c.bf16 %v4461_v15, %v4460_v43  ;;  %v4347_v0 = vadd.f32 %v4346_v20, %v4298_v58  ;;  %v4205_v20 = vadd.f32 %v4204_v50, %v13296_v25  ;;  %v4432_v15 = vadd.f32 %v13371_v13, %v4394_v6 }
 0x4fe   : > { %v4393_v46 = vmul.f32 %v13373_v11, %v4347_v0  ;;  %v4612_v28 = vunpack.c.l.b16 %v4489_v36  ;;  %v4613_v51 = vunpack.c.h.b16 %v4489_v36  ;;  %v4254_v58 = vadd.f32 %v4253_v39, %v4205_v20 }
 0x4ff   : > { %v4464_v0 = vmax.f32 %v4432_v15, 0.0 }
 0x500   : > { %v4431_v3 = vadd.f32 %v13376_v57, %v4393_v46  ;;  %v4614_v16 = vpack.c.b16 %v4612_v28, %v4610_v33  ;;  %v4615_v10 = vpack.c.b16 %v4613_v51, %v4611_v14  ;;  %v4434_v51 = vadd.f32 %v13371_v13, %v4396_v9 }
 0x501   : > { %v4299_v42 = vpop.f32.mrf.mxu2  ;;  %v4348_v4 = vpop.f32.mrf.mxu3  ;;  %v4016_v9 = vadd.f32 %v13298_v53, %v13211_v37 }
 0x502   : > { %v4463_v7 = vmax.f32 %v4431_v3, 0.0  ;;  %v4300_v29 = vadd.f32 %v4299_v42, %v4251_v18  ;;  %4625 = vmatpush.bf16.msra.mxu2 %v4614_v16  ;;  %4643 = vmatpush.bf16.msrb.mxu3 %v4615_v10  ;;  %v4209_v5 = vpop.f32.mrf.mxu0  ;;  %v4258_v50 = vpop.f32.mrf.mxu1 }
 0x504   : > { %v4490_v45 = vpack.c.bf16 %v4463_v7, %v4462_v56  ;;  %v4349_v43 = vadd.f32 %v4348_v4, %v4300_v29  ;;  %v4256_v56 = vadd.f32 %v4255_v24, %v4207_v8  ;;  %v4466_v29 = vmax.f32 %v4434_v51, 0.0 }
 0x505   : > { %9900 = vmatmul.msk.bf16.vlgmr.msra.gmra.mxu2 %vm4523_vm2, %v13396_v48  ;;  %9902 = vmatmul.msk.bf16.vlgmr.msrb.gmra.mxu3 %vm4523_vm2, %v13396_v48  ;;  %v4436_v24 = vadd.f32 %v13371_v13, %v4398_v27 }
 0x506   : > { %v4395_v19 = vmul.f32 %v13373_v11, %v4349_v43  ;;  %9897 = vmatmul.msk.bf16.gmra.mxu0 %vm4523_vm2, %v13419_v17  ;;  %9899 = vmatmul.msk.bf16.gmra.mxu1 %vm4523_vm2, %v13419_v17  ;;  %v4692_v18 = vunpack.c.l.b16 %v4490_v45  ;;  %v4693_v39 = vunpack.c.h.b16 %v4490_v45  ;;  %v4210_v45 = vadd.f32 %v4209_v5, %v13311_v21 }
 0x508   : > { %v4433_v25 = vadd.f32 %v13376_v57, %v4395_v19  ;;  %v4259_v21 = vadd.f32 %v4258_v50, %v4210_v45 }
 0x509   : > { %v4302_v1 = vpop.f32.mrf.mxu2  ;;  %v4351_v36 = vpop.f32.mrf.mxu3 }
 0x50a   : > { %v4465_v2 = vmax.f32 %v4433_v25, 0.0  ;;  %v4303_v33 = vadd.f32 %v4302_v1, %v4254_v58  ;;  %v4211_v28 = vpop.f32.mrf.mxu0  ;;  %v4260_v20 = vpop.f32.mrf.mxu1  ;;  %v4400_v25 = vmul.f32 %v13367_v59, %v13290_v47 }
 0x50c   : > { %v4491_v14 = vpack.c.bf16 %v4465_v2, %v4464_v0  ;;  %v4352_v46 = vadd.f32 %v4351_v36, %v4303_v33  ;;  %v4468_v0 = vmax.f32 %v4436_v24, 0.0  ;;  %v4163_v2 = vadd.f32 %v13319_v52, %v13317_v40 }
 0x50d   : > { %v4021_v24 = vadd.f32 %v13313_v55, %v13222_v12 }
 0x50e   : > { %v4397_v3 = vmul.f32 %v13373_v11, %v4352_v46  ;;  %v4694_v16 = vunpack.c.l.b16 %v4491_v14  ;;  %v4695_v10 = vunpack.c.h.b16 %v4491_v14  ;;  %v4212_v14 = vadd.f32 %v4211_v28, %v4163_v2 }
 0x510   : > { %v4435_v61 = vadd.f32 %v13376_v57, %v4397_v3  ;;  %v4696_v42 = vpack.c.b16 %v4694_v16, %v4692_v18  ;;  %v4697_v4 = vpack.c.b16 %v4695_v10, %v4693_v39  ;;  %v4438_v18 = vadd.f32 %v13371_v13, %v4400_v25 }
 0x511   : > { %v4304_v6 = vpop.f32.mrf.mxu2  ;;  %v4353_v7 = vpop.f32.mrf.mxu3  ;;  %v4065_v39 = vadd.f32 %v13300_v22, %v4016_v9  ;;  %v4261_v10 = vadd.f32 %v4260_v20, %v4212_v14 }
 0x512   : > { %v4467_v26 = vmax.f32 %v4435_v61, 0.0  ;;  %v4305_v43 = vadd.f32 %v4304_v6, %v4256_v56  ;;  %4707 = vmatpush.bf16.msrb.mxu0 %v4696_v42  ;;  %4725 = vmatpush.bf16.msrb.mxu1 %v4697_v4  ;;  %v4214_v34 = vpop.f32.mrf.mxu0  ;;  %v4263_v51 = vpop.f32.mrf.mxu1  ;;  %v4470_v4 = vmax.f32 %v4438_v18, 0.0 }
 0x513   : > { %v4402_v6 = vmul.f32 %v13367_v59, %v4065_v39  ;;  %v4215_v22 = vadd.f32 %v4214_v34, %v13328_v35 }
 0x514   : > { %v4492_v15 = vpack.c.bf16 %v4467_v26, %v4466_v29  ;;  %v4354_v19 = vadd.f32 %v4353_v7, %v4305_v43 }
 0x515   : > { %9901 = vmatmul.msk.bf16.gmra.mxu2 %vm4523_vm2, %v13419_v17  ;;  %9903 = vmatmul.msk.bf16.gmra.mxu3 %vm4523_vm2, %v13419_v17  ;;  %v4440_v20 = vadd.f32 %v13371_v13, %v4402_v6  ;;  %v4264_v35 = vadd.f32 %v4263_v51, %v4215_v22  ;;  %v4173_v22 = vadd.f32 %v13353_v23, %v13351_v31 }
 0x516   : > { %v4399_v58 = vmul.f32 %v13373_v11, %v4354_v19  ;;  %9904 = vmatmul.msk.bf16.vlgmr.msrb.gmra.mxu0 %vm4523_vm2, %v13396_v48  ;;  %9906 = vmatmul.msk.bf16.vlgmr.msrb.gmra.mxu1 %vm4523_vm2, %v13396_v48  ;;  %v4774_v47 = vunpack.c.l.b16 %v4492_v15  ;;  %v4775_v3 = vunpack.c.h.b16 %v4492_v15  ;;  %v4404_v19 = vmul.f32 %v13367_v59, %v13305_v63 }
 0x518   : > { %v4437_v5 = vadd.f32 %v13376_v57, %v4399_v58 }
 0x519   : > { %v4307_v1 = vpop.f32.mrf.mxu2  ;;  %v4356_v36 = vpop.f32.mrf.mxu3 }
 0x51a   : > { %v4469_v33 = vmax.f32 %v4437_v5, 0.0  ;;  %v4308_v8 = vadd.f32 %v4307_v1, %v4259_v21  ;;  %v4216_v40 = vpop.f32.mrf.mxu0  ;;  %v4265_v43 = vpop.f32.mrf.mxu1  ;;  %v4472_v21 = vmax.f32 %v4440_v20, 0.0  ;;  %v4168_v5 = vadd.f32 %v13336_v38, %v13334_v60 }
 0x51c   : > { %v4493_v46 = vpack.c.bf16 %v4469_v33, %v4468_v0  ;;  %v4357_v50 = vadd.f32 %v4356_v36, %v4308_v8  ;;  %v4217_v36 = vadd.f32 %v4216_v40, %v4168_v5  ;;  %v4442_v33 = vadd.f32 %v13371_v13, %v4404_v19 }
 0x51d   : > { %v4070_v8 = vadd.f32 %v13315_v44, %v4021_v24 }
 0x51e   : > { %v4401_v37 = vmul.f32 %v13373_v11, %v4357_v50  ;;  %v4776_v53 = vunpack.c.l.b16 %v4493_v46  ;;  %v4777_v16 = vunpack.c.h.b16 %v4493_v46  ;;  %v4266_v51 = vadd.f32 %v4265_v43, %v4217_v36 }
 0x520   : > { %v4439_v56 = vadd.f32 %v13376_v57, %v4401_v37  ;;  %v4778_v52 = vpack.c.b16 %v4776_v53, %v4774_v47  ;;  %v4779_v61 = vpack.c.b16 %v4777_v16, %v4775_v3  ;;  %v4474_v3 = vmax.f32 %v4442_v33, 0.0 }
 0x521   : > { %v4309_v28 = vpop.f32.mrf.mxu2  ;;  %v4358_v42 = vpop.f32.mrf.mxu3  ;;  %v4406_v37 = vmul.f32 %v13367_v59, %v4070_v8 }
 0x522   : > { %v4471_v7 = vmax.f32 %v4439_v56, 0.0  ;;  %v4310_v29 = vadd.f32 %v4309_v28, %v4261_v10  ;;  %4789 = vmatpush.bf16.msrb.mxu2 %v4778_v52  ;;  %4807 = vmatpush.bf16.msra.mxu3 %v4779_v61  ;;  %v4219_v9 = vpop.f32.mrf.mxu0  ;;  %v4268_v50 = vpop.f32.mrf.mxu1 }
 0x523   : > { %v4220_v44 = vadd.f32 %v4219_v9, %v13345_v41  ;;  %v4444_v52 = vadd.f32 %v13371_v13, %v4406_v37  ;;  %v14986_v37 = vld [vmem:[#allocation24_spill] sm:$0xff] }
 0x524   : > { %v4494_v27 = vpack.c.bf16 %v4471_v7, %v4470_v4  ;;  %v4359_v26 = vadd.f32 %v4358_v42, %v4310_v29  ;;  %v4408_v42 = vmul.f32 %v13367_v59, %v13322_v32  ;;  %v4026_v4 = vadd.f32 %v13330_v62, %v13232_v30 }
 0x525   : > { %9908 = vmatmul.msk.bf16.vlgmr.msrb.gmra.mxu2 %vm4523_vm2, %v13396_v48  ;;  %9910 = vmatmul.msk.bf16.vlgmr.msra.gmra.mxu3 %vm4523_vm2, %v13396_v48  ;;  %v4269_v41 = vadd.f32 %v4268_v50, %v4220_v44  ;;  %v4476_v29 = vmax.f32 %v4444_v52, 0.0 }
 0x526   : > { %v4403_v45 = vmul.f32 %v13373_v11, %v4359_v26  ;;  %9905 = vmatmul.msk.bf16.gmra.mxu0 %vm4523_vm2, %v13419_v17  ;;  %9907 = vmatmul.msk.bf16.gmra.mxu1 %vm4523_vm2, %v13419_v17  ;;  %v4856_v63 = vunpack.c.l.b16 %v4494_v27  ;;  %v4857_v14 = vunpack.c.h.b16 %v4494_v27  ;;  %v4075_v19 = vadd.f32 %v13332_v49, %v4026_v4 }
 0x528   : > { %v4441_v15 = vadd.f32 %v13376_v57, %v4403_v45  ;;  %v4410_v36 = vmul.f32 %v13367_v59, %v4075_v19 }
 0x529   : > { %v4312_v58 = vpop.f32.mrf.mxu2  ;;  %v4361_v34 = vpop.f32.mrf.mxu3 }
 0x52a   : > { %v4473_v25 = vmax.f32 %v4441_v15, 0.0  ;;  %v4313_v1 = vadd.f32 %v4312_v58, %v4264_v35  ;;  %v4221_v56 = vpop.f32.mrf.mxu0  ;;  %v4270_v20 = vpop.f32.mrf.mxu1  ;;  %v4446_v15 = vadd.f32 %v13371_v13, %v4408_v42 }
 0x52b   : > { %v4222_v43 = vadd.f32 %v4221_v56, %v4173_v22 }
 0x52c   : > { %v4495_v0 = vpack.c.bf16 %v4473_v25, %v4472_v21  ;;  %v4362_v2 = vadd.f32 %v4361_v34, %v4313_v1  ;;  %v4478_v1 = vmax.f32 %v4446_v15, 0.0 }
 0x52d   : > { %v4271_v21 = vadd.f32 %v4270_v20, %v4222_v43 }
 0x52e   : > { %v4405_v12 = vmul.f32 %v13373_v11, %v4362_v2  ;;  %v4858_v55 = vunpack.c.l.b16 %v4495_v0  ;;  %v4859_v46 = vunpack.c.h.b16 %v4495_v0 }
 0x530   : > { %v4443_v60 = vadd.f32 %v13376_v57, %v4405_v12  ;;  %v4860_v38 = vpack.c.b16 %v4858_v55, %v4856_v63  ;;  %v4861_v18 = vpack.c.b16 %v4859_v46, %v4857_v14  ;;  %v4448_v14 = vadd.f32 %v13371_v13, %v4410_v36 }
 0x531   : > { %v4314_v39 = vpop.f32.mrf.mxu2  ;;  %v4363_v47 = vpop.f32.mrf.mxu3 }
 0x532   : > { %v4475_v53 = vmax.f32 %v4443_v60, 0.0  ;;  %v4315_v16 = vadd.f32 %v4314_v39, %v4266_v51  ;;  %4871 = vmatpush.bf16.msra.mxu0 %v4860_v38  ;;  %4889 = vmatpush.bf16.msra.mxu1 %v4861_v18  ;;  %v4224_v58 = vpop.f32.mrf.mxu0  ;;  %v4273_v63 = vpop.f32.mrf.mxu1  ;;  %v14983_v51 = vld [vmem:[#allocation21_spill] sm:$0xff]  ;;  %v14984_v60 = vld [vmem:[#allocation30_spill] sm:$0xff] }
 0x533   : > { %v4225_v49 = vadd.f32 %v4224_v58, %v13357_v54  ;;  %v4412_v50 = vmul.f32 %v13367_v59, %v14983_v51  ;;  %v14985_v38 = vld [vmem:[#allocation22_spill] sm:$0xff] }
 0x534   : > { %v4496_v10 = vpack.c.bf16 %v4475_v53, %v4474_v3  ;;  %v4364_v40 = vadd.f32 %v4363_v47, %v4315_v16  ;;  %v4031_v18 = vadd.f32 %v14985_v38, %v14984_v60  ;;  %v4480_v3 = vmax.f32 %v4448_v14, 0.0  ;;  %v14987_v53 = vld [vmem:[#allocation25_spill] sm:$0xff]  ;;  %v11107_v14 = vld [vmem:[#allocation8 + $0x64] sm:$0xf0]  ;;  %v11105_v51 = vld [vmem:[#allocation8 + $0x54] sm:$0xf0] }
 0x535   : > { %9909 = vmatmul.msk.bf16.gmra.mxu2 %vm4523_vm2, %v13419_v17  ;;  %9911 = vmatmul.msk.bf16.gmra.mxu3 %vm4523_vm2, %v13419_v17  ;;  %v4274_v54 = vadd.f32 %v4273_v63, %v4225_v49  ;;  %v4178_v16 = vadd.f32 %v14987_v53, %v14986_v37  ;;  %v9978_v63 = vld [vmem:[#allocation8 + $0x60] sm:$0xf]  ;;  %v11121_v38 = vld [vmem:[#allocation8 + $0xd4] sm:$0xf0]  ;;  %v11119_v53 = vld [vmem:[#allocation8 + $0xc4] sm:$0xf0] }
 0x536   : > { %v4407_v61 = vmul.f32 %v13373_v11, %v4364_v40  ;;  %9912 = vmatmul.msk.bf16.vlgmr.msra.gmra.mxu0 %vm4523_vm2, %v13396_v48  ;;  %9914 = vmatmul.msk.bf16.vlgmr.msra.gmra.mxu1 %vm4523_vm2, %v13396_v48  ;;  %v4938_v32 = vunpack.c.l.b16 %v4496_v10  ;;  %v4939_v24 = vunpack.c.h.b16 %v4496_v10 }
 0x538   : > { %v4445_v28 = vadd.f32 %v13376_v57, %v4407_v61  ;;  %v4450_v61 = vadd.f32 %v13371_v13, %v4412_v50  ;;  %v10034_v50 = vld [vmem:[#allocation8 + $0xd0] sm:$0xf] }
 0x539   : > { %v4317_v6 = vpop.f32.mrf.mxu2  ;;  %v4366_v7 = vpop.f32.mrf.mxu3 }
 0x53a   : > { %v4477_v27 = vmax.f32 %v4445_v28, 0.0  ;;  %v4318_v26 = vadd.f32 %v4317_v6, %v4269_v41  ;;  %v4226_v55 = vpop.f32.mrf.mxu0  ;;  %v14988_v41 = vld [vmem:[#allocation23_spill] sm:$0xff]  ;;  %v4275_v22 = vpop.f32.mrf.mxu1 }
 0x53b   : > { %v4227_v56 = vadd.f32 %v4226_v55, %v4178_v16  ;;  %v4080_v28 = vadd.f32 %v14988_v41, %v4031_v18  ;;  %v10035_v18 = vor.u32 %v11121_v38, %v10034_v50  ;;  %v10114_v16 = vld [vmem:[#allocation8 + $0x170] sm:$0xf]  ;;  %v11101_v41 = vld [vmem:[#allocation8 + $0x34] sm:$0xf0] }
 0x53c   : > { %v4497_v45 = vpack.c.bf16 %v4477_v27, %v4476_v29  ;;  %v4367_v35 = vadd.f32 %v4366_v7, %v4318_v26  ;;  %v10146_v50 = vld [vmem:[#allocation8 + $0x1b0] sm:$0xf]  ;;  %v11149_v38 = vld [vmem:[#allocation8 + $0x1b4] sm:$0xf0] }
 0x53d   : > { %v4276_v27 = vadd.f32 %v4275_v22, %v4227_v56  ;;  %v4414_v15 = vmul.f32 %v13367_v59, %v4080_v28  ;;  %v10018_v28 = vld [vmem:[#allocation8 + $0xb0] sm:$0xf]  ;;  %v10170_v22 = vld [vmem:[#allocation8 + $0x1e0] sm:$0xf] }
 0x53e   : > { %v4409_v30 = vmul.f32 %v13373_v11, %v4367_v35  ;;  %v4940_v62 = vunpack.c.l.b16 %v4497_v45  ;;  %v4941_v34 = vunpack.c.h.b16 %v4497_v45  ;;  %v4482_v35 = vmax.f32 %v4450_v61, 0.0  ;;  %v9954_v61 = vld [vmem:[#allocation8 + $0x30] sm:$0xf] }
 0x540   : > { %v4447_v31 = vadd.f32 %v13376_v57, %v4409_v30  ;;  %v4942_v23 = vpack.c.b16 %v4940_v62, %v4938_v32  ;;  %v4943_v5 = vpack.c.b16 %v4941_v34, %v4939_v24  ;;  %v4452_v62 = vadd.f32 %v13371_v13, %v4414_v15 }
 0x541   : > { %v4319_v25 = vpop.f32.mrf.mxu2  ;;  %v4368_v9 = vpop.f32.mrf.mxu3 }
 0x542   : > { %v4479_v0 = vmax.f32 %v4447_v31, 0.0  ;;  %v4320_v2 = vadd.f32 %v4319_v25, %v4271_v21  ;;  %4953 = vmatpush.bf16.msra.mxu2 %v4942_v23  ;;  %4971 = vmatpush.bf16.msrb.mxu3 %v4943_v5  ;;  %v4484_v21 = vmax.f32 %v4452_v62, 0.0  ;;  %v9986_v25 = vld [vmem:[#allocation8 + $0x70] sm:$0xf]  ;;  %v11137_v62 = vld [vmem:[#allocation8 + $0x154] sm:$0xf0] }
 0x544   : > { %v4498_v33 = vpack.c.bf16 %v4479_v0, %v4478_v1  ;;  %v4369_v8 = vadd.f32 %v4368_v9, %v4320_v2  ;;  %v11109_v9 = vld [vmem:[#allocation8 + $0x74] sm:$0xf0]  ;;  %v10050_v1 = vld [vmem:[#allocation8 + $0xf0] sm:$0xf] }
 0x545   : > { %9916 = vmatmul.msk.bf16.vlgmr.msra.gmra.mxu2 %vm4523_vm2, %v13396_v48  ;;  %9918 = vmatmul.msk.bf16.vlgmr.msrb.gmra.mxu3 %vm4523_vm2, %v13396_v48  ;;  %v9987_v2 = vor.u32 %v11109_v9, %v9986_v25  ;;  %v10002_v25 = vld [vmem:[#allocation8 + $0x90] sm:$0xf] }
 0x546   : > { %v4411_v12 = vmul.f32 %v13373_v11, %v4369_v8  ;;  %9913 = vmatmul.msk.bf16.gmra.mxu0 %vm4523_vm2, %v13419_v17  ;;  %9915 = vmatmul.msk.bf16.gmra.mxu1 %vm4523_vm2, %v13419_v17  ;;  %v5020_v42 = vunpack.c.l.b16 %v4498_v33  ;;  %v5021_v4 = vunpack.c.h.b16 %v4498_v33 }
 0x548   : > { %v4449_v46 = vadd.f32 %v13376_v57, %v4411_v12  ;;  %v9979_v12 = vor.u32 %v11107_v14, %v9978_v63  ;;  %v11095_v63 = vld [vmem:[#allocation8 + $0x4] sm:$0xf0] }
 0x549   : > { %v4322_v39 = vpop.f32.mrf.mxu2  ;;  %v4371_v47 = vpop.f32.mrf.mxu3 }
 0x54a   : > { %v4481_v44 = vmax.f32 %v4449_v46, 0.0  ;;  %v4323_v10 = vadd.f32 %v4322_v39, %v4274_v54  ;;  %v11123_v54 = vld [vmem:[#allocation8 + $0xe4] sm:$0xf0]  ;;  %v9970_v46 = vld [vmem:[#allocation8 + $0x50] sm:$0xf] }
 0x54b   : > { %v9971_v60 = vor.u32 %v11105_v51, %v9970_v46  ;;  %v9962_v39 = vld [vmem:[#allocation8 + $0x40] sm:$0xf]  ;;  %v10082_v46 = vld [vmem:[#allocation8 + $0x130] sm:$0xf]  ;;  %v11133_v51 = vld [vmem:[#allocation8 + $0x134] sm:$0xf0] }
 0x54c   : > { %v4499_v40 = vpack.c.bf16 %v4481_v44, %v4480_v3  ;;  %v4372_v52 = vadd.f32 %v4371_v47, %v4323_v10  ;;  %v11103_v47 = vld [vmem:[#allocation8 + $0x44] sm:$0xf0]  ;;  %v10026_v3 = vld [vmem:[#allocation8 + $0xc0] sm:$0xf]  ;;  %v11141_v44 = vld [vmem:[#allocation8 + $0x174] sm:$0xf0] }
 0x54d   : > { %v9963_v37 = vor.u32 %v11103_v47, %v9962_v39  ;;  %v10178_v10 = vld [vmem:[#allocation8 + $0x1f0] sm:$0xf]  ;;  %v10115_v56 = vor.u32 %v11141_v44, %v10114_v16  ;;  %v10074_v39 = vld [vmem:[#allocation8 + $0x120] sm:$0xf]  ;;  %v11131_v47 = vld [vmem:[#allocation8 + $0x124] sm:$0xf0] }
 0x54e   : > { %v4413_v6 = vmul.f32 %v13373_v11, %v4372_v52  ;;  %v5022_v7 = vunpack.c.l.b16 %v4499_v40  ;;  %v5023_v29 = vunpack.c.h.b16 %v4499_v40  ;;  %v11157_v40 = vld [vmem:[#allocation8 + $0x1f4] sm:$0xf0] }
 0x54f   : > { %v10179_v52 = vor.u32 %v11157_v40, %v10178_v10 }
 0x550   : > { %v4451_v26 = vadd.f32 %v13376_v57, %v4413_v6  ;;  %v5024_v20 = vpack.c.b16 %v5022_v7, %v5020_v42  ;;  %v5025_v43 = vpack.c.b16 %v5023_v29, %v5021_v4  ;;  %v9955_v42 = vor.u32 %v11101_v41, %v9954_v61  ;;  %v11117_v4 = vld [vmem:[#allocation8 + $0xb4] sm:$0xf0]  ;;  %v10106_v7 = vld [vmem:[#allocation8 + $0x160] sm:$0xf]  ;;  %v11139_v29 = vld [vmem:[#allocation8 + $0x164] sm:$0xf0] }
 0x551   : > { %v4324_v45 = vpop.f32.mrf.mxu2  ;;  %v4373_v24 = vpop.f32.mrf.mxu3  ;;  %v10019_v6 = vor.u32 %v11117_v4, %v10018_v28  ;;  %v10130_v61 = vld [vmem:[#allocation8 + $0x190] sm:$0xf]  ;;  %v11145_v41 = vld [vmem:[#allocation8 + $0x194] sm:$0xf0] }
 0x552   : > { %v4483_v19 = vmax.f32 %v4451_v26, 0.0  ;;  %v4325_v32 = vadd.f32 %v4324_v45, %v4276_v27  ;;  %5035 = vmatpush.bf16.msrb.mxu0 %v5024_v20  ;;  %5053 = vmatpush.bf16.msrb.mxu1 %v5025_v43  ;;  %v10107_v27 = vor.u32 %v11139_v29, %v10106_v7  ;;  %v11155_v26 = vld [vmem:[#allocation8 + $0x1e4] sm:$0xf0]  ;;  %v9946_v43 = vld [vmem:[#allocation8 + $0x20] sm:$0xf]  ;;  %v10131_v4 = vor.u32 %v11145_v41, %v10130_v61 }
 0x553   : > { %v10171_v20 = vor.u32 %v11155_v26, %v10170_v22  ;;  %v11099_v45 = vld [vmem:[#allocation8 + $0x24] sm:$0xf0] }
 0x554   : > { %v4500_v58 = vpack.c.bf16 %v4483_v19, %v4482_v35  ;;  %v4374_v30 = vadd.f32 %v4373_v24, %v4325_v32  ;;  %v10010_v35 = vld [vmem:[#allocation8 + $0xa0] sm:$0xf]  ;;  %v9947_v32 = vor.u32 %v11099_v45, %v9946_v43  ;;  %v11115_v24 = vld [vmem:[#allocation8 + $0xa4] sm:$0xf0] }
 0x555   : > { %9917 = vmatmul.msk.bf16.gmra.mxu2 %vm4523_vm2, %v13419_v17  ;;  %9919 = vmatmul.msk.bf16.gmra.mxu3 %vm4523_vm2, %v13419_v17  ;;  %v11127_v26 = vld [vmem:[#allocation8 + $0x104] sm:$0xf0] }
 0x556   : > { %v4415_v34 = vmul.f32 %v13373_v11, %v4374_v30  ;;  %9920 = vmatmul.msk.bf16.vlgmr.msrb.gmra.mxu0 %vm4523_vm2, %v13396_v48  ;;  %9922 = vmatmul.msk.bf16.vlgmr.msrb.gmra.mxu1 %vm4523_vm2, %v13396_v48  ;;  %v5102_v5 = vunpack.c.l.b16 %v4500_v58  ;;  %v5103_v36 = vunpack.c.h.b16 %v4500_v58  ;;  %v11125_v11 = vld [vmem:[#allocation8 + $0xf4] sm:$0xf0]  ;;  %v10011_v58 = vor.u32 %v11115_v24, %v10010_v35  ;;  %v10098_v30 = vld [vmem:[#allocation8 + $0x150] sm:$0xf] }
 0x557   : > { %v10051_v49 = vor.u32 %v11125_v11, %v10050_v1  ;;  %6115 = vmatpush.bf16.msra.mxu0 %v9987_v2  ;;  %v11113_v1 = vld [vmem:[#allocation8 + $0x94] sm:$0xf0]  ;;  %v10154_v2 = vld [vmem:[#allocation8 + $0x1c0] sm:$0xf] }
 0x558   : > { %v4453_v59 = vadd.f32 %v13376_v57, %v4415_v34  ;;  %v10042_v57 = vld [vmem:[#allocation8 + $0xe0] sm:$0xf]  ;;  %v10162_v34 = vld [vmem:[#allocation8 + $0x1d0] sm:$0xf] }
 0x559   : > { %6143 = vmatpush.bf16.msra.mxu1 %v10051_v49  ;;  %v10043_v55 = vor.u32 %v11123_v54, %v10042_v57  ;;  %v11151_v49 = vld [vmem:[#allocation8 + $0x1c4] sm:$0xf0] }
 0x55a   : > { %v4485_v31 = vmax.f32 %v4453_v59, 0.0  ;;  %v10099_v59 = vor.u32 %v11137_v62, %v10098_v30  ;;  %v11111_v54 = vld [vmem:[#allocation8 + $0x84] sm:$0xf0] }
 0x55b   : > { %6116 = vmatpush.bf16.msra.mxu0 %v9979_v12 }
 0x55c   : > { %v4501_v23 = vpack.c.bf16 %v4485_v31, %v4484_v21  ;;  %v11153_v21 = vld [vmem:[#allocation8 + $0x1d4] sm:$0xf0] }
 0x55d   : > { %6144 = vmatpush.bf16.msra.mxu1 %v10043_v55  ;;  %v10163_v31 = vor.u32 %v11153_v21, %v10162_v34 }
 0x55e   : > { %v5104_v0 = vunpack.c.l.b16 %v4501_v23  ;;  %v5105_v13 = vunpack.c.h.b16 %v4501_v23  ;;  %v9938_v23 = vld [vmem:[#allocation8 + $0x10] sm:$0xf] }
 0x55f   : > { %6117 = vmatpush.bf16.msra.mxu0 %v9971_v60  ;;  %v10083_v60 = vor.u32 %v11133_v51, %v10082_v46 }
 0x560   : > { %v5106_v33 = vpack.c.b16 %v5104_v0, %v5102_v5  ;;  %v5107_v8 = vpack.c.b16 %v5105_v13, %v5103_v36  ;;  %v11097_v5 = vld [vmem:[#allocation8 + $0x14] sm:$0xf0]  ;;  %v10003_v36 = vor.u32 %v11113_v1, %v10002_v25  ;;  %v10090_v0 = vld [vmem:[#allocation8 + $0x140] sm:$0xf]  ;;  %v11135_v13 = vld [vmem:[#allocation8 + $0x144] sm:$0xf0] }
 0x561   : > { %6145 = vmatpush.bf16.msra.mxu1 %v10035_v18  ;;  %v9939_v9 = vor.u32 %v11097_v5, %v9938_v23  ;;  %v10091_v11 = vor.u32 %v11135_v13, %v10090_v0  ;;  %v10147_v18 = vor.u32 %v11149_v38, %v10146_v50 }
 0x562   : > { %5117 = vmatpush.bf16.msrb.mxu2 %v5106_v33  ;;  %5135 = vmatpush.bf16.msra.mxu3 %v5107_v8  ;;  %v10155_v33 = vor.u32 %v11151_v49, %v10154_v2  ;;  %v9930_v8 = vld [vmem:[#allocation8] sm:$0xf] }
 0x563   : > { %6118 = vmatpush.bf16.msra.mxu0 %v9963_v37  ;;  %v9931_v12 = vor.u32 %v11095_v63, %v9930_v8  ;;  %v10075_v37 = vor.u32 %v11131_v47, %v10074_v39 }
 0x565   : > { %9924 = vmatmul.msk.bf16.vlgmr.msrb.gmra.mxu2 %vm4523_vm2, %v13396_v48  ;;  %9926 = vmatmul.msk.bf16.vlgmr.msra.gmra.mxu3 %vm4523_vm2, %v13396_v48  ;;  %v10027_v48 = vor.u32 %v11119_v53, %v10026_v3  ;;  %v10138_v3 = vld [vmem:[#allocation8 + $0x1a0] sm:$0xf]  ;;  %v11147_v53 = vld [vmem:[#allocation8 + $0x1a4] sm:$0xf0] }
 0x566   : > { %9921 = vmatmul.msk.bf16.gmra.mxu0 %vm4523_vm2, %v13419_v17  ;;  %9923 = vmatmul.msk.bf16.gmra.mxu1 %vm4523_vm2, %v13419_v17  ;;  %v10139_v16 = vor.u32 %v11147_v53, %v10138_v3 }
 0x567   : > { %6171 = vmatpush.bf16.msra.mxu2 %v10115_v56  ;;  %6146 = vmatpush.bf16.msra.mxu1 %v10027_v48  ;;  %v10066_v56 = vld [vmem:[#allocation8 + $0x110] sm:$0xf] }
 0x568   : > { %6199 = vmatpush.bf16.msrb.mxu3 %v10179_v52  ;;  %6119 = vmatpush.bf16.msra.mxu0 %v9955_v42  ;;  %v11129_v52 = vld [vmem:[#allocation8 + $0x114] sm:$0xf0] }
 0x569   : > { %v10067_v42 = vor.u32 %v11129_v52, %v10066_v56 }
 0x56b   : > { %6172 = vmatpush.bf16.msra.mxu2 %v10107_v27  ;;  %6147 = vmatpush.bf16.msra.mxu1 %v10019_v6  ;;  %v10058_v27 = vld [vmem:[#allocation8 + $0x100] sm:$0xf] }
 0x56c   : > { %6200 = vmatpush.bf16.msrb.mxu3 %v10171_v20  ;;  %6120 = vmatpush.bf16.msra.mxu0 %v9947_v32  ;;  %v10122_v20 = vld [vmem:[#allocation8 + $0x180] sm:$0xf]  ;;  %v10059_v24 = vor.u32 %v11127_v26, %v10058_v27 }
 0x56f   : > { %6173 = vmatpush.bf16.msra.mxu2 %v10099_v59  ;;  %6148 = vmatpush.bf16.msra.mxu1 %v10011_v58  ;;  %v11143_v58 = vld [vmem:[#allocation8 + $0x184] sm:$0xf0] }
 0x570   : > { %6201 = vmatpush.bf16.msrb.mxu3 %v10163_v31  ;;  %6121 = vmatpush.bf16.msra.mxu0 %v9939_v9  ;;  %v10123_v30 = vor.u32 %v11143_v58, %v10122_v20 }
 0x572   : > { %v13552_v15 = vpop.f32.mrf.mxu0  ;;  %v13554_v19 = vpop.f32.mrf.mxu1 }
 0x573   : > { %6174 = vmatpush.bf16.msra.mxu2 %v10091_v11  ;;  %6149 = vmatpush.bf16.msra.mxu1 %v10003_v36  ;;  %v4566_v28 = vpack.c.bf16 %v13554_v19, %v13552_v15 }
 0x574   : > { %6202 = vmatpush.bf16.msrb.mxu3 %v10155_v33  ;;  %6122 = vmatpush.bf16.msra.mxu0 %v9931_v12 }
 0x575   : > { %9925 = vmatmul.msk.bf16.gmra.mxu2 %vm4523_vm2, %v13419_v17  ;;  %9927 = vmatmul.msk.bf16.gmra.mxu3 %vm4523_vm2, %v13419_v17  ;;  %v9994_v17 = vld [vmem:[#allocation8 + $0x80] sm:$0xf]  ;;  %v4570_v15 = vunpack.c.l.b16 %v4566_v28  ;;  %v13566_v62 = vunpack.c.h.b16 %v4566_v28 }
 0x576   : > { %v9995_v55 = vor.u32 %v11111_v54, %v9994_v17 }
 0x577   : > { %6175 = vmatpush.bf16.msra.mxu2 %v10083_v60  ;;  %v4572_v51 = vpack.c.b16 %v4570_v15, %v4570_v15 }
 0x578   : > { %6150 = vmatpush.bf16.msra.mxu1 %v9995_v55  ;;  %6203 = vmatpush.bf16.msrb.mxu3 %v10147_v18  ;;  %v4573_v18 = vpack.c.b16 %v13566_v62, %v13566_v62 }
 0x57a   : > { %v4541_v14 = vpop.f32.mrf.mxu0  ;;  %v4559_v57 = vpop.f32.mrf.mxu1 }
 0x57b   : > { %v4567_v48 = vpack.c.bf16 %v4559_v57, %v4541_v14  ;;  %6176 = vmatpush.bf16.msra.mxu2 %v10075_v37 }
 0x57c   : > { %6204 = vmatpush.bf16.msrb.mxu3 %v10139_v16  ;;  %v14989_v16 = vmov 0 }
 0x57d   : > { %v4577_v6 = vunpack.c.l.b16 %v4567_v48  ;;  %v4578_v7 = vunpack.c.h.b16 %v4567_v48  ;;  %v14990_v16 = vsel %vm13575_vm6, 4294967295, %v14989_v16 }
 0x57e   : > { %14991 = vst [vmem:[#allocation26_spill] sm:$0xff] %v14990_v16 }
 0x57f   : > { %6177 = vmatpush.bf16.msra.mxu2 %v10067_v42  ;;  %v4579_v23 = vpack.c.b16 %v4577_v6, %v4570_v15  ;;  %v4580_v9 = vpack.c.b16 %v4578_v7, %v13566_v62 }
 0x580   : > { %6205 = vmatpush.bf16.msrb.mxu3 %v10131_v4 }
 0x581   : > { %v4582_v49 = vshrl.u32 %v4579_v23, 16  ;;  %v4585_v63 = vshll.u32 %v4579_v23, 16  ;;  %v4590_v14 = vshrl.u32 %v4580_v9, 16  ;;  %v4593_v57 = vshll.u32 %v4580_v9, 16 }
 0x583   : > { %v4544_v44 = vpop.f32.mrf.mxu0  ;;  %v4562_v10 = vpop.f32.mrf.mxu1  ;;  %6178 = vmatpush.bf16.msra.mxu2 %v10059_v24  ;;  %v13571_v39 = vrot.slane %v4582_v49, 3  ;;  %v13583_v56 = vrot.slane %v4593_v57, 4 }
 0x584   : > { %v4568_v40 = vpack.c.bf16 %v4562_v10, %v4544_v44  ;;  %6206 = vmatpush.bf16.msrb.mxu3 %v10123_v30  ;;  %v13579_v44 = vrot.slane %v4585_v63, 4  ;;  %v13581_v10 = vrot.slane %v4590_v14, 3 }
 0x586   : > { %v4600_v29 = vunpack.c.l.b16 %v4568_v40  ;;  %v4601_v22 = vunpack.c.h.b16 %v4568_v40 }
 0x588   : > { %v4627_v43 = vpop.f32.mrf.mxu2  ;;  %v4645_v45 = vpop.f32.mrf.mxu3  ;;  %v13562_v35 = vpack.c.b16 %v4600_v29, %v4577_v6  ;;  %v13564_v32 = vpack.c.b16 %v4601_v22, %v4578_v7 }
 0x589   : > { %v4654_v19 = vpack.c.bf16 %v4645_v45, %v4627_v43 }
 0x58b   : > { %v4658_v34 = vunpack.c.l.b16 %v4654_v19  ;;  %v4659_v59 = vunpack.c.h.b16 %v4654_v19  ;;  %v4546_v21 = vpop.f32.mrf.mxu0  ;;  %v4564_v31 = vpop.f32.mrf.mxu1 }
 0x58d   : > { %v4660_v5 = vpack.c.b16 %v4658_v34, %v4658_v34  ;;  %v4661_v25 = vpack.c.b16 %v4659_v59, %v4659_v59 }
 0x58f   : > { %v5183_v1 = vshrl.u32 %v4660_v5, 16  ;;  %v5186_v36 = vshll.u32 %v4660_v5, 16  ;;  %v5191_v0 = vshrl.u32 %v4661_v25, 16  ;;  %v5194_v13 = vshll.u32 %v4661_v25, 16 }
 0x590   : > { %v4629_v2 = vpop.f32.mrf.mxu2  ;;  %v4647_v11 = vpop.f32.mrf.mxu3 }
 0x591   : > { %v5185_v33 = vrot.slane %v5183_v1, 4  ;;  %v5188_v8 = vrot.slane %v5186_v36, 5  ;;  %v4655_v17 = vpack.c.bf16 %v4647_v11, %v4629_v2  ;;  %v5193_v12 = vrot.slane %v5191_v0, 4 }
 0x592   : > { %v5196_v54 = vrot.slane %v5194_v13, 5 }
 0x593   : > { %v4709_v55 = vpop.f32.mrf.mxu0  ;;  %v4727_v46 = vpop.f32.mrf.mxu1  ;;  %v4663_v50 = vunpack.c.l.b16 %v4655_v17  ;;  %v4664_v60 = vunpack.c.h.b16 %v4655_v17  ;;  %v5189_v47 = vor.u32 %v5188_v8, %v5185_v33 }
 0x594   : > { %v4736_v38 = vpack.c.bf16 %v4727_v46, %v4709_v55  ;;  %v5197_v40 = vor.u32 %v5196_v54, %v5193_v12 }
 0x595   : > { %v4665_v3 = vpack.c.b16 %v4663_v50, %v4658_v34  ;;  %v4666_v37 = vpack.c.b16 %v4664_v60, %v4659_v59  ;;  %v5431_v22 = vsel %vm13575_vm6, %v4572_v51, %v5189_v47  ;;  %v4588_v51 = vor.u32 %v13579_v44, %v13571_v39 }
 0x596   : > { %v4740_v53 = vunpack.c.l.b16 %v4736_v38  ;;  %v4741_v48 = vunpack.c.h.b16 %v4736_v38  ;;  %v5432_v21 = vsel %vm13575_vm6, %v4573_v18, %v5197_v40  ;;  %v4604_v44 = vrot.slane %v13562_v35, 3 }
 0x597   : > { %v4668_v52 = vshrl.u32 %v4665_v3, 16  ;;  %v4671_v61 = vshll.u32 %v4665_v3, 16  ;;  %v4676_v41 = vshrl.u32 %v4666_v37, 16  ;;  %v4679_v28 = vshll.u32 %v4666_v37, 16 }
 0x598   : > { %v4632_v42 = vpop.f32.mrf.mxu2  ;;  %v4650_v4 = vpop.f32.mrf.mxu3  ;;  %v4742_v7 = vpack.c.b16 %v4740_v53, %v4740_v53  ;;  %v4743_v29 = vpack.c.b16 %v4741_v48, %v4741_v48 }
 0x599   : > { %v4656_v6 = vpack.c.bf16 %v4650_v4, %v4632_v42  ;;  %v4670_v27 = vrot.slane %v4668_v52, 3  ;;  %v4673_v26 = vrot.slane %v4671_v61, 4  ;;  %v4678_v20 = vrot.slane %v4676_v41, 3 }
 0x59a   : > { %v4681_v43 = vrot.slane %v4679_v28, 4  ;;  %v13587_v58 = vrot.slane %v4742_v7, 1  ;;  %v13589_v15 = vrot.slane %v4743_v29, 1 }
 0x59b   : > { %v4684_v45 = vunpack.c.l.b16 %v4656_v6  ;;  %v4685_v24 = vunpack.c.h.b16 %v4656_v6  ;;  %v4711_v19 = vpop.f32.mrf.mxu0  ;;  %v4729_v30 = vpop.f32.mrf.mxu1  ;;  %v4674_v62 = vor.u32 %v4673_v26, %v4670_v27 }
 0x59c   : > { %v4682_v34 = vor.u32 %v4681_v43, %v4678_v20  ;;  %v4737_v59 = vpack.c.bf16 %v4729_v30, %v4711_v19  ;;  %v13595_v5 = vsel %vm5437_vm5, %v5431_v22, %v13587_v58  ;;  %v13599_v25 = vsel %vm5437_vm5, %v5432_v21, %v13589_v15 }
 0x59d   : > { %v4686_v31 = vpack.c.b16 %v4684_v45, %v4663_v50  ;;  %v4687_v23 = vpack.c.b16 %v4685_v24, %v4664_v60  ;;  %v5199_v9 = vshrl.u32 %v4674_v62, 16  ;;  %v5202_v1 = vshll.u32 %v4674_v62, 16  ;;  %6123 = vmatmul.bf16.vlgmr.msra.gmra.mxu0 %v13595_v5  ;;  %6151 = vmatmul.bf16.vlgmr.msra.gmra.mxu1 %v13599_v25 }
 0x59e   : > { %v5207_v36 = vshrl.u32 %v4682_v34, 16  ;;  %v5210_v0 = vshll.u32 %v4682_v34, 16  ;;  %v4745_v11 = vunpack.c.l.b16 %v4737_v59  ;;  %v4746_v49 = vunpack.c.h.b16 %v4737_v59 }
 0x59f   : > { %v4688_v13 = vrot.slane %v4686_v31, 3  ;;  %v4689_v2 = vrot.slane %v4687_v23, 3  ;;  %v5201_v33 = vrot.slane %v5199_v9, 4  ;;  %v5204_v8 = vrot.slane %v5202_v1, 5 }
 0x5a0   : > { %v5209_v63 = vrot.slane %v5207_v36, 4  ;;  %v5212_v17 = vrot.slane %v5210_v0, 5  ;;  %v4634_v14 = vpop.f32.mrf.mxu2  ;;  %v4652_v57 = vpop.f32.mrf.mxu3  ;;  %v4747_v50 = vpack.c.b16 %v4745_v11, %v4740_v53  ;;  %v4748_v60 = vpack.c.b16 %v4746_v49, %v4741_v48 }
 0x5a1   : > { %v5215_v12 = vshrl.u32 %v4688_v13, 16  ;;  %v5218_v54 = vshll.u32 %v4688_v13, 16  ;;  %v5223_v55 = vshrl.u32 %v4689_v2, 16  ;;  %v5226_v46 = vshll.u32 %v4689_v2, 16 }
 0x5a2   : > { %v5205_v38 = vor.u32 %v5204_v8, %v5201_v33  ;;  %v4750_v61 = vshrl.u32 %v4747_v50, 16  ;;  %v4753_v41 = vshll.u32 %v4747_v50, 16  ;;  %v4758_v28 = vshrl.u32 %v4748_v60, 16 }
 0x5a3   : > { %v5217_v18 = vrot.slane %v5215_v12, 4  ;;  %v5220_v47 = vrot.slane %v5218_v54, 5  ;;  %v5225_v3 = vrot.slane %v5223_v55, 4  ;;  %v5228_v37 = vrot.slane %v5226_v46, 5  ;;  %v4714_v40 = vpop.f32.mrf.mxu0  ;;  %v4732_v52 = vpop.f32.mrf.mxu1 }
 0x5a4   : > { %v4761_v42 = vshll.u32 %v4748_v60, 16  ;;  %v4738_v7 = vpack.c.bf16 %v4732_v52, %v4714_v40  ;;  %v5213_v29 = vor.u32 %v5212_v17, %v5209_v63  ;;  %v4752_v22 = vrot.slane %v4750_v61, 3 }
 0x5a5   : > { %v5221_v4 = vor.u32 %v5220_v47, %v5217_v18  ;;  %v5229_v6 = vor.u32 %v5228_v37, %v5225_v3  ;;  %v4755_v27 = vrot.slane %v4753_v41, 4  ;;  %v4760_v39 = vrot.slane %v4758_v28, 3 }
 0x5a6   : > { %v4763_v53 = vrot.slane %v4761_v42, 4  ;;  %v4596_v48 = vor.u32 %v13583_v56, %v13581_v10  ;;  %v4766_v26 = vunpack.c.l.b16 %v4738_v7  ;;  %v4767_v20 = vunpack.c.h.b16 %v4738_v7 }
 0x5a7   : > { %v4605_v43 = vrot.slane %v13564_v32, 3  ;;  %v4756_v45 = vor.u32 %v4755_v27, %v4752_v22  ;;  %v5433_v62 = vsel %vm13575_vm6, %v4588_v51, %v5205_v38  ;;  %v5435_v32 = vsel %vm13575_vm6, %v4604_v44, %v5221_v4 }
 0x5a8   : > { %v4764_v24 = vor.u32 %v4763_v53, %v4760_v39  ;;  %v4791_v19 = vpop.f32.mrf.mxu2  ;;  %v4809_v30 = vpop.f32.mrf.mxu3  ;;  %v4768_v59 = vpack.c.b16 %v4766_v26, %v4745_v11  ;;  %v4769_v21 = vpack.c.b16 %v4767_v20, %v4746_v49  ;;  %v5434_v31 = vsel %vm13575_vm6, %v4596_v48, %v5213_v29 }
 0x5a9   : > { %v4818_v34 = vpack.c.bf16 %v4809_v30, %v4791_v19  ;;  %v13613_v10 = vrot.slane %v4756_v45, 1  ;;  %v5436_v56 = vsel %vm13575_vm6, %v4605_v43, %v5229_v6  ;;  %v14992_v7 = vmov 0 }
 0x5aa   : > { %v13615_v35 = vrot.slane %v4764_v24, 1  ;;  %v4770_v1 = vrot.slane %v4768_v59, 3  ;;  %v4771_v36 = vrot.slane %v4769_v21, 3  ;;  %v14993_v7 = vsel %vm13644_vm9, 4294967295, %v14992_v7 }
 0x5ab   : > { %v4822_v23 = vunpack.c.l.b16 %v4818_v34  ;;  %v4823_v9 = vunpack.c.h.b16 %v4818_v34  ;;  %v4716_v0 = vpop.f32.mrf.mxu0  ;;  %v4734_v13 = vpop.f32.mrf.mxu1  ;;  %v13623_v2 = vsel %vm5437_vm5, %v5433_v62, %v13613_v10  ;;  %14994 = vst [vmem:[#allocation27_spill] sm:$0xff] %v14993_v7  ;;  %v11224_v7 = vld [vmem:[#allocation10 + $0x104] sm:$0xf0] }
 0x5ac   : > { %v13627_v11 = vsel %vm5437_vm5, %v5434_v31, %v13615_v35  ;;  %v13629_v8 = vrot.slane %v4770_v1, 1  ;;  %v13631_v63 = vrot.slane %v4771_v36, 1  ;;  %6179 = vmatmul.bf16.vlgmr.msra.gmra.mxu2 %v13623_v2 }
 0x5ad   : > { %v4824_v49 = vpack.c.b16 %v4822_v23, %v4822_v23  ;;  %v4825_v33 = vpack.c.b16 %v4823_v9, %v4823_v9  ;;  %6207 = vmatmul.bf16.vlgmr.msrb.gmra.mxu3 %v13627_v11 }
 0x5ae   : > { %v13637_v46 = vsel %vm5437_vm5, %v5435_v32, %v13629_v8  ;;  %v13641_v51 = vsel %vm5437_vm5, %v5436_v56, %v13631_v63  ;;  %vm14393_vm5 = vmand %vm5505_vm14, %vm7371_vm4 }
 0x5af   : > { %v5249_v17 = vshrl.u32 %v4824_v49, 16  ;;  %v5252_v14 = vshll.u32 %v4824_v49, 16  ;;  %v5257_v57 = vshrl.u32 %v4825_v33, 16  ;;  %v5260_v12 = vshll.u32 %v4825_v33, 16 }
 0x5b0   : > { %v4793_v54 = vpop.f32.mrf.mxu2  ;;  %v4811_v55 = vpop.f32.mrf.mxu3 }
 0x5b1   : > { %v5251_v50 = vrot.slane %v5249_v17, 5  ;;  %v5254_v60 = vrot.slane %v5252_v14, 6  ;;  %v4819_v38 = vpack.c.bf16 %v4811_v55, %v4793_v54  ;;  %v5259_v18 = vrot.slane %v5257_v57, 5 }
 0x5b2   : > { %v5262_v47 = vrot.slane %v5260_v12, 6 }
 0x5b3   : > { %v4873_v3 = vpop.f32.mrf.mxu0  ;;  %v4891_v37 = vpop.f32.mrf.mxu1  ;;  %v4827_v40 = vunpack.c.l.b16 %v4819_v38  ;;  %v4828_v52 = vunpack.c.h.b16 %v4819_v38  ;;  %v5255_v41 = vor.u32 %v5254_v60, %v5251_v50 }
 0x5b4   : > { %v4900_v61 = vpack.c.bf16 %v4891_v37, %v4873_v3  ;;  %v5263_v29 = vor.u32 %v5262_v47, %v5259_v18 }
 0x5b5   : > { %v4829_v28 = vpack.c.b16 %v4827_v40, %v4822_v23  ;;  %v4830_v42 = vpack.c.b16 %v4828_v52, %v4823_v9  ;;  %v5465_v45 = vsel %vm13644_vm9, %v13587_v58, %v5255_v41 }
 0x5b6   : > { %v4904_v4 = vunpack.c.l.b16 %v4900_v61  ;;  %v4905_v6 = vunpack.c.h.b16 %v4900_v61  ;;  %v5466_v58 = vsel %vm13644_vm9, %v13589_v15, %v5263_v29 }
 0x5b7   : > { %v4832_v22 = vshrl.u32 %v4829_v28, 16  ;;  %v4835_v27 = vshll.u32 %v4829_v28, 16  ;;  %v4840_v39 = vshrl.u32 %v4830_v42, 16  ;;  %v4843_v53 = vshll.u32 %v4830_v42, 16 }
 0x5b8   : > { %v4796_v48 = vpop.f32.mrf.mxu2  ;;  %v4814_v44 = vpop.f32.mrf.mxu3  ;;  %v4906_v20 = vpack.c.b16 %v4904_v4, %v4904_v4  ;;  %v4907_v43 = vpack.c.b16 %v4905_v6, %v4905_v6 }
 0x5b9   : > { %v4820_v26 = vpack.c.bf16 %v4814_v44, %v4796_v48  ;;  %v4834_v24 = vrot.slane %v4832_v22, 3  ;;  %v4837_v19 = vrot.slane %v4835_v27, 4  ;;  %v4842_v30 = vrot.slane %v4840_v39, 3 }
 0x5ba   : > { %v4845_v62 = vrot.slane %v4843_v53, 4  ;;  %v13651_v21 = vrot.slane %v4906_v20, 2  ;;  %v13653_v31 = vrot.slane %v4907_v43, 2 }
 0x5bb   : > { %v4848_v34 = vunpack.c.l.b16 %v4820_v26  ;;  %v4849_v59 = vunpack.c.h.b16 %v4820_v26  ;;  %v4875_v32 = vpop.f32.mrf.mxu0  ;;  %v4893_v56 = vpop.f32.mrf.mxu1  ;;  %v4838_v23 = vor.u32 %v4837_v19, %v4834_v24 }
 0x5bc   : > { %v4846_v9 = vor.u32 %v4845_v62, %v4842_v30  ;;  %v13655_v1 = vpack.c.bf16 %v4893_v56, %v4875_v32  ;;  %v13662_v13 = vsel %vm5471_vm10, %v5465_v45, %v13651_v21  ;;  %v13666_v49 = vsel %vm5471_vm10, %v5466_v58, %v13653_v31  ;;  %v11173_v30 = vld [vmem:[#allocation8 + $0x274] sm:$0xf0]  ;;  %v10306_v62 = vld [vmem:[#allocation8 + $0x2f0] sm:$0xf] }
 0x5bd   : > { %v4850_v36 = vpack.c.b16 %v4848_v34, %v4827_v40  ;;  %v4851_v0 = vpack.c.b16 %v4849_v59, %v4828_v52  ;;  %6128 = vmatmul.bf16.gmra.mxu0 %v13662_v13  ;;  %6156 = vmatmul.bf16.gmra.mxu1 %v13666_v49  ;;  %v5265_v14 = vshrl.u32 %v4838_v23, 16  ;;  %v5268_v15 = vshll.u32 %v4838_v23, 16  ;;  %v11189_v23 = vld [vmem:[#allocation8 + $0x2f4] sm:$0xf0] }
 0x5be   : > { %v4909_v33 = vunpack.c.l.b16 %v13655_v1  ;;  %v4910_v17 = vunpack.c.h.b16 %v13655_v1  ;;  %v5273_v54 = vshrl.u32 %v4846_v9, 16  ;;  %v5276_v55 = vshll.u32 %v4846_v9, 16 }
 0x5bf   : > { %v4852_v57 = vrot.slane %v4850_v36, 3  ;;  %v4853_v12 = vrot.slane %v4851_v0, 3  ;;  %v5267_v47 = vrot.slane %v5265_v14, 5  ;;  %v5270_v3 = vrot.slane %v5268_v15, 6 }
 0x5c0   : > { %v4798_v50 = vpop.f32.mrf.mxu2  ;;  %v4816_v60 = vpop.f32.mrf.mxu3  ;;  %v4911_v38 = vpack.c.b16 %v4909_v33, %v4904_v4  ;;  %v4912_v18 = vpack.c.b16 %v4910_v17, %v4905_v6  ;;  %v10242_v6 = vld [vmem:[#allocation8 + $0x270] sm:$0xf]  ;;  %v5275_v24 = vrot.slane %v5273_v54, 5  ;;  %v5278_v19 = vrot.slane %v5276_v55, 6 }
 0x5c1   : > { %v5281_v37 = vshrl.u32 %v4852_v57, 16  ;;  %v5284_v40 = vshll.u32 %v4852_v57, 16  ;;  %v5289_v52 = vshrl.u32 %v4853_v12, 16  ;;  %v5292_v61 = vshll.u32 %v4853_v12, 16 }
 0x5c2   : > { %v4914_v41 = vshrl.u32 %v4911_v38, 16  ;;  %v4917_v28 = vshll.u32 %v4911_v38, 16  ;;  %v4922_v42 = vshrl.u32 %v4912_v18, 16  ;;  %v4925_v29 = vshll.u32 %v4912_v18, 16 }
 0x5c3   : > { %v5283_v22 = vrot.slane %v5281_v37, 5  ;;  %v5286_v27 = vrot.slane %v5284_v40, 6  ;;  %v5291_v39 = vrot.slane %v5289_v52, 5  ;;  %v4878_v53 = vpop.f32.mrf.mxu0  ;;  %v4896_v48 = vpop.f32.mrf.mxu1  ;;  %v5271_v45 = vor.u32 %v5270_v3, %v5267_v47 }
 0x5c4   : > { %v4916_v44 = vrot.slane %v4914_v41, 3  ;;  %v4919_v26 = vrot.slane %v4917_v28, 4  ;;  %v4924_v20 = vrot.slane %v4922_v42, 3  ;;  %v4927_v4 = vrot.slane %v4925_v29, 4  ;;  %v10234_v29 = vld [vmem:[#allocation8 + $0x260] sm:$0xf] }
 0x5c5   : > { %v4902_v43 = vpack.c.bf16 %v4896_v48, %v4878_v53  ;;  %v5294_v34 = vrot.slane %v5292_v61, 6  ;;  %v10243_v56 = vor.u32 %v11173_v30, %v10242_v6  ;;  %v5467_v58 = vsel %vm13644_vm9, %v13613_v10, %v5271_v45 }
 0x5c6   : > { %v4920_v59 = vor.u32 %v4919_v26, %v4916_v44  ;;  %v4928_v32 = vor.u32 %v4927_v4, %v4924_v20  ;;  %v5279_v36 = vor.u32 %v5278_v19, %v5275_v24  ;;  %v10307_v12 = vor.u32 %v11189_v23, %v10306_v62  ;;  %v11187_v26 = vld [vmem:[#allocation8 + $0x2e4] sm:$0xf0]  ;;  %v11185_v23 = vld [vmem:[#allocation8 + $0x2d4] sm:$0xf0] }
 0x5c7   : > { %v4930_v9 = vunpack.c.l.b16 %v4902_v43  ;;  %v4931_v1 = vunpack.c.h.b16 %v4902_v43  ;;  %6227 = vmatpush.bf16.msrb.mxu0 %v10243_v56  ;;  %v5287_v54 = vor.u32 %v5286_v27, %v5283_v22  ;;  %v5295_v3 = vor.u32 %v5294_v34, %v5291_v39  ;;  %v11171_v22 = vld [vmem:[#allocation8 + $0x264] sm:$0xf0]  ;;  %v10298_v27 = vld [vmem:[#allocation8 + $0x2e0] sm:$0xf]  ;;  %v10226_v34 = vld [vmem:[#allocation8 + $0x250] sm:$0xf] }
 0x5c8   : > { %v4955_v0 = vpop.f32.mrf.mxu2  ;;  %v4973_v14 = vpop.f32.mrf.mxu3  ;;  %v13675_v15 = vrot.slane %v4920_v59, 2  ;;  %v13677_v57 = vrot.slane %v4928_v32, 2  ;;  %v5468_v38 = vsel %vm13644_vm9, %v13615_v35, %v5279_v36  ;;  %6255 = vmatpush.bf16.msrb.mxu1 %v10307_v12  ;;  %v10235_v6 = vor.u32 %v11171_v22, %v10234_v29  ;;  %v11169_v32 = vld [vmem:[#allocation8 + $0x254] sm:$0xf0]  ;;  %v10290_v56 = vld [vmem:[#allocation8 + $0x2d0] sm:$0xf] }
 0x5c9   : > { %v4982_v55 = vpack.c.bf16 %v4973_v14, %v4955_v0  ;;  %v4932_v50 = vpack.c.b16 %v4930_v9, %v4909_v33  ;;  %v4933_v60 = vpack.c.b16 %v4931_v1, %v4910_v17  ;;  %v5469_v47 = vsel %vm13644_vm9, %v13629_v8, %v5287_v54 }
 0x5ca   : > { %v13684_v10 = vsel %vm5471_vm10, %v5467_v58, %v13675_v15  ;;  %v13688_v18 = vsel %vm5471_vm10, %v5468_v38, %v13677_v57  ;;  %v5470_v61 = vsel %vm13644_vm9, %v13631_v63, %v5295_v3  ;;  %v10299_v43 = vor.u32 %v11187_v26, %v10298_v27 }
 0x5cb   : > { %v4986_v33 = vunpack.c.l.b16 %v4982_v55  ;;  %v4987_v17 = vunpack.c.h.b16 %v4982_v55  ;;  %v4934_v37 = vrot.slane %v4932_v50, 3  ;;  %v4935_v40 = vrot.slane %v4933_v60, 3  ;;  %v4880_v52 = vpop.f32.mrf.mxu0  ;;  %v4898_v35 = vpop.f32.mrf.mxu1  ;;  %6184 = vmatmul.bf16.gmra.mxu2 %v13684_v10  ;;  %6212 = vmatmul.bf16.gmra.mxu3 %v13688_v18 }
 0x5cc   : > { %6228 = vmatpush.bf16.msrb.mxu0 %v10235_v6  ;;  %6256 = vmatpush.bf16.msrb.mxu1 %v10299_v43  ;;  %v10227_v0 = vor.u32 %v11169_v32, %v10226_v34  ;;  %v10291_v14 = vor.u32 %v11185_v23, %v10290_v56  ;;  %v10282_v52 = vld [vmem:[#allocation8 + $0x2c0] sm:$0xf] }
 0x5cd   : > { %v4988_v41 = vpack.c.b16 %v4986_v33, %v4986_v33  ;;  %v4989_v28 = vpack.c.b16 %v4987_v17, %v4987_v17  ;;  %v13698_v8 = vrot.slane %v4934_v37, 2  ;;  %v13700_v42 = vrot.slane %v4935_v40, 2  ;;  %v10218_v37 = vld [vmem:[#allocation8 + $0x240] sm:$0xf]  ;;  %v11167_v40 = vld [vmem:[#allocation8 + $0x244] sm:$0xf0] }
 0x5cf   : > { %v5315_v39 = vshrl.u32 %v4988_v41, 16  ;;  %v5318_v53 = vshll.u32 %v4988_v41, 16  ;;  %v5323_v48 = vshrl.u32 %v4989_v28, 16  ;;  %v5326_v44 = vshll.u32 %v4989_v28, 16  ;;  %v11183_v28 = vld [vmem:[#allocation8 + $0x2c4] sm:$0xf0] }
 0x5d0   : > { %v4957_v20 = vpop.f32.mrf.mxu2  ;;  %v4975_v4 = vpop.f32.mrf.mxu3  ;;  %v13704_v63 = vsel %vm5471_vm10, %v5469_v47, %v13698_v8  ;;  %v13708_v45 = vsel %vm5471_vm10, %v5470_v61, %v13700_v42  ;;  %6229 = vmatpush.bf16.msrb.mxu0 %v10227_v0  ;;  %6257 = vmatpush.bf16.msrb.mxu1 %v10291_v14  ;;  %v10219_v41 = vor.u32 %v11167_v40, %v10218_v37 }
 0x5d1   : > { %v5317_v24 = vrot.slane %v5315_v39, 6  ;;  %v5320_v19 = vrot.slane %v5318_v53, 7  ;;  %v5325_v30 = vrot.slane %v5323_v48, 6  ;;  %v5328_v62 = vrot.slane %v5326_v44, 7 }
 0x5d2   : > { %v4983_v59 = vpack.c.bf16 %v4975_v4, %v4957_v20  ;;  %v10283_v26 = vor.u32 %v11183_v28, %v10282_v52  ;;  %v11108_v20 = vld [vmem:[#allocation8 + $0x74] sm:$0xf]  ;;  %v9988_v4 = vld [vmem:[#allocation8 + $0x78] sm:$0xf0] }
 0x5d3   : > { %v5037_v9 = vpop.f32.mrf.mxu0  ;;  %v5055_v1 = vpop.f32.mrf.mxu1  ;;  %v5321_v58 = vor.u32 %v5320_v19, %v5317_v24  ;;  %v5329_v36 = vor.u32 %v5328_v62, %v5325_v30  ;;  %v11124_v28 = vld [vmem:[#allocation8 + $0xf4] sm:$0xf] }
 0x5d4   : > { %v4991_v12 = vunpack.c.l.b16 %v4983_v59  ;;  %v4992_v54 = vunpack.c.h.b16 %v4983_v59  ;;  %v5064_v55 = vpack.c.bf16 %v5055_v1, %v5037_v9  ;;  %6230 = vmatpush.bf16.msrb.mxu0 %v10219_v41  ;;  %6258 = vmatpush.bf16.msrb.mxu1 %v10283_v26  ;;  %v9991_v9 = vor.u32 %v11108_v20, %v9988_v4  ;;  %v10210_v26 = vld [vmem:[#allocation8 + $0x230] sm:$0xf]  ;;  %v11165_v20 = vld [vmem:[#allocation8 + $0x234] sm:$0xf0] }
 0x5d5   : > { %v5499_v35 = vsel %vm13712_vm13, %v13651_v21, %v5321_v58  ;;  %v5500_v61 = vsel %vm13712_vm13, %v13653_v31, %v5329_v36  ;;  %v11181_v4 = vld [vmem:[#allocation8 + $0x2b4] sm:$0xf0] }
 0x5d6   : > { %v4993_v60 = vpack.c.b16 %v4991_v12, %v4986_v33  ;;  %v4994_v38 = vpack.c.b16 %v4992_v54, %v4987_v17  ;;  %v5068_v47 = vunpack.c.l.b16 %v5064_v55  ;;  %v5069_v3 = vunpack.c.h.b16 %v5064_v55  ;;  %6283 = vmatpush.bf16.msrb.mxu2 %v9991_v9 }
 0x5d8   : > { %v4996_v33 = vshrl.u32 %v4993_v60, 16  ;;  %v4999_v17 = vshll.u32 %v4993_v60, 16  ;;  %v5004_v29 = vshrl.u32 %v4994_v38, 16  ;;  %v5007_v22 = vshll.u32 %v4994_v38, 16  ;;  %v4960_v27 = vpop.f32.mrf.mxu2  ;;  %v4978_v39 = vpop.f32.mrf.mxu3 }
 0x5d9   : > { %v4984_v53 = vpack.c.bf16 %v4978_v39, %v4960_v27  ;;  %v5070_v48 = vpack.c.b16 %v5068_v47, %v5068_v47  ;;  %v5071_v44 = vpack.c.b16 %v5069_v3, %v5069_v3  ;;  %v10052_v27 = vld [vmem:[#allocation8 + $0xf8] sm:$0xf0] }
 0x5da   : > { %v4998_v21 = vrot.slane %v4996_v33, 3  ;;  %v5001_v6 = vrot.slane %v4999_v17, 4  ;;  %v5006_v43 = vrot.slane %v5004_v29, 3  ;;  %v5009_v24 = vrot.slane %v5007_v22, 4 }
 0x5db   : > { %v5012_v31 = vunpack.c.l.b16 %v4984_v53  ;;  %v5013_v19 = vunpack.c.h.b16 %v4984_v53  ;;  %v13722_v30 = vrot.slane %v5070_v48, 3  ;;  %v13724_v62 = vrot.slane %v5071_v44, 3  ;;  %v5039_v34 = vpop.f32.mrf.mxu0  ;;  %v5057_v59 = vpop.f32.mrf.mxu1 }
 0x5dc   : > { %v5002_v32 = vor.u32 %v5001_v6, %v4998_v21  ;;  %v5010_v56 = vor.u32 %v5009_v24, %v5006_v43  ;;  %v13726_v23 = vpack.c.bf16 %v5057_v59, %v5039_v34  ;;  %v11106_v6 = vld [vmem:[#allocation8 + $0x64] sm:$0xf]  ;;  %v9980_v43 = vld [vmem:[#allocation8 + $0x68] sm:$0xf0] }
 0x5dd   : > { %v5014_v1 = vpack.c.b16 %v5012_v31, %v4991_v12  ;;  %v5015_v58 = vpack.c.b16 %v5013_v19, %v4992_v54  ;;  %v13730_v36 = vsel %vm5505_vm14, %v5499_v35, %v13722_v30  ;;  %v13734_v0 = vsel %vm5505_vm14, %v5500_v61, %v13724_v62 }
 0x5de   : > { %v14897_v14 = vunpack.c.l.b16 %v13726_v23  ;;  %v14896_v55 = vunpack.c.h.b16 %v13726_v23  ;;  %6133 = vmatmul.bf16.gmra.mxu0 %v13730_v36  ;;  %6161 = vmatmul.bf16.gmra.mxu1 %v13734_v0  ;;  %v5331_v60 = vshrl.u32 %v5002_v32, 16  ;;  %v5334_v38 = vshll.u32 %v5002_v32, 16 }
 0x5df   : > { %v5016_v12 = vrot.slane %v5014_v1, 3  ;;  %v5017_v54 = vrot.slane %v5015_v58, 3  ;;  %v5339_v61 = vshrl.u32 %v5010_v56, 16  ;;  %v5342_v41 = vshll.u32 %v5010_v56, 16  ;;  %v11122_v56 = vld [vmem:[#allocation8 + $0xe4] sm:$0xf] }
 0x5e0   : > { %v4962_v37 = vpop.f32.mrf.mxu2  ;;  %v4980_v40 = vpop.f32.mrf.mxu3  ;;  %v5075_v52 = vpack.c.b16 %v14897_v14, %v5068_v47  ;;  %v5076_v35 = vpack.c.b16 %v14896_v55, %v5069_v3  ;;  %v5333_v29 = vrot.slane %v5331_v60, 6  ;;  %v5336_v22 = vrot.slane %v5334_v38, 7  ;;  %v10274_v47 = vld [vmem:[#allocation8 + $0x2b0] sm:$0xf]  ;;  %v10044_v38 = vld [vmem:[#allocation8 + $0xe8] sm:$0xf0] }
 0x5e1   : > { %v13744_v33 = vshrl.u32 %v5016_v12, 16  ;;  %v13746_v17 = vshll.u32 %v5016_v12, 16  ;;  %v13748_v21 = vshrl.u32 %v5017_v54, 16  ;;  %v13750_v3 = vshll.u32 %v5017_v54, 16  ;;  %v10202_v12 = vld [vmem:[#allocation8 + $0x220] sm:$0xf] }
 0x5e2   : > { %v5078_v39 = vshrl.u32 %v5075_v52, 16  ;;  %v5081_v53 = vshll.u32 %v5075_v52, 16  ;;  %v5086_v48 = vshrl.u32 %v5076_v35, 16  ;;  %v5089_v44 = vshll.u32 %v5076_v35, 16  ;;  %v11163_v35 = vld [vmem:[#allocation8 + $0x224] sm:$0xf0] }
 0x5e3   : > { %v13752_v24 = vpop.f32.mrf.mxu0  ;;  %v13754_v31 = vpop.f32.mrf.mxu1  ;;  %v5337_v9 = vor.u32 %v5336_v22, %v5333_v29  ;;  %v5341_v1 = vrot.slane %v5339_v61, 6  ;;  %v5344_v58 = vrot.slane %v5342_v41, 7  ;;  %v10055_v60 = vor.u32 %v11124_v28, %v10052_v27  ;;  %v10266_v55 = vld [vmem:[#allocation8 + $0x2a0] sm:$0xf]  ;;  %v11179_v41 = vld [vmem:[#allocation8 + $0x2a4] sm:$0xf0] }
 0x5e4   : > { %v5080_v19 = vrot.slane %v5078_v39, 3  ;;  %v5083_v34 = vrot.slane %v5081_v53, 4  ;;  %v5088_v59 = vrot.slane %v5086_v48, 3  ;;  %v5091_v32 = vrot.slane %v5089_v44, 4  ;;  %v11104_v28 = vld [vmem:[#allocation8 + $0x54] sm:$0xf] }
 0x5e5   : > { %v5501_v39 = vsel %vm13712_vm13, %v13675_v15, %v5337_v9  ;;  %v5345_v53 = vor.u32 %v5344_v58, %v5341_v1  ;;  %6311 = vmatpush.bf16.msra.mxu3 %v10055_v60  ;;  %v10211_v29 = vor.u32 %v11165_v20, %v10210_v26  ;;  %v10275_v61 = vor.u32 %v11181_v4, %v10274_v47  ;;  %v9972_v22 = vld [vmem:[#allocation8 + $0x58] sm:$0xf0]  ;;  %v10194_v47 = vld [vmem:[#allocation8 + $0x210] sm:$0xf]  ;;  %v11161_v4 = vld [vmem:[#allocation8 + $0x214] sm:$0xf0] }
 0x5e6   : > { %v5084_v40 = vor.u32 %v5083_v34, %v5080_v19  ;;  %v5092_v52 = vor.u32 %v5091_v32, %v5088_v59  ;;  %v9983_v19 = vor.u32 %v11106_v6, %v9980_v43  ;;  %v10047_v34 = vor.u32 %v11122_v56, %v10044_v38  ;;  %v11120_v59 = vld [vmem:[#allocation8 + $0xd4] sm:$0xf]  ;;  %v10036_v32 = vld [vmem:[#allocation8 + $0xd8] sm:$0xf0]  ;;  %v10258_v1 = vld [vmem:[#allocation8 + $0x290] sm:$0xf] }
 0x5e7   : > { %v5502_v26 = vsel %vm13712_vm13, %v13677_v57, %v5345_v53  ;;  %6231 = vmatpush.bf16.msrb.mxu0 %v10211_v29  ;;  %6259 = vmatpush.bf16.msrb.mxu1 %v10275_v61  ;;  %v10203_v20 = vor.u32 %v11163_v35, %v10202_v12  ;;  %v10267_v43 = vor.u32 %v11179_v41, %v10266_v55  ;;  %v11177_v58 = vld [vmem:[#allocation8 + $0x294] sm:$0xf0]  ;;  %v5360_v57 = vrot.slane %v13750_v3, 7  ;;  %v11102_v12 = vld [vmem:[#allocation8 + $0x44] sm:$0xf] }
 0x5e8   : > { %v5119_v27 = vpop.f32.mrf.mxu2  ;;  %v5137_v48 = vpop.f32.mrf.mxu3  ;;  %v13761_v44 = vrot.slane %v5084_v40, 3  ;;  %v13763_v14 = vrot.slane %v5092_v52, 3  ;;  %6284 = vmatpush.bf16.msrb.mxu2 %v9983_v19  ;;  %v9975_v56 = vor.u32 %v11104_v28, %v9972_v22  ;;  %v9964_v40 = vld [vmem:[#allocation8 + $0x48] sm:$0xf0]  ;;  %v10039_v55 = vor.u32 %v11120_v59, %v10036_v32  ;;  %v11118_v53 = vld [vmem:[#allocation8 + $0xc4] sm:$0xf] }
 0x5e9   : > { %v5146_v15 = vpack.c.bf16 %v5137_v48, %v5119_v27  ;;  %6312 = vmatpush.bf16.msra.mxu3 %v10047_v34  ;;  %v10028_v29 = vld [vmem:[#allocation8 + $0xc8] sm:$0xf0]  ;;  %v10186_v61 = vld [vmem:[#allocation8 + $0x200] sm:$0xf]  ;;  %v10259_v28 = vor.u32 %v11177_v58, %v10258_v1  ;;  %v11159_v22 = vld [vmem:[#allocation8 + $0x204] sm:$0xf0]  ;;  %v9967_v19 = vor.u32 %v11102_v12, %v9964_v40 }
 0x5ea   : > { %v13771_v9 = vsel %vm5505_vm14, %v5501_v39, %v13761_v44  ;;  %v13775_v6 = vsel %vm5505_vm14, %v5502_v26, %v13763_v14  ;;  %v10195_v39 = vor.u32 %v11161_v4, %v10194_v47  ;;  %v10250_v27 = vld [vmem:[#allocation8 + $0x280] sm:$0xf]  ;;  %v11175_v48 = vld [vmem:[#allocation8 + $0x284] sm:$0xf0]  ;;  %v11100_v34 = vld [vmem:[#allocation8 + $0x34] sm:$0xf]  ;;  %v10031_v26 = vor.u32 %v11118_v53, %v10028_v29 }
 0x5eb   : > { %v13778_v60 = vunpack.c.l.b16 %v5146_v15  ;;  %v13780_v38 = vunpack.c.h.b16 %v5146_v15  ;;  %6189 = vmatmul.bf16.gmra.mxu2 %v13771_v9  ;;  %6217 = vmatmul.bf16.gmra.mxu3 %v13775_v6  ;;  %v5044_v52 = vpop.f32.mrf.mxu0  ;;  %v5062_v35 = vpop.f32.mrf.mxu1  ;;  %v9956_v59 = vld [vmem:[#allocation8 + $0x38] sm:$0xf0]  ;;  %v11116_v47 = vld [vmem:[#allocation8 + $0xb4] sm:$0xf]  ;;  %v14997_v12 = vmov 0  ;;  %v15000_v53 = vrot.slane %v13744_v33, 6 }
 0x5ec   : > { %6232 = vmatpush.bf16.msrb.mxu0 %v10203_v20  ;;  %6260 = vmatpush.bf16.msrb.mxu1 %v10267_v43  ;;  %v10020_v4 = vld [vmem:[#allocation8 + $0xb8] sm:$0xf0]  ;;  %v10187_v20 = vor.u32 %v11159_v22, %v10186_v61  ;;  %v10251_v43 = vor.u32 %v11175_v48, %v10250_v27  ;;  %v14998_v12 = vsel %vm13794_vm1, 4294967295, %v14997_v12  ;;  %v9959_v40 = vor.u32 %v11100_v34, %v9956_v59 }
 0x5ed   : > { %v5152_v3 = vpack.c.b16 %v13778_v60, %v13778_v60  ;;  %v5153_v41 = vpack.c.b16 %v13780_v38, %v13780_v38  ;;  %6285 = vmatpush.bf16.msrb.mxu2 %v9975_v56  ;;  %6313 = vmatpush.bf16.msra.mxu3 %v10039_v55  ;;  %v5066_v56 = vpack.c.bf16 %v13754_v31, %v13752_v24  ;;  %v15001_v29 = vrot.slane %v13746_v17, 7 }
 0x5ee   : > { %14999 = vst [vmem:[#allocation28_spill] sm:$0xff] %v14998_v12  ;;  %v10023_v55 = vor.u32 %v11116_v47, %v10020_v4  ;;  %v15004_v59 = vunpack.c.h.b16 %v13726_v23  ;;  %v11228_v12 = vld [vmem:[#allocation10 + $0x124] sm:$0xf0] }
 0x5ef   : > { %v5381_v32 = vshrl.u32 %v5152_v3, 16  ;;  %v5388_v15 = vshrl.u32 %v5153_v41, 16  ;;  %v5384_v52 = vshll.u32 %v5152_v3, 16  ;;  %v5391_v35 = vshll.u32 %v5153_v41, 16  ;;  %v11098_v41 = vld [vmem:[#allocation8 + $0x24] sm:$0xf] }
 0x5f0   : > { %v5121_v37 = vpop.f32.mrf.mxu2  ;;  %v5139_v54 = vpop.f32.mrf.mxu3  ;;  %6233 = vmatpush.bf16.msrb.mxu0 %v10195_v39  ;;  %6261 = vmatpush.bf16.msrb.mxu1 %v10259_v28  ;;  %v9948_v28 = vld [vmem:[#allocation8 + $0x28] sm:$0xf0]  ;;  %v5094_v22 = vunpack.c.l.b16 %v5066_v56  ;;  %v5095_v27 = vunpack.c.h.b16 %v5066_v56 }
 0x5f1   : > { %v5383_v1 = vrot.slane %v5381_v32, 7  ;;  %v5390_v58 = vrot.slane %v5388_v15, 7  ;;  %v13788_v16 = vpack.c.bf16 %v5139_v54, %v5121_v37  ;;  %6286 = vmatpush.bf16.msrb.mxu2 %v9967_v19  ;;  %v5353_v54 = vor.u32 %v15001_v29, %v15000_v53  ;;  %6314 = vmatpush.bf16.msra.mxu3 %v10031_v26  ;;  %v10012_v19 = vld [vmem:[#allocation8 + $0xa8] sm:$0xf0] }
 0x5f2   : > { %v15002_v37 = vrot.slane %v13748_v21, 6 }
 0x5f3   : > { %v5155_v61 = vunpack.c.l.b16 %v13788_v16  ;;  %v5156_v24 = vunpack.c.h.b16 %v13788_v16  ;;  %v5386_v31 = vor.u32 %v5384_v52, %v5383_v1  ;;  %v5393_v3 = vor.u32 %v5391_v35, %v5390_v58  ;;  %v9940_v52 = vld [vmem:[#allocation8 + $0x18] sm:$0xf0]  ;;  %v11112_v35 = vld [vmem:[#allocation8 + $0x94] sm:$0xf] }
 0x5f4   : > { %v5361_v39 = vor.u32 %v5360_v57, %v15002_v37  ;;  %v5503_v33 = vsel %vm13712_vm13, %v13698_v8, %v5353_v54  ;;  %6234 = vmatpush.bf16.msrb.mxu0 %v10187_v20  ;;  %6262 = vmatpush.bf16.msrb.mxu1 %v10251_v43  ;;  %v10004_v37 = vld [vmem:[#allocation8 + $0x98] sm:$0xf0] }
 0x5f5   : > { %v5157_v21 = vpack.c.b16 %v5155_v61, %v13778_v60  ;;  %v5158_v57 = vpack.c.b16 %v5156_v24, %v13780_v38  ;;  %v13821_v48 = vsel %vm13794_vm1, %v13722_v30, %v5386_v31  ;;  %v13826_v8 = vsel %vm13794_vm1, %v13724_v62, %v5393_v3  ;;  %6287 = vmatpush.bf16.msrb.mxu2 %v9959_v40  ;;  %v11096_v62 = vld [vmem:[#allocation8 + $0x14] sm:$0xf]  ;;  %v11094_v3 = vld [vmem:[#allocation8 + $0x4] sm:$0xf]  ;;  %v10276_v16 = vld [vmem:[#allocation8 + $0x2b8] sm:$0xf0] }
 0x5f6   : > { %v5504_v17 = vsel %vm13712_vm13, %v13700_v42, %v5361_v39  ;;  %v11114_v42 = vld [vmem:[#allocation8 + $0xa4] sm:$0xf]  ;;  %6138 = vmatmul.bf16.gmra.mxu0 %v13821_v48  ;;  %6166 = vmatmul.bf16.gmra.mxu1 %v13826_v8  ;;  %v9951_v60 = vor.u32 %v11098_v41, %v9948_v28  ;;  %v15003_v38 = vunpack.c.l.b16 %v13726_v23  ;;  %v5097_v30 = vpack.c.b16 %v5095_v27, %v15004_v59  ;;  %v9932_v41 = vld [vmem:[#allocation8 + $0x8] sm:$0xf0] }
 0x5f7   : > { %v5160_v32 = vshrl.u32 %v5157_v21, 16  ;;  %v5163_v15 = vshll.u32 %v5157_v21, 16  ;;  %v5168_v26 = vshrl.u32 %v5158_v57, 16  ;;  %v5171_v47 = vshll.u32 %v5158_v57, 16  ;;  %6315 = vmatpush.bf16.msra.mxu3 %v10023_v55 }
 0x5f8   : > { %v5096_v34 = vpack.c.b16 %v5094_v22, %v15003_v38  ;;  %v10015_v4 = vor.u32 %v11114_v42, %v10012_v19  ;;  %v5099_v1 = vrot.slane %v5097_v30, 3  ;;  %v13834_v58 = vpop.f32.mrf.mxu2  ;;  %v13836_v56 = vpop.f32.mrf.mxu3  ;;  %v9943_v31 = vor.u32 %v11096_v62, %v9940_v52  ;;  %v11110_v19 = vld [vmem:[#allocation8 + $0x84] sm:$0xf]  ;;  %v9996_v38 = vld [vmem:[#allocation8 + $0x88] sm:$0xf0] }
 0x5f9   : > { %v5162_v53 = vrot.slane %v5160_v32, 3  ;;  %v5165_v23 = vrot.slane %v5163_v15, 4  ;;  %v5170_v29 = vrot.slane %v5168_v26, 3  ;;  %v5173_v54 = vrot.slane %v5171_v47, 4  ;;  %6288 = vmatpush.bf16.msrb.mxu2 %v9951_v60  ;;  %v10116_v52 = vld [vmem:[#allocation8 + $0x178] sm:$0xf0] }
 0x5fa   : > { %v5098_v20 = vrot.slane %v5096_v34, 3  ;;  %v13840_v43 = vrot.slane %v5099_v1, 3  ;;  %v10007_v28 = vor.u32 %v11112_v35, %v10004_v37  ;;  %v9935_v42 = vor.u32 %v11094_v3, %v9932_v41  ;;  %v11156_v35 = vld [vmem:[#allocation8 + $0x1f4] sm:$0xf]  ;;  %v11138_v1 = vld [vmem:[#allocation8 + $0x164] sm:$0xf] }
 0x5fb   : > { %v5166_v40 = vor.u32 %v5165_v23, %v5162_v53  ;;  %v5174_v55 = vor.u32 %v5173_v54, %v5170_v29  ;;  %6316 = vmatpush.bf16.msra.mxu3 %v10015_v4  ;;  %v9999_v47 = vor.u32 %v11110_v19, %v9996_v38  ;;  %v11140_v4 = vld [vmem:[#allocation8 + $0x174] sm:$0xf]  ;;  %v10108_v53 = vld [vmem:[#allocation8 + $0x168] sm:$0xf0]  ;;  %v10164_v3 = vld [vmem:[#allocation8 + $0x1d8] sm:$0xf0] }
 0x5fc   : > { %v13838_v39 = vrot.slane %v5098_v20, 3  ;;  %v13848_v27 = vsel %vm5505_vm14, %v5504_v17, %v13840_v43  ;;  %v10180_v20 = vld [vmem:[#allocation8 + $0x1f8] sm:$0xf0]  ;;  %v10172_v29 = vld [vmem:[#allocation8 + $0x1e8] sm:$0xf0]  ;;  %v10111_v54 = vor.u32 %v11138_v1, %v10108_v53 }
 0x5fd   : > { %v5395_v21 = vshrl.u32 %v5166_v40, 16  ;;  %v5402_v57 = vshrl.u32 %v5174_v55, 16  ;;  %v5398_v60 = vshll.u32 %v5166_v40, 16  ;;  %v5405_v30 = vshll.u32 %v5174_v55, 16  ;;  %6289 = vmatpush.bf16.msrb.mxu2 %v9943_v31  ;;  %v11136_v40 = vld [vmem:[#allocation8 + $0x154] sm:$0xf] }
 0x5fe   : > { %v13844_v22 = vsel %vm5505_vm14, %v5503_v33, %v13838_v39  ;;  %v10183_v23 = vor.u32 %v11156_v35, %v10180_v20  ;;  %v10100_v55 = vld [vmem:[#allocation8 + $0x158] sm:$0xf0]  ;;  %v11152_v31 = vld [vmem:[#allocation8 + $0x1d4] sm:$0xf]  ;;  %v10156_v19 = vld [vmem:[#allocation8 + $0x1c8] sm:$0xf0] }
 0x5ff   : > { %v5397_v34 = vrot.slane %v5395_v21, 7  ;;  %v5404_v59 = vrot.slane %v5402_v57, 7  ;;  %6317 = vmatpush.bf16.msra.mxu3 %v10007_v28  ;;  %v10103_v41 = vor.u32 %v11136_v40, %v10100_v55  ;;  %v10167_v28 = vor.u32 %v11152_v31, %v10164_v3  ;;  %v11134_v21 = vld [vmem:[#allocation8 + $0x144] sm:$0xf]  ;;  %v10092_v57 = vld [vmem:[#allocation8 + $0x148] sm:$0xf0]  ;;  %vm14405_vm14 = vmand %vm7403_vm8, %vm7404_vm12 }
 0x600   : > { %v5126_v32 = vpop.f32.mrf.mxu2  ;;  %v5144_v15 = vpop.f32.mrf.mxu3  ;;  %6367 = vmatpush.bf16.msra.mxu1 %v10183_v23  ;;  %v10095_v38 = vor.u32 %v11134_v21, %v10092_v57  ;;  %v11170_v35 = vld [vmem:[#allocation8 + $0x264] sm:$0xf]  ;;  %v10300_v53 = vld [vmem:[#allocation8 + $0x2e8] sm:$0xf0]  ;;  %v11168_v31 = vld [vmem:[#allocation8 + $0x254] sm:$0xf] }
 0x601   : > { %v5400_v26 = vor.u32 %v5398_v60, %v5397_v34  ;;  %v5407_v33 = vor.u32 %v5405_v30, %v5404_v59  ;;  %6290 = vmatpush.bf16.msrb.mxu2 %v9935_v42  ;;  %v11150_v42 = vld [vmem:[#allocation8 + $0x1c4] sm:$0xf]  ;;  %v11172_v60 = vld [vmem:[#allocation8 + $0x274] sm:$0xf]  ;;  %v10244_v59 = vld [vmem:[#allocation8 + $0x278] sm:$0xf0] }
 0x602   : > { %v10159_v34 = vor.u32 %v11150_v42, %v10156_v19  ;;  %v11188_v30 = vld [vmem:[#allocation8 + $0x2f4] sm:$0xf]  ;;  %v10247_v32 = vor.u32 %v11172_v60, %v10244_v59  ;;  %v10308_v15 = vld [vmem:[#allocation8 + $0x2f8] sm:$0xf0]  ;;  %v11186_v1 = vld [vmem:[#allocation8 + $0x2e4] sm:$0xf] }
 0x603   : > { %v13853_v17 = vsel %vm13794_vm1, %v13761_v44, %v5400_v26  ;;  %v13858_v62 = vsel %vm13794_vm1, %v13763_v14, %v5407_v33  ;;  %6318 = vmatpush.bf16.msra.mxu3 %v9999_v47  ;;  %v10119_v44 = vor.u32 %v11140_v4, %v10116_v52  ;;  %v11154_v14 = vld [vmem:[#allocation8 + $0x1e4] sm:$0xf]  ;;  %v10311_v26 = vor.u32 %v11188_v30, %v10308_v15  ;;  %v11132_v33 = vld [vmem:[#allocation8 + $0x134] sm:$0xf]  ;;  %v10084_v47 = vld [vmem:[#allocation8 + $0x138] sm:$0xf0] }
 0x604   : > { %6194 = vmatmul.bf16.gmra.mxu2 %v13853_v17  ;;  %6222 = vmatmul.bf16.gmra.mxu3 %v13858_v62  ;;  %v10175_v37 = vor.u32 %v11154_v14, %v10172_v29  ;;  %v11148_v4 = vld [vmem:[#allocation8 + $0x1b4] sm:$0xf]  ;;  %v10087_v52 = vor.u32 %v11132_v33, %v10084_v47  ;;  %v11130_v23 = vld [vmem:[#allocation8 + $0x124] sm:$0xf]  ;;  %v5148_v14 = vpack.c.bf16 %v13836_v56, %v13834_v58  ;;  %v10140_v40 = vld [vmem:[#allocation8 + $0x1a8] sm:$0xf0] }
 0x605   : > { %6339 = vmatpush.bf16.msra.mxu0 %v10119_v44  ;;  %6395 = vmatpush.bf16.msra.mxu2 %v10247_v32  ;;  %v10303_v29 = vor.u32 %v11186_v1, %v10300_v53  ;;  %v10228_v3 = vld [vmem:[#allocation8 + $0x258] sm:$0xf0]  ;;  %v11128_v42 = vld [vmem:[#allocation8 + $0x114] sm:$0xf]  ;;  %v11166_v59 = vld [vmem:[#allocation8 + $0x244] sm:$0xf] }
 0x606   : > { %6235 = vmatmul.bf16.vlgmr.msrb.gmra.mxu0 %v13637_v46  ;;  %6263 = vmatmul.bf16.vlgmr.msrb.gmra.mxu1 %v13641_v51  ;;  %v10231_v21 = vor.u32 %v11168_v31, %v10228_v3  ;;  %v10292_v57 = vld [vmem:[#allocation8 + $0x2d8] sm:$0xf0]  ;;  %v11144_v56 = vld [vmem:[#allocation8 + $0x194] sm:$0xf]  ;;  %v5176_v32 = vunpack.c.l.b16 %v5148_v14  ;;  %v5177_v15 = vunpack.c.h.b16 %v5148_v14  ;;  %v10220_v33 = vld [vmem:[#allocation8 + $0x248] sm:$0xf0] }
 0x607   : > { %6368 = vmatpush.bf16.msra.mxu1 %v10175_v37  ;;  %6423 = vmatpush.bf16.msrb.mxu3 %v10311_v26  ;;  %v11146_v37 = vld [vmem:[#allocation8 + $0x1a4] sm:$0xf]  ;;  %v10068_v19 = vld [vmem:[#allocation8 + $0x118] sm:$0xf0] }
 0x608   : > { %v10132_v60 = vld [vmem:[#allocation8 + $0x198] sm:$0xf0]  ;;  %v10071_v26 = vor.u32 %v11128_v42, %v10068_v19  ;;  %v11182_v47 = vld [vmem:[#allocation8 + $0x2c4] sm:$0xf]  ;;  %v5178_v1 = vpack.c.b16 %v5176_v32, %v5155_v61  ;;  %v5179_v53 = vpack.c.b16 %v5177_v15, %v5156_v24 }
 0x609   : > { %6340 = vmatpush.bf16.msra.mxu0 %v10111_v54  ;;  %v10076_v54 = vld [vmem:[#allocation8 + $0x128] sm:$0xf0]  ;;  %v11162_v3 = vld [vmem:[#allocation8 + $0x224] sm:$0xf] }
 0x60a   : > { %v10079_v55 = vor.u32 %v11130_v23, %v10076_v54  ;;  %v11164_v54 = vld [vmem:[#allocation8 + $0x234] sm:$0xf]  ;;  %v5181_v31 = vrot.slane %v5179_v53, 3 }
 0x60b   : > { %6369 = vmatpush.bf16.msra.mxu1 %v10167_v28  ;;  %v10143_v28 = vor.u32 %v11146_v37, %v10140_v40  ;;  %6424 = vmatpush.bf16.msrb.mxu3 %v10303_v29  ;;  %v10212_v37 = vld [vmem:[#allocation8 + $0x238] sm:$0xf0]  ;;  %v11180_v40 = vld [vmem:[#allocation8 + $0x2b4] sm:$0xf] }
 0x60c   : > { %v10215_v61 = vor.u32 %v11164_v54, %v10212_v37  ;;  %v10279_v24 = vor.u32 %v11180_v40, %v10276_v16  ;;  %v5416_v19 = vshrl.u32 %v5181_v31, 16 }
 0x60d   : > { %6341 = vmatpush.bf16.msra.mxu0 %v10103_v41  ;;  %v11184_v41 = vld [vmem:[#allocation8 + $0x2d4] sm:$0xf] }
 0x60e   : > { %v10295_v58 = vor.u32 %v11184_v41, %v10292_v57  ;;  %v10204_v41 = vld [vmem:[#allocation8 + $0x228] sm:$0xf0]  ;;  %v10196_v57 = vld [vmem:[#allocation8 + $0x218] sm:$0xf0]  ;;  %v5418_v15 = vrot.slane %v5416_v19, 7 }
 0x60f   : > { %6370 = vmatpush.bf16.msra.mxu1 %v10159_v34 }
 0x610   : > { %6425 = vmatpush.bf16.msrb.mxu3 %v10295_v58  ;;  %v10260_v58 = vld [vmem:[#allocation8 + $0x298] sm:$0xf0] }
 0x611   : > { %6342 = vmatpush.bf16.msra.mxu0 %v10095_v38 }
 0x614   : > { %6291 = vmatmul.bf16.vlgmr.msrb.gmra.mxu2 %v13595_v5  ;;  %6319 = vmatmul.bf16.vlgmr.msra.gmra.mxu3 %v13599_v25  ;;  %v10148_v5 = vld [vmem:[#allocation8 + $0x1b8] sm:$0xf0]  ;;  %v10236_v25 = vld [vmem:[#allocation8 + $0x268] sm:$0xf0] }
 0x615   : > { %v10151_v44 = vor.u32 %v11148_v4, %v10148_v5  ;;  %v10239_v20 = vor.u32 %v11170_v35, %v10236_v25  ;;  %6343 = vmatpush.bf16.msra.mxu0 %v10087_v52  ;;  %v10284_v4 = vld [vmem:[#allocation8 + $0x2c8] sm:$0xf0]  ;;  %v11126_v52 = vld [vmem:[#allocation8 + $0x104] sm:$0xf]  ;;  %v10135_v35 = vor.u32 %v11144_v56, %v10132_v60  ;;  %v10223_v25 = vor.u32 %v11166_v59, %v10220_v33 }
 0x616   : > { %6240 = vmatmul.bf16.gmra.mxu0 %v13704_v63  ;;  %6268 = vmatmul.bf16.gmra.mxu1 %v13708_v45  ;;  %v10060_v5 = vld [vmem:[#allocation8 + $0x108] sm:$0xf0]  ;;  %v10287_v23 = vor.u32 %v11182_v47, %v10284_v4  ;;  %v11158_v60 = vld [vmem:[#allocation8 + $0x204] sm:$0xf] }
 0x617   : > { %6371 = vmatpush.bf16.msra.mxu1 %v10151_v44  ;;  %6396 = vmatpush.bf16.msra.mxu2 %v10239_v20  ;;  %v11142_v44 = vld [vmem:[#allocation8 + $0x184] sm:$0xf]  ;;  %v10124_v20 = vld [vmem:[#allocation8 + $0x188] sm:$0xf0]  ;;  %v10063_v14 = vor.u32 %v11126_v52, %v10060_v5  ;;  %v5419_v52 = vshll.u32 %v5181_v31, 16 }
 0x618   : > { %v10127_v29 = vor.u32 %v11142_v44, %v10124_v20  ;;  %6426 = vmatpush.bf16.msrb.mxu3 %v10287_v23  ;;  %v10188_v59 = vld [vmem:[#allocation8 + $0x208] sm:$0xf0]  ;;  %v11174_v33 = vld [vmem:[#allocation8 + $0x284] sm:$0xf] }
 0x619   : > { %6344 = vmatpush.bf16.msra.mxu0 %v10079_v55  ;;  %v5180_v55 = vrot.slane %v5178_v1, 3  ;;  %v10252_v47 = vld [vmem:[#allocation8 + $0x288] sm:$0xf0]  ;;  %v10191_v5 = vor.u32 %v11158_v60, %v10188_v59  ;;  %v5421_v44 = vor.u32 %v5419_v52, %v5418_v15 }
 0x61a   : > { %v6124_v38 = vpop.f32.mrf.mxu0  ;;  %v6152_v34 = vpop.f32.mrf.mxu1  ;;  %v10255_v20 = vor.u32 %v11174_v33, %v10252_v47 }
 0x61b   : > { %v13870_v30 = vadd.f32 %v6152_v34, %v6124_v38  ;;  %6372 = vmatpush.bf16.msra.mxu1 %v10143_v28  ;;  %6397 = vmatpush.bf16.msra.mxu2 %v10231_v21  ;;  %v11178_v28 = vld [vmem:[#allocation8 + $0x2a4] sm:$0xf]  ;;  %v11160_v21 = vld [vmem:[#allocation8 + $0x214] sm:$0xf]  ;;  %v5409_v42 = vshrl.u32 %v5180_v55, 16  ;;  %v5412_v4 = vshll.u32 %v5180_v55, 16  ;;  %v5538_v37 = vsel %vm13794_vm1, %v13840_v43, %v5421_v44 }
 0x61c   : > { %6427 = vmatpush.bf16.msrb.mxu3 %v10279_v24  ;;  %v11176_v34 = vld [vmem:[#allocation8 + $0x294] sm:$0xf]  ;;  %v10199_v56 = vor.u32 %v11160_v21, %v10196_v57 }
 0x61d   : > { %6345 = vmatpush.bf16.msra.mxu0 %v10071_v26  ;;  %v5411_v32 = vrot.slane %v5409_v42, 7  ;;  %v10263_v26 = vor.u32 %v11176_v34, %v10260_v58 }
 0x61f   : > { %6373 = vmatpush.bf16.msra.mxu1 %v10135_v35  ;;  %6398 = vmatpush.bf16.msra.mxu2 %v10223_v25  ;;  %v5414_v25 = vor.u32 %v5412_v4, %v5411_v32 }
 0x621   : > { %6346 = vmatpush.bf16.msra.mxu0 %v10063_v14  ;;  %v5537_v54 = vsel %vm13794_vm1, %v13838_v39, %v5414_v25 }
 0x622   : > { %v13881_v23 = vpop.f32.mrf.mxu0  ;;  %v13883_v14 = vpop.f32.mrf.mxu1 }
 0x623   : > { %6374 = vmatpush.bf16.msra.mxu1 %v10127_v29  ;;  %6399 = vmatpush.bf16.msra.mxu2 %v10215_v61 }
 0x624   : > { %6296 = vmatmul.bf16.gmra.mxu2 %v13662_v13  ;;  %6324 = vmatmul.bf16.gmra.mxu3 %v13666_v49  ;;  %v10207_v13 = vor.u32 %v11162_v3, %v10204_v41  ;;  %v10268_v49 = vld [vmem:[#allocation8 + $0x2a8] sm:$0xf0] }
 0x625   : > { %v10271_v38 = vor.u32 %v11178_v28, %v10268_v49 }
 0x626   : > { %6245 = vmatmul.bf16.gmra.mxu0 %v13844_v22  ;;  %6273 = vmatmul.bf16.gmra.mxu1 %v13848_v27 }
 0x627   : > { %6400 = vmatpush.bf16.msra.mxu2 %v10207_v13  ;;  %6428 = vmatpush.bf16.msrb.mxu3 %v10271_v38 }
 0x62b   : > { %6401 = vmatpush.bf16.msra.mxu2 %v10199_v56  ;;  %6429 = vmatpush.bf16.msrb.mxu3 %v10263_v26 }
 0x62f   : > { %v6180_v35 = vpop.f32.mrf.mxu2  ;;  %6402 = vmatpush.bf16.msra.mxu2 %v10191_v5  ;;  %6430 = vmatpush.bf16.msrb.mxu3 %v10255_v20 }
 0x630   : > { %v6181_v1 = vadd.f32 %v6180_v35, %v13870_v30  ;;  %v6208_v53 = vpop.f32.mrf.mxu3 }
 0x632   : > { %v6209_v29 = vadd.f32 %v6208_v53, %v6181_v1 }
 0x634   : > { %6301 = vmatmul.bf16.gmra.mxu2 %v13730_v36  ;;  %6329 = vmatmul.bf16.gmra.mxu3 %v13734_v0 }
 0x636   : > { %6250 = vmatmul.bf16.gmra.mxu0 %v5537_v54  ;;  %6278 = vmatmul.bf16.gmra.mxu1 %v5538_v37 }
 0x637   : > { %v13897_v36 = vpop.f32.mrf.mxu2 }
 0x638   : > { %v13899_v0 = vpop.f32.mrf.mxu3 }
 0x63a   : > { %v6129_v30 = vpop.f32.mrf.mxu0  ;;  %v6157_v40 = vpop.f32.mrf.mxu1 }
 0x63b   : > { %v6158_v55 = vadd.f32 %v6157_v40, %v6129_v30 }
 0x642   : > { %v13901_v16 = vpop.f32.mrf.mxu0  ;;  %v13903_v24 = vpop.f32.mrf.mxu1 }
 0x644   : > { %6306 = vmatmul.bf16.gmra.mxu2 %v13821_v48  ;;  %6334 = vmatmul.bf16.gmra.mxu3 %v13826_v8 }
 0x646   : > { %6347 = vmatmul.bf16.vlgmr.msra.gmra.mxu0 %v13623_v2  ;;  %6375 = vmatmul.bf16.vlgmr.msra.gmra.mxu1 %v13627_v11 }
 0x64e   : > { %v6185_v39 = vpop.f32.mrf.mxu2  ;;  %v6213_v31 = vpop.f32.mrf.mxu3 }
 0x64f   : > { %v6186_v43 = vadd.f32 %v6185_v39, %v6158_v55 }
 0x651   : > { %v6214_v61 = vadd.f32 %v6213_v31, %v6186_v43 }
 0x654   : > { %6403 = vmatmul.bf16.vlgmr.msra.gmra.mxu2 %v13637_v46  ;;  %6431 = vmatmul.bf16.vlgmr.msrb.gmra.mxu3 %v13641_v51 }
 0x656   : > { %6352 = vmatmul.bf16.gmra.mxu0 %v13684_v10  ;;  %6380 = vmatmul.bf16.gmra.mxu1 %v13688_v18  ;;  %v13913_v8 = vpop.f32.mrf.mxu2  ;;  %v13915_v46 = vpop.f32.mrf.mxu3 }
 0x65b   : > { %v6134_v2 = vpop.f32.mrf.mxu0  ;;  %v6162_v11 = vpop.f32.mrf.mxu1 }
 0x65c   : > { %v6163_v48 = vadd.f32 %v6162_v11, %v6134_v2 }
 0x663   : > { %v13917_v51 = vpop.f32.mrf.mxu0  ;;  %v13919_v10 = vpop.f32.mrf.mxu1 }
 0x664   : > { %6408 = vmatmul.bf16.gmra.mxu2 %v13704_v63  ;;  %6436 = vmatmul.bf16.gmra.mxu3 %v13708_v45 }
 0x666   : > { %6357 = vmatmul.bf16.gmra.mxu0 %v13771_v9  ;;  %6385 = vmatmul.bf16.gmra.mxu1 %v13775_v6 }
 0x66e   : > { %v6190_v18 = vpop.f32.mrf.mxu2  ;;  %v6218_v41 = vpop.f32.mrf.mxu3 }
 0x66f   : > { %v6191_v3 = vadd.f32 %v6190_v18, %v6163_v48 }
 0x671   : > { %v6219_v28 = vadd.f32 %v6218_v41, %v6191_v3 }
 0x673   : > { %v6139_v13 = vpop.f32.mrf.mxu0  ;;  %v6167_v63 = vpop.f32.mrf.mxu1 }
 0x674   : > { %v6168_v49 = vadd.f32 %v6167_v63, %v6139_v13  ;;  %6413 = vmatmul.bf16.gmra.mxu2 %v13844_v22  ;;  %6441 = vmatmul.bf16.gmra.mxu3 %v13848_v27 }
 0x676   : > { %6362 = vmatmul.bf16.gmra.mxu0 %v13853_v17  ;;  %6390 = vmatmul.bf16.gmra.mxu1 %v13858_v62  ;;  %v13925_v6 = vpop.f32.mrf.mxu2  ;;  %v13927_v21 = vpop.f32.mrf.mxu3 }
 0x67b   : > { %v6141_v45 = vpop.f32.mrf.mxu0  ;;  %v6169_v9 = vpop.f32.mrf.mxu1 }
 0x67c   : > { %v6451_v9 = vld [vmem:[%s14872_s9] sm:$0xf] }
 0x683   : > { %v6236_v57 = vpop.f32.mrf.mxu0  ;;  %v6264_v42 = vpop.f32.mrf.mxu1 }
 0x684   : > { %v6237_v19 = vadd.f32 %v6236_v57, %v6209_v29  ;;  %6418 = vmatmul.bf16.gmra.mxu2 %v5537_v54  ;;  %6446 = vmatmul.bf16.gmra.mxu3 %v5538_v37  ;;  %v6155_v57 = vadd.f32 %v13883_v14, %v13881_v23 }
 0x686   : > { %v13929_v38 = vadd.f32 %v6264_v42, %v6237_v19 }
 0x687   : > { %v6195_v22 = vpop.f32.mrf.mxu2  ;;  %v6223_v34 = vpop.f32.mrf.mxu3 }
 0x688   : > { %v6196_v27 = vadd.f32 %v6195_v22, %v6168_v49  ;;  %v6453_v22 = vperm.slane %v6451_v9, 0 }
 0x68a   : > { %v6224_v58 = vadd.f32 %v6223_v34, %v6196_v27  ;;  %v6183_v27 = vadd.f32 %v13897_v36, %v6155_v57 }
 0x68b   : > { %v6238_v17 = vpop.f32.mrf.mxu0  ;;  %v13931_v56 = vpop.f32.mrf.mxu1 }
 0x68f   : > { %v6197_v62 = vpop.f32.mrf.mxu2  ;;  %v6225_v60 = vpop.f32.mrf.mxu3 }
 0x690   : > { %v6473_v62 = vperm.slane %v6451_v9, 1 }
 0x693   : > { %v6241_v59 = vpop.f32.mrf.mxu0  ;;  %v6269_v32 = vpop.f32.mrf.mxu1 }
 0x694   : > { %v6242_v15 = vadd.f32 %v6241_v59, %v6214_v61 }
 0x696   : > { %v13933_v26 = vadd.f32 %v6269_v32, %v6242_v15  ;;  %v13969_v32 = vperm.slane %v6453_v22, 0  ;;  %v6454_v15 = vperm.slane %v6451_v9, 2 }
 0x697   : > { %v6292_v33 = vpop.f32.mrf.mxu2  ;;  %v6320_v47 = vpop.f32.mrf.mxu3 }
 0x698   : > { %v6321_v34 = vadd.f32 %v6320_v47, %v6292_v33  ;;  %v6459_v33 = vmul.f32 %v13969_v32, %v13929_v38 }
 0x69b   : > { %v13935_v4 = vpop.f32.mrf.mxu0  ;;  %v13937_v52 = vpop.f32.mrf.mxu1 }
 0x69f   : > { %v6294_v5 = vpop.f32.mrf.mxu2  ;;  %v6322_v35 = vpop.f32.mrf.mxu3 }
 0x6a0   : > { %v6323_v36 = vadd.f32 %v6322_v35, %v6294_v5 }
 0x6a3   : > { %v6246_v25 = vpop.f32.mrf.mxu0  ;;  %v6274_v44 = vpop.f32.mrf.mxu1 }
 0x6a4   : > { %v6247_v20 = vadd.f32 %v6246_v25, %v6219_v28  ;;  %v6211_v25 = vadd.f32 %v13899_v0, %v6183_v27 }
 0x6a6   : > { %v13939_v1 = vadd.f32 %v6274_v44, %v6247_v20  ;;  %v6474_v20 = vperm.slane %v6451_v9, 3  ;;  %v6239_v23 = vadd.f32 %v6238_v17, %v6211_v25 }
 0x6a7   : > { %v6297_v53 = vpop.f32.mrf.mxu2  ;;  %v6325_v29 = vpop.f32.mrf.mxu3 }
 0x6a8   : > { %v6267_v0 = vadd.f32 %v13931_v56, %v6239_v23  ;;  %v6326_v56 = vadd.f32 %v6325_v29, %v6297_v53 }
 0x6ab   : > { %v13941_v54 = vpop.f32.mrf.mxu0  ;;  %v13943_v37 = vpop.f32.mrf.mxu1 }
 0x6af   : > { %v13945_v30 = vpop.f32.mrf.mxu2  ;;  %v13947_v40 = vpop.f32.mrf.mxu3 }
 0x6b3   : > { %v6251_v55 = vpop.f32.mrf.mxu0  ;;  %v6279_v39 = vpop.f32.mrf.mxu1 }
 0x6b4   : > { %v6252_v43 = vadd.f32 %v6251_v55, %v6224_v58  ;;  %v13972_v55 = vperm.slane %v6473_v62, 1  ;;  %v11723_v62 = vmov 65535  }
 0x6b6   : > { %v13949_v31 = vadd.f32 %v6279_v39, %v6252_v43  ;;  %v13976_v43 = vperm.slane %v6454_v15, 0  ;;  %v6479_v57 = vadd.f32 %v13972_v55, %v6459_v33  ;;  %v6532_v15 = vsel %vm5462_vm7, 4294967295, %v11723_v62 }
 0x6b7   : > { %v13951_v61 = vpop.f32.mrf.mxu2  ;;  %v13953_v2 = vpop.f32.mrf.mxu3  ;;  %v13995_v53 = vsel %vm5428_vm3, %v6532_v15, 0  ;;  %vm6526_vm3 = vcmask 56320  }
 0x6bb   : > { %v6253_v11 = vpop.f32.mrf.mxu0  ;;  %v6281_v48 = vpop.f32.mrf.mxu1 }
 0x6bf   : > { %v13955_v18 = vpop.f32.mrf.mxu2  ;;  %v13957_v3 = vpop.f32.mrf.mxu3 }
 0x6c3   : > { %v6348_v41 = vpop.f32.mrf.mxu0  ;;  %v6376_v28 = vpop.f32.mrf.mxu1 }
 0x6c4   : > { %v6349_v58 = vadd.f32 %v6348_v41, %v6321_v34  ;;  %v13978_v41 = vperm.slane %v6474_v20, 1  ;;  %v6493_v34 = vmax.f32 %v6479_v57, 0.0 }
 0x6c6   : > { %v6377_v44 = vadd.f32 %v6376_v28, %v6349_v58 }
 0x6c7   : > { %v13959_v13 = vpop.f32.mrf.mxu2  ;;  %v13961_v63 = vpop.f32.mrf.mxu3 }
 0x6cb   : > { %v6350_v49 = vpop.f32.mrf.mxu0  ;;  %v6378_v45 = vpop.f32.mrf.mxu1 }
 0x6cc   : > { %v6351_v11 = vadd.f32 %v6350_v49, %v6323_v36  ;;  %v6461_v49 = vmul.f32 %v13969_v32, %v6267_v0  ;;  %v6463_v0 = vmul.f32 %v13969_v32, %v13933_v26 }
 0x6ce   : > { %v6379_v38 = vadd.f32 %v6378_v45, %v6351_v11  ;;  %v11190_v11 = vld [vmem:[%s14873_s10] sm:$0x10]  ;;  %v6483_v26 = vadd.f32 %v13972_v55, %v6463_v0 }
 0x6cf   : > { %v6309_v42 = vpop.f32.mrf.mxu2  ;;  %v6337_v19 = vpop.f32.mrf.mxu3 }
 0x6d0   : > { %v6160_v42 = vadd.f32 %v13903_v24, %v13901_v16  ;;  %v6481_v24 = vadd.f32 %v13972_v55, %v6461_v49 }
 0x6d2   : > { %v6188_v35 = vadd.f32 %v13913_v8, %v6160_v42 }
 0x6d3   : > { %v6353_v60 = vpop.f32.mrf.mxu0  ;;  %v6381_v59 = vpop.f32.mrf.mxu1 }
 0x6d4   : > { %v6354_v25 = vadd.f32 %v6353_v60, %v6326_v56  ;;  %v6216_v16 = vadd.f32 %v13915_v46, %v6188_v35  ;;  %v10314_v46 = vld [vmem:[%s14873_s10] sm:$0xf] }
 0x6d5   : > { %v14012_v49 = vor.u32 %v11190_v11, %v10314_v46 }
 0x6d6   : > { %v6244_v29 = vadd.f32 %v13935_v4, %v6216_v16  ;;  %v6382_v33 = vadd.f32 %v6381_v59, %v6354_v25  ;;  %v6328_v4 = vadd.f32 %v13947_v40, %v13945_v30  ;;  %v6497_v16 = vmax.f32 %v6483_v26, 0.0 }
 0x6d7   : > { %v6404_v14 = vpop.f32.mrf.mxu2  ;;  %v6432_v39 = vpop.f32.mrf.mxu3 }
 0x6d8   : > { %v6405_v47 = vadd.f32 %v6404_v14, %v6377_v44  ;;  %v6272_v35 = vadd.f32 %v13937_v52, %v6244_v29  ;;  %v6165_v52 = vadd.f32 %v13919_v10, %v13917_v51 }
 0x6da   : > { %v6433_v48 = vadd.f32 %v6432_v39, %v6405_v47  ;;  %v6465_v62 = vmul.f32 %v13969_v32, %v6272_v35 }
 0x6db   : > { %v6355_v28 = vpop.f32.mrf.mxu0  ;;  %v6383_v9 = vpop.f32.mrf.mxu1 }
 0x6dc   : > { %v6460_v17 = vmul.f32 %v13976_v43, %v6433_v48  ;;  %v6495_v48 = vmax.f32 %v6481_v24, 0.0  ;;  %v6331_v24 = vadd.f32 %v13953_v2, %v13951_v61 }
 0x6de   : > { %v6480_v5 = vadd.f32 %v13978_v41, %v6460_v17 }
 0x6df   : > { %v6406_v19 = vpop.f32.mrf.mxu2  ;;  %v6434_v22 = vpop.f32.mrf.mxu3 }
 0x6e0   : > { %v6494_v27 = vmax.f32 %v6480_v5, 0.0  ;;  %v6407_v58 = vadd.f32 %v6406_v19, %v6379_v38  ;;  %v6356_v19 = vadd.f32 %v6355_v28, %v6328_v4 }
 0x6e2   : > { %v6507_v44 = vpack.c.bf16 %v6494_v27, %v6493_v34  ;;  %v6435_v20 = vadd.f32 %v6434_v22, %v6407_v58  ;;  %v6384_v28 = vadd.f32 %v6383_v9, %v6356_v19 }
 0x6e3   : > { %v6358_v45 = vpop.f32.mrf.mxu0  ;;  %v13991_v8 = vpop.f32.mrf.mxu1 }
 0x6e4   : > { %v6522_v23 = vunpack.c.l.b16 %v6507_v44  ;;  %v6523_v14 = vunpack.c.h.b16 %v6507_v44  ;;  %v6462_v39 = vmul.f32 %v13976_v43, %v6435_v20  ;;  %v6193_v20 = vadd.f32 %v13925_v6, %v6165_v52 }
 0x6e6   : > { %v6482_v60 = vadd.f32 %v13978_v41, %v6462_v39  ;;  %v6524_v36 = vpack.c.b16 %v6522_v23, %v6522_v23  ;;  %v6525_v47 = vpack.c.b16 %v6523_v14, %v6523_v14  ;;  %v6221_v2 = vadd.f32 %v13927_v21, %v6193_v20 }
 0x6e7   : > { %v6409_v59 = vpop.f32.mrf.mxu2  ;;  %v6437_v57 = vpop.f32.mrf.mxu3  ;;  %v6333_v21 = vadd.f32 %v13957_v3, %v13955_v18 }
 0x6e8   : > { %v6496_v17 = vmax.f32 %v6482_v60, 0.0  ;;  %v6410_v42 = vadd.f32 %v6409_v59, %v6382_v33  ;;  %v6535_v38 = vand.u32 %v13995_v53, %v6524_v36  ;;  %v6538_v5 = vand.u32 %v13995_v53, %v6525_v47 }
 0x6e9   : > { %v6485_v36 = vadd.f32 %v13972_v55, %v6465_v62  ;;  %v6359_v47 = vadd.f32 %v6358_v45, %v6331_v24  ;;  %v6467_v45 = vmul.f32 %v13969_v32, %v13939_v1  ;;  %v6249_v26 = vadd.f32 %v13941_v54, %v6221_v2 }
 0x6ea   : > { %v6508_v22 = vpack.c.bf16 %v6496_v17, %v6495_v48  ;;  %v6438_v34 = vadd.f32 %v6437_v57, %v6410_v42  ;;  %6547 = vmatpush.bf16.msrb.mxu0 %v6535_v38  ;;  %6561 = vmatpush.bf16.msrb.mxu1 %v6538_v5 }
 0x6eb   : > { %v6360_v30 = vpop.f32.mrf.mxu0  ;;  %v14015_v40 = vpop.f32.mrf.mxu1  ;;  %v6499_v42 = vmax.f32 %v6485_v36, 0.0  ;;  %v6387_v35 = vadd.f32 %v13991_v8, %v6359_v47  ;;  %v6487_v18 = vadd.f32 %v13972_v55, %v6467_v45  ;;  %v6277_v3 = vadd.f32 %v13943_v37, %v6249_v26 }
 0x6ec   : > { %v6605_v56 = vunpack.c.l.b16 %v6508_v22  ;;  %v6606_v27 = vunpack.c.h.b16 %v6508_v22  ;;  %v6464_v58 = vmul.f32 %v13976_v43, %v6438_v34  ;;  %v6361_v8 = vadd.f32 %v6360_v30, %v6333_v21 }
 0x6ed   : > { %10316 = vmatmul.msk.bf16.vlgmr.msrb.gmra.mxu0 %vm6526_vm3, %v14012_v49  ;;  %10317 = vmatmul.msk.bf16.vlgmr.msrb.gmra.mxu1 %vm6526_vm3, %v14012_v49  ;;  %v6469_v36 = vmul.f32 %v13969_v32, %v6277_v3  ;;  %v6336_v47 = vadd.f32 %v13961_v63, %v13959_v13 }
 0x6ee   : > { %v6607_v15 = vpack.c.b16 %v6605_v56, %v6522_v23  ;;  %v6608_v25 = vpack.c.b16 %v6606_v27, %v6523_v14  ;;  %v6484_v44 = vadd.f32 %v13978_v41, %v6464_v58  ;;  %v6389_v30 = vadd.f32 %v14015_v40, %v6361_v8 }
 0x6ef   : > { %v6411_v51 = vpop.f32.mrf.mxu2  ;;  %v6439_v10 = vpop.f32.mrf.mxu3  ;;  %v6489_v13 = vadd.f32 %v13972_v55, %v6469_v36 }
 0x6f0   : > { %v6498_v39 = vmax.f32 %v6484_v44, 0.0  ;;  %v6412_v29 = vadd.f32 %v6411_v51, %v6384_v28  ;;  %v6610_v33 = vshrl.u32 %v6607_v15, 16  ;;  %v6613_v60 = vshll.u32 %v6607_v15, 16 }
 0x6f1   : > { %v6618_v9 = vshrl.u32 %v6608_v25, 16  ;;  %v6621_v23 = vshll.u32 %v6608_v25, 16 }
 0x6f2   : > { %v6509_v14 = vpack.c.bf16 %v6498_v39, %v6497_v16  ;;  %v6440_v46 = vadd.f32 %v6439_v10, %v6412_v29  ;;  %v6612_v11 = vrot.slane %v6610_v33, 3  ;;  %v6615_v48 = vrot.slane %v6613_v60, 4 }
 0x6f3   : > { %v6363_v6 = vpop.f32.mrf.mxu0  ;;  %v14030_v0 = vpop.f32.mrf.mxu1  ;;  %v6620_v4 = vrot.slane %v6618_v9, 3  ;;  %v6623_v61 = vrot.slane %v6621_v23, 4  ;;  %v6501_v60 = vmax.f32 %v6487_v18, 0.0 }
 0x6f4   : > { %v6690_v59 = vunpack.c.l.b16 %v6509_v14  ;;  %v6691_v57 = vunpack.c.h.b16 %v6509_v14  ;;  %v6466_v17 = vmul.f32 %v13976_v43, %v6440_v46  ;;  %v6616_v38 = vor.u32 %v6615_v48, %v6612_v11 }
 0x6f5   : > { %v6624_v5 = vor.u32 %v6623_v61, %v6620_v4  ;;  %v6364_v48 = vadd.f32 %v6363_v6, %v6336_v47 }
 0x6f6   : > { %v6486_v19 = vadd.f32 %v13978_v41, %v6466_v17  ;;  %v6692_v22 = vpack.c.b16 %v6690_v59, %v6605_v56  ;;  %v6693_v34 = vpack.c.b16 %v6691_v57, %v6606_v27  ;;  %v6626_v62 = vand.u32 %v6616_v38, %v13995_v53 }
 0x6f7   : > { %v6414_v58 = vpop.f32.mrf.mxu2  ;;  %v6442_v52 = vpop.f32.mrf.mxu3  ;;  %v6629_v28 = vand.u32 %v6624_v5, %v13995_v53 }
 0x6f8   : > { %v6500_v1 = vmax.f32 %v6486_v19, 0.0  ;;  %v6415_v15 = vadd.f32 %v6414_v58, %v6387_v35  ;;  %v6694_v25 = vrot.slane %v6692_v22, 3  ;;  %v6695_v44 = vrot.slane %v6693_v34, 3  ;;  %6638 = vmatpush.bf16.msrb.mxu2 %v6626_v62 }
 0x6f9   : > { %6652 = vmatpush.bf16.msra.mxu3 %v6629_v28  ;;  %v6392_v19 = vadd.f32 %v14030_v0, %v6364_v48  ;;  %v6503_v58 = vmax.f32 %v6489_v13, 0.0 }
 0x6fa   : > { %v6510_v56 = vpack.c.bf16 %v6500_v1, %v6499_v42  ;;  %v6443_v27 = vadd.f32 %v6442_v52, %v6415_v15  ;;  %v6697_v54 = vand.u32 %v6694_v25, %v13995_v53  ;;  %v6700_v20 = vand.u32 %v6695_v44, %v13995_v53 }
 0x6fb   : > { %v6365_v16 = vpop.f32.mrf.mxu0  ;;  %v6393_v24 = vpop.f32.mrf.mxu1  ;;  %10318 = vmatmul.msk.bf16.vlgmr.msrb.gmra.mxu2 %vm6526_vm3, %v14012_v49  ;;  %v6471_v52 = vmul.f32 %v13969_v32, %v13949_v31 }
 0x6fc   : > { %v6761_v51 = vunpack.c.l.b16 %v6510_v56  ;;  %v6762_v10 = vunpack.c.h.b16 %v6510_v56  ;;  %v6468_v39 = vmul.f32 %v13976_v43, %v6443_v27  ;;  %6709 = vmatpush.bf16.msra.mxu0 %v6697_v54  ;;  %6723 = vmatpush.bf16.msra.mxu1 %v6700_v20 }
 0x6fd   : > { %10319 = vmatmul.msk.bf16.vlgmr.msra.gmra.mxu3 %vm6526_vm3, %v14012_v49  ;;  %v6491_v20 = vadd.f32 %v13972_v55, %v6471_v52 }
 0x6fe   : > { %v6763_v29 = vpack.c.b16 %v6761_v51, %v6690_v59  ;;  %v6764_v33 = vpack.c.b16 %v6762_v10, %v6691_v57  ;;  %v6488_v37 = vadd.f32 %v13978_v41, %v6468_v39 }
 0x6ff   : > { %v6416_v9 = vpop.f32.mrf.mxu2  ;;  %v6444_v23 = vpop.f32.mrf.mxu3  ;;  %10320 = vmatmul.msk.bf16.vlgmr.msra.gmra.mxu0 %vm6526_vm3, %v14012_v49  ;;  %10321 = vmatmul.msk.bf16.vlgmr.msra.gmra.mxu1 %vm6526_vm3, %v14012_v49 }
 0x700   : > { %v6502_v14 = vmax.f32 %v6488_v37, 0.0  ;;  %v6417_v40 = vadd.f32 %v6416_v9, %v6389_v30  ;;  %v6766_v46 = vshrl.u32 %v6763_v29, 16  ;;  %v6769_v11 = vshll.u32 %v6763_v29, 16 }
 0x701   : > { %v6774_v4 = vshrl.u32 %v6764_v33, 16  ;;  %v6777_v61 = vshll.u32 %v6764_v33, 16 }
 0x702   : > { %v6511_v2 = vpack.c.bf16 %v6502_v14, %v6501_v60  ;;  %v6445_v59 = vadd.f32 %v6444_v23, %v6417_v40  ;;  %v6768_v57 = vrot.slane %v6766_v46, 2  ;;  %v6771_v17 = vrot.slane %v6769_v11, 3 }
 0x703   : > { %v6776_v63 = vrot.slane %v6774_v4, 2  ;;  %v6779_v42 = vrot.slane %v6777_v61, 3 }
 0x704   : > { %v6846_v45 = vunpack.c.l.b16 %v6511_v2  ;;  %v6847_v38 = vunpack.c.h.b16 %v6511_v2  ;;  %v6470_v5 = vmul.f32 %v13976_v43, %v6445_v59  ;;  %v6772_v35 = vor.u32 %v6771_v17, %v6768_v57 }
 0x705   : > { %v6780_v22 = vor.u32 %v6779_v42, %v6776_v63 }
 0x706   : > { %v6490_v6 = vadd.f32 %v13978_v41, %v6470_v5  ;;  %v6782_v34 = vand.u32 %v6772_v35, %v13995_v53  ;;  %v6848_v26 = vpack.c.b16 %v6846_v45, %v6761_v51  ;;  %v6849_v21 = vpack.c.b16 %v6847_v38, %v6762_v10 }
 0x707   : > { %v6419_v62 = vpop.f32.mrf.mxu2  ;;  %v6447_v28 = vpop.f32.mrf.mxu3  ;;  %v6785_v1 = vand.u32 %v6780_v22, %v13995_v53  ;;  %v6505_v51 = vmax.f32 %v6491_v20, 0.0 }
 0x708   : > { %v6504_v15 = vmax.f32 %v6490_v6, 0.0  ;;  %v6420_v25 = vadd.f32 %v6419_v62, %v6392_v19  ;;  %6794 = vmatpush.bf16.msra.mxu2 %v6782_v34  ;;  %v6850_v44 = vrot.slane %v6848_v26, 2  ;;  %v6851_v0 = vrot.slane %v6849_v21, 2  ;;  %v10396_v62 = vld [vmem:[#allocation10 + $0x70] sm:$0xf] }
 0x709   : > { %6808 = vmatpush.bf16.msrb.mxu3 %v6785_v1  ;;  %v11222_v1 = vld [vmem:[#allocation10 + $0xf4] sm:$0xf0] }
 0x70a   : > { %v6512_v8 = vpack.c.bf16 %v6504_v15, %v6503_v58  ;;  %v6448_v56 = vadd.f32 %v6447_v28, %v6420_v25  ;;  %v6853_v27 = vand.u32 %v6850_v44, %v13995_v53  ;;  %v6856_v54 = vand.u32 %v6851_v0, %v13995_v53  ;;  %v10460_v28 = vld [vmem:[#allocation10 + $0xf0] sm:$0xf]  ;;  %v10388_v0 = vld [vmem:[#allocation10 + $0x60] sm:$0xf] }
 0x70b   : > { %10322 = vmatmul.msk.bf16.vlgmr.msra.gmra.mxu2 %vm6526_vm3, %v14012_v49  ;;  %v10461_v44 = vor.u32 %v11222_v1, %v10460_v28 }
 0x70c   : > { %v6917_v18 = vunpack.c.l.b16 %v6512_v8  ;;  %v6918_v31 = vunpack.c.h.b16 %v6512_v8  ;;  %v6472_v32 = vmul.f32 %v13976_v43, %v6448_v56  ;;  %6865 = vmatpush.bf16.msrb.mxu0 %v6853_v27  ;;  %6879 = vmatpush.bf16.msrb.mxu1 %v6856_v54  ;;  %v11204_v8 = vld [vmem:[#allocation10 + $0x64] sm:$0xf0]  ;;  %v10452_v56 = vld [vmem:[#allocation10 + $0xe0] sm:$0xf] }
 0x70d   : > { %10323 = vmatmul.msk.bf16.vlgmr.msrb.gmra.mxu3 %vm6526_vm3, %v14012_v49  ;;  %v10389_v20 = vor.u32 %v11204_v8, %v10388_v0 }
 0x70e   : > { %v6919_v3 = vpack.c.b16 %v6917_v18, %v6846_v45  ;;  %v6920_v16 = vpack.c.b16 %v6918_v31, %v6847_v38  ;;  %v6492_v24 = vadd.f32 %v13978_v41, %v6472_v32  ;;  %v10588_v32 = vld [vmem:[#allocation10 + $0x1f0] sm:$0xf] }
 0x70f   : > { %v6421_v10 = vpop.f32.mrf.mxu2  ;;  %v6449_v39 = vpop.f32.mrf.mxu3  ;;  %10324 = vmatmul.msk.bf16.vlgmr.msrb.gmra.mxu0 %vm6526_vm3, %v14012_v49  ;;  %10325 = vmatmul.msk.bf16.vlgmr.msrb.gmra.mxu1 %vm6526_vm3, %v14012_v49 }
 0x710   : > { %v6506_v55 = vmax.f32 %v6492_v24, 0.0  ;;  %v6922_v43 = vshrl.u32 %v6919_v3, 16  ;;  %v6925_v30 = vshll.u32 %v6919_v3, 16  ;;  %v6930_v29 = vshrl.u32 %v6920_v16, 16 }
 0x711   : > { %v6933_v33 = vshll.u32 %v6920_v16, 16 }
 0x712   : > { %v6513_v37 = vpack.c.bf16 %v6506_v55, %v6505_v51  ;;  %v6924_v60 = vrot.slane %v6922_v43, 1  ;;  %v6927_v36 = vrot.slane %v6925_v30, 2  ;;  %v6932_v47 = vrot.slane %v6930_v29, 1  ;;  %v11254_v51 = vld [vmem:[#allocation10 + $0x1f4] sm:$0xf0] }
 0x713   : > { %v6935_v9 = vrot.slane %v6933_v33, 2  ;;  %v10589_v43 = vor.u32 %v11254_v51, %v10588_v32  ;;  %v10380_v30 = vld [vmem:[#allocation10 + $0x50] sm:$0xf]  ;;  %v11202_v29 = vld [vmem:[#allocation10 + $0x54] sm:$0xf0] }
 0x714   : > { %v7002_v41 = vunpack.c.l.b16 %v6513_v37  ;;  %v7003_v23 = vunpack.c.h.b16 %v6513_v37  ;;  %v6928_v14 = vor.u32 %v6927_v36, %v6924_v60  ;;  %v10444_v33 = vld [vmem:[#allocation10 + $0xd0] sm:$0xf]  ;;  %v10381_v36 = vor.u32 %v11202_v29, %v10380_v30  ;;  %v11234_v32 = vld [vmem:[#allocation10 + $0x154] sm:$0xf0] }
 0x715   : > { %v6936_v40 = vor.u32 %v6935_v9, %v6932_v47  ;;  %v11218_v47 = vld [vmem:[#allocation10 + $0xd4] sm:$0xf0] }
 0x716   : > { %v7072_v46 = vpack.c.b16 %v7002_v41, %v7002_v41  ;;  %v7073_v11 = vpack.c.b16 %v7003_v23, %v7003_v23  ;;  %v6938_v48 = vand.u32 %v6928_v14, %v13995_v53  ;;  %v7004_v4 = vpack.c.b16 %v7002_v41, %v6917_v18  ;;  %v10524_v18 = vld [vmem:[#allocation10 + $0x170] sm:$0xf]  ;;  %v10516_v41 = vld [vmem:[#allocation10 + $0x160] sm:$0xf]  ;;  %v11250_v51 = vld [vmem:[#allocation10 + $0x1d4] sm:$0xf0] }
 0x717   : > { %v6941_v61 = vand.u32 %v6936_v40, %v13995_v53  ;;  %v7005_v2 = vpack.c.b16 %v7003_v23, %v6918_v31  ;;  %v11238_v31 = vld [vmem:[#allocation10 + $0x174] sm:$0xf0]  ;;  %v11236_v23 = vld [vmem:[#allocation10 + $0x164] sm:$0xf0] }
 0x718   : > { %6950 = vmatpush.bf16.msrb.mxu2 %v6938_v48  ;;  %v7006_v59 = vrot.slane %v7004_v4, 1  ;;  %v7077_v57 = vshll.u32 %v7072_v46, 16  ;;  %v7084_v13 = vshll.u32 %v7073_v11, 16  ;;  %v7075_v42 = vshrl.u32 %v7072_v46, 16  ;;  %v11198_v30 = vld [vmem:[#allocation10 + $0x34] sm:$0xf0] }
 0x719   : > { %6964 = vmatpush.bf16.msra.mxu3 %v6941_v61  ;;  %v7007_v17 = vrot.slane %v7005_v2, 1  ;;  %v7082_v5 = vshrl.u32 %v7073_v11, 16  ;;  %v10525_v24 = vor.u32 %v11238_v31, %v10524_v18  ;;  %v10517_v40 = vor.u32 %v11236_v23, %v10516_v41  ;;  %v10580_v2 = vld [vmem:[#allocation10 + $0x1e0] sm:$0xf]  ;;  %v10508_v31 = vld [vmem:[#allocation10 + $0x150] sm:$0xf] }
 0x71a   : > { %v7009_v63 = vand.u32 %v7006_v59, %v13995_v53  ;;  %v7079_v45 = vrot.slane %v7077_v57, 1  ;;  %v7086_v35 = vrot.slane %v7084_v13, 1  ;;  %v10445_v46 = vor.u32 %v11218_v47, %v10444_v33  ;;  %v11252_v59 = vld [vmem:[#allocation10 + $0x1e4] sm:$0xf0]  ;;  %v10500_v33 = vld [vmem:[#allocation10 + $0x140] sm:$0xf] }
 0x71b   : > { %v7012_v38 = vand.u32 %v7007_v17, %v13995_v53  ;;  %10326 = vmatmul.msk.bf16.vlgmr.msrb.gmra.mxu2 %vm6526_vm3, %v14012_v49  ;;  %v10509_v23 = vor.u32 %v11234_v32, %v10508_v31 }
 0x71c   : > { %7021 = vmatpush.bf16.msra.mxu0 %v7009_v63  ;;  %v7080_v19 = vor.u32 %v7079_v45, %v7075_v42  ;;  %v7087_v22 = vor.u32 %v7086_v35, %v7082_v5 }
 0x71d   : > { %7035 = vmatpush.bf16.msra.mxu1 %v7012_v38  ;;  %10327 = vmatmul.msk.bf16.vlgmr.msra.gmra.mxu3 %vm6526_vm3, %v14012_v49  ;;  %v10581_v38 = vor.u32 %v11252_v59, %v10580_v2 }
 0x71e   : > { %v7089_v6 = vand.u32 %v7080_v19, %v13995_v53  ;;  %v7092_v34 = vand.u32 %v7087_v22, %v13995_v53  ;;  %v11206_v53 = vld [vmem:[#allocation10 + $0x74] sm:$0xf0] }
 0x71f   : > { %10328 = vmatmul.msk.bf16.vlgmr.msra.gmra.mxu0 %vm6526_vm3, %v14012_v49  ;;  %v10397_v25 = vor.u32 %v11206_v53, %v10396_v62 }
 0x720   : > { %7101 = vmatpush.bf16.msra.mxu2 %v7089_v6  ;;  %10329 = vmatmul.msk.bf16.vlgmr.msra.gmra.mxu1 %vm6526_vm3, %v14012_v49 }
 0x721   : > { %7115 = vmatpush.bf16.msrb.mxu3 %v7092_v34  ;;  %8019 = vmatpush.bf16.msrb.mxu0 %v10397_v25 }
 0x722   : > { %8037 = vmatpush.bf16.msrb.mxu1 %v10461_v44 }
 0x724   : > { %8055 = vmatpush.bf16.msrb.mxu2 %v10525_v24  ;;  %v10572_v24 = vld [vmem:[#allocation10 + $0x1d0] sm:$0xf] }
 0x725   : > { %8020 = vmatpush.bf16.msrb.mxu0 %v10389_v20  ;;  %8073 = vmatpush.bf16.msra.mxu3 %v10589_v43 }
 0x728   : > { %8056 = vmatpush.bf16.msrb.mxu2 %v10517_v40  ;;  %v10564_v40 = vld [vmem:[#allocation10 + $0x1c0] sm:$0xf] }
 0x729   : > { %8021 = vmatpush.bf16.msrb.mxu0 %v10381_v36  ;;  %8074 = vmatpush.bf16.msra.mxu3 %v10581_v38 }
 0x72b   : > { %10330 = vmatmul.msk.bf16.vlgmr.msra.gmra.mxu2 %vm6526_vm3, %v14012_v49 }
 0x72c   : > { %8057 = vmatpush.bf16.msrb.mxu2 %v10509_v23 }
 0x72d   : > { %10331 = vmatmul.msk.bf16.vlgmr.msrb.gmra.mxu3 %vm6526_vm3, %v14012_v49  ;;  %v11220_v49 = vld [vmem:[#allocation10 + $0xe4] sm:$0xf0] }
 0x72e   : > { %v10453_v3 = vor.u32 %v11220_v49, %v10452_v56 }
 0x730   : > { %8038 = vmatpush.bf16.msrb.mxu1 %v10453_v3 }
 0x734   : > { %8039 = vmatpush.bf16.msrb.mxu1 %v10445_v46  ;;  %v11248_v46 = vld [vmem:[#allocation10 + $0x1c4] sm:$0xf0] }
 0x76a   : > { %v6549_v26 = vpop.f32.mrf.mxu0  ;;  %v6563_v21 = vpop.f32.mrf.mxu1 }
 0x76b   : > { %v6568_v15 = vpack.c.bf16 %v6563_v21, %v6549_v26 }
 0x76d   : > { %v6571_v16 = vunpack.c.l.b16 %v6568_v15  ;;  %v6572_v10 = vunpack.c.h.b16 %v6568_v15 }
 0x76f   : > { %v14100_v14 = vpack.c.b16 %v6571_v16, %v6571_v16  ;;  %v14104_v48 = vpack.c.b16 %v6572_v10, %v6572_v10 }
 0x771   : > { %v6578_v42 = vshrl.u32 %v14100_v14, 16  ;;  %v6581_v45 = vshll.u32 %v14100_v14, 16  ;;  %v6586_v5 = vshrl.u32 %v14104_v48, 16  ;;  %v6589_v35 = vshll.u32 %v14104_v48, 16 }
 0x772   : > { %v6551_v58 = vpop.f32.mrf.mxu0  ;;  %v6565_v52 = vpop.f32.mrf.mxu1 }
 0x773   : > { %v6569_v39 = vpack.c.bf16 %v6565_v52, %v6551_v58  ;;  %v14138_v53 = vrot.slane %v6578_v42, 1  ;;  %v14140_v28 = vrot.slane %v6581_v45, 2  ;;  %v14142_v1 = vrot.slane %v6586_v5, 1 }
 0x774   : > { %v14144_v15 = vrot.slane %v6589_v35, 2 }
 0x775   : > { %v6596_v4 = vunpack.c.l.b16 %v6569_v39  ;;  %v6597_v17 = vunpack.c.h.b16 %v6569_v39  ;;  %v11200_v39 = vld [vmem:[#allocation10 + $0x44] sm:$0xf0] }
 0x777   : > { %v14120_v19 = vpack.c.b16 %v6596_v4, %v6571_v16  ;;  %v14130_v21 = vpack.c.b16 %v6597_v17, %v6572_v10  ;;  %v10372_v10 = vld [vmem:[#allocation10 + $0x40] sm:$0xf]  ;;  %v10573_v17 = vor.u32 %v11250_v51, %v10572_v24 }
 0x779   : > { %15007 = vst [vmem:[#allocation30_spill] sm:$0xff] %v14120_v19  ;;  %8075 = vmatpush.bf16.msra.mxu3 %v10573_v17 }
 0x77a   : > { %15008 = vst [vmem:[#allocation22_spill] sm:$0xff] %v14130_v21 }
 0x77c   : > { %v6711_v27 = vpop.f32.mrf.mxu0  ;;  %v6725_v54 = vpop.f32.mrf.mxu1 }
 0x77d   : > { %v6730_v55 = vpack.c.bf16 %v6725_v54, %v6711_v27 }
 0x77e   : > { %v6640_v37 = vpop.f32.mrf.mxu2 }
 0x77f   : > { %v14106_v61 = vunpack.c.l.b16 %v6730_v55  ;;  %v14110_v13 = vunpack.c.h.b16 %v6730_v55 }
 0x780   : > { %v6654_v60 = vpop.f32.mrf.mxu3 }
 0x781   : > { %v6659_v9 = vpack.c.bf16 %v6654_v60, %v6640_v37  ;;  %15005 = vst [vmem:[#allocation29_spill] sm:$0xff] %v14106_v61  ;;  %v14124_v22 = vpack.c.b16 %v14106_v61, %v14106_v61  ;;  %v14134_v58 = vpack.c.b16 %v14110_v13, %v14110_v13  ;;  %v11232_v37 = vld [vmem:[#allocation10 + $0x144] sm:$0xf0]  ;;  %v10356_v61 = vld [vmem:[#allocation10 + $0x20] sm:$0xf] }
 0x782   : > { %15006 = vst [vmem:[#allocation21_spill] sm:$0xff] %v14110_v13  ;;  %v10501_v38 = vor.u32 %v11232_v37, %v10500_v33 }
 0x783   : > { %v14102_v11 = vunpack.c.l.b16 %v6659_v9  ;;  %v14108_v57 = vunpack.c.h.b16 %v6659_v9  ;;  %v6738_v44 = vshrl.u32 %v14124_v22, 16  ;;  %v6741_v20 = vshll.u32 %v14124_v22, 16 }
 0x784   : > { %v6713_v0 = vpop.f32.mrf.mxu0  ;;  %v6727_v8 = vpop.f32.mrf.mxu1  ;;  %v6746_v49 = vshrl.u32 %v14134_v58, 16  ;;  %v6749_v18 = vshll.u32 %v14134_v58, 16  ;;  %8058 = vmatpush.bf16.msrb.mxu2 %v10501_v38 }
 0x785   : > { %v14114_v63 = vpack.c.b16 %v14102_v11, %v14102_v11  ;;  %v14128_v6 = vpack.c.b16 %v14108_v57, %v14108_v57  ;;  %v6740_v29 = vrot.slane %v6738_v44, 1  ;;  %v6743_v2 = vrot.slane %v6741_v20, 2 }
 0x786   : > { %v6642_v34 = vpop.f32.mrf.mxu2  ;;  %v6748_v59 = vrot.slane %v6746_v49, 1  ;;  %v6751_v45 = vrot.slane %v6749_v18, 2  ;;  %v14167_v32 = vpack.c.bf16 %v6727_v8, %v6713_v0 }
 0x787   : > { %v6667_v52 = vshrl.u32 %v14114_v63, 16  ;;  %v6670_v62 = vshll.u32 %v14114_v63, 16  ;;  %v6675_v56 = vshrl.u32 %v14128_v6, 16  ;;  %v6678_v27 = vshll.u32 %v14128_v6, 16 }
 0x788   : > { %v6656_v26 = vpop.f32.mrf.mxu3  ;;  %v10373_v6 = vor.u32 %v11200_v39, %v10372_v10  ;;  %v6744_v18 = vor.u32 %v6743_v2, %v6740_v29  ;;  %15009 = vst [vmem:[#allocation24_spill] sm:$0xff] %v14167_v32  ;;  %v6752_v37 = vor.u32 %v6751_v45, %v6748_v59 }
 0x789   : > { %v6660_v54 = vpack.c.bf16 %v6656_v26, %v6642_v34  ;;  %v6669_v3 = vrot.slane %v6667_v52, 1  ;;  %v6672_v16 = vrot.slane %v6670_v62, 2  ;;  %v6677_v60 = vrot.slane %v6675_v56, 1 }
 0x78a   : > { %v6680_v36 = vrot.slane %v6678_v27, 2  ;;  %v10565_v34 = vor.u32 %v11248_v46, %v10564_v40  ;;  %v7152_v49 = vrot.slane %v6667_v52, 6  ;;  %8022 = vmatpush.bf16.msrb.mxu0 %v10373_v6  ;;  %v7153_v24 = vrot.slane %v6670_v62, 7 }
 0x78b   : > { %v6683_v47 = vunpack.c.l.b16 %v6660_v54  ;;  %v6673_v63 = vor.u32 %v6672_v16, %v6669_v3  ;;  %v6684_v42 = vunpack.c.h.b16 %v6660_v54  ;;  %v7155_v51 = vrot.slane %v6675_v56, 6 }
 0x78c   : > { %v6681_v26 = vor.u32 %v6680_v36, %v6677_v60  ;;  %v6867_v3 = vpop.f32.mrf.mxu0  ;;  %v6881_v16 = vpop.f32.mrf.mxu1  ;;  %v7156_v10 = vrot.slane %v6678_v27, 7  ;;  %8076 = vmatpush.bf16.msra.mxu3 %v10565_v34  ;;  %v14172_v56 = vrot.slane %v6744_v18, 5  ;;  %v14179_v59 = vrot.slane %v6752_v37, 5  ;;  %v10428_v37 = vld [vmem:[#allocation10 + $0xb0] sm:$0xf] }
 0x78d   : > { %v6685_v44 = vpack.c.b16 %v6683_v47, %v14102_v11  ;;  %v7159_v39 = vshrl.u32 %v6673_v63, 16  ;;  %v7162_v33 = vshll.u32 %v6673_v63, 16  ;;  %v6686_v52 = vpack.c.b16 %v6684_v42, %v14108_v57 }
 0x78e   : > { %v6796_v9 = vpop.f32.mrf.mxu2  ;;  %v7167_v60 = vshrl.u32 %v6681_v26, 16  ;;  %v7170_v29 = vshll.u32 %v6681_v26, 16  ;;  %v6886_v47 = vpack.c.bf16 %v6881_v16, %v6867_v3  ;;  %v7157_v23 = vor.u32 %v7156_v10, %v7155_v51  ;;  %v10484_v3 = vld [vmem:[#allocation10 + $0x120] sm:$0xf] }
 0x78f   : > { %v6687_v0 = vrot.slane %v6685_v44, 3  ;;  %v14177_v57 = vrot.slane %v7162_v33, 7  ;;  %v6688_v2 = vrot.slane %v6686_v52, 3  ;;  %v10436_v33 = vld [vmem:[#allocation10 + $0xc0] sm:$0xf] }
 0x790   : > { %v6810_v41 = vpop.f32.mrf.mxu3  ;;  %v14181_v17 = vrot.slane %v7167_v60, 6  ;;  %v14183_v63 = vrot.slane %v7170_v29, 7  ;;  %v14187_v45 = vunpack.c.l.b16 %v6886_v47  ;;  %v14189_v26 = vunpack.c.h.b16 %v6886_v47  ;;  %v11216_v52 = vld [vmem:[#allocation10 + $0xc4] sm:$0xf0] }
 0x791   : > { %v6815_v4 = vpack.c.bf16 %v6810_v41, %v6796_v9  ;;  %v7154_v41 = vor.u32 %v7153_v24, %v7152_v49  ;;  %v14185_v42 = vshrl.u32 %v6687_v0, 16  ;;  %v14199_v49 = vsel %vm13712_vm13, %v14104_v48, %v7157_v23 }
 0x792   : > { %15011 = vst [vmem:[#allocation23_spill] sm:$0xff] %v14187_v45  ;;  %v14203_v16 = vshll.u32 %v6687_v0, 16  ;;  %v14205_v24 = vshrl.u32 %v6688_v2, 16  ;;  %v14207_v51 = vshll.u32 %v6688_v2, 16 }
 0x793   : > { %v14158_v5 = vunpack.c.l.b16 %v6815_v4  ;;  %v14160_v35 = vunpack.c.h.b16 %v6815_v4  ;;  %v14175_v4 = vrot.slane %v7159_v39, 6  ;;  %15010 = vst [vmem:[#allocation25_spill] sm:$0xff] %v14185_v42  ;;  %v14194_v44 = vsel %vm13712_vm13, %v14100_v14, %v7154_v41  ;;  %v11246_v41 = vld [vmem:[#allocation10 + $0x1b4] sm:$0xf0]  ;;  %v10540_v42 = vld [vmem:[#allocation10 + $0x190] sm:$0xf] }
 0x794   : > { %15012 = vst [vmem:[#allocation31_spill] sm:$0xff] %v14189_v26  ;;  %v14217_v39 = vpack.c.b16 %v14187_v45, %v14187_v45 }
 0x795   : > { %v6820_v54 = vpack.c.b16 %v14158_v5, %v14158_v5  ;;  %v6821_v11 = vpack.c.b16 %v14160_v35, %v14160_v35  ;;  %15013 = vst [vmem:[#allocation32_spill] sm:$0xff] %v14203_v16 }
 0x796   : > { %v6798_v8 = vpop.f32.mrf.mxu2  ;;  %15014 = vst [vmem:[#allocation33_spill] sm:$0xff] %v14205_v24 }
 0x797   : > { %v6823_v9 = vshrl.u32 %v6820_v54, 16  ;;  %v6826_v62 = vshll.u32 %v6820_v54, 16  ;;  %v6831_v40 = vshrl.u32 %v6821_v11, 16  ;;  %v6834_v46 = vshll.u32 %v6821_v11, 16  ;;  %15015 = vst [vmem:[#allocation34_spill] sm:$0xff] %v14207_v51 }
 0x798   : > { %v6812_v36 = vpop.f32.mrf.mxu3 }
 0x799   : > { %v6825_v38 = vrot.slane %v6823_v9, 1  ;;  %v6828_v6 = vrot.slane %v6826_v62, 2  ;;  %v6816_v34 = vpack.c.bf16 %v6812_v36, %v6798_v8  ;;  %v6833_v54 = vrot.slane %v6831_v40, 1 }
 0x79a   : > { %v6836_v18 = vrot.slane %v6834_v46, 2  ;;  %v14211_v10 = vrot.slane %v6823_v9, 3  ;;  %v14213_v11 = vrot.slane %v6826_v62, 4  ;;  %v14224_v8 = vpack.c.b16 %v14189_v26, %v14189_v26 }
 0x79b   : > { %v14220_v60 = vor.u32 %v6828_v6, %v6825_v38  ;;  %v6839_v29 = vunpack.c.l.b16 %v6816_v34  ;;  %v14228_v47 = vrot.slane %v6831_v40, 3  ;;  %v14230_v9 = vrot.slane %v6834_v46, 4  ;;  %v10364_v6 = vld [vmem:[#allocation10 + $0x30] sm:$0xf] }
 0x79c   : > { %v14226_v36 = vor.u32 %v6836_v18, %v6833_v54  ;;  %v10437_v38 = vor.u32 %v11216_v52, %v10436_v33  ;;  %v6840_v25 = vunpack.c.h.b16 %v6816_v34  ;;  %v6894_v54 = vshrl.u32 %v14217_v39, 16  ;;  %v10492_v46 = vld [vmem:[#allocation10 + $0x130] sm:$0xf]  ;;  %v11230_v18 = vld [vmem:[#allocation10 + $0x134] sm:$0xf0] }
 0x79d   : > { %v6897_v40 = vshll.u32 %v14217_v39, 16  ;;  %v14244_v23 = vpack.c.b16 %v6839_v29, %v14158_v5  ;;  %v6902_v52 = vshrl.u32 %v14224_v8, 16  ;;  %v6905_v2 = vshll.u32 %v14224_v8, 16  ;;  %v10556_v34 = vld [vmem:[#allocation10 + $0x1b0] sm:$0xf] }
 0x79e   : > { %v6952_v48 = vpop.f32.mrf.mxu2  ;;  %8040 = vmatpush.bf16.msrb.mxu1 %v10437_v38  ;;  %v7209_v43 = vshrl.u32 %v14220_v60, 16  ;;  %v7212_v14 = vshll.u32 %v14220_v60, 16  ;;  %v7217_v5 = vshrl.u32 %v14226_v36, 16  ;;  %v11214_v29 = vld [vmem:[#allocation10 + $0xb4] sm:$0xf0]  ;;  %v7220_v27 = vshll.u32 %v14226_v36, 16 }
 0x79f   : > { %v10493_v55 = vor.u32 %v11230_v18, %v10492_v46  ;;  %v14263_v20 = vpack.c.b16 %v6840_v25, %v14160_v35  ;;  %v14265_v26 = vrot.slane %v6894_v54, 1  ;;  %v10365_v60 = vor.u32 %v11198_v30, %v10364_v6  ;;  %v11196_v36 = vld [vmem:[#allocation10 + $0x24] sm:$0xf0]  ;;  %v10420_v25 = vld [vmem:[#allocation10 + $0xa0] sm:$0xf] }
 0x7a0   : > { %v6966_v0 = vpop.f32.mrf.mxu3  ;;  %v10557_v21 = vor.u32 %v11246_v41, %v10556_v34  ;;  %v6899_v19 = vrot.slane %v6897_v40, 2  ;;  %v14270_v45 = vrot.slane %v6902_v52, 1  ;;  %v14272_v51 = vrot.slane %v6905_v2, 2  ;;  %v11212_v35 = vld [vmem:[#allocation10 + $0xa4] sm:$0xf0] }
 0x7a1   : > { %v6971_v62 = vpack.c.bf16 %v6966_v0, %v6952_v48  ;;  %v14239_v48 = vpop.f32.mrf.mxu0  ;;  %v14241_v0 = vpop.f32.mrf.mxu1  ;;  %8059 = vmatpush.bf16.msrb.mxu2 %v10493_v55  ;;  %8023 = vmatpush.bf16.msrb.mxu0 %v10365_v60  ;;  %v10429_v41 = vor.u32 %v11214_v29, %v10428_v37  ;;  %v10485_v6 = vor.u32 %v11228_v12, %v10484_v3  ;;  %v10548_v18 = vld [vmem:[#allocation10 + $0x1a0] sm:$0xf]  ;;  %v10348_v40 = vld [vmem:[#allocation10 + $0x10] sm:$0xf]  ;;  %v11194_v52 = vld [vmem:[#allocation10 + $0x14] sm:$0xf0] }
 0x7a2   : > { %15016 = vst [vmem:[#allocation35_spill] sm:$0xff] %v14241_v0  ;;  %8077 = vmatpush.bf16.msra.mxu3 %v10557_v21  ;;  %v14278_v34 = vrot.slane %v7209_v43, 3  ;;  %v14280_v2 = vrot.slane %v7212_v14, 4  ;;  %v14282_v55 = vrot.slane %v7217_v5, 3  ;;  %v10476_v54 = vld [vmem:[#allocation10 + $0x110] sm:$0xf]  ;;  %v6900_v5 = vor.u32 %v6899_v19, %v14265_v26 }
 0x7a3   : > { %v14246_v33 = vunpack.c.l.b16 %v6971_v62  ;;  %v14256_v31 = vunpack.c.h.b16 %v6971_v62  ;;  %v6843_v62 = vrot.slane %v14244_v23, 3  ;;  %v11244_v23 = vld [vmem:[#allocation10 + $0x1a4] sm:$0xf0]  ;;  %v10412_v30 = vld [vmem:[#allocation10 + $0x90] sm:$0xf]  ;;  %v14288_v21 = vrot.slane %v7220_v27, 4  ;;  %8041 = vmatpush.bf16.msrb.mxu1 %v10429_v41 }
 0x7a4   : > { %v11210_v60 = vld [vmem:[#allocation10 + $0x94] sm:$0xf0]  ;;  %v6844_v12 = vrot.slane %v14263_v20, 3  ;;  %v6908_v29 = vor.u32 %v14272_v51, %v14270_v45  ;;  %v10357_v16 = vor.u32 %v11196_v36, %v10356_v61  ;;  %v10549_v43 = vor.u32 %v11244_v23, %v10548_v18 }
 0x7a5   : > { %15017 = vst [vmem:[#allocation36_spill] sm:$0xff] %v14246_v33  ;;  %v14260_v38 = vpack.c.b16 %v14246_v33, %v14246_v33  ;;  %v14286_v24 = vpack.c.b16 %v14256_v31, %v14256_v31  ;;  %v11226_v14 = vld [vmem:[#allocation10 + $0x114] sm:$0xf0]  ;;  %v14293_v37 = vshrl.u32 %v6843_v62, 16  ;;  %8060 = vmatpush.bf16.msrb.mxu2 %v10485_v6  ;;  %v10421_v41 = vor.u32 %v11212_v35, %v10420_v25  ;;  %v10468_v33 = vld [vmem:[#allocation10 + $0x100] sm:$0xf] }
 0x7a6   : > { %15018 = vst [vmem:[#allocation37_spill] sm:$0xff] %v14256_v31  ;;  %v14267_v13 = vpop.f32.mrf.mxu2  ;;  %v11242_v27 = vld [vmem:[#allocation10 + $0x194] sm:$0xf0]  ;;  %8024 = vmatpush.bf16.msrb.mxu0 %v10357_v16  ;;  %v10477_v61 = vor.u32 %v11226_v14, %v10476_v54  ;;  %v10349_v26 = vor.u32 %v11194_v52, %v10348_v40  ;;  %v14304_v51 = vshll.u32 %v6843_v62, 16  ;;  %v14306_v36 = vshrl.u32 %v6844_v12, 16  ;;  %8078 = vmatpush.bf16.msra.mxu3 %v10549_v43 }
 0x7a7   : > { %15019 = vst [vmem:[#allocation38_spill] sm:$0xff] %v14293_v37  ;;  %v15020_v32 = vshrl.u32 %v14260_v38, 16  ;;  %v15021_v3 = vshll.u32 %v14260_v38, 16  ;;  %v6990_v45 = vshll.u32 %v14286_v24, 16  ;;  %8042 = vmatpush.bf16.msrb.mxu1 %v10421_v41  ;;  %v10413_v25 = vor.u32 %v11210_v60, %v10412_v30  ;;  %v10340_v35 = vld [vmem:[#allocation10] sm:$0xf] }
 0x7a8   : > { %v14274_v46 = vpop.f32.mrf.mxu3  ;;  %v14308_v18 = vshll.u32 %v6844_v12, 16  ;;  %v14310_v23 = vrot.slane %v6900_v5, 2  ;;  %v10469_v19 = vor.u32 %v11224_v7, %v10468_v33  ;;  %v11192_v54 = vld [vmem:[#allocation10 + $0x4] sm:$0xf0]  ;;  %v10532_v40 = vld [vmem:[#allocation10 + $0x180] sm:$0xf] }
 0x7a9   : > { %v6981_v20 = vrot.slane %v15020_v32, 1  ;;  %v6984_v31 = vrot.slane %v15021_v3, 2  ;;  %v7023_v37 = vpop.f32.mrf.mxu0  ;;  %v7037_v0 = vpop.f32.mrf.mxu1  ;;  %v10541_v32 = vor.u32 %v11242_v27, %v10540_v42  ;;  %8061 = vmatpush.bf16.msrb.mxu2 %v10477_v61  ;;  %v14314_v52 = vrot.slane %v6908_v29, 2  ;;  %v11240_v30 = vld [vmem:[#allocation10 + $0x184] sm:$0xf0] }
 0x7aa   : > { %v7042_v16 = vpack.c.bf16 %v7037_v0, %v7023_v37  ;;  %v14318_v42 = vpack.c.bf16 %v14274_v46, %v14267_v13  ;;  %v15022_v60 = vshrl.u32 %v14286_v24, 16  ;;  %v6992_v43 = vrot.slane %v6990_v45, 2  ;;  %8025 = vmatpush.bf16.msrb.mxu0 %v10349_v26 }
 0x7ab   : > { %v14312_v62 = vor.u32 %v6984_v31, %v6981_v20  ;;  %v15024_v0 = vshll.u32 %v14260_v38, 16  ;;  %v14328_v33 = vrot.slane %v6990_v45, 1  ;;  %8079 = vmatpush.bf16.msra.mxu3 %v10541_v32  ;;  %8043 = vmatpush.bf16.msrb.mxu1 %v10413_v25  ;;  %v10341_v46 = vor.u32 %v11192_v54, %v10340_v35  ;;  %v11205_v54 = vld [vmem:[#allocation10 + $0x74] sm:$0xf] }
 0x7ac   : > { %v6989_v12 = vrot.slane %v15022_v60, 1  ;;  %v14322_v7 = vunpack.c.l.b16 %v7042_v16  ;;  %v14330_v13 = vunpack.c.h.b16 %v7042_v16  ;;  %v10533_v27 = vor.u32 %v11240_v30, %v10532_v40  ;;  %v11208_v16 = vld [vmem:[#allocation10 + $0x84] sm:$0xf0] }
 0x7ad   : > { %v14326_v31 = vrot.slane %v15024_v0, 1  ;;  %8062 = vmatpush.bf16.msrb.mxu2 %v10469_v19  ;;  %v7255_v45 = vshll.u32 %v14312_v62, 16  ;;  %v15027_v61 = vor.u32 %v14177_v57, %v14175_v4  ;;  %v15028_v26 = vor.u32 %v14140_v28, %v14138_v53  ;;  %v10404_v4 = vld [vmem:[#allocation10 + $0x80] sm:$0xf] }
 0x7ae   : > { %v7103_v6 = vpop.f32.mrf.mxu2  ;;  %15023 = vst [vmem:[#allocation39_spill] sm:$0xff] %v14322_v7  ;;  %v14338_v29 = vpack.c.b16 %v14322_v7, %v14322_v7  ;;  %v14343_v41 = vpack.c.b16 %v14330_v13, %v14330_v13  ;;  %8026 = vmatpush.bf16.msrb.mxu0 %v10341_v46  ;;  %v14364_v57 = vor.u32 %v6992_v43, %v6989_v12  ;;  %v10398_v12 = vld [vmem:[#allocation10 + $0x78] sm:$0xf0]  ;;  %v10716_v7 = vld [vmem:[#allocation10 + $0x2f0] sm:$0xf] }
 0x7af   : > { %15025 = vst [vmem:[#allocation40_spill] sm:$0xff] %v14330_v13  ;;  %v7342_v19 = vsel %vm13712_vm13, %v15028_v26, %v15027_v61  ;;  %8080 = vmatpush.bf16.msra.mxu3 %v10533_v27  ;;  %v14377_v46 = vrot.slane %v7255_v45, 1  ;;  %v11270_v27 = vld [vmem:[#allocation10 + $0x274] sm:$0xf0]  ;;  %v10405_v20 = vor.u32 %v11208_v16, %v10404_v4  ;;  %v10401_v13 = vor.u32 %v11205_v54, %v10398_v12  ;;  %v10390_v54 = vld [vmem:[#allocation10 + $0x68] sm:$0xf0] }
 0x7b0   : > { %v7117_v3 = vpop.f32.mrf.mxu3  ;;  %v7050_v25 = vshrl.u32 %v14338_v29, 16  ;;  %v7053_v35 = vshll.u32 %v14338_v29, 16  ;;  %v7058_v28 = vshrl.u32 %v14343_v41, 16  ;;  %v15033_v16 = vrot.slane %v14124_v22, 5  ;;  %v10644_v12 = vld [vmem:[#allocation10 + $0x260] sm:$0xf] }
 0x7b1   : > { %v7122_v14 = vpack.c.bf16 %v7117_v3, %v7103_v6  ;;  %v7215_v3 = vor.u32 %v14280_v2, %v14278_v34  ;;  %v7356_v34 = vsel %vm5462_vm7, %v7342_v19, %v14172_v56  ;;  %v10652_v2 = vld [vmem:[#allocation10 + $0x270] sm:$0xf]  ;;  %v11221_v56 = vld [vmem:[#allocation10 + $0xf4] sm:$0xf]  ;;  %8044 = vmatpush.bf16.msrb.mxu1 %v10405_v20  ;;  %v15035_v22 = vor.u32 %v14183_v63, %v14181_v17  ;;  %v10708_v63 = vld [vmem:[#allocation10 + $0x2e0] sm:$0xf] }
 0x7b2   : > { %v14374_v43 = vrot.slane %v7050_v25, 1  ;;  %v14389_v25 = vrot.slane %v7053_v35, 2  ;;  %8127 = vmatpush.bf16.msra.mxu2 %v10401_v13  ;;  %v14446_v13 = vrot.slane %v7058_v28, 1  ;;  %v10638_v45 = vld [vmem:[#allocation10 + $0x258] sm:$0xf0] }
 0x7b3   : > { %v14332_v37 = vunpack.c.l.b16 %v7122_v14  ;;  %v14334_v5 = vunpack.c.h.b16 %v7122_v14  ;;  %v7375_v19 = vsel %vm14393_vm5, %v7356_v34, %v7215_v3  ;;  %v11203_v3 = vld [vmem:[#allocation10 + $0x64] sm:$0xf]  ;;  %v7348_v34 = vsel %vm5462_vm7, %v14194_v44, %v15033_v16 }
 0x7b4   : > { %v15036_v44 = vor.u32 %v14144_v15, %v14142_v1  ;;  %v11219_v16 = vld [vmem:[#allocation10 + $0xe4] sm:$0xf]  ;;  %v15038_v1 = vrot.slane %v14134_v58, 5  ;;  %v15039_v58 = vor.u32 %v14230_v9, %v14228_v47  ;;  %v14468_v47 = vld [vmem:[#allocation10 + $0x2d4] sm:$0xf0] }
 0x7b5   : > { %15026 = vst [vmem:[#allocation41_spill] sm:$0xff] %v14334_v5  ;;  %v14356_v32 = vpack.c.b16 %v14332_v37, %v14332_v37  ;;  %v14360_v6 = vpack.c.b16 %v14334_v5, %v14334_v5  ;;  %v11286_v5 = vld [vmem:[#allocation10 + $0x2f4] sm:$0xf0] }
 0x7b6   : > { %v7352_v15 = vsel %vm5462_vm7, %v14199_v49, %v15038_v1  ;;  %v7272_v1 = vshrl.u32 %v14312_v62, 16  ;;  %v7056_v62 = vor.u32 %v14389_v25, %v14374_v43  ;;  %v11197_v25 = vld [vmem:[#allocation10 + $0x34] sm:$0xf] }
 0x7b7   : > { %v14920_v40 = vshrl.u32 %v14356_v32, 16  ;;  %v14919_v30 = vshll.u32 %v14356_v32, 16  ;;  %v14921_v60 = vshrl.u32 %v14360_v6, 16  ;;  %v14925_v14 = vshll.u32 %v14360_v6, 16 }
 0x7b8   : > { %v7374_v49 = vsel %vm14393_vm5, %v7352_v15, %v15039_v58 }
 0x7b9   : > { %v7132_v61 = vrot.slane %v14920_v40, 1  ;;  %v7135_v26 = vrot.slane %v14919_v30, 2  ;;  %v14387_v53 = vrot.slane %v14921_v60, 1  ;;  %v10462_v30 = vld [vmem:[#allocation10 + $0xf8] sm:$0xf0]  ;;  %v7143_v35 = vrot.slane %v14925_v14, 2 }
 0x7ba   : > { %v7389_v60 = vsel %vm5471_vm10, %v7375_v19, %v14310_v23  ;;  %v7223_v23 = vor.u32 %v14288_v21, %v14282_v55  ;;  %v7343_v55 = vsel %vm13712_vm13, %v15036_v44, %v15035_v22  ;;  %v10653_v21 = vor.u32 %v11270_v27, %v10652_v2  ;;  %v11268_v19 = vld [vmem:[#allocation10 + $0x264] sm:$0xf0]  ;;  %v10454_v14 = vld [vmem:[#allocation10 + $0xe8] sm:$0xf0]  ;;  %v11201_v2 = vld [vmem:[#allocation10 + $0x54] sm:$0xf] }
 0x7bb   : > { %v14399_v40 = vor.u32 %v7135_v26, %v7132_v61  ;;  %v14412_v4 = vsel %vm14405_vm14, %v7389_v60, %v14377_v46  ;;  %v7259_v61 = vshll.u32 %v14364_v57, 16  ;;  %v15034_v26 = vor.u32 %v14213_v11, %v14211_v10  ;;  %v10382_v27 = vld [vmem:[#allocation10 + $0x58] sm:$0xf0] }
 0x7bc   : > { %8063 = vmatmul.bf16.vlgmr.msrb.gmra.mxu2 %v14412_v4  ;;  %v10465_v60 = vor.u32 %v11221_v56, %v10462_v30  ;;  %v15037_v10 = vrot.slane %v14217_v39, 2  ;;  %v7360_v17 = vsel %vm5462_vm7, %v7343_v55, %v14179_v59  ;;  %v11284_v30 = vld [vmem:[#allocation10 + $0x2e4] sm:$0xf0]  ;;  %v10636_v56 = vld [vmem:[#allocation10 + $0x250] sm:$0xf]  ;;  %8091 = vmatpush.bf16.msra.mxu0 %v10653_v21  ;;  %v10393_v44 = vor.u32 %v11203_v3, %v10390_v54 }
 0x7bd   : > { %v7373_v20 = vsel %vm14393_vm5, %v7348_v34, %v15034_v26  ;;  %v14438_v34 = vrot.slane %v7259_v61, 1  ;;  %v7376_v59 = vsel %vm14393_vm5, %v7360_v17, %v7223_v23  ;;  %v11266_v61 = vld [vmem:[#allocation10 + $0x254] sm:$0xf0]  ;;  %v11217_v26 = vld [vmem:[#allocation10 + $0xd4] sm:$0xf]  ;;  %v10717_v23 = vor.u32 %v11286_v5, %v10716_v7 }
 0x7be   : > { %v7381_v11 = vsel %vm5471_vm10, %v7373_v20, %v15037_v10  ;;  %8145 = vmatpush.bf16.msrb.mxu3 %v10465_v60  ;;  %v7393_v28 = vsel %vm5471_vm10, %v7376_v59, %v14314_v52  ;;  %v15040_v20 = vrot.slane %v14224_v8, 2  ;;  %v10446_v55 = vld [vmem:[#allocation10 + $0xd8] sm:$0xf0]  ;;  %v14466_v21 = vld [vmem:[#allocation10 + $0x2d0] sm:$0xf]  ;;  %v10645_v8 = vor.u32 %v11268_v19, %v10644_v12  ;;  %8128 = vmatpush.bf16.msra.mxu2 %v10393_v44 }
 0x7bf   : > { %v14451_v39 = vsel %vm14405_vm14, %v7381_v11, %v14326_v31  ;;  %v14473_v9 = vsel %vm14405_vm14, %v7393_v28, %v14438_v34  ;;  %v10457_v60 = vor.u32 %v11219_v16, %v10454_v14  ;;  %v11199_v10 = vld [vmem:[#allocation10 + $0x44] sm:$0xf]  ;;  %v10374_v7 = vld [vmem:[#allocation10 + $0x48] sm:$0xf0]  ;;  %v14480_v5 = vld [vmem:[#allocation10 + $0x240] sm:$0xf]  ;;  %v7144_v3 = vor.u32 %v7143_v35, %v14387_v53  ;;  %8109 = vmatpush.bf16.msra.mxu1 %v10717_v23 }
 0x7c0   : > { %8027 = vmatmul.bf16.vlgmr.msrb.gmra.mxu0 %v14451_v39  ;;  %v7385_v22 = vsel %vm5471_vm10, %v7374_v49, %v15040_v20  ;;  %v15041_v54 = vshll.u32 %v14343_v41, 16  ;;  %8081 = vmatmul.bf16.vlgmr.msra.gmra.mxu3 %v14473_v9  ;;  %v11264_v17 = vld [vmem:[#allocation10 + $0x244] sm:$0xf0]  ;;  %v7303_v15 = vshrl.u32 %v14399_v40, 16  ;;  %v10709_v14 = vor.u32 %v11284_v30, %v10708_v63  ;;  %v11215_v16 = vld [vmem:[#allocation10 + $0xc4] sm:$0xf] }
 0x7c1   : > { %v14478_v52 = vsel %vm14405_vm14, %v7385_v22, %v14328_v33  ;;  %v10385_v12 = vor.u32 %v11201_v2, %v10382_v27  ;;  %v10637_v19 = vor.u32 %v11266_v61, %v10636_v56  ;;  %v10438_v59 = vld [vmem:[#allocation10 + $0xc8] sm:$0xf0]  ;;  %v7306_v53 = vshll.u32 %v14399_v40, 16  ;;  %8092 = vmatpush.bf16.msra.mxu0 %v10645_v8  ;;  %v10692_v56 = vld [vmem:[#allocation10 + $0x2c0] sm:$0xf] }
 0x7c2   : > { %v7063_v11 = vrot.slane %v15041_v54, 2  ;;  %8045 = vmatmul.bf16.vlgmr.msrb.gmra.mxu1 %v14478_v52  ;;  %8146 = vmatpush.bf16.msrb.mxu3 %v10457_v60  ;;  %v10449_v35 = vor.u32 %v11217_v26, %v10446_v55  ;;  %v10701_v58 = vor.u32 %v14468_v47, %v14466_v21  ;;  %v7305_v49 = vrot.slane %v7303_v15, 5  ;;  %v11280_v40 = vld [vmem:[#allocation10 + $0x2c4] sm:$0xf0]  ;;  %v10366_v47 = vld [vmem:[#allocation10 + $0x38] sm:$0xf0] }
 0x7c3   : > { %v10377_v28 = vor.u32 %v11199_v10, %v10374_v7  ;;  %v10629_v20 = vor.u32 %v11264_v17, %v14480_v5  ;;  %v7274_v63 = vor.u32 %v7272_v1, %v14377_v46  ;;  %v7308_v30 = vrot.slane %v7306_v53, 6  ;;  %8110 = vmatpush.bf16.msra.mxu1 %v10709_v14  ;;  %8129 = vmatpush.bf16.msra.mxu2 %v10385_v12  ;;  %v15045_v10 = vld [vmem:[#allocation35_spill] sm:$0xff]  ;;  %v10430_v17 = vld [vmem:[#allocation10 + $0xb8] sm:$0xf0]  ;;  %v11262_v12 = vld [vmem:[#allocation10 + $0x234] sm:$0xf0] }
 0x7c4   : > { %v10441_v2 = vor.u32 %v11215_v16, %v10438_v59  ;;  %v7292_v27 = vrot.slane %v7056_v62, 7  ;;  %v15042_v61 = vshrl.u32 %v14260_v38, 16  ;;  %v15043_v22 = vshrl.u32 %v14356_v32, 16  ;;  %v10684_v53 = vld [vmem:[#allocation10 + $0x2b0] sm:$0xf]  ;;  %v11338_v5 = vld [vmem:[%s14878_s15 + $0x18] sm:$0xff] }
 0x7c5   : > { %v7309_v43 = vor.u32 %v7308_v30, %v7305_v49  ;;  %v7290_v44 = vrot.slane %v14338_v29, 7  ;;  %v15044_v46 = vshll.u32 %v14356_v32, 16  ;;  %v7064_v21 = vor.u32 %v7063_v11, %v14446_v13  ;;  %8093 = vmatpush.bf16.msra.mxu0 %v10637_v19  ;;  %v10620_v13 = vld [vmem:[#allocation10 + $0x230] sm:$0xf]  ;;  %v11213_v11 = vld [vmem:[#allocation10 + $0xb4] sm:$0xf] }
 0x7c6   : > { %v7270_v26 = vor.u32 %v14326_v31, %v15042_v61  ;;  %v7296_v23 = vrot.slane %v15043_v22, 5  ;;  %8147 = vmatpush.bf16.msrb.mxu3 %v10449_v35  ;;  %v7423_v38 = vsel %vm5530_vm15, %v7274_v63, %v7292_v27  ;;  %v7275_v31 = vshrl.u32 %v14364_v57, 16  ;;  %v11278_v35 = vld [vmem:[#allocation10 + $0x2b4] sm:$0xf0]  ;;  %v11195_v30 = vld [vmem:[#allocation10 + $0x24] sm:$0xf] }
 0x7c7   : > { %v7297_v55 = vrot.slane %v15044_v46, 6  ;;  %v7311_v8 = vshrl.u32 %v7144_v3, 16  ;;  %v7314_v60 = vshll.u32 %v7144_v3, 16  ;;  %v14509_v7 = vpack.c.bf16 %v15045_v10, %v14239_v48  ;;  %8111 = vmatpush.bf16.msra.mxu1 %v10701_v58  ;;  %8130 = vmatpush.bf16.msra.mxu2 %v10377_v28  ;;  %v10358_v27 = vld [vmem:[#allocation10 + $0x28] sm:$0xf0] }
 0x7c8   : > { %v14513_v29 = vsel %vm13644_vm9, %v7423_v38, %v7309_v43  ;;  %v10693_v32 = vor.u32 %v11280_v40, %v10692_v56  ;;  %v7277_v1 = vor.u32 %v7275_v31, %v14438_v34  ;;  %v7293_v15 = vrot.slane %v7064_v21, 7  ;;  %v15050_v56 = vld [vmem:[#allocation38_spill] sm:$0xff]  ;;  %v15051_v40 = vld [vmem:[#allocation36_spill] sm:$0xff]  ;;  %v11211_v61 = vld [vmem:[#allocation10 + $0xa4] sm:$0xf] }
 0x7c9   : > { %v7298_v54 = vor.u32 %v7297_v55, %v7296_v23  ;;  %v7313_v14 = vrot.slane %v7311_v8, 5  ;;  %v7316_v57 = vrot.slane %v7314_v60, 6  ;;  %v10369_v3 = vor.u32 %v11197_v25, %v10366_v47  ;;  %8094 = vmatpush.bf16.msra.mxu0 %v10629_v20  ;;  %v10612_v46 = vld [vmem:[#allocation10 + $0x220] sm:$0xf]  ;;  %v11260_v55 = vld [vmem:[#allocation10 + $0x224] sm:$0xf0] }
 0x7ca   : > { %v7415_v48 = vsel %vm5530_vm15, %v7270_v26, %v7290_v44  ;;  %v15047_v19 = vshrl.u32 %v14286_v24, 16  ;;  %v7291_v59 = vrot.slane %v14343_v41, 7  ;;  %8148 = vmatpush.bf16.msrb.mxu3 %v10441_v2  ;;  %v10433_v62 = vor.u32 %v11213_v11, %v10430_v17  ;;  %v10422_v26 = vld [vmem:[#allocation10 + $0xa8] sm:$0xf0]  ;;  %v10350_v11 = vld [vmem:[#allocation10 + $0x18] sm:$0xf0]  ;;  %v7105_v17 = vpop.f32.mrf.mxu2 }
 0x7cb   : > { %v7317_v34 = vor.u32 %v7316_v57, %v7313_v14  ;;  %v15048_v49 = vshrl.u32 %v14360_v6, 16  ;;  %v15049_v58 = vshll.u32 %v14360_v6, 16  ;;  %v7227_v24 = vrot.slane %v15050_v56, 3  ;;  %v15053_v6 = vld [vmem:[#allocation37_spill] sm:$0xff]  ;;  %8112 = vmatpush.bf16.msra.mxu1 %v10693_v32  ;;  %8131 = vmatpush.bf16.msra.mxu2 %v10369_v3  ;;  %v15055_v8 = vld [vmem:[#allocation24_spill] sm:$0xff] }
 0x7cc   : > { %v7271_v16 = vor.u32 %v14328_v33, %v15047_v19  ;;  %v15052_v33 = vunpack.c.l.b16 %v14318_v42  ;;  %8068 = vmatmul.bf16.gmra.mxu2 %v14513_v29  ;;  %v14534_v20 = vsel %vm13644_vm9, %v7415_v48, %v7298_v54  ;;  %v10621_v2 = vor.u32 %v11262_v12, %v10620_v13  ;;  %v11276_v54 = vld [vmem:[#allocation10 + $0x2a4] sm:$0xf0]  ;;  %v11193_v13 = vld [vmem:[#allocation10 + $0x14] sm:$0xf] }
 0x7cd   : > { %v7299_v63 = vrot.slane %v15048_v49, 5  ;;  %v7300_v28 = vrot.slane %v15049_v58, 6  ;;  %v15054_v22 = vunpack.c.h.b16 %v14318_v42  ;;  %v7427_v43 = vsel %vm5530_vm15, %v7277_v1, %v7293_v15  ;;  %v10676_v42 = vld [vmem:[#allocation10 + $0x2a0] sm:$0xf]  ;;  %v7119_v1 = vpop.f32.mrf.mxu3  ;;  %v15056_v15 = vld [vmem:[#allocation25_spill] sm:$0xff]  ;;  %v15058_v57 = vld [vmem:[#allocation32_spill] sm:$0xff] }
 0x7ce   : > { %v14529_v41 = vpack.c.b16 %v15052_v33, %v15051_v40  ;;  %v10685_v44 = vor.u32 %v11278_v35, %v10684_v53  ;;  %v7230_v21 = vrot.slane %v14304_v51, 4  ;;  %v14545_v38 = vsel %vm13644_vm9, %v7427_v43, %v7317_v34  ;;  %8149 = vmatpush.bf16.msrb.mxu3 %v10433_v62  ;;  %8095 = vmatpush.bf16.msra.mxu0 %v10621_v2  ;;  %v10414_v53 = vld [vmem:[#allocation10 + $0x98] sm:$0xf0]  ;;  %v15060_v35 = vld [vmem:[#allocation33_spill] sm:$0xff]  ;;  %v11274_v2 = vld [vmem:[#allocation10 + $0x294] sm:$0xf0] }
 0x7cf   : > { %v14539_v23 = vpack.c.b16 %v15054_v22, %v15053_v6  ;;  %v7301_v25 = vor.u32 %v7300_v28, %v7299_v63  ;;  %v7419_v47 = vsel %vm5530_vm15, %v7271_v16, %v7291_v59  ;;  %v10361_v31 = vor.u32 %v11195_v30, %v10358_v27  ;;  %v11209_v59 = vld [vmem:[#allocation10 + $0x94] sm:$0xf]  ;;  %v15062_v62 = vld [vmem:[#allocation34_spill] sm:$0xff]  ;;  %v10668_v33 = vld [vmem:[#allocation10 + $0x290] sm:$0xf] }
 0x7d0   : > { %v6755_v60 = vunpack.c.h.b16 %v15055_v8  ;;  %v6910_v10 = vunpack.c.l.b16 %v14509_v7  ;;  %8032 = vmatmul.bf16.gmra.mxu0 %v14534_v20  ;;  %v10425_v32 = vor.u32 %v11211_v61, %v10422_v26  ;;  %v15057_v14 = vrot.slane %v15056_v15, 6  ;;  %8086 = vmatmul.bf16.gmra.mxu3 %v14545_v38  ;;  %v11191_v61 = vld [vmem:[#allocation10 + $0x4] sm:$0xf]  ;;  %v10342_v43 = vld [vmem:[#allocation10 + $0x8] sm:$0xf0]  ;;  %v15070_v15 = vld [vmem:[#allocation22_spill] sm:$0xff] }
 0x7d1   : > { %v14553_v51 = vsel %vm13644_vm9, %v7419_v47, %v7301_v25  ;;  %v15059_v12 = vrot.slane %v15058_v57, 7  ;;  %v7235_v48 = vrot.slane %v14306_v36, 3  ;;  %v7238_v19 = vrot.slane %v14308_v18, 4  ;;  %v10604_v36 = vld [vmem:[#allocation10 + $0x210] sm:$0xf]  ;;  %8113 = vmatpush.bf16.msra.mxu1 %v10685_v44  ;;  %8132 = vmatpush.bf16.msra.mxu2 %v10361_v31  ;;  %v15064_v6 = vld [vmem:[#allocation23_spill] sm:$0xff] }
 0x7d2   : > { %v10613_v16 = vor.u32 %v11260_v55, %v10612_v46  ;;  %v15061_v34 = vrot.slane %v15060_v35, 6  ;;  %v15063_v49 = vrot.slane %v15062_v62, 7  ;;  %v6999_v58 = vrot.slane %v14529_v41, 3  ;;  %8050 = vmatmul.bf16.gmra.mxu1 %v14553_v51  ;;  %v11258_v18 = vld [vmem:[#allocation10 + $0x214] sm:$0xf0]  ;;  %8150 = vmatpush.bf16.msrb.mxu3 %v10425_v32  ;;  %v15067_v31 = vld [vmem:[#allocation29_spill] sm:$0xff] }
 0x7d3   : > { %v7181_v3 = vor.u32 %v15059_v12, %v15057_v14  ;;  %v7000_v28 = vrot.slane %v14539_v23, 3  ;;  %v6911_v30 = vunpack.c.h.b16 %v14509_v7  ;;  %v10677_v27 = vor.u32 %v11276_v54, %v10676_v42  ;;  %v10596_v25 = vld [vmem:[#allocation10 + $0x200] sm:$0xf]  ;;  %v11207_v46 = vld [vmem:[#allocation10 + $0x84] sm:$0xf]  ;;  %v15065_v55 = vld [vmem:[#allocation30_spill] sm:$0xff] }
 0x7d4   : > { %v7189_v63 = vor.u32 %v15063_v49, %v15061_v34  ;;  %v10353_v40 = vor.u32 %v11193_v13, %v10350_v11  ;;  %v14570_v26 = vpack.c.bf16 %v7119_v1, %v7105_v17  ;;  %v14573_v22 = vpack.c.b16 %v6910_v10, %v15064_v6  ;;  %v15069_v13 = vld [vmem:[#allocation21_spill] sm:$0xff]  ;;  %8096 = vmatpush.bf16.msra.mxu0 %v10613_v16  ;;  %v10406_v10 = vld [vmem:[#allocation10 + $0x88] sm:$0xf0]  ;;  %v10654_v32 = vld [vmem:[#allocation10 + $0x278] sm:$0xf0] }
 0x7d5   : > { %v10417_v7 = vor.u32 %v11209_v59, %v10414_v53  ;;  %v15066_v47 = vrot.slane %v15065_v55, 3  ;;  %v15068_v42 = vunpack.c.l.b16 %v15055_v8  ;;  %v6757_v11 = vpack.c.b16 %v6755_v60, %v15069_v13  ;;  %v11269_v1 = vld [vmem:[#allocation10 + $0x274] sm:$0xf]  ;;  %v15072_v59 = vld [vmem:[#allocation31_spill] sm:$0xff]  ;;  %v11256_v53 = vld [vmem:[#allocation10 + $0x204] sm:$0xf0]  ;;  %8114 = vmatpush.bf16.msra.mxu1 %v10677_v27  ;;  %v7039_v13 = vpop.f32.mrf.mxu1 }
 0x7d6   : > { %v10605_v17 = vor.u32 %v11258_v18, %v10604_v36  ;;  %v15071_v14 = vrot.slane %v15070_v15, 3  ;;  %v7231_v12 = vor.u32 %v7230_v21, %v7227_v24  ;;  %v14592_v8 = vpack.c.b16 %v6911_v30, %v15072_v59  ;;  %v11285_v60 = vld [vmem:[#allocation10 + $0x2f4] sm:$0xf]  ;;  %v10718_v16 = vld [vmem:[#allocation10 + $0x2f8] sm:$0xf0]  ;;  %8133 = vmatpush.bf16.msra.mxu2 %v10353_v40 }
 0x7d7   : > { %v7344_v44 = vsel %vm13712_vm13, %v15066_v47, %v7181_v3  ;;  %v6756_v54 = vpack.c.b16 %v15068_v42, %v15067_v31  ;;  %v14589_v3 = vor.u32 %v7238_v19, %v7235_v48  ;;  %v14596_v35 = vshll.u32 %v6999_v58, 16  ;;  %v11237_v56 = vld [vmem:[#allocation10 + $0x174] sm:$0xf]  ;;  %v10526_v24 = vld [vmem:[#allocation10 + $0x178] sm:$0xf0]  ;;  %8151 = vmatpush.bf16.msrb.mxu3 %v10417_v7  ;;  %v7025_v42 = vpop.f32.mrf.mxu0 }
 0x7d8   : > { %v7345_v57 = vsel %vm13712_vm13, %v15071_v14, %v7189_v63  ;;  %v10669_v34 = vor.u32 %v11274_v2, %v10668_v33  ;;  %v10345_v62 = vor.u32 %v11191_v61, %v10342_v43  ;;  %v7146_v49 = vunpack.c.l.b16 %v14570_v26  ;;  %v10660_v63 = vld [vmem:[#allocation10 + $0x280] sm:$0xf]  ;;  %v11272_v30 = vld [vmem:[#allocation10 + $0x284] sm:$0xf0]  ;;  %8097 = vmatpush.bf16.msra.mxu0 %v10605_v17  ;;  %v11253_v33 = vld [vmem:[#allocation10 + $0x1f4] sm:$0xf] }
 0x7d9   : > { %v14601_v21 = vshll.u32 %v7000_v28, 16  ;;  %v10334_v48 = vrot.slane %v14573_v22, 5  ;;  %v10409_v19 = vor.u32 %v11207_v46, %v10406_v10  ;;  %v10657_v36 = vor.u32 %v11269_v1, %v10654_v32  ;;  %v10590_v2 = vld [vmem:[#allocation10 + $0x1f8] sm:$0xf0]  ;;  %v11267_v61 = vld [vmem:[#allocation10 + $0x264] sm:$0xf] }
 0x7da   : > { %v10597_v18 = vor.u32 %v11256_v53, %v10596_v25  ;;  %v7147_v27 = vunpack.c.h.b16 %v14570_v26  ;;  %v10721_v40 = vor.u32 %v11285_v60, %v10718_v16  ;;  %v7364_v6 = vsel %vm5462_vm7, %v7344_v44, %v6756_v54  ;;  %v10646_v47 = vld [vmem:[#allocation10 + $0x268] sm:$0xf0]  ;;  %v11283_v22 = vld [vmem:[#allocation10 + $0x2e4] sm:$0xf]  ;;  %8115 = vmatpush.bf16.msra.mxu1 %v10669_v34  ;;  %8134 = vmatpush.bf16.msra.mxu2 %v10345_v62  ;;  %v11265_v59 = vld [vmem:[#allocation10 + $0x254] sm:$0xf] }
 0x7db   : > { %v7368_v43 = vsel %vm5462_vm7, %v7345_v57, %v6757_v11  ;;  %v10529_v55 = vor.u32 %v11237_v56, %v10526_v24  ;;  %v10710_v7 = vld [vmem:[#allocation10 + $0x2e8] sm:$0xf0]  ;;  %v7265_v46 = vrot.slane %v14596_v35, 1  ;;  %v10661_v31 = vor.u32 %v11272_v30, %v10660_v63  ;;  %8152 = vmatpush.bf16.msrb.mxu3 %v10409_v19  ;;  %v11235_v10 = vld [vmem:[#allocation10 + $0x164] sm:$0xf] }
 0x7dc   : > { %v7148_v25 = vpack.c.b16 %v7146_v49, %v14332_v37  ;;  %v7377_v26 = vsel %vm14393_vm5, %v7364_v6, %v7231_v12  ;;  %v7269_v44 = vrot.slane %v14601_v21, 1  ;;  %v10335_v54 = vrot.slane %v14592_v8, 5  ;;  %v10518_v1 = vld [vmem:[#allocation10 + $0x168] sm:$0xf0]  ;;  %8098 = vmatpush.bf16.msra.mxu0 %v10597_v18  ;;  %v15073_v37 = vld [vmem:[#allocation41_spill] sm:$0xff] }
 0x7dd   : > { %v7378_v11 = vsel %vm14393_vm5, %v7368_v43, %v14589_v3  ;;  %v10593_v17 = vor.u32 %v11253_v33, %v10590_v2  ;;  %v7149_v32 = vpack.c.b16 %v7147_v27, %v15073_v37  ;;  %v10649_v15 = vor.u32 %v11267_v61, %v10646_v47  ;;  %v11251_v57 = vld [vmem:[#allocation10 + $0x1e4] sm:$0xf]  ;;  %v10582_v12 = vld [vmem:[#allocation10 + $0x1e8] sm:$0xf0]  ;;  %8135 = vmatmul.bf16.vlgmr.msra.gmra.mxu2 %v14451_v39  ;;  %v11281_v3 = vld [vmem:[#allocation10 + $0x2d4] sm:$0xf] }
 0x7de   : > { %8199 = vmatpush.bf16.msrb.mxu2 %v10657_v36  ;;  %v10713_v14 = vor.u32 %v11283_v22, %v10710_v7  ;;  %v7397_v8 = vsel %vm5471_vm10, %v7377_v26, %v10334_v48  ;;  %v7043_v53 = vpack.c.bf16 %v7039_v13, %v7025_v42  ;;  %v10702_v60 = vld [vmem:[#allocation10 + $0x2d8] sm:$0xf0]  ;;  %8116 = vmatpush.bf16.msra.mxu1 %v10661_v31  ;;  %v7150_v16 = vrot.slane %v7148_v25, 3  ;;  %v11233_v56 = vld [vmem:[#allocation10 + $0x154] sm:$0xf] }
 0x7df   : > { %8217 = vmatpush.bf16.msra.mxu3 %v10721_v40  ;;  %v14623_v34 = vsel %vm14405_vm14, %v7397_v8, %v7265_v46  ;;  %v10521_v62 = vor.u32 %v11235_v10, %v10518_v1  ;;  %v7401_v39 = vsel %vm5471_vm10, %v7378_v11, %v10335_v54  ;;  %v10585_v49 = vor.u32 %v11251_v57, %v10582_v12  ;;  %v10510_v24 = vld [vmem:[#allocation10 + $0x158] sm:$0xf0]  ;;  %v11249_v48 = vld [vmem:[#allocation10 + $0x1d4] sm:$0xf]  ;;  %v11263_v27 = vld [vmem:[#allocation10 + $0x244] sm:$0xf] }
 0x7e0   : > { %8163 = vmatpush.bf16.msrb.mxu0 %v10529_v55  ;;  %v7151_v19 = vrot.slane %v7149_v32, 3  ;;  %v14631_v63 = vsel %vm14405_vm14, %v7401_v39, %v7269_v44  ;;  %v10641_v30 = vor.u32 %v11265_v59, %v10638_v45  ;;  %v10705_v36 = vor.u32 %v11281_v3, %v10702_v60  ;;  %v10574_v18 = vld [vmem:[#allocation10 + $0x1d8] sm:$0xf0]  ;;  %8153 = vmatmul.bf16.vlgmr.msrb.gmra.mxu3 %v14478_v52  ;;  %v10630_v33 = vld [vmem:[#allocation10 + $0x248] sm:$0xf0]  ;;  %v15074_v11 = vld [vmem:[#allocation39_spill] sm:$0xff] }
 0x7e1   : > { %8099 = vmatmul.bf16.vlgmr.msra.gmra.mxu0 %v14623_v34  ;;  %v7066_v40 = vunpack.c.l.b16 %v7043_v53  ;;  %v11279_v2 = vld [vmem:[#allocation10 + $0x2c4] sm:$0xf]  ;;  %v10694_v61 = vld [vmem:[#allocation10 + $0x2c8] sm:$0xf0]  ;;  %v7319_v6 = vshrl.u32 %v7150_v16, 16  ;;  %v7322_v43 = vshll.u32 %v7150_v16, 16  ;;  %v10513_v0 = vor.u32 %v11233_v56, %v10510_v24 }
 0x7e2   : > { %8181 = vmatpush.bf16.msrb.mxu1 %v10593_v17  ;;  %8200 = vmatpush.bf16.msrb.mxu2 %v10649_v15  ;;  %v7067_v55 = vunpack.c.h.b16 %v7043_v53  ;;  %v10577_v47 = vor.u32 %v11249_v48, %v10574_v18  ;;  %v11231_v22 = vld [vmem:[#allocation10 + $0x144] sm:$0xf]  ;;  %v10502_v7 = vld [vmem:[#allocation10 + $0x148] sm:$0xf0]  ;;  %v7327_v25 = vshrl.u32 %v7151_v19, 16  ;;  %v7330_v26 = vshll.u32 %v7151_v19, 16 }
 0x7e3   : > { %8218 = vmatpush.bf16.msra.mxu3 %v10713_v14  ;;  %8117 = vmatmul.bf16.vlgmr.msra.gmra.mxu1 %v14631_v63  ;;  %v11247_v31 = vld [vmem:[#allocation10 + $0x1c4] sm:$0xf]  ;;  %v10633_v52 = vor.u32 %v11263_v27, %v10630_v33  ;;  %v10697_v42 = vor.u32 %v11279_v2, %v10694_v61  ;;  %v10566_v13 = vld [vmem:[#allocation10 + $0x1c8] sm:$0xf0]  ;;  %v11261_v54 = vld [vmem:[#allocation10 + $0x234] sm:$0xf]  ;;  %v7068_v17 = vpack.c.b16 %v7066_v40, %v15074_v11 }
 0x7e4   : > { %8164 = vmatpush.bf16.msrb.mxu0 %v10521_v62  ;;  %v10622_v10 = vld [vmem:[#allocation10 + $0x238] sm:$0xf0]  ;;  %v11277_v1 = vld [vmem:[#allocation10 + $0x2b4] sm:$0xf]  ;;  %v7278_v32 = vshrl.u32 %v6999_v58, 16  ;;  %v7321_v15 = vrot.slane %v7319_v6, 5  ;;  %v10505_v57 = vor.u32 %v11231_v22, %v10502_v7  ;;  %v10569_v53 = vor.u32 %v11247_v31, %v10566_v13 }
 0x7e5   : > { %v10686_v37 = vld [vmem:[#allocation10 + $0x2b8] sm:$0xf0]  ;;  %v7324_v14 = vrot.slane %v7322_v43, 6  ;;  %v11229_v12 = vld [vmem:[#allocation10 + $0x134] sm:$0xf]  ;;  %v15075_v59 = vld [vmem:[#allocation40_spill] sm:$0xff]  ;;  %v10625_v39 = vor.u32 %v11261_v54, %v10622_v10 }
 0x7e6   : > { %8182 = vmatpush.bf16.msrb.mxu1 %v10585_v49  ;;  %8201 = vmatpush.bf16.msrb.mxu2 %v10641_v30  ;;  %v7069_v8 = vpack.c.b16 %v7067_v55, %v15075_v59  ;;  %v10494_v45 = vld [vmem:[#allocation10 + $0x138] sm:$0xf0]  ;;  %v11245_v3 = vld [vmem:[#allocation10 + $0x1b4] sm:$0xf]  ;;  %v7329_v16 = vrot.slane %v7327_v25, 5  ;;  %v7332_v62 = vrot.slane %v7330_v26, 6  ;;  %v10689_v49 = vor.u32 %v11277_v1, %v10686_v37 }
 0x7e7   : > { %8219 = vmatpush.bf16.msra.mxu3 %v10705_v36  ;;  %v10558_v60 = vld [vmem:[#allocation10 + $0x1b8] sm:$0xf0]  ;;  %v11259_v41 = vld [vmem:[#allocation10 + $0x224] sm:$0xf]  ;;  %v10614_v58 = vld [vmem:[#allocation10 + $0x228] sm:$0xf0]  ;;  %v7280_v48 = vor.u32 %v7278_v32, %v7265_v46  ;;  %v7325_v36 = vor.u32 %v7324_v14, %v7321_v15  ;;  %v10497_v18 = vor.u32 %v11229_v12, %v10494_v45 }
 0x7e8   : > { %8165 = vmatpush.bf16.msrb.mxu0 %v10513_v0  ;;  %v7281_v56 = vshrl.u32 %v7000_v28, 16  ;;  %v10336_v24 = vrot.slane %v7068_v17, 10  ;;  %v11275_v19 = vld [vmem:[#allocation10 + $0x2a4] sm:$0xf]  ;;  %v10678_v30 = vld [vmem:[#allocation10 + $0x2a8] sm:$0xf0]  ;;  %v10561_v33 = vor.u32 %v11245_v3, %v10558_v60  ;;  %v7333_v23 = vor.u32 %v7332_v62, %v7329_v16 }
 0x7e9   : > { %v10337_v27 = vrot.slane %v7069_v8, 10  ;;  %v11227_v2 = vld [vmem:[#allocation10 + $0x124] sm:$0xf]  ;;  %v10486_v61 = vld [vmem:[#allocation10 + $0x128] sm:$0xf0]  ;;  %v10617_v28 = vor.u32 %v11259_v41, %v10614_v58  ;;  %v10681_v6 = vor.u32 %v11275_v19, %v10678_v30 }
 0x7ea   : > { %8183 = vmatpush.bf16.msrb.mxu1 %v10577_v47  ;;  %8202 = vmatpush.bf16.msrb.mxu2 %v10633_v52  ;;  %v7283_v40 = vor.u32 %v7281_v56, %v7269_v44  ;;  %v11243_v35 = vld [vmem:[#allocation10 + $0x1a4] sm:$0xf]  ;;  %v10550_v46 = vld [vmem:[#allocation10 + $0x1a8] sm:$0xf0]  ;;  %v11257_v43 = vld [vmem:[#allocation10 + $0x214] sm:$0xf]  ;;  %v7431_v0 = vsel %vm5530_vm15, %v7280_v48, %v10336_v24  ;;  %v10489_v44 = vor.u32 %v11227_v2, %v10486_v61 }
 0x7eb   : > { %8220 = vmatpush.bf16.msra.mxu3 %v10697_v42  ;;  %v10606_v55 = vld [vmem:[#allocation10 + $0x218] sm:$0xf0]  ;;  %v11273_v47 = vld [vmem:[#allocation10 + $0x294] sm:$0xf]  ;;  %v7441_v21 = vsel %vm13644_vm9, %v7431_v0, %v7325_v36  ;;  %v10553_v31 = vor.u32 %v11243_v35, %v10550_v46  ;;  %v11255_v11 = vld [vmem:[#allocation10 + $0x204] sm:$0xf] }
 0x7ec   : > { %8166 = vmatpush.bf16.msrb.mxu0 %v10505_v57  ;;  %v10670_v22 = vld [vmem:[#allocation10 + $0x298] sm:$0xf0]  ;;  %v7435_v7 = vsel %vm5530_vm15, %v7283_v40, %v10337_v27  ;;  %v11225_v25 = vld [vmem:[#allocation10 + $0x114] sm:$0xf]  ;;  %v10609_v52 = vor.u32 %v11257_v43, %v10606_v55  ;;  %v10598_v17 = vld [vmem:[#allocation10 + $0x208] sm:$0xf0] }
 0x7ed   : > { %8140 = vmatmul.bf16.gmra.mxu2 %v14534_v20  ;;  %v10478_v26 = vld [vmem:[#allocation10 + $0x118] sm:$0xf0]  ;;  %v7442_v20 = vsel %vm13644_vm9, %v7435_v7, %v7333_v23  ;;  %v10673_v42 = vor.u32 %v11273_v47, %v10670_v22  ;;  %v11241_v13 = vld [vmem:[#allocation10 + $0x194] sm:$0xf]  ;;  %v11271_v10 = vld [vmem:[#allocation10 + $0x284] sm:$0xf]  ;;  %v10601_v57 = vor.u32 %v11255_v11, %v10598_v17 }
 0x7ee   : > { %8184 = vmatpush.bf16.msrb.mxu1 %v10569_v53  ;;  %8203 = vmatpush.bf16.msrb.mxu2 %v10625_v39  ;;  %v10542_v54 = vld [vmem:[#allocation10 + $0x198] sm:$0xf0]  ;;  %v10662_v1 = vld [vmem:[#allocation10 + $0x288] sm:$0xf0]  ;;  %v10481_v37 = vor.u32 %v11225_v25, %v10478_v26  ;;  %v11223_v15 = vld [vmem:[#allocation10 + $0x104] sm:$0xf] }
 0x7ef   : > { %8221 = vmatpush.bf16.msra.mxu3 %v10689_v49  ;;  %v10545_v32 = vor.u32 %v11241_v13, %v10542_v54  ;;  %v10470_v14 = vld [vmem:[#allocation10 + $0x108] sm:$0xf0]  ;;  %v10665_v12 = vor.u32 %v11271_v10, %v10662_v1  ;;  %v11239_v59 = vld [vmem:[#allocation10 + $0x184] sm:$0xf]  ;;  %v11293_v2 = vld [vmem:[#allocation11 + $0x30] sm:$0xff] }
 0x7f0   : > { %8167 = vmatpush.bf16.msrb.mxu0 %v10497_v18  ;;  %8158 = vmatmul.bf16.gmra.mxu3 %v14553_v51  ;;  %v10534_v8 = vld [vmem:[#allocation10 + $0x188] sm:$0xf0]  ;;  %v10473_v53 = vor.u32 %v11223_v15, %v10470_v14  ;;  %v11294_v18 = vld [vmem:[#allocation11 + $0x38] sm:$0xff]  ;;  %v11301_v23 = vld [vmem:[#allocation11 + $0x70] sm:$0xff] }
 0x7f1   : > { %8104 = vmatmul.bf16.gmra.mxu0 %v7441_v21  ;;  %v10537_v51 = vor.u32 %v11239_v59, %v10534_v8  ;;  %v11300_v25 = vld [vmem:[#allocation11 + $0x68] sm:$0xff]  ;;  %v11291_v26 = vld [vmem:[#allocation11 + $0x20] sm:$0xff]  ;;  %v11290_v13 = vld [vmem:[#allocation11 + $0x18] sm:$0xff] }
 0x7f2   : > { %8185 = vmatpush.bf16.msrb.mxu1 %v10561_v33  ;;  %8204 = vmatpush.bf16.msrb.mxu2 %v10617_v28  ;;  %v11302_v33 = vld [vmem:[#allocation11 + $0x78] sm:$0xff]  ;;  %v11289_v14 = vld [vmem:[#allocation11 + $0x10] sm:$0xff] }
 0x7f3   : > { %8222 = vmatpush.bf16.msra.mxu3 %v10681_v6  ;;  %8122 = vmatmul.bf16.gmra.mxu1 %v7442_v20  ;;  %v11292_v6 = vld [vmem:[#allocation11 + $0x28] sm:$0xff]  ;;  %v11310_v54 = vld [vmem:[#allocation11 + $0xb8] sm:$0xff] }
 0x7f4   : > { %8168 = vmatpush.bf16.msrb.mxu0 %v10489_v44  ;;  %v11318_v1 = vld [vmem:[#allocation11 + $0xf8] sm:$0xff] }
 0x7f5   : > { %v11298_v15 = vld [vmem:[#allocation11 + $0x58] sm:$0xff] }
 0x7f6   : > { %8186 = vmatpush.bf16.msrb.mxu1 %v10553_v31  ;;  %8205 = vmatpush.bf16.msrb.mxu2 %v10609_v52 }
 0x7f7   : > { %8223 = vmatpush.bf16.msra.mxu3 %v10673_v42  ;;  %v11299_v42 = vld [vmem:[#allocation11 + $0x60] sm:$0xff] }
 0x7f8   : > { %8169 = vmatpush.bf16.msrb.mxu0 %v10481_v37 }
 0x7fa   : > { %8187 = vmatpush.bf16.msrb.mxu1 %v10545_v32  ;;  %8206 = vmatpush.bf16.msrb.mxu2 %v10601_v57 }
 0x7fb   : > { %8224 = vmatpush.bf16.msra.mxu3 %v10665_v12  ;;  %v11309_v12 = vld [vmem:[#allocation11 + $0xb0] sm:$0xff] }
 0x7fc   : > { %8170 = vmatpush.bf16.msrb.mxu0 %v10473_v53 }
 0x7fd   : > { %8207 = vmatmul.bf16.vlgmr.msrb.gmra.mxu2 %v14623_v34 }
 0x7fe   : > { %8188 = vmatpush.bf16.msrb.mxu1 %v10537_v51  ;;  %8902 = vmatpush.bf16.msra.mxu2 %v11310_v54 }
 0x7ff   : > { %8915 = vmatpush.bf16.msrb.mxu3 %v11318_v1 }
 0x800   : > { %8225 = vmatmul.bf16.vlgmr.msra.gmra.mxu3 %v14631_v63  ;;  %8876 = vmatpush.bf16.msra.mxu0 %v11294_v18 }
 0x801   : > { %8171 = vmatmul.bf16.vlgmr.msrb.gmra.mxu0 %v14412_v4 }
 0x802   : > { %8889 = vmatpush.bf16.msra.mxu1 %v11302_v33  ;;  %8903 = vmatpush.bf16.msra.mxu2 %v11309_v12 }
 0x803   : > { %8189 = vmatmul.bf16.vlgmr.msrb.gmra.mxu1 %v14473_v9 }
 0x804   : > { %8877 = vmatpush.bf16.msra.mxu0 %v11293_v2 }
 0x806   : > { %8890 = vmatpush.bf16.msra.mxu1 %v11301_v23 }
 0x808   : > { %8878 = vmatpush.bf16.msra.mxu0 %v11292_v6 }
 0x80a   : > { %8891 = vmatpush.bf16.msra.mxu1 %v11300_v25  ;;  %v11295_v25 = vld [vmem:[#allocation11 + $0x40] sm:$0xff] }
 0x80c   : > { %8879 = vmatpush.bf16.msra.mxu0 %v11291_v26 }
 0x80d   : > { %8212 = vmatmul.bf16.gmra.mxu2 %v7441_v21 }
 0x80e   : > { %8892 = vmatpush.bf16.msra.mxu1 %v11299_v42  ;;  %v11306_v42 = vld [vmem:[#allocation11 + $0x98] sm:$0xff] }
 0x810   : > { %8230 = vmatmul.bf16.gmra.mxu3 %v7442_v20  ;;  %v8235_v20 = vld [vmem:[%s14875_s12] sm:$0xf]  ;;  %8880 = vmatpush.bf16.msra.mxu0 %v11290_v13 }
 0x811   : > { %8176 = vmatmul.bf16.gmra.mxu0 %v14513_v29  ;;  %v8237_v17 = vperm.slane %v8235_v20, 0  ;;  %v8249_v59 = vperm.slane %v8235_v20, 1 }
 0x812   : > { %8893 = vmatpush.bf16.msra.mxu1 %v11298_v15 }
 0x813   : > { %8194 = vmatmul.bf16.gmra.mxu1 %v14545_v38  ;;  %v14678_v51 = vperm.slane %v8237_v17, 0 }
 0x814   : > { %8881 = vmatpush.bf16.msra.mxu0 %v11289_v14  ;;  %v11333_v14 = vld [vmem:[#allocation11 + $0x170] sm:$0xff] }
 0x83d   : > { %v8028_v45 = vpop.f32.mrf.mxu0 }
 0x83f   : > { %v8046_v3 = vpop.f32.mrf.mxu1  ;;  %v8064_v16 = vpop.f32.mrf.mxu2 }
 0x840   : > { %v8047_v60 = vadd.f32 %v8046_v3, %v8028_v45  ;;  %v8238_v3 = vperm.slane %v8235_v20, 2 }
 0x842   : > { %v8065_v62 = vadd.f32 %v8064_v16, %v8047_v60 }
 0x843   : > { %v8082_v39 = vpop.f32.mrf.mxu3 }
 0x844   : > { %v8083_v34 = vadd.f32 %v8082_v39, %v8065_v62  ;;  %v11297_v62 = vld [vmem:[#allocation11 + $0x50] sm:$0xff]  ;;  %v11288_v39 = vld [vmem:[#allocation11 + $0x8] sm:$0xff] }
 0x845   : > { %v8030_v49 = vpop.f32.mrf.mxu0  ;;  %8894 = vmatpush.bf16.msra.mxu1 %v11297_v62  ;;  %8882 = vmatpush.bf16.msra.mxu0 %v11288_v39 }
 0x847   : > { %v8048_v41 = vpop.f32.mrf.mxu1  ;;  %v8066_v58 = vpop.f32.mrf.mxu2 }
 0x848   : > { %v8049_v4 = vadd.f32 %v8048_v41, %v8030_v49  ;;  %v11317_v41 = vld [vmem:[#allocation11 + $0xf0] sm:$0xff] }
 0x849   : > { %8916 = vmatpush.bf16.msrb.mxu3 %v11317_v41 }
 0x84a   : > { %v8067_v63 = vadd.f32 %v8066_v58, %v8049_v4  ;;  %v11308_v4 = vld [vmem:[#allocation11 + $0xa8] sm:$0xff] }
 0x84b   : > { %v8084_v56 = vpop.f32.mrf.mxu3  ;;  %8904 = vmatpush.bf16.msra.mxu2 %v11308_v4  ;;  %v11323_v4 = vld [vmem:[#allocation11 + $0x120] sm:$0xff] }
 0x84c   : > { %v14659_v24 = vadd.f32 %v8084_v56, %v8067_v63 }
 0x84d   : > { %v8033_v9 = vpop.f32.mrf.mxu0 }
 0x84f   : > { %v8051_v29 = vpop.f32.mrf.mxu1  ;;  %v14661_v48 = vpop.f32.mrf.mxu2 }
 0x850   : > { %v8052_v60 = vadd.f32 %v8051_v29, %v8033_v9  ;;  %v14685_v9 = vperm.slane %v8238_v3, 0  ;;  %v11316_v29 = vld [vmem:[#allocation11 + $0xe8] sm:$0xff] }
 0x851   : > { %8917 = vmatpush.bf16.msrb.mxu3 %v11316_v29 }
 0x852   : > { %v8070_v58 = vadd.f32 %v14661_v48, %v8052_v60 }
 0x853   : > { %v14663_v38 = vpop.f32.mrf.mxu3 }
 0x854   : > { %v8088_v23 = vadd.f32 %v14663_v38, %v8070_v58  ;;  %v11334_v38 = vld [vmem:[#allocation11 + $0x178] sm:$0xff]  ;;  %v11304_v58 = vld [vmem:[#allocation11 + $0x88] sm:$0xff] }
 0x855   : > { %v8035_v19 = vpop.f32.mrf.mxu0 }
 0x856   : > { %v14683_v19 = vperm.slane %v8249_v59, 1  ;;  %v11324_v59 = vld [vmem:[#allocation11 + $0x128] sm:$0xff] }
 0x857   : > { %v8053_v30 = vpop.f32.mrf.mxu1  ;;  %v8071_v36 = vpop.f32.mrf.mxu2 }
 0x85b   : > { %v8089_v27 = vpop.f32.mrf.mxu3 }
 0x85c   : > { %v11296_v27 = vld [vmem:[#allocation11 + $0x48] sm:$0xff] }
 0x85d   : > { %8895 = vmatpush.bf16.msra.mxu1 %v11296_v27 }
 0x85e   : > { %v8100_v40 = vpop.f32.mrf.mxu0 }
 0x85f   : > { %v8101_v11 = vadd.f32 %v8100_v40, %v8083_v34  ;;  %v8250_v34 = vperm.slane %v8235_v20, 3  ;;  %v11287_v40 = vld [vmem:[#allocation11] sm:$0xff] }
 0x860   : > { %v8118_v61 = vpop.f32.mrf.mxu1  ;;  %v8136_v28 = vpop.f32.mrf.mxu2  ;;  %8883 = vmatpush.bf16.msra.mxu0 %v11287_v40 }
 0x861   : > { %v8119_v53 = vadd.f32 %v8118_v61, %v8101_v11  ;;  %v14687_v2 = vperm.slane %v8250_v34, 1  ;;  %v11307_v61 = vld [vmem:[#allocation11 + $0xa0] sm:$0xff]  ;;  %8896 = vmatpush.bf16.msra.mxu1 %v11295_v25  ;;  %v11332_v34 = vld [vmem:[#allocation11 + $0x168] sm:$0xff] }
 0x862   : > { %8905 = vmatpush.bf16.msra.mxu2 %v11307_v61  ;;  %v11331_v61 = vld [vmem:[#allocation11 + $0x160] sm:$0xff] }
 0x863   : > { %v8154_v35 = vpop.f32.mrf.mxu3  ;;  %v8243_v56 = vmul.f32 %v14678_v51, %v8119_v53 }
 0x864   : > { %v8155_v10 = vadd.f32 %v8154_v35, %v8136_v28 }
 0x865   : > { %v8255_v35 = vadd.f32 %v14683_v19, %v8243_v56  ;;  %8941 = vmatpush.bf16.msrb.mxu1 %v11334_v38 }
 0x866   : > { %v8102_v46 = vpop.f32.mrf.mxu0  ;;  %8906 = vmatpush.bf16.msra.mxu2 %v11306_v42 }
 0x867   : > { %v8103_v63 = vadd.f32 %v8102_v46, %v14659_v24  ;;  %v11326_v24 = vld [vmem:[#allocation11 + $0x138] sm:$0xff]  ;;  %v8261_v13 = vmax.f32 %v8255_v35, 0.0 }
 0x868   : > { %v14665_v43 = vpop.f32.mrf.mxu1  ;;  %v8138_v0 = vpop.f32.mrf.mxu2  ;;  %8928 = vmatpush.bf16.msrb.mxu0 %v11326_v24 }
 0x869   : > { %v8121_v28 = vadd.f32 %v14665_v43, %v8103_v63  ;;  %v11325_v43 = vld [vmem:[#allocation11 + $0x130] sm:$0xff]  ;;  %8942 = vmatpush.bf16.msrb.mxu1 %v11333_v14 }
 0x86b   : > { %v8156_v55 = vpop.f32.mrf.mxu3 }
 0x86c   : > { %v8157_v30 = vadd.f32 %v8156_v55, %v8138_v0  ;;  %v11315_v55 = vld [vmem:[#allocation11 + $0xe0] sm:$0xff]  ;;  %8929 = vmatpush.bf16.msrb.mxu0 %v11325_v43 }
 0x86d   : > { %8918 = vmatpush.bf16.msrb.mxu3 %v11315_v55  ;;  %8943 = vmatpush.bf16.msrb.mxu1 %v11332_v34 }
 0x86e   : > { %v14667_v47 = vpop.f32.mrf.mxu0 }
 0x870   : > { %v14669_v22 = vpop.f32.mrf.mxu1  ;;  %v14671_v21 = vpop.f32.mrf.mxu2  ;;  %8930 = vmatpush.bf16.msrb.mxu0 %v11324_v59 }
 0x871   : > { %8944 = vmatpush.bf16.msrb.mxu1 %v11331_v61 }
 0x873   : > { %v14673_v44 = vpop.f32.mrf.mxu3 }
 0x874   : > { %v8160_v54 = vadd.f32 %v14673_v44, %v14671_v21  ;;  %v11305_v21 = vld [vmem:[#allocation11 + $0x90] sm:$0xff]  ;;  %8931 = vmatpush.bf16.msrb.mxu0 %v11323_v4 }
 0x875   : > { %8907 = vmatpush.bf16.msra.mxu2 %v11305_v21 }
 0x876   : > { %v8107_v7 = vpop.f32.mrf.mxu0 }
 0x877   : > { %v8106_v7 = vadd.f32 %v14667_v47, %v8088_v23  ;;  %v11314_v47 = vld [vmem:[#allocation11 + $0xd8] sm:$0xff] }
 0x878   : > { %v8125_v31 = vpop.f32.mrf.mxu1  ;;  %v8143_v52 = vpop.f32.mrf.mxu2  ;;  %8919 = vmatpush.bf16.msrb.mxu3 %v11314_v47 }
 0x879   : > { %v8245_v52 = vmul.f32 %v14678_v51, %v8121_v28  ;;  %v8124_v17 = vadd.f32 %v14669_v22, %v8106_v7  ;;  %8908 = vmatpush.bf16.msra.mxu2 %v11304_v58  ;;  %v11322_v7 = vld [vmem:[#allocation11 + $0x118] sm:$0xff] }
 0x87a   : > { %8932 = vmatpush.bf16.msrb.mxu0 %v11322_v7 }
 0x87b   : > { %v8161_v37 = vpop.f32.mrf.mxu3  ;;  %v8247_v3 = vmul.f32 %v14678_v51, %v8124_v17  ;;  %v11312_v51 = vld [vmem:[#allocation11 + $0xc8] sm:$0xff] }
 0x87e   : > { %v8172_v32 = vpop.f32.mrf.mxu0 }
 0x87f   : > { %v8173_v57 = vadd.f32 %v8172_v32, %v8155_v10 }
 0x880   : > { %v8190_v8 = vpop.f32.mrf.mxu1  ;;  %v8208_v16 = vpop.f32.mrf.mxu2 }
 0x881   : > { %v8191_v45 = vadd.f32 %v8190_v8, %v8173_v57  ;;  %v8257_v57 = vadd.f32 %v14683_v19, %v8245_v52  ;;  %v11342_v52 = vld [vmem:[%s14878_s15 + $0x38] sm:$0xff] }
 0x883   : > { %v8209_v49 = vadd.f32 %v8208_v16, %v8191_v45  ;;  %v8226_v36 = vpop.f32.mrf.mxu3  ;;  %v11313_v45 = vld [vmem:[#allocation11 + $0xd0] sm:$0xff]  ;;  %v8263_v41 = vmax.f32 %v8257_v57, 0.0 }
 0x884   : > { %8920 = vmatpush.bf16.msrb.mxu3 %v11313_v45  ;;  %v11321_v57 = vld [vmem:[#allocation11 + $0x110] sm:$0xff] }
 0x885   : > { %v8227_v33 = vadd.f32 %v8226_v36, %v8209_v49  ;;  %v8259_v36 = vadd.f32 %v14683_v19, %v8247_v3  ;;  %8933 = vmatpush.bf16.msrb.mxu0 %v11321_v57 }
 0x886   : > { %v8174_v18 = vpop.f32.mrf.mxu0 }
 0x887   : > { %v8175_v48 = vadd.f32 %v8174_v18, %v8157_v30  ;;  %v8244_v46 = vmul.f32 %v14685_v9, %v8227_v33 }
 0x888   : > { %v8192_v6 = vpop.f32.mrf.mxu1  ;;  %v8210_v31 = vpop.f32.mrf.mxu2  ;;  %8921 = vmatpush.bf16.msrb.mxu3 %v11312_v51 }
 0x889   : > { %v8193_v0 = vadd.f32 %v8192_v6, %v8175_v48  ;;  %v8256_v26 = vadd.f32 %v14687_v2, %v8244_v46 }
 0x88b   : > { %v8211_v20 = vadd.f32 %v8210_v31, %v8193_v0  ;;  %v8262_v11 = vmax.f32 %v8256_v26, 0.0  ;;  %v8228_v10 = vpop.f32.mrf.mxu3  ;;  %v11303_v31 = vld [vmem:[#allocation11 + $0x80] sm:$0xff] }
 0x88c   : > { %8909 = vmatpush.bf16.msra.mxu2 %v11303_v31 }
 0x88d   : > { %v8267_v37 = vpack.c.bf16 %v8262_v11, %v8261_v13  ;;  %v8229_v32 = vadd.f32 %v8228_v10, %v8211_v20  ;;  %v11311_v20 = vld [vmem:[#allocation11 + $0xc0] sm:$0xff] }
 0x88e   : > { %v8177_v1 = vpop.f32.mrf.mxu0  ;;  %8922 = vmatpush.bf16.msrb.mxu3 %v11311_v20 }
 0x88f   : > { %v8178_v15 = vadd.f32 %v8177_v1, %v8160_v54  ;;  %v8271_v44 = vunpack.c.l.b16 %v8267_v37  ;;  %v8272_v8 = vunpack.c.h.b16 %v8267_v37  ;;  %v8246_v53 = vmul.f32 %v14685_v9, %v8229_v32  ;;  %v11330_v1 = vld [vmem:[#allocation11 + $0x158] sm:$0xff] }
 0x890   : > { %v8195_v12 = vpop.f32.mrf.mxu1  ;;  %v8213_v60 = vpop.f32.mrf.mxu2  ;;  %v8265_v32 = vmax.f32 %v8259_v36, 0.0  ;;  %9024 = vmatpush.bf16.msrb.mxu2 %v11342_v52  ;;  %8945 = vmatpush.bf16.msrb.mxu1 %v11330_v1 }
 0x891   : > { %v8196_v22 = vadd.f32 %v8195_v12, %v8178_v15  ;;  %v8273_v16 = vpack.c.b16 %v8271_v44, %v8271_v44  ;;  %v8274_v62 = vpack.c.b16 %v8272_v8, %v8272_v8  ;;  %v8258_v39 = vadd.f32 %v14687_v2, %v8246_v53  ;;  %v11341_v8 = vld [vmem:[%s14878_s15 + $0x30] sm:$0xff] }
 0x893   : > { %v8214_v49 = vadd.f32 %v8213_v60, %v8196_v22  ;;  %v8278_v63 = vshrl.u32 %v8273_v16, 16  ;;  %v8281_v56 = vshrl.u32 %v8274_v62, 16  ;;  %v8285_v30 = vrot.slane %v8273_v16, 1  ;;  %v8231_v33 = vpop.f32.mrf.mxu3 }
 0x894   : > { %v14703_v29 = vrot.slane %v8274_v62, 1  ;;  %v8289_v18 = vshll.u32 %v8273_v16, 16  ;;  %v8292_v27 = vshll.u32 %v8274_v62, 16  ;;  %v8264_v40 = vmax.f32 %v8258_v39, 0.0  ;;  %9025 = vmatpush.bf16.msrb.mxu2 %v11341_v8 }
 0x895   : > { %v8232_v24 = vadd.f32 %v8231_v33, %v8214_v49  ;;  %v8347_v23 = vrot.slane %v8273_v16, 2  ;;  %v8393_v6 = vsel %vm13794_vm1, %v8273_v16, %v8285_v30  ;;  %v8348_v35 = vrot.slane %v8274_v62, 2  ;;  %v11329_v49 = vld [vmem:[#allocation11 + $0x150] sm:$0xff] }
 0x896   : > { %v8179_v48 = vpop.f32.mrf.mxu0  ;;  %v10722_v46 = vrot.slane %v8289_v18, 2  ;;  %v10723_v0 = vrot.slane %v8292_v27, 2  ;;  %v8268_v55 = vpack.c.bf16 %v8264_v40, %v8263_v41  ;;  %v8394_v19 = vsel %vm13794_vm1, %v8274_v62, %v14703_v29  ;;  %8946 = vmatpush.bf16.msrb.mxu1 %v11329_v49 }
 0x897   : > { %v8248_v26 = vmul.f32 %v14685_v9, %v8232_v24  ;;  %v8349_v38 = vrot.slane %v8278_v63, 2  ;;  %v8350_v43 = vrot.slane %v8281_v56, 2  ;;  %v8401_v9 = vsel %vm5530_vm15, %v8393_v6, %v8347_v23 }
 0x898   : > { %v8197_v25 = vpop.f32.mrf.mxu1  ;;  %v8296_v42 = vunpack.c.l.b16 %v8268_v55  ;;  %v8297_v13 = vunpack.c.h.b16 %v8268_v55  ;;  %v8395_v54 = vsel %vm13794_vm1, %v8278_v63, %v10722_v46  ;;  %v8396_v11 = vsel %vm13794_vm1, %v8281_v56, %v10723_v0  ;;  %v8215_v47 = vpop.f32.mrf.mxu2  ;;  %v11320_v63 = vld [vmem:[#allocation11 + $0x108] sm:$0xff]  ;;  %v11319_v46 = vld [vmem:[#allocation11 + $0x100] sm:$0xff] }
 0x899   : > { %v8260_v17 = vadd.f32 %v14687_v2, %v8248_v26  ;;  %v8405_v10 = vsel %vm5530_vm15, %v8394_v19, %v8348_v35  ;;  %v8341_v37 = vrot.slane %v8285_v30, 1  ;;  %v8409_v12 = vsel %vm5530_vm15, %v8395_v54, %v8349_v38  ;;  %v11328_v35 = vld [vmem:[#allocation11 + $0x148] sm:$0xff]  ;;  %8934 = vmatpush.bf16.msrb.mxu0 %v11320_v63  ;;  %v11327_v54 = vld [vmem:[#allocation11 + $0x140] sm:$0xff] }
 0x89a   : > { %v8298_v15 = vpack.c.b16 %v8296_v42, %v8296_v42  ;;  %v14722_v14 = vpack.c.b16 %v8297_v13, %v8297_v13  ;;  %v8413_v2 = vsel %vm5530_vm15, %v8396_v11, %v8350_v43  ;;  %v8342_v44 = vrot.slane %v14703_v29, 1  ;;  %8947 = vmatpush.bf16.msrb.mxu1 %v11328_v35  ;;  %v11336_v63 = vld [vmem:[%s14878_s15 + $0x8] sm:$0xff] }
 0x89b   : > { %v8266_v59 = vmax.f32 %v8260_v17, 0.0  ;;  %v8397_v21 = vsel %vm13794_vm1, %v8285_v30, %v8341_v37  ;;  %v8233_v60 = vpop.f32.mrf.mxu3 }
 0x89c   : > { %v14732_v53 = vrot.slane %v8298_v15, 1  ;;  %v10724_v22 = vrot.slane %v8298_v15, 7  ;;  %v14735_v45 = vrot.slane %v14722_v14, 1  ;;  %v10725_v3 = vrot.slane %v14722_v14, 7 }
 0x89d   : > { %v8269_v16 = vpack.c.bf16 %v8266_v59, %v8265_v32  ;;  %v8303_v62 = vshll.u32 %v8298_v15, 16  ;;  %v8312_v39 = vshrl.u32 %v8298_v15, 16  ;;  %v8307_v34 = vshll.u32 %v14722_v14, 16  ;;  %8935 = vmatpush.bf16.msrb.mxu0 %v11319_v46 }
 0x89e   : > { %v8423_v41 = vsel %vm13712_vm13, %v8401_v9, %v10724_v22  ;;  %v8424_v4 = vsel %vm13712_vm13, %v8405_v10, %v10725_v3  ;;  %v8314_v58 = vshrl.u32 %v14722_v14, 16  ;;  %v8357_v56 = vrot.slane %v14732_v53, 7  ;;  %8948 = vmatpush.bf16.msrb.mxu1 %v11327_v54 }
 0x89f   : > { %v8317_v30 = vunpack.c.l.b16 %v8269_v16  ;;  %v8318_v51 = vunpack.c.h.b16 %v8269_v16  ;;  %v8431_v36 = vsel %vm5496_vm11, %v8423_v41, %v8298_v15  ;;  %v8434_v18 = vsel %vm5496_vm11, %v8424_v4, %v14722_v14  ;;  %v11340_v4 = vld [vmem:[%s14878_s15 + $0x28] sm:$0xff] }
 0x8a0   : > { %v8452_v27 = vsel %vm13644_vm9, %v8431_v36, %v14732_v53  ;;  %v8453_v40 = vsel %vm13644_vm9, %v8434_v18, %v14735_v45  ;;  %v8425_v33 = vsel %vm13712_vm13, %v8409_v12, %v8303_v62  ;;  %v8426_v48 = vsel %vm13712_vm13, %v8413_v2, %v8307_v34  ;;  %9026 = vmatpush.bf16.msrb.mxu2 %v11340_v4  ;;  %v11448_v36 = vld [vmem:[%s15078_s2] ss:$0 sm:$0xff]  ;;  %s11647_s2 = sshra.s32 %s9054_s5, 4  ;;  %s11648_s2 = int_to_ptr.hbm [resolvable:$true] %s11647_s2 }
 0x8a1   : > { %v8319_v24 = vpack.c.b16 %v8317_v30, %v8317_v30  ;;  %v8320_v61 = vpack.c.b16 %v8318_v51, %v8318_v51  ;;  %v8438_v23 = vsel %vm5496_vm11, %v8425_v33, %v8312_v39  ;;  %v8442_v6 = vsel %vm5496_vm11, %v8426_v48, %v8314_v58  ;;  %v11337_v58 = vld [vmem:[%s14878_s15 + $0x10] sm:$0xff]  ;;  %s11649_s3 = scalar_lea.hbm %s11648_s2, 8  ;;  %p11654_p12 = scmp.lt.s32.totalorder %s11648_s2, %s15079_s17 }
 0x8a2   : > { %v8417_v0 = vsel %vm5530_vm15, %v8397_v21, %v10724_v22  ;;  %v8358_v55 = vrot.slane %v14735_v45, 7  ;;  %v8398_v7 = vsel %vm13794_vm1, %v14703_v29, %v8342_v44  ;;  %p11650_p1 = scmp.ne.s32.totalorder %s11648_s2, %s11649_s3  ;;  %p11655_p8 = scmp.lt.s32.totalorder %s11653_s29, %s11649_s3 }
 0x8a3   : > { %v10730_v19 = vrot.slane %v8319_v24, 6  ;;  %v8381_v31 = vrot.slane %v8319_v24, 7  ;;  %v10731_v25 = vrot.slane %v8320_v61, 6  ;;  %v8382_v26 = vrot.slane %v8320_v61, 7 }
 0x8a4   : > { %v8322_v20 = vshll.u32 %v8319_v24, 16  ;;  %v8331_v38 = vshrl.u32 %v8319_v24, 16  ;;  %v8326_v43 = vshll.u32 %v8320_v61, 16  ;;  %v8333_v52 = vshrl.u32 %v8320_v61, 16  ;;  %p11651_p3 = pnand %p11650_p1, %p11912_p13  ;;  %p11656_p7 = por %p11655_p8, %p11654_p12 }
 0x8a5   : > { %v8460_v42 = vsel %vm5462_vm7, %v8452_v27, %v10730_v19  ;;  %v8464_v13 = vsel %vm5462_vm7, %v8453_v40, %v10731_v25  ;;  %v8335_v11 = vrot.slane %v8319_v24, 1  ;;  %v8427_v47 = vsel %vm13712_vm13, %v8417_v0, %v8357_v56  ;;  %v11335_v56 = vld [vmem:[%s14878_s15] sm:$0xff] }
 0x8a6   : > { %v8482_v29 = vsel %vm13575_vm6, %v8460_v42, %v8381_v31  ;;  %v8483_v17 = vsel %vm13575_vm6, %v8464_v13, %v8382_v26  ;;  %v10728_v9 = vrot.slane %v8322_v20, 6  ;;  %v8377_v10 = vrot.slane %v8331_v38, 6  ;;  %p11652_p5 = pneg %p11651_p3 }
 0x8a7   : > { %8884 = vmatmul.bf16.vlgmr.msra.gmra.mxu0 %v8482_v29  ;;  %8897 = vmatmul.bf16.vlgmr.msra.gmra.mxu1 %v8483_v17  ;;  %v10729_v1 = vrot.slane %v8326_v43, 6  ;;  %v8378_v37 = vrot.slane %v8333_v52, 6  ;;  %v8379_v32 = vrot.slane %v8335_v11, 6  ;;  %v8385_v15 = vrot.slane %v8335_v11, 7 }
 0x8a8   : > { %v8454_v57 = vsel %vm13644_vm9, %v8438_v23, %v10728_v9  ;;  %v8446_v12 = vsel %vm5496_vm11, %v8427_v47, %v14732_v53  ;;  %v8336_v59 = vrot.slane %v8320_v61, 1  ;;  %v8421_v2 = vsel %vm5530_vm15, %v8398_v7, %v10725_v3  ;;  %p11657_p9 = pnand %p11656_p7, %p11652_p5 }
 0x8a9   : > { %v8468_v21 = vsel %vm5462_vm7, %v8454_v57, %v8377_v10  ;;  %v8455_v44 = vsel %vm13644_vm9, %v8442_v6, %v10729_v1  ;;  %v8456_v8 = vsel %vm13644_vm9, %v8446_v12, %v10730_v19  ;;  %v8428_v22 = vsel %vm13712_vm13, %v8421_v2, %v8358_v55 }
 0x8aa   : > { %v8484_v53 = vsel %vm13575_vm6, %v8468_v21, %v8322_v20  ;;  %v8472_v60 = vsel %vm5462_vm7, %v8455_v44, %v8378_v37  ;;  %v8476_v14 = vsel %vm5462_vm7, %v8456_v8, %v8379_v32  ;;  %v8380_v3 = vrot.slane %v8336_v59, 6  ;;  %v11449_v20 = vld [vmem:[%s15080_s23] ss:$0 sm:$0xff] }
 0x8ab   : > { %8910 = vmatmul.bf16.vlgmr.msra.gmra.mxu2 %v8484_v53  ;;  %v8485_v16 = vsel %vm13575_vm6, %v8472_v60, %v8326_v43  ;;  %v8486_v62 = vsel %vm13575_vm6, %v8476_v14, %v8385_v15  ;;  %v8386_v39 = vrot.slane %v8336_v59, 7  ;;  %v8450_v50 = vsel %vm5496_vm11, %v8428_v22, %v14735_v45  ;;  %v11339_v45 = vld [vmem:[%s14878_s15 + $0x20] sm:$0xff] }
 0x8ac   : > { %8923 = vmatmul.bf16.vlgmr.msrb.gmra.mxu3 %v8485_v16  ;;  %v8457_v49 = vsel %vm13644_vm9, %v8450_v50, %v10731_v25  ;;  %9027 = vmatpush.bf16.msrb.mxu2 %v11339_v45 }
 0x8ad   : > { %v8480_v34 = vsel %vm5462_vm7, %v8457_v49, %v8380_v3 }
 0x8ae   : > { %v8487_v41 = vsel %vm13575_vm6, %v8480_v34, %v8386_v39 }
 0x8b0   : > { %9028 = vmatpush.bf16.msrb.mxu2 %v11338_v5 }
 0x8b4   : > { %9029 = vmatpush.bf16.msrb.mxu2 %v11337_v58 }
 0x8b7   : > { %8936 = vmatmul.bf16.vlgmr.msrb.gmra.mxu0 %v8486_v62  ;;  %8949 = vmatmul.bf16.vlgmr.msrb.gmra.mxu1 %v8487_v41 }
 0x8b8   : > { %9030 = vmatpush.bf16.msrb.mxu2 %v11336_v63 }
 0x8bc   : > { %9031 = vmatpush.bf16.msrb.mxu2 %v11335_v56 }
 0x924   : > { %v8885_v30 = vpop.f32.mrf.mxu0  ;;  %v8898_v51 = vpop.f32.mrf.mxu1 }
 0x925   : > { %v8886_v18 = vadd.f32 %v11448_v36, %v8885_v30 }
 0x927   : > { %v8899_v33 = vadd.f32 %v8898_v51, %v8886_v18 }
 0x92c   : > { %v8887_v27 = vpop.f32.mrf.mxu0  ;;  %v8900_v40 = vpop.f32.mrf.mxu1 }
 0x92e   : > { %v8911_v48 = vpop.f32.mrf.mxu2 }
 0x92f   : > { %v8912_v24 = vadd.f32 %v8911_v48, %v8899_v33  ;;  %v8924_v61 = vpop.f32.mrf.mxu3 }
 0x931   : > { %v8925_v23 = vadd.f32 %v8924_v61, %v8912_v24 }
 0x934   : > { %v8937_v6 = vpop.f32.mrf.mxu0  ;;  %v8950_v35 = vpop.f32.mrf.mxu1 }
 0x935   : > { %v8938_v46 = vadd.f32 %v8937_v6, %v8925_v23 }
 0x936   : > { %v8913_v0 = vpop.f32.mrf.mxu2 }
 0x937   : > { %v8951_v55 = vadd.f32 %v8950_v35, %v8938_v46  ;;  %v8926_v7 = vpop.f32.mrf.mxu3 }
 0x939   : > { %v8954_v19 = vmax.f32 %v8951_v55, 0.0 }
 0x93b   : > { %v8955_v31 = vpack.c.bf16 %v8954_v19, %v8954_v19 }
 0x93c   : > { %v8939_v25 = vpop.f32.mrf.mxu0  ;;  %v8952_v26 = vpop.f32.mrf.mxu1 }
 0x93d   : > { %9032 = vmatmul.bf16.vlgmr.msrb.gmra.mxu2 %v8955_v31 }
 0x9c0   : > { %v9033_v38 = vpop.f32.mrf.mxu2 }
 0x9c1   : > { %v9034_v43 = vadd.f32 %v11449_v20, %v9033_v38 }
 0x9c3   : > { %9037 = vst.msk [vmem:[%s652_s0] sm:$0xff] %vm4523_vm2, %v9034_v43 }
 0x9c4   : > { %11660 = shalt.err (!%p11657_p9)
}
 0x9c5   : > { %11367 = dma.vmem_to_hbm [thread:$0]  (%p11912_p13), %s9052_s8, 128, %s9054_s5, %s9039_s30  }
 0x9c8   : > { %v9035_v52 = vpop.f32.mrf.mxu2 }
 0x9c9 PF: > { %s9065_s21 = sand.u32 1, %s11699_s24   ;;  %p15081_p10 = scmp.ge.s32.totalorder %s11711_s27, 2 }
 0x9ca   : > { %s9066_s13 = scalar_lea.sflag [#allocation4], %s9065_s21 }
 0x9cb   : > { %p11390_p11 = pnand %p15081_p10, %p11917_p4 }
 0x9cd   : > { %p11391_p0 = pneg %p11390_p11 }
 0x9cf   : > { %11694 = dma.done.wait (%p11391_p0), %s9066_s13, 128  }
 0x9d0   : > { %11696 = vsyncadd (%p11391_p0), %s9066_s13, 4294967168  ;;  %s15082_s3 = sld [smem:[#allocation19_spill]]  ;;  %p33_p2 = scmp.ge.s32.totalorder %s11892_s1, 4  }
 0x9d1   : > { %s15083_s26 = sld [smem:[#allocation20_spill]]  ;;  %s15084_s24 = smov %s11703_s25 }
 0x9d2   : > { %s15086_s27 = smov %s11892_s1  ;;  %35 = sbr.rel (!%p33_p2) target bundleno = 20 (0x14), region = 160 }
 0x9d6   : > { %s15085_s25 = smov %s15082_s3 }
 0x9d7   :  { %9072 = vsyncpa [#allocation3], 1 }
 0x9d8   :  { %9074 = vsyncpa [#allocation3 + $0x1], 1 }
 0x9d9   :  { %9075 = vsyncpa [#allocation6], 1 }
 0x9da   :  { %9076 = vsyncpa [#allocation9], 1 }
 0x9db   :  { %9077 = vsyncpa [#allocation12], 1 }
 0x9dc   :  { %9078 = vsyncpa [#allocation4], 1 }
 0x9dd   :  { %9080 = vsyncpa [#allocation4 + $0x1], 1 }

</bundles_post_ra>
